<compile_context>
chip_gen: v7x
topology: tpu7x:2x2x1
jax: 0.10.0
libtpu: 0.0.40
codegen_flags: <defaults>
</compile_context>

<pallas_src>
import functools

import jax
import jax.numpy as jnp
from jax.experimental import pallas as pl
from jax.experimental.pallas import tpu as pltpu


@functools.lru_cache(maxsize=None)
def _vmem_limit_bytes():
    """Generation-aware VMEM budget: ~3/4 of capacity, capped at 100 MiB."""
    try:
        cap = int(pltpu.get_tpu_info().vmem_capacity_bytes)
    except Exception:
        cap = 64 * 1024 * 1024  # conservative fallback (safe on v7x)
    return min(100 * 1024 * 1024, (cap * 3) // 4)


# ----------------------------- Pallas kernels ------------------------------

def _p2_head_kernel(xf_ref, mask_ref, w0_ref, b0_ref, w1_ref, b1_ref,
                    o_ref, t0p_ref, *, wp, m):
    """Fused ConvBN(in,192,3,s1,p1) -> ConvBN(192,224,3,s1,p1), one image.

    Spatial positions are flattened over the 1-padded (hp, wp) grid so every
    3x3 tap is the constant flat offset di*wp + dj; all tensors stay 2-D
    (flat_m, channels).  The 192-channel intermediate never leaves VMEM.
    """
    c0 = w0_ref.shape[-1]
    acc0 = jnp.zeros((m, c0), jnp.float32)
    for di in range(3):
        for dj in range(3):
            off = di * wp + dj
            acc0 = acc0 + jnp.dot(xf_ref[0, off:off + m, :],
                                  w0_ref[di * 3 + dj],
                                  preferred_element_type=jnp.float32)
    # BN + ReLU; zero the off-grid garbage rows; shift by wp+1 into the
    # scratch so it becomes the 1-padded flat input of the second conv.
    t0 = (jnp.maximum(acc0 + b0_ref[...], 0.0).astype(jnp.bfloat16)
          * mask_ref[...])
    t0p_ref[...] = jnp.zeros_like(t0p_ref)
    t0p_ref[wp + 1:wp + 1 + m, :] = t0

    c1 = w1_ref.shape[-1]
    acc1 = jnp.zeros((m, c1), jnp.float32)
    for di in range(3):
        for dj in range(3):
            off = di * wp + dj
            acc1 = acc1 + jnp.dot(t0p_ref[off:off + m, :],
                                  w1_ref[di * 3 + dj],
                                  preferred_element_type=jnp.float32)
    o_ref[0] = jnp.maximum(acc1 + b1_ref[...], 0.0).astype(o_ref.dtype)


def _tail_kernel(xp_ref, w1_ref, b1_ref, tp_ref, w2_ref, b2_ref, pool_ref,
                 o_ref, *, wq, m):
    """Fused p1 ConvBN(3x3,s2) + p2_2 ConvBN(3x3,s2) + pre-reduced maxpool,
    written directly into the channel-concatenated output block.

    Stride-2 taps are read from even/odd parity planes, so each tap is again
    a constant flat offset and every dot is a plain 2-D MXU matmul.
    """
    c1 = w1_ref.shape[-1]
    c2 = w2_ref.shape[-1]
    c3 = pool_ref.shape[-1]

    acc1 = jnp.zeros((m, c1), jnp.float32)
    acc2 = jnp.zeros((m, c2), jnp.float32)
    for di in range(3):
        for dj in range(3):
            plane = (di % 2) * 2 + (dj % 2)
            off = (di // 2) * wq + (dj // 2)
            tap = di * 3 + dj
            acc1 = acc1 + jnp.dot(xp_ref[0, plane, off:off + m, :],
                                  w1_ref[tap],
                                  preferred_element_type=jnp.float32)
            acc2 = acc2 + jnp.dot(tp_ref[0, plane, off:off + m, :],
                                  w2_ref[tap],
                                  preferred_element_type=jnp.float32)
    o_ref[0, :, 0:c1] = jnp.maximum(acc1 + b1_ref[...], 0.0)
    o_ref[0, :, c1:c1 + c2] = jnp.maximum(acc2 + b2_ref[...], 0.0)
    o_ref[0, :, c1 + c2:c1 + c2 + c3] = pool_ref[0]


# ------------------------------- helpers ------------------------------------

def _fold_bn(w_oihw, gamma, beta, mean, var, eps=1e-5):
    """Fold eval-mode BN into the conv.  Returns per-tap bf16 weights
    (9, cin, cout) (tap index = di*3 + dj) and an f32 bias (1, cout)."""
    cout, cin, kh, kw = w_oihw.shape
    scale = gamma / jnp.sqrt(var + eps)
    wt = jnp.transpose(w_oihw, (2, 3, 1, 0)).reshape(kh * kw, cin, cout)
    wt = wt * scale[None, None, :]
    bias = (beta - mean * scale).reshape(1, cout)
    return wt.astype(jnp.bfloat16), bias.astype(jnp.float32)


def _parity_planes_flat(x_nhwc, oh, ow):
    """(N,H,W,C) -> (N, 4, Lp, C): flattened stride-2 parity planes.
    Plane p = 2*row_parity + col_parity; plane[i, j] = x[2i+pr, 2j+pc].
    Row width wq = ow+1; flat length padded so all in-kernel tap reads stay
    in bounds.  Total data volume is 1x (no im2col inflation)."""
    n, h, w, c = x_nhwc.shape
    wq = ow + 1
    lp = (oh + 2) * wq
    planes = []
    for pr in range(2):
        for pc in range(2):
            pln = x_nhwc[:, pr::2, pc::2, :][:, :oh + 1, :ow + 1, :]
            ph, pw = pln.shape[1], pln.shape[2]
            pln = jnp.pad(pln, ((0, 0), (0, (oh + 1) - ph), (0, wq - pw),
                                (0, 0)))
            pln = pln.reshape(n, (oh + 1) * wq, c)
            pln = jnp.pad(pln, ((0, 0), (0, lp - (oh + 1) * wq), (0, 0)))
            planes.append(pln)
    return jnp.stack(planes, axis=1)


# ------------------------------- wrappers ------------------------------------

def _p2_head(x_nhwc, p20, p21):
    """Fused p2_0 + p2_1 (two stride-1 pad-1 ConvBN+ReLU).  Returns bf16
    (N, H, W, 224); the 192-channel intermediate stays in VMEM."""
    n, h, w, cin = x_nhwc.shape
    hp, wp = h + 2, w + 2
    m = hp * wp

    w0, b0 = _fold_bn(*p20)                      # (9, cin, 192), (1, 192)
    w1, b1 = _fold_bn(*p21)                      # (9, 192, 224), (1, 224)
    c0, c1 = w0.shape[-1], w1.shape[-1]

    x1 = jnp.pad(x_nhwc, ((0, 0), (1, 1), (1, 1), (0, 0))).astype(jnp.bfloat16)
    xf = jnp.pad(x1.reshape(n, m, cin), ((0, 0), (0, 3 * wp), (0, 0)))

    # validity mask over the (hp, wp) grid: 1 where (row < h) & (col < w).
    rows = jnp.arange(hp) < h
    cols = jnp.arange(wp) < w
    mask = (rows[:, None] & cols[None, :]).reshape(m, 1).astype(jnp.bfloat16)

    kernel = functools.partial(_p2_head_kernel, wp=wp, m=m)
    out = pl.pallas_call(
        kernel,
        out_shape=jax.ShapeDtypeStruct((n, m, c1), jnp.bfloat16),
        grid=(n,),
        in_specs=[
            pl.BlockSpec((1, m + 3 * wp, cin), lambda b: (b, 0, 0)),
            pl.BlockSpec((m, 1), lambda b: (0, 0)),            # grid-invariant
            pl.BlockSpec((9, cin, c0), lambda b: (0, 0, 0)),   # grid-invariant
            pl.BlockSpec((1, c0), lambda b: (0, 0)),           # grid-invariant
            pl.BlockSpec((9, c0, c1), lambda b: (0, 0, 0)),    # grid-invariant
            pl.BlockSpec((1, c1), lambda b: (0, 0)),           # grid-invariant
        ],
        out_specs=pl.BlockSpec((1, m, c1), lambda b: (b, 0, 0)),
        scratch_shapes=[pltpu.VMEM((m + 3 * wp, c0), jnp.bfloat16)],
        compiler_params=pltpu.CompilerParams(
            dimension_semantics=("parallel",),
            vmem_limit_bytes=_vmem_limit_bytes()),
    )(xf, mask, w0, b0, w1, b1)

    return out.reshape(n, hp, wp, c1)[:, :h, :w, :]


def _fused_tail(x_nhwc, t_nhwc, p1, p22):
    """Fused p1 = ConvBN(x,384,3,s2,p0), p2 = ConvBN(t,256,3,s2,p0) and
    MaxPool3x3/s2(x), written into one channel-concatenated output."""
    n, h, w, cin = x_nhwc.shape
    oh, ow = (h - 3) // 2 + 1, (w - 3) // 2 + 1
    wq = ow + 1
    mt = oh * wq
    lp = (oh + 2) * wq

    w1, b1 = _fold_bn(*p1)                       # (9, cin, 384)
    w2, b2 = _fold_bn(*p22)                      # (9, 224, 256)
    c1, c2, c3 = w1.shape[-1], w2.shape[-1], cin
    ct = t_nhwc.shape[-1]
    ctot = c1 + c2 + c3

    xp = _parity_planes_flat(x_nhwc.astype(jnp.bfloat16), oh, ow)
    tp = _parity_planes_flat(t_nhwc, oh, ow)

    # MaxPool pre-reduced in the wrapper (f32, exact): single (mt, cin) operand.
    taps = [x_nhwc[:, i:i + 2 * oh:2, j:j + 2 * ow:2, :]
            for i in range(3) for j in range(3)]
    pool = jnp.max(jnp.stack(taps, axis=0), axis=0)          # (n, oh, ow, cin)
    pool = jnp.pad(pool, ((0, 0), (0, 0), (0, 1), (0, 0))).reshape(n, mt, cin)

    kernel = functools.partial(_tail_kernel, wq=wq, m=mt)
    out = pl.pallas_call(
        kernel,
        out_shape=jax.ShapeDtypeStruct((n, mt, ctot), jnp.float32),
        grid=(n,),
        in_specs=[
            pl.BlockSpec((1, 4, lp, cin), lambda b: (b, 0, 0, 0)),
            pl.BlockSpec((9, cin, c1), lambda b: (0, 0, 0)),   # grid-invariant
            pl.BlockSpec((1, c1), lambda b: (0, 0)),           # grid-invariant
            pl.BlockSpec((1, 4, lp, ct), lambda b: (b, 0, 0, 0)),
            pl.BlockSpec((9, ct, c2), lambda b: (0, 0, 0)),    # grid-invariant
            pl.BlockSpec((1, c2), lambda b: (0, 0)),           # grid-invariant
            pl.BlockSpec((1, mt, c3), lambda b: (b, 0, 0)),
        ],
        out_specs=pl.BlockSpec((1, mt, ctot), lambda b: (b, 0, 0)),
        compiler_params=pltpu.CompilerParams(
            dimension_semantics=("parallel",),
            vmem_limit_bytes=_vmem_limit_bytes()),
    )(xp, w1, b1, tp, w2, b2, pool)

    return out.reshape(n, oh, wq, ctot)[:, :, :ow, :]


@jax.jit
def reduction_a_forward(x_nchw, params):
    x = jnp.transpose(x_nchw, (0, 2, 3, 1)).astype(jnp.float32)  # NCHW -> NHWC
    t = _p2_head(x, params["p2_0"], params["p2_1"])              # (n,h,w,224) bf16
    out = _fused_tail(x, t, params["p1"], params["p2_2"])        # (n,oh,ow,656)
    return jnp.transpose(out, (0, 3, 1, 2))                      # back to NCHW


# --------------------------- parameter construction -------------------------

def _make_convbn_params(key, in_c, out_c, k):
    k0, k1, k2, k3, k4 = jax.random.split(key, 5)
    w = jax.random.normal(k0, (out_c, in_c, k, k), jnp.float32) * 0.05
    gamma = jax.random.uniform(k1, (out_c,), jnp.float32, 0.5, 1.5)
    beta = jax.random.normal(k2, (out_c,), jnp.float32) * 0.1
    mean = jax.random.normal(k3, (out_c,), jnp.float32) * 0.1
    var = jax.random.uniform(k4, (out_c,), jnp.float32, 0.5, 1.5)
    return (w, gamma, beta, mean, var)


def make_reduction_a_params(key, in_channels):
    keys = jax.random.split(key, 4)
    return {
        "p1":   _make_convbn_params(keys[0], in_channels, 384, 3),
        "p2_0": _make_convbn_params(keys[1], in_channels, 192, 3),
        "p2_1": _make_convbn_params(keys[2], 192, 224, 3),
        "p2_2": _make_convbn_params(keys[3], 224, 256, 3),
    }


# ----------------------------- pure-JAX reference ----------------------------

def _ref_convbn(x_nchw, p, stride, padding):
    w, gamma, beta, mean, var = p
    y = jax.lax.conv_general_dilated(
        x_nchw, w, window_strides=(stride, stride),
        padding=((padding, padding), (padding, padding)),
        dimension_numbers=("NCHW", "OIHW", "NCHW"),
        precision=jax.lax.Precision.HIGHEST)
    scale = gamma / jnp.sqrt(var + 1e-5)
    y = y * scale[None, :, None, None] + (beta - mean * scale)[None, :, None, None]
    return jnp.maximum(y, 0.0)


def reduction_a_reference(x_nchw, params):
    p1 = _ref_convbn(x_nchw, params["p1"], 2, 0)
    t = _ref_convbn(x_nchw, params["p2_0"], 1, 1)
    t = _ref_convbn(t, params["p2_1"], 1, 1)
    p2 = _ref_convbn(t, params["p2_2"], 2, 0)
    p3 = jax.lax.reduce_window(x_nchw, -jnp.inf, jax.lax.max,
                               (1, 1, 3, 3), (1, 1, 2, 2), "VALID")
    return jnp.concatenate([p1, p2, p3], axis=1)


# --------------------------------- main --------------------------------------

if __name__ == "__main__":
    key = jax.random.PRNGKey(0)
    kx, kp = jax.random.split(key)

    in_channels, n, h, w = 16, 2, 9, 9
    x = jax.random.normal(kx, (n, in_channels, h, w), jnp.float32)
    params = make_reduction_a_params(kp, in_channels)

    out = jax.block_until_ready(reduction_a_forward(x, params))

    oh = (h - 3) // 2 + 1
    ow = (w - 3) // 2 + 1
    assert out.shape == (n, 384 + 256 + in_channels, oh, ow), out.shape
    assert bool(jnp.all(jnp.isfinite(out)))

    # Loose check against an f32 XLA reference (kernel uses bf16 conv inputs /
    # BN-folded bf16 weights, so exact equality is not expected).
    ref = jax.block_until_ready(reduction_a_reference(x, params))
    err = float(jnp.max(jnp.abs(out - ref)) / (jnp.max(jnp.abs(ref)) + 1e-6))
    assert err < 0.1, f"mismatch vs reference: normalized max err {err}"

    print("KERNEL_OK")
</pallas_src>

<mosaic_0001>
module attributes {stable_mosaic.version = 11 : i64} {
  func.func @_p2_head_kernel(%arg0: i32, %arg1: memref<1x154x16xbf16, #tpu.memory_space<vmem>>, %arg2: memref<121x1xbf16, #tpu.memory_space<vmem>>, %arg3: memref<9x16x192xbf16, #tpu.memory_space<vmem>>, %arg4: memref<1x192xf32, #tpu.memory_space<vmem>>, %arg5: memref<9x192x224xbf16, #tpu.memory_space<vmem>>, %arg6: memref<1x224xf32, #tpu.memory_space<vmem>>, %arg7: memref<1x121x224xbf16, #tpu.memory_space<vmem>>, %arg8: memref<154x192xbf16, #tpu.memory_space<vmem>>) attributes {dimension_semantics = [#tpu.dimension_semantics<parallel>], iteration_bounds = array<i64: 2>, scalar_prefetch = 0 : i64, scratch_operands = 1 : i64, tpu.core_type = #tpu.core_type<tc>, window_params = [{transform_indices = @transform_0, window_bounds = array<i64: 1, 154, 16>}, {pipeline_mode = #tpu.pipeline_mode<synchronous>, transform_indices = @transform_1, window_bounds = array<i64: 121, 1>}, {pipeline_mode = #tpu.pipeline_mode<synchronous>, transform_indices = @transform_2, window_bounds = array<i64: 9, 16, 192>}, {pipeline_mode = #tpu.pipeline_mode<synchronous>, transform_indices = @transform_3, window_bounds = array<i64: 1, 192>}, {pipeline_mode = #tpu.pipeline_mode<synchronous>, transform_indices = @transform_4, window_bounds = array<i64: 9, 192, 224>}, {pipeline_mode = #tpu.pipeline_mode<synchronous>, transform_indices = @transform_5, window_bounds = array<i64: 1, 224>}, {transform_indices = @transform_6, window_bounds = array<i64: 1, 121, 224>}]} {
    %cst = arith.constant 0.000000e+00 : f32
    %0 = vector.broadcast %cst : f32 to vector<121x192xf32>
    %c0 = arith.constant 0 : index
    %c0_0 = arith.constant 0 : index
    %c0_1 = arith.constant 0 : index
    %1 = vector.load %arg1[%c0, %c0_0, %c0_1] : memref<1x154x16xbf16, #tpu.memory_space<vmem>>, vector<1x121x16xbf16>
    %2 = vector.shape_cast %1 : vector<1x121x16xbf16> to vector<121x16xbf16>
    %c0_2 = arith.constant 0 : index
    %c0_3 = arith.constant 0 : index
    %c0_4 = arith.constant 0 : index
    %3 = vector.load %arg3[%c0_2, %c0_3, %c0_4] : memref<9x16x192xbf16, #tpu.memory_space<vmem>>, vector<1x16x192xbf16>
    %4 = vector.shape_cast %3 : vector<1x16x192xbf16> to vector<16x192xbf16>
    %cst_5 = arith.constant dense<0.000000e+00> : vector<121x192xf32>
    %5 = tpu.matmul %2, %4, %cst_5 {dimension_numbers = #tpu.dot_dimension_numbers<[1], [0], [0], [1], [0, 0, 1, 1], [], []>} : vector<121x16xbf16>, vector<16x192xbf16>, vector<121x192xf32> -> vector<121x192xf32>
    %6 = arith.addf %0, %5 : vector<121x192xf32>
    %c0_6 = arith.constant 0 : index
    %c1 = arith.constant 1 : index
    %c0_7 = arith.constant 0 : index
    %7 = vector.load %arg1[%c0_6, %c1, %c0_7] : memref<1x154x16xbf16, #tpu.memory_space<vmem>>, vector<1x121x16xbf16>
    %8 = vector.shape_cast %7 : vector<1x121x16xbf16> to vector<121x16xbf16>
    %c1_8 = arith.constant 1 : index
    %c0_9 = arith.constant 0 : index
    %c0_10 = arith.constant 0 : index
    %9 = vector.load %arg3[%c1_8, %c0_9, %c0_10] : memref<9x16x192xbf16, #tpu.memory_space<vmem>>, vector<1x16x192xbf16>
    %10 = vector.shape_cast %9 : vector<1x16x192xbf16> to vector<16x192xbf16>
    %cst_11 = arith.constant dense<0.000000e+00> : vector<121x192xf32>
    %11 = tpu.matmul %8, %10, %cst_11 {dimension_numbers = #tpu.dot_dimension_numbers<[1], [0], [0], [1], [0, 0, 1, 1], [], []>} : vector<121x16xbf16>, vector<16x192xbf16>, vector<121x192xf32> -> vector<121x192xf32>
    %12 = arith.addf %6, %11 : vector<121x192xf32>
    %c0_12 = arith.constant 0 : index
    %c2 = arith.constant 2 : index
    %c0_13 = arith.constant 0 : index
    %13 = vector.load %arg1[%c0_12, %c2, %c0_13] : memref<1x154x16xbf16, #tpu.memory_space<vmem>>, vector<1x121x16xbf16>
    %14 = vector.shape_cast %13 : vector<1x121x16xbf16> to vector<121x16xbf16>
    %c2_14 = arith.constant 2 : index
    %c0_15 = arith.constant 0 : index
    %c0_16 = arith.constant 0 : index
    %15 = vector.load %arg3[%c2_14, %c0_15, %c0_16] : memref<9x16x192xbf16, #tpu.memory_space<vmem>>, vector<1x16x192xbf16>
    %16 = vector.shape_cast %15 : vector<1x16x192xbf16> to vector<16x192xbf16>
    %cst_17 = arith.constant dense<0.000000e+00> : vector<121x192xf32>
    %17 = tpu.matmul %14, %16, %cst_17 {dimension_numbers = #tpu.dot_dimension_numbers<[1], [0], [0], [1], [0, 0, 1, 1], [], []>} : vector<121x16xbf16>, vector<16x192xbf16>, vector<121x192xf32> -> vector<121x192xf32>
    %18 = arith.addf %12, %17 : vector<121x192xf32>
    %c0_18 = arith.constant 0 : index
    %c11 = arith.constant 11 : index
    %c0_19 = arith.constant 0 : index
    %19 = vector.load %arg1[%c0_18, %c11, %c0_19] : memref<1x154x16xbf16, #tpu.memory_space<vmem>>, vector<1x121x16xbf16>
    %20 = vector.shape_cast %19 : vector<1x121x16xbf16> to vector<121x16xbf16>
    %c3 = arith.constant 3 : index
    %c0_20 = arith.constant 0 : index
    %c0_21 = arith.constant 0 : index
    %21 = vector.load %arg3[%c3, %c0_20, %c0_21] : memref<9x16x192xbf16, #tpu.memory_space<vmem>>, vector<1x16x192xbf16>
    %22 = vector.shape_cast %21 : vector<1x16x192xbf16> to vector<16x192xbf16>
    %cst_22 = arith.constant dense<0.000000e+00> : vector<121x192xf32>
    %23 = tpu.matmul %20, %22, %cst_22 {dimension_numbers = #tpu.dot_dimension_numbers<[1], [0], [0], [1], [0, 0, 1, 1], [], []>} : vector<121x16xbf16>, vector<16x192xbf16>, vector<121x192xf32> -> vector<121x192xf32>
    %24 = arith.addf %18, %23 : vector<121x192xf32>
    %c0_23 = arith.constant 0 : index
    %c12 = arith.constant 12 : index
    %c0_24 = arith.constant 0 : index
    %25 = vector.load %arg1[%c0_23, %c12, %c0_24] : memref<1x154x16xbf16, #tpu.memory_space<vmem>>, vector<1x121x16xbf16>
    %26 = vector.shape_cast %25 : vector<1x121x16xbf16> to vector<121x16xbf16>
    %c4 = arith.constant 4 : index
    %c0_25 = arith.constant 0 : index
    %c0_26 = arith.constant 0 : index
    %27 = vector.load %arg3[%c4, %c0_25, %c0_26] : memref<9x16x192xbf16, #tpu.memory_space<vmem>>, vector<1x16x192xbf16>
    %28 = vector.shape_cast %27 : vector<1x16x192xbf16> to vector<16x192xbf16>
    %cst_27 = arith.constant dense<0.000000e+00> : vector<121x192xf32>
    %29 = tpu.matmul %26, %28, %cst_27 {dimension_numbers = #tpu.dot_dimension_numbers<[1], [0], [0], [1], [0, 0, 1, 1], [], []>} : vector<121x16xbf16>, vector<16x192xbf16>, vector<121x192xf32> -> vector<121x192xf32>
    %30 = arith.addf %24, %29 : vector<121x192xf32>
    %c0_28 = arith.constant 0 : index
    %c13 = arith.constant 13 : index
    %c0_29 = arith.constant 0 : index
    %31 = vector.load %arg1[%c0_28, %c13, %c0_29] : memref<1x154x16xbf16, #tpu.memory_space<vmem>>, vector<1x121x16xbf16>
    %32 = vector.shape_cast %31 : vector<1x121x16xbf16> to vector<121x16xbf16>
    %c5 = arith.constant 5 : index
    %c0_30 = arith.constant 0 : index
    %c0_31 = arith.constant 0 : index
    %33 = vector.load %arg3[%c5, %c0_30, %c0_31] : memref<9x16x192xbf16, #tpu.memory_space<vmem>>, vector<1x16x192xbf16>
    %34 = vector.shape_cast %33 : vector<1x16x192xbf16> to vector<16x192xbf16>
    %cst_32 = arith.constant dense<0.000000e+00> : vector<121x192xf32>
    %35 = tpu.matmul %32, %34, %cst_32 {dimension_numbers = #tpu.dot_dimension_numbers<[1], [0], [0], [1], [0, 0, 1, 1], [], []>} : vector<121x16xbf16>, vector<16x192xbf16>, vector<121x192xf32> -> vector<121x192xf32>
    %36 = arith.addf %30, %35 : vector<121x192xf32>
    %c0_33 = arith.constant 0 : index
    %c22 = arith.constant 22 : index
    %c0_34 = arith.constant 0 : index
    %37 = vector.load %arg1[%c0_33, %c22, %c0_34] : memref<1x154x16xbf16, #tpu.memory_space<vmem>>, vector<1x121x16xbf16>
    %38 = vector.shape_cast %37 : vector<1x121x16xbf16> to vector<121x16xbf16>
    %c6 = arith.constant 6 : index
    %c0_35 = arith.constant 0 : index
    %c0_36 = arith.constant 0 : index
    %39 = vector.load %arg3[%c6, %c0_35, %c0_36] : memref<9x16x192xbf16, #tpu.memory_space<vmem>>, vector<1x16x192xbf16>
    %40 = vector.shape_cast %39 : vector<1x16x192xbf16> to vector<16x192xbf16>
    %cst_37 = arith.constant dense<0.000000e+00> : vector<121x192xf32>
    %41 = tpu.matmul %38, %40, %cst_37 {dimension_numbers = #tpu.dot_dimension_numbers<[1], [0], [0], [1], [0, 0, 1, 1], [], []>} : vector<121x16xbf16>, vector<16x192xbf16>, vector<121x192xf32> -> vector<121x192xf32>
    %42 = arith.addf %36, %41 : vector<121x192xf32>
    %c0_38 = arith.constant 0 : index
    %c23 = arith.constant 23 : index
    %c0_39 = arith.constant 0 : index
    %43 = vector.load %arg1[%c0_38, %c23, %c0_39] : memref<1x154x16xbf16, #tpu.memory_space<vmem>>, vector<1x121x16xbf16>
    %44 = vector.shape_cast %43 : vector<1x121x16xbf16> to vector<121x16xbf16>
    %c7 = arith.constant 7 : index
    %c0_40 = arith.constant 0 : index
    %c0_41 = arith.constant 0 : index
    %45 = vector.load %arg3[%c7, %c0_40, %c0_41] : memref<9x16x192xbf16, #tpu.memory_space<vmem>>, vector<1x16x192xbf16>
    %46 = vector.shape_cast %45 : vector<1x16x192xbf16> to vector<16x192xbf16>
    %cst_42 = arith.constant dense<0.000000e+00> : vector<121x192xf32>
    %47 = tpu.matmul %44, %46, %cst_42 {dimension_numbers = #tpu.dot_dimension_numbers<[1], [0], [0], [1], [0, 0, 1, 1], [], []>} : vector<121x16xbf16>, vector<16x192xbf16>, vector<121x192xf32> -> vector<121x192xf32>
    %48 = arith.addf %42, %47 : vector<121x192xf32>
    %c0_43 = arith.constant 0 : index
    %c24 = arith.constant 24 : index
    %c0_44 = arith.constant 0 : index
    %49 = vector.load %arg1[%c0_43, %c24, %c0_44] : memref<1x154x16xbf16, #tpu.memory_space<vmem>>, vector<1x121x16xbf16>
    %50 = vector.shape_cast %49 : vector<1x121x16xbf16> to vector<121x16xbf16>
    %c8 = arith.constant 8 : index
    %c0_45 = arith.constant 0 : index
    %c0_46 = arith.constant 0 : index
    %51 = vector.load %arg3[%c8, %c0_45, %c0_46] : memref<9x16x192xbf16, #tpu.memory_space<vmem>>, vector<1x16x192xbf16>
    %52 = vector.shape_cast %51 : vector<1x16x192xbf16> to vector<16x192xbf16>
    %cst_47 = arith.constant dense<0.000000e+00> : vector<121x192xf32>
    %53 = tpu.matmul %50, %52, %cst_47 {dimension_numbers = #tpu.dot_dimension_numbers<[1], [0], [0], [1], [0, 0, 1, 1], [], []>} : vector<121x16xbf16>, vector<16x192xbf16>, vector<121x192xf32> -> vector<121x192xf32>
    %54 = arith.addf %48, %53 : vector<121x192xf32>
    %c0_48 = arith.constant 0 : index
    %c0_49 = arith.constant 0 : index
    %55 = vector.load %arg4[%c0_48, %c0_49] : memref<1x192xf32, #tpu.memory_space<vmem>>, vector<1x192xf32>
    %56 = vector.broadcast %55 : vector<1x192xf32> to vector<121x192xf32>
    %57 = arith.addf %54, %56 : vector<121x192xf32>
    %cst_50 = arith.constant 0.000000e+00 : f32
    %58 = vector.broadcast %cst_50 : f32 to vector<121x192xf32>
    %59 = arith.maximumf %57, %58 : vector<121x192xf32>
    %60 = arith.truncf %59 : vector<121x192xf32> to vector<121x192xbf16>
    %c0_51 = arith.constant 0 : index
    %c0_52 = arith.constant 0 : index
    %61 = vector.load %arg2[%c0_51, %c0_52] : memref<121x1xbf16, #tpu.memory_space<vmem>>, vector<121x1xbf16>
    %62 = vector.broadcast %61 : vector<121x1xbf16> to vector<121x192xbf16>
    %63 = arith.mulf %60, %62 : vector<121x192xbf16>
    %cst_53 = arith.constant 0.000000e+00 : bf16
    %64 = vector.broadcast %cst_53 : bf16 to vector<154x192xbf16>
    %c0_54 = arith.constant 0 : index
    %c0_55 = arith.constant 0 : index
    %65 = vector.load %arg8[%c0_54, %c0_55] : memref<154x192xbf16, #tpu.memory_space<vmem>>, vector<154x192xbf16>
    tpu.vector_store %arg8[%c0_54, %c0_55], %64 {strides = array<i32>} : memref<154x192xbf16, #tpu.memory_space<vmem>>, vector<154x192xbf16>,
    %c12_56 = arith.constant 12 : index
    %c0_57 = arith.constant 0 : index
    %66 = vector.load %arg8[%c12_56, %c0_57] : memref<154x192xbf16, #tpu.memory_space<vmem>>, vector<121x192xbf16>
    tpu.vector_store %arg8[%c12_56, %c0_57], %63 {strides = array<i32>} : memref<154x192xbf16, #tpu.memory_space<vmem>>, vector<121x192xbf16>,
    %cst_58 = arith.constant 0.000000e+00 : f32
    %67 = vector.broadcast %cst_58 : f32 to vector<121x224xf32>
    %c0_59 = arith.constant 0 : index
    %c0_60 = arith.constant 0 : index
    %68 = vector.load %arg8[%c0_59, %c0_60] : memref<154x192xbf16, #tpu.memory_space<vmem>>, vector<121x192xbf16>
    %c0_61 = arith.constant 0 : index
    %c0_62 = arith.constant 0 : index
    %c0_63 = arith.constant 0 : index
    %69 = vector.load %arg5[%c0_61, %c0_62, %c0_63] : memref<9x192x224xbf16, #tpu.memory_space<vmem>>, vector<1x192x224xbf16>
    %70 = vector.shape_cast %69 : vector<1x192x224xbf16> to vector<192x224xbf16>
    %cst_64 = arith.constant dense<0.000000e+00> : vector<121x224xf32>
    %71 = tpu.matmul %68, %70, %cst_64 {dimension_numbers = #tpu.dot_dimension_numbers<[1], [0], [0], [1], [0, 0, 1, 1], [], []>} : vector<121x192xbf16>, vector<192x224xbf16>, vector<121x224xf32> -> vector<121x224xf32>
    %72 = arith.addf %67, %71 : vector<121x224xf32>
    %c1_65 = arith.constant 1 : index
    %c0_66 = arith.constant 0 : index
    %73 = vector.load %arg8[%c1_65, %c0_66] : memref<154x192xbf16, #tpu.memory_space<vmem>>, vector<121x192xbf16>
    %c1_67 = arith.constant 1 : index
    %c0_68 = arith.constant 0 : index
    %c0_69 = arith.constant 0 : index
    %74 = vector.load %arg5[%c1_67, %c0_68, %c0_69] : memref<9x192x224xbf16, #tpu.memory_space<vmem>>, vector<1x192x224xbf16>
    %75 = vector.shape_cast %74 : vector<1x192x224xbf16> to vector<192x224xbf16>
    %cst_70 = arith.constant dense<0.000000e+00> : vector<121x224xf32>
    %76 = tpu.matmul %73, %75, %cst_70 {dimension_numbers = #tpu.dot_dimension_numbers<[1], [0], [0], [1], [0, 0, 1, 1], [], []>} : vector<121x192xbf16>, vector<192x224xbf16>, vector<121x224xf32> -> vector<121x224xf32>
    %77 = arith.addf %72, %76 : vector<121x224xf32>
    %c2_71 = arith.constant 2 : index
    %c0_72 = arith.constant 0 : index
    %78 = vector.load %arg8[%c2_71, %c0_72] : memref<154x192xbf16, #tpu.memory_space<vmem>>, vector<121x192xbf16>
    %c2_73 = arith.constant 2 : index
    %c0_74 = arith.constant 0 : index
    %c0_75 = arith.constant 0 : index
    %79 = vector.load %arg5[%c2_73, %c0_74, %c0_75] : memref<9x192x224xbf16, #tpu.memory_space<vmem>>, vector<1x192x224xbf16>
    %80 = vector.shape_cast %79 : vector<1x192x224xbf16> to vector<192x224xbf16>
    %cst_76 = arith.constant dense<0.000000e+00> : vector<121x224xf32>
    %81 = tpu.matmul %78, %80, %cst_76 {dimension_numbers = #tpu.dot_dimension_numbers<[1], [0], [0], [1], [0, 0, 1, 1], [], []>} : vector<121x192xbf16>, vector<192x224xbf16>, vector<121x224xf32> -> vector<121x224xf32>
    %82 = arith.addf %77, %81 : vector<121x224xf32>
    %c11_77 = arith.constant 11 : index
    %c0_78 = arith.constant 0 : index
    %83 = vector.load %arg8[%c11_77, %c0_78] : memref<154x192xbf16, #tpu.memory_space<vmem>>, vector<121x192xbf16>
    %c3_79 = arith.constant 3 : index
    %c0_80 = arith.constant 0 : index
    %c0_81 = arith.constant 0 : index
    %84 = vector.load %arg5[%c3_79, %c0_80, %c0_81] : memref<9x192x224xbf16, #tpu.memory_space<vmem>>, vector<1x192x224xbf16>
    %85 = vector.shape_cast %84 : vector<1x192x224xbf16> to vector<192x224xbf16>
    %cst_82 = arith.constant dense<0.000000e+00> : vector<121x224xf32>
    %86 = tpu.matmul %83, %85, %cst_82 {dimension_numbers = #tpu.dot_dimension_numbers<[1], [0], [0], [1], [0, 0, 1, 1], [], []>} : vector<121x192xbf16>, vector<192x224xbf16>, vector<121x224xf32> -> vector<121x224xf32>
    %87 = arith.addf %82, %86 : vector<121x224xf32>
    %c12_83 = arith.constant 12 : index
    %c0_84 = arith.constant 0 : index
    %88 = vector.load %arg8[%c12_83, %c0_84] : memref<154x192xbf16, #tpu.memory_space<vmem>>, vector<121x192xbf16>
    %c4_85 = arith.constant 4 : index
    %c0_86 = arith.constant 0 : index
    %c0_87 = arith.constant 0 : index
    %89 = vector.load %arg5[%c4_85, %c0_86, %c0_87] : memref<9x192x224xbf16, #tpu.memory_space<vmem>>, vector<1x192x224xbf16>
    %90 = vector.shape_cast %89 : vector<1x192x224xbf16> to vector<192x224xbf16>
    %cst_88 = arith.constant dense<0.000000e+00> : vector<121x224xf32>
    %91 = tpu.matmul %88, %90, %cst_88 {dimension_numbers = #tpu.dot_dimension_numbers<[1], [0], [0], [1], [0, 0, 1, 1], [], []>} : vector<121x192xbf16>, vector<192x224xbf16>, vector<121x224xf32> -> vector<121x224xf32>
    %92 = arith.addf %87, %91 : vector<121x224xf32>
    %c13_89 = arith.constant 13 : index
    %c0_90 = arith.constant 0 : index
    %93 = vector.load %arg8[%c13_89, %c0_90] : memref<154x192xbf16, #tpu.memory_space<vmem>>, vector<121x192xbf16>
    %c5_91 = arith.constant 5 : index
    %c0_92 = arith.constant 0 : index
    %c0_93 = arith.constant 0 : index
    %94 = vector.load %arg5[%c5_91, %c0_92, %c0_93] : memref<9x192x224xbf16, #tpu.memory_space<vmem>>, vector<1x192x224xbf16>
    %95 = vector.shape_cast %94 : vector<1x192x224xbf16> to vector<192x224xbf16>
    %cst_94 = arith.constant dense<0.000000e+00> : vector<121x224xf32>
    %96 = tpu.matmul %93, %95, %cst_94 {dimension_numbers = #tpu.dot_dimension_numbers<[1], [0], [0], [1], [0, 0, 1, 1], [], []>} : vector<121x192xbf16>, vector<192x224xbf16>, vector<121x224xf32> -> vector<121x224xf32>
    %97 = arith.addf %92, %96 : vector<121x224xf32>
    %c22_95 = arith.constant 22 : index
    %c0_96 = arith.constant 0 : index
    %98 = vector.load %arg8[%c22_95, %c0_96] : memref<154x192xbf16, #tpu.memory_space<vmem>>, vector<121x192xbf16>
    %c6_97 = arith.constant 6 : index
    %c0_98 = arith.constant 0 : index
    %c0_99 = arith.constant 0 : index
    %99 = vector.load %arg5[%c6_97, %c0_98, %c0_99] : memref<9x192x224xbf16, #tpu.memory_space<vmem>>, vector<1x192x224xbf16>
    %100 = vector.shape_cast %99 : vector<1x192x224xbf16> to vector<192x224xbf16>
    %cst_100 = arith.constant dense<0.000000e+00> : vector<121x224xf32>
    %101 = tpu.matmul %98, %100, %cst_100 {dimension_numbers = #tpu.dot_dimension_numbers<[1], [0], [0], [1], [0, 0, 1, 1], [], []>} : vector<121x192xbf16>, vector<192x224xbf16>, vector<121x224xf32> -> vector<121x224xf32>
    %102 = arith.addf %97, %101 : vector<121x224xf32>
    %c23_101 = arith.constant 23 : index
    %c0_102 = arith.constant 0 : index
    %103 = vector.load %arg8[%c23_101, %c0_102] : memref<154x192xbf16, #tpu.memory_space<vmem>>, vector<121x192xbf16>
    %c7_103 = arith.constant 7 : index
    %c0_104 = arith.constant 0 : index
    %c0_105 = arith.constant 0 : index
    %104 = vector.load %arg5[%c7_103, %c0_104, %c0_105] : memref<9x192x224xbf16, #tpu.memory_space<vmem>>, vector<1x192x224xbf16>
    %105 = vector.shape_cast %104 : vector<1x192x224xbf16> to vector<192x224xbf16>
    %cst_106 = arith.constant dense<0.000000e+00> : vector<121x224xf32>
    %106 = tpu.matmul %103, %105, %cst_106 {dimension_numbers = #tpu.dot_dimension_numbers<[1], [0], [0], [1], [0, 0, 1, 1], [], []>} : vector<121x192xbf16>, vector<192x224xbf16>, vector<121x224xf32> -> vector<121x224xf32>
    %107 = arith.addf %102, %106 : vector<121x224xf32>
    %c24_107 = arith.constant 24 : index
    %c0_108 = arith.constant 0 : index
    %108 = vector.load %arg8[%c24_107, %c0_108] : memref<154x192xbf16, #tpu.memory_space<vmem>>, vector<121x192xbf16>
    %c8_109 = arith.constant 8 : index
    %c0_110 = arith.constant 0 : index
    %c0_111 = arith.constant 0 : index
    %109 = vector.load %arg5[%c8_109, %c0_110, %c0_111] : memref<9x192x224xbf16, #tpu.memory_space<vmem>>, vector<1x192x224xbf16>
    %110 = vector.shape_cast %109 : vector<1x192x224xbf16> to vector<192x224xbf16>
    %cst_112 = arith.constant dense<0.000000e+00> : vector<121x224xf32>
    %111 = tpu.matmul %108, %110, %cst_112 {dimension_numbers = #tpu.dot_dimension_numbers<[1], [0], [0], [1], [0, 0, 1, 1], [], []>} : vector<121x192xbf16>, vector<192x224xbf16>, vector<121x224xf32> -> vector<121x224xf32>
    %112 = arith.addf %107, %111 : vector<121x224xf32>
    %c0_113 = arith.constant 0 : index
    %c0_114 = arith.constant 0 : index
    %113 = vector.load %arg6[%c0_113, %c0_114] : memref<1x224xf32, #tpu.memory_space<vmem>>, vector<1x224xf32>
    %114 = vector.broadcast %113 : vector<1x224xf32> to vector<121x224xf32>
    %115 = arith.addf %112, %114 : vector<121x224xf32>
    %cst_115 = arith.constant 0.000000e+00 : f32
    %116 = vector.broadcast %cst_115 : f32 to vector<121x224xf32>
    %117 = arith.maximumf %115, %116 : vector<121x224xf32>
    %118 = arith.truncf %117 : vector<121x224xf32> to vector<121x224xbf16>
    %c0_116 = arith.constant 0 : index
    %c0_117 = arith.constant 0 : index
    %c0_118 = arith.constant 0 : index
    %119 = vector.load %arg7[%c0_116, %c0_117, %c0_118] : memref<1x121x224xbf16, #tpu.memory_space<vmem>>, vector<1x121x224xbf16>
    %120 = vector.shape_cast %119 : vector<1x121x224xbf16> to vector<121x224xbf16>
    %121 = vector.shape_cast %118 : vector<121x224xbf16> to vector<1x121x224xbf16>
    tpu.vector_store %arg7[%c0_116, %c0_117, %c0_118], %121 {strides = array<i32>} : memref<1x121x224xbf16, #tpu.memory_space<vmem>>, vector<1x121x224xbf16>,
    return
  }
  func.func @transform_0(%arg0: i32) -> (i32, i32, i32) {
    %c0_i32 = arith.constant 0 : i32
    %c0_i32_0 = arith.constant 0 : i32
    %c0_i32_1 = arith.constant 0 : i32
    return %arg0, %c0_i32, %c0_i32_0 : i32, i32, i32
  }
  func.func @transform_1(%arg0: i32) -> (i32, i32) {
    %c0_i32 = arith.constant 0 : i32
    %c0_i32_0 = arith.constant 0 : i32
    %c0_i32_1 = arith.constant 0 : i32
    return %c0_i32, %c0_i32_0 : i32, i32
  }
  func.func @transform_2(%arg0: i32) -> (i32, i32, i32) {
    %c0_i32 = arith.constant 0 : i32
    %c0_i32_0 = arith.constant 0 : i32
    %c0_i32_1 = arith.constant 0 : i32
    %c0_i32_2 = arith.constant 0 : i32
    return %c0_i32, %c0_i32_0, %c0_i32_1 : i32, i32, i32
  }
  func.func @transform_3(%arg0: i32) -> (i32, i32) {
    %c0_i32 = arith.constant 0 : i32
    %c0_i32_0 = arith.constant 0 : i32
    %c0_i32_1 = arith.constant 0 : i32
    return %c0_i32, %c0_i32_0 : i32, i32
  }
  func.func @transform_4(%arg0: i32) -> (i32, i32, i32) {
    %c0_i32 = arith.constant 0 : i32
    %c0_i32_0 = arith.constant 0 : i32
    %c0_i32_1 = arith.constant 0 : i32
    %c0_i32_2 = arith.constant 0 : i32
    return %c0_i32, %c0_i32_0, %c0_i32_1 : i32, i32, i32
  }
  func.func @transform_5(%arg0: i32) -> (i32, i32) {
    %c0_i32 = arith.constant 0 : i32
    %c0_i32_0 = arith.constant 0 : i32
    %c0_i32_1 = arith.constant 0 : i32
    return %c0_i32, %c0_i32_0 : i32, i32
  }
  func.func @transform_6(%arg0: i32) -> (i32, i32, i32) {
    %c0_i32 = arith.constant 0 : i32
    %c0_i32_0 = arith.constant 0 : i32
    %c0_i32_1 = arith.constant 0 : i32
    return %arg0, %c0_i32, %c0_i32_0 : i32, i32, i32
  }
}

module attributes {stable_mosaic.version = 11 : i64} {
  func.func @_tail_kernel(%arg0: i32, %arg1: memref<1x4x30x16xbf16, #tpu.memory_space<vmem>>, %arg2: memref<9x16x384xbf16, #tpu.memory_space<vmem>>, %arg3: memref<1x384xf32, #tpu.memory_space<vmem>>, %arg4: memref<1x4x30x224xbf16, #tpu.memory_space<vmem>>, %arg5: memref<9x224x256xbf16, #tpu.memory_space<vmem>>, %arg6: memref<1x256xf32, #tpu.memory_space<vmem>>, %arg7: memref<1x20x16xf32, #tpu.memory_space<vmem>>, %arg8: memref<1x20x656xf32, #tpu.memory_space<vmem>>) attributes {dimension_semantics = [#tpu.dimension_semantics<parallel>], iteration_bounds = array<i64: 2>, scalar_prefetch = 0 : i64, scratch_operands = 0 : i64, tpu.core_type = #tpu.core_type<tc>, window_params = [{transform_indices = @transform_0, window_bounds = array<i64: 1, 4, 30, 16>}, {pipeline_mode = #tpu.pipeline_mode<synchronous>, transform_indices = @transform_1, window_bounds = array<i64: 9, 16, 384>}, {pipeline_mode = #tpu.pipeline_mode<synchronous>, transform_indices = @transform_2, window_bounds = array<i64: 1, 384>}, {transform_indices = @transform_3, window_bounds = array<i64: 1, 4, 30, 224>}, {pipeline_mode = #tpu.pipeline_mode<synchronous>, transform_indices = @transform_4, window_bounds = array<i64: 9, 224, 256>}, {pipeline_mode = #tpu.pipeline_mode<synchronous>, transform_indices = @transform_5, window_bounds = array<i64: 1, 256>}, {transform_indices = @transform_6, window_bounds = array<i64: 1, 20, 16>}, {transform_indices = @transform_7, window_bounds = array<i64: 1, 20, 656>}]} {
    %cst = arith.constant 0.000000e+00 : f32
    %0 = vector.broadcast %cst : f32 to vector<20x384xf32>
    %cst_0 = arith.constant 0.000000e+00 : f32
    %1 = vector.broadcast %cst_0 : f32 to vector<20x256xf32>
    %c0 = arith.constant 0 : index
    %c0_1 = arith.constant 0 : index
    %c0_2 = arith.constant 0 : index
    %c0_3 = arith.constant 0 : index
    %2 = vector.load %arg1[%c0, %c0_1, %c0_2, %c0_3] : memref<1x4x30x16xbf16, #tpu.memory_space<vmem>>, vector<1x1x20x16xbf16>
    %3 = vector.shape_cast %2 : vector<1x1x20x16xbf16> to vector<20x16xbf16>
    %c0_4 = arith.constant 0 : index
    %c0_5 = arith.constant 0 : index
    %c0_6 = arith.constant 0 : index
    %4 = vector.load %arg2[%c0_4, %c0_5, %c0_6] : memref<9x16x384xbf16, #tpu.memory_space<vmem>>, vector<1x16x384xbf16>
    %5 = vector.shape_cast %4 : vector<1x16x384xbf16> to vector<16x384xbf16>
    %cst_7 = arith.constant dense<0.000000e+00> : vector<20x384xf32>
    %6 = tpu.matmul %3, %5, %cst_7 {dimension_numbers = #tpu.dot_dimension_numbers<[1], [0], [0], [1], [0, 0, 1, 1], [], []>} : vector<20x16xbf16>, vector<16x384xbf16>, vector<20x384xf32> -> vector<20x384xf32>
    %7 = arith.addf %0, %6 : vector<20x384xf32>
    %c0_8 = arith.constant 0 : index
    %c0_9 = arith.constant 0 : index
    %c0_10 = arith.constant 0 : index
    %c0_11 = arith.constant 0 : index
    %8 = vector.load %arg4[%c0_8, %c0_9, %c0_10, %c0_11] : memref<1x4x30x224xbf16, #tpu.memory_space<vmem>>, vector<1x1x20x224xbf16>
    %9 = vector.shape_cast %8 : vector<1x1x20x224xbf16> to vector<20x224xbf16>
    %c0_12 = arith.constant 0 : index
    %c0_13 = arith.constant 0 : index
    %c0_14 = arith.constant 0 : index
    %10 = vector.load %arg5[%c0_12, %c0_13, %c0_14] : memref<9x224x256xbf16, #tpu.memory_space<vmem>>, vector<1x224x256xbf16>
    %11 = vector.shape_cast %10 : vector<1x224x256xbf16> to vector<224x256xbf16>
    %cst_15 = arith.constant dense<0.000000e+00> : vector<20x256xf32>
    %12 = tpu.matmul %9, %11, %cst_15 {dimension_numbers = #tpu.dot_dimension_numbers<[1], [0], [0], [1], [0, 0, 1, 1], [], []>} : vector<20x224xbf16>, vector<224x256xbf16>, vector<20x256xf32> -> vector<20x256xf32>
    %13 = arith.addf %1, %12 : vector<20x256xf32>
    %c0_16 = arith.constant 0 : index
    %c1 = arith.constant 1 : index
    %c0_17 = arith.constant 0 : index
    %c0_18 = arith.constant 0 : index
    %14 = vector.load %arg1[%c0_16, %c1, %c0_17, %c0_18] : memref<1x4x30x16xbf16, #tpu.memory_space<vmem>>, vector<1x1x20x16xbf16>
    %15 = vector.shape_cast %14 : vector<1x1x20x16xbf16> to vector<20x16xbf16>
    %c1_19 = arith.constant 1 : index
    %c0_20 = arith.constant 0 : index
    %c0_21 = arith.constant 0 : index
    %16 = vector.load %arg2[%c1_19, %c0_20, %c0_21] : memref<9x16x384xbf16, #tpu.memory_space<vmem>>, vector<1x16x384xbf16>
    %17 = vector.shape_cast %16 : vector<1x16x384xbf16> to vector<16x384xbf16>
    %cst_22 = arith.constant dense<0.000000e+00> : vector<20x384xf32>
    %18 = tpu.matmul %15, %17, %cst_22 {dimension_numbers = #tpu.dot_dimension_numbers<[1], [0], [0], [1], [0, 0, 1, 1], [], []>} : vector<20x16xbf16>, vector<16x384xbf16>, vector<20x384xf32> -> vector<20x384xf32>
    %19 = arith.addf %7, %18 : vector<20x384xf32>
    %c0_23 = arith.constant 0 : index
    %c1_24 = arith.constant 1 : index
    %c0_25 = arith.constant 0 : index
    %c0_26 = arith.constant 0 : index
    %20 = vector.load %arg4[%c0_23, %c1_24, %c0_25, %c0_26] : memref<1x4x30x224xbf16, #tpu.memory_space<vmem>>, vector<1x1x20x224xbf16>
    %21 = vector.shape_cast %20 : vector<1x1x20x224xbf16> to vector<20x224xbf16>
    %c1_27 = arith.constant 1 : index
    %c0_28 = arith.constant 0 : index
    %c0_29 = arith.constant 0 : index
    %22 = vector.load %arg5[%c1_27, %c0_28, %c0_29] : memref<9x224x256xbf16, #tpu.memory_space<vmem>>, vector<1x224x256xbf16>
    %23 = vector.shape_cast %22 : vector<1x224x256xbf16> to vector<224x256xbf16>
    %cst_30 = arith.constant dense<0.000000e+00> : vector<20x256xf32>
    %24 = tpu.matmul %21, %23, %cst_30 {dimension_numbers = #tpu.dot_dimension_numbers<[1], [0], [0], [1], [0, 0, 1, 1], [], []>} : vector<20x224xbf16>, vector<224x256xbf16>, vector<20x256xf32> -> vector<20x256xf32>
    %25 = arith.addf %13, %24 : vector<20x256xf32>
    %c0_31 = arith.constant 0 : index
    %c0_32 = arith.constant 0 : index
    %c1_33 = arith.constant 1 : index
    %c0_34 = arith.constant 0 : index
    %26 = vector.load %arg1[%c0_31, %c0_32, %c1_33, %c0_34] : memref<1x4x30x16xbf16, #tpu.memory_space<vmem>>, vector<1x1x20x16xbf16>
    %27 = vector.shape_cast %26 : vector<1x1x20x16xbf16> to vector<20x16xbf16>
    %c2 = arith.constant 2 : index
    %c0_35 = arith.constant 0 : index
    %c0_36 = arith.constant 0 : index
    %28 = vector.load %arg2[%c2, %c0_35, %c0_36] : memref<9x16x384xbf16, #tpu.memory_space<vmem>>, vector<1x16x384xbf16>
    %29 = vector.shape_cast %28 : vector<1x16x384xbf16> to vector<16x384xbf16>
    %cst_37 = arith.constant dense<0.000000e+00> : vector<20x384xf32>
    %30 = tpu.matmul %27, %29, %cst_37 {dimension_numbers = #tpu.dot_dimension_numbers<[1], [0], [0], [1], [0, 0, 1, 1], [], []>} : vector<20x16xbf16>, vector<16x384xbf16>, vector<20x384xf32> -> vector<20x384xf32>
    %31 = arith.addf %19, %30 : vector<20x384xf32>
    %c0_38 = arith.constant 0 : index
    %c0_39 = arith.constant 0 : index
    %c1_40 = arith.constant 1 : index
    %c0_41 = arith.constant 0 : index
    %32 = vector.load %arg4[%c0_38, %c0_39, %c1_40, %c0_41] : memref<1x4x30x224xbf16, #tpu.memory_space<vmem>>, vector<1x1x20x224xbf16>
    %33 = vector.shape_cast %32 : vector<1x1x20x224xbf16> to vector<20x224xbf16>
    %c2_42 = arith.constant 2 : index
    %c0_43 = arith.constant 0 : index
    %c0_44 = arith.constant 0 : index
    %34 = vector.load %arg5[%c2_42, %c0_43, %c0_44] : memref<9x224x256xbf16, #tpu.memory_space<vmem>>, vector<1x224x256xbf16>
    %35 = vector.shape_cast %34 : vector<1x224x256xbf16> to vector<224x256xbf16>
    %cst_45 = arith.constant dense<0.000000e+00> : vector<20x256xf32>
    %36 = tpu.matmul %33, %35, %cst_45 {dimension_numbers = #tpu.dot_dimension_numbers<[1], [0], [0], [1], [0, 0, 1, 1], [], []>} : vector<20x224xbf16>, vector<224x256xbf16>, vector<20x256xf32> -> vector<20x256xf32>
    %37 = arith.addf %25, %36 : vector<20x256xf32>
    %c0_46 = arith.constant 0 : index
    %c2_47 = arith.constant 2 : index
    %c0_48 = arith.constant 0 : index
    %c0_49 = arith.constant 0 : index
    %38 = vector.load %arg1[%c0_46, %c2_47, %c0_48, %c0_49] : memref<1x4x30x16xbf16, #tpu.memory_space<vmem>>, vector<1x1x20x16xbf16>
    %39 = vector.shape_cast %38 : vector<1x1x20x16xbf16> to vector<20x16xbf16>
    %c3 = arith.constant 3 : index
    %c0_50 = arith.constant 0 : index
    %c0_51 = arith.constant 0 : index
    %40 = vector.load %arg2[%c3, %c0_50, %c0_51] : memref<9x16x384xbf16, #tpu.memory_space<vmem>>, vector<1x16x384xbf16>
    %41 = vector.shape_cast %40 : vector<1x16x384xbf16> to vector<16x384xbf16>
    %cst_52 = arith.constant dense<0.000000e+00> : vector<20x384xf32>
    %42 = tpu.matmul %39, %41, %cst_52 {dimension_numbers = #tpu.dot_dimension_numbers<[1], [0], [0], [1], [0, 0, 1, 1], [], []>} : vector<20x16xbf16>, vector<16x384xbf16>, vector<20x384xf32> -> vector<20x384xf32>
    %43 = arith.addf %31, %42 : vector<20x384xf32>
    %c0_53 = arith.constant 0 : index
    %c2_54 = arith.constant 2 : index
    %c0_55 = arith.constant 0 : index
    %c0_56 = arith.constant 0 : index
    %44 = vector.load %arg4[%c0_53, %c2_54, %c0_55, %c0_56] : memref<1x4x30x224xbf16, #tpu.memory_space<vmem>>, vector<1x1x20x224xbf16>
    %45 = vector.shape_cast %44 : vector<1x1x20x224xbf16> to vector<20x224xbf16>
    %c3_57 = arith.constant 3 : index
    %c0_58 = arith.constant 0 : index
    %c0_59 = arith.constant 0 : index
    %46 = vector.load %arg5[%c3_57, %c0_58, %c0_59] : memref<9x224x256xbf16, #tpu.memory_space<vmem>>, vector<1x224x256xbf16>
    %47 = vector.shape_cast %46 : vector<1x224x256xbf16> to vector<224x256xbf16>
    %cst_60 = arith.constant dense<0.000000e+00> : vector<20x256xf32>
    %48 = tpu.matmul %45, %47, %cst_60 {dimension_numbers = #tpu.dot_dimension_numbers<[1], [0], [0], [1], [0, 0, 1, 1], [], []>} : vector<20x224xbf16>, vector<224x256xbf16>, vector<20x256xf32> -> vector<20x256xf32>
    %49 = arith.addf %37, %48 : vector<20x256xf32>
    %c0_61 = arith.constant 0 : index
    %c3_62 = arith.constant 3 : index
    %c0_63 = arith.constant 0 : index
    %c0_64 = arith.constant 0 : index
    %50 = vector.load %arg1[%c0_61, %c3_62, %c0_63, %c0_64] : memref<1x4x30x16xbf16, #tpu.memory_space<vmem>>, vector<1x1x20x16xbf16>
    %51 = vector.shape_cast %50 : vector<1x1x20x16xbf16> to vector<20x16xbf16>
    %c4 = arith.constant 4 : index
    %c0_65 = arith.constant 0 : index
    %c0_66 = arith.constant 0 : index
    %52 = vector.load %arg2[%c4, %c0_65, %c0_66] : memref<9x16x384xbf16, #tpu.memory_space<vmem>>, vector<1x16x384xbf16>
    %53 = vector.shape_cast %52 : vector<1x16x384xbf16> to vector<16x384xbf16>
    %cst_67 = arith.constant dense<0.000000e+00> : vector<20x384xf32>
    %54 = tpu.matmul %51, %53, %cst_67 {dimension_numbers = #tpu.dot_dimension_numbers<[1], [0], [0], [1], [0, 0, 1, 1], [], []>} : vector<20x16xbf16>, vector<16x384xbf16>, vector<20x384xf32> -> vector<20x384xf32>
    %55 = arith.addf %43, %54 : vector<20x384xf32>
    %c0_68 = arith.constant 0 : index
    %c3_69 = arith.constant 3 : index
    %c0_70 = arith.constant 0 : index
    %c0_71 = arith.constant 0 : index
    %56 = vector.load %arg4[%c0_68, %c3_69, %c0_70, %c0_71] : memref<1x4x30x224xbf16, #tpu.memory_space<vmem>>, vector<1x1x20x224xbf16>
    %57 = vector.shape_cast %56 : vector<1x1x20x224xbf16> to vector<20x224xbf16>
    %c4_72 = arith.constant 4 : index
    %c0_73 = arith.constant 0 : index
    %c0_74 = arith.constant 0 : index
    %58 = vector.load %arg5[%c4_72, %c0_73, %c0_74] : memref<9x224x256xbf16, #tpu.memory_space<vmem>>, vector<1x224x256xbf16>
    %59 = vector.shape_cast %58 : vector<1x224x256xbf16> to vector<224x256xbf16>
    %cst_75 = arith.constant dense<0.000000e+00> : vector<20x256xf32>
    %60 = tpu.matmul %57, %59, %cst_75 {dimension_numbers = #tpu.dot_dimension_numbers<[1], [0], [0], [1], [0, 0, 1, 1], [], []>} : vector<20x224xbf16>, vector<224x256xbf16>, vector<20x256xf32> -> vector<20x256xf32>
    %61 = arith.addf %49, %60 : vector<20x256xf32>
    %c0_76 = arith.constant 0 : index
    %c2_77 = arith.constant 2 : index
    %c1_78 = arith.constant 1 : index
    %c0_79 = arith.constant 0 : index
    %62 = vector.load %arg1[%c0_76, %c2_77, %c1_78, %c0_79] : memref<1x4x30x16xbf16, #tpu.memory_space<vmem>>, vector<1x1x20x16xbf16>
    %63 = vector.shape_cast %62 : vector<1x1x20x16xbf16> to vector<20x16xbf16>
    %c5 = arith.constant 5 : index
    %c0_80 = arith.constant 0 : index
    %c0_81 = arith.constant 0 : index
    %64 = vector.load %arg2[%c5, %c0_80, %c0_81] : memref<9x16x384xbf16, #tpu.memory_space<vmem>>, vector<1x16x384xbf16>
    %65 = vector.shape_cast %64 : vector<1x16x384xbf16> to vector<16x384xbf16>
    %cst_82 = arith.constant dense<0.000000e+00> : vector<20x384xf32>
    %66 = tpu.matmul %63, %65, %cst_82 {dimension_numbers = #tpu.dot_dimension_numbers<[1], [0], [0], [1], [0, 0, 1, 1], [], []>} : vector<20x16xbf16>, vector<16x384xbf16>, vector<20x384xf32> -> vector<20x384xf32>
    %67 = arith.addf %55, %66 : vector<20x384xf32>
    %c0_83 = arith.constant 0 : index
    %c2_84 = arith.constant 2 : index
    %c1_85 = arith.constant 1 : index
    %c0_86 = arith.constant 0 : index
    %68 = vector.load %arg4[%c0_83, %c2_84, %c1_85, %c0_86] : memref<1x4x30x224xbf16, #tpu.memory_space<vmem>>, vector<1x1x20x224xbf16>
    %69 = vector.shape_cast %68 : vector<1x1x20x224xbf16> to vector<20x224xbf16>
    %c5_87 = arith.constant 5 : index
    %c0_88 = arith.constant 0 : index
    %c0_89 = arith.constant 0 : index
    %70 = vector.load %arg5[%c5_87, %c0_88, %c0_89] : memref<9x224x256xbf16, #tpu.memory_space<vmem>>, vector<1x224x256xbf16>
    %71 = vector.shape_cast %70 : vector<1x224x256xbf16> to vector<224x256xbf16>
    %cst_90 = arith.constant dense<0.000000e+00> : vector<20x256xf32>
    %72 = tpu.matmul %69, %71, %cst_90 {dimension_numbers = #tpu.dot_dimension_numbers<[1], [0], [0], [1], [0, 0, 1, 1], [], []>} : vector<20x224xbf16>, vector<224x256xbf16>, vector<20x256xf32> -> vector<20x256xf32>
    %73 = arith.addf %61, %72 : vector<20x256xf32>
    %c0_91 = arith.constant 0 : index
    %c0_92 = arith.constant 0 : index
    %c5_93 = arith.constant 5 : index
    %c0_94 = arith.constant 0 : index
    %74 = vector.load %arg1[%c0_91, %c0_92, %c5_93, %c0_94] : memref<1x4x30x16xbf16, #tpu.memory_space<vmem>>, vector<1x1x20x16xbf16>
    %75 = vector.shape_cast %74 : vector<1x1x20x16xbf16> to vector<20x16xbf16>
    %c6 = arith.constant 6 : index
    %c0_95 = arith.constant 0 : index
    %c0_96 = arith.constant 0 : index
    %76 = vector.load %arg2[%c6, %c0_95, %c0_96] : memref<9x16x384xbf16, #tpu.memory_space<vmem>>, vector<1x16x384xbf16>
    %77 = vector.shape_cast %76 : vector<1x16x384xbf16> to vector<16x384xbf16>
    %cst_97 = arith.constant dense<0.000000e+00> : vector<20x384xf32>
    %78 = tpu.matmul %75, %77, %cst_97 {dimension_numbers = #tpu.dot_dimension_numbers<[1], [0], [0], [1], [0, 0, 1, 1], [], []>} : vector<20x16xbf16>, vector<16x384xbf16>, vector<20x384xf32> -> vector<20x384xf32>
    %79 = arith.addf %67, %78 : vector<20x384xf32>
    %c0_98 = arith.constant 0 : index
    %c0_99 = arith.constant 0 : index
    %c5_100 = arith.constant 5 : index
    %c0_101 = arith.constant 0 : index
    %80 = vector.load %arg4[%c0_98, %c0_99, %c5_100, %c0_101] : memref<1x4x30x224xbf16, #tpu.memory_space<vmem>>, vector<1x1x20x224xbf16>
    %81 = vector.shape_cast %80 : vector<1x1x20x224xbf16> to vector<20x224xbf16>
    %c6_102 = arith.constant 6 : index
    %c0_103 = arith.constant 0 : index
    %c0_104 = arith.constant 0 : index
    %82 = vector.load %arg5[%c6_102, %c0_103, %c0_104] : memref<9x224x256xbf16, #tpu.memory_space<vmem>>, vector<1x224x256xbf16>
    %83 = vector.shape_cast %82 : vector<1x224x256xbf16> to vector<224x256xbf16>
    %cst_105 = arith.constant dense<0.000000e+00> : vector<20x256xf32>
    %84 = tpu.matmul %81, %83, %cst_105 {dimension_numbers = #tpu.dot_dimension_numbers<[1], [0], [0], [1], [0, 0, 1, 1], [], []>} : vector<20x224xbf16>, vector<224x256xbf16>, vector<20x256xf32> -> vector<20x256xf32>
    %85 = arith.addf %73, %84 : vector<20x256xf32>
    %c0_106 = arith.constant 0 : index
    %c1_107 = arith.constant 1 : index
    %c5_108 = arith.constant 5 : index
    %c0_109 = arith.constant 0 : index
    %86 = vector.load %arg1[%c0_106, %c1_107, %c5_108, %c0_109] : memref<1x4x30x16xbf16, #tpu.memory_space<vmem>>, vector<1x1x20x16xbf16>
    %87 = vector.shape_cast %86 : vector<1x1x20x16xbf16> to vector<20x16xbf16>
    %c7 = arith.constant 7 : index
    %c0_110 = arith.constant 0 : index
    %c0_111 = arith.constant 0 : index
    %88 = vector.load %arg2[%c7, %c0_110, %c0_111] : memref<9x16x384xbf16, #tpu.memory_space<vmem>>, vector<1x16x384xbf16>
    %89 = vector.shape_cast %88 : vector<1x16x384xbf16> to vector<16x384xbf16>
    %cst_112 = arith.constant dense<0.000000e+00> : vector<20x384xf32>
    %90 = tpu.matmul %87, %89, %cst_112 {dimension_numbers = #tpu.dot_dimension_numbers<[1], [0], [0], [1], [0, 0, 1, 1], [], []>} : vector<20x16xbf16>, vector<16x384xbf16>, vector<20x384xf32> -> vector<20x384xf32>
    %91 = arith.addf %79, %90 : vector<20x384xf32>
    %c0_113 = arith.constant 0 : index
    %c1_114 = arith.constant 1 : index
    %c5_115 = arith.constant 5 : index
    %c0_116 = arith.constant 0 : index
    %92 = vector.load %arg4[%c0_113, %c1_114, %c5_115, %c0_116] : memref<1x4x30x224xbf16, #tpu.memory_space<vmem>>, vector<1x1x20x224xbf16>
    %93 = vector.shape_cast %92 : vector<1x1x20x224xbf16> to vector<20x224xbf16>
    %c7_117 = arith.constant 7 : index
    %c0_118 = arith.constant 0 : index
    %c0_119 = arith.constant 0 : index
    %94 = vector.load %arg5[%c7_117, %c0_118, %c0_119] : memref<9x224x256xbf16, #tpu.memory_space<vmem>>, vector<1x224x256xbf16>
    %95 = vector.shape_cast %94 : vector<1x224x256xbf16> to vector<224x256xbf16>
    %cst_120 = arith.constant dense<0.000000e+00> : vector<20x256xf32>
    %96 = tpu.matmul %93, %95, %cst_120 {dimension_numbers = #tpu.dot_dimension_numbers<[1], [0], [0], [1], [0, 0, 1, 1], [], []>} : vector<20x224xbf16>, vector<224x256xbf16>, vector<20x256xf32> -> vector<20x256xf32>
    %97 = arith.addf %85, %96 : vector<20x256xf32>
    %c0_121 = arith.constant 0 : index
    %c0_122 = arith.constant 0 : index
    %c6_123 = arith.constant 6 : index
    %c0_124 = arith.constant 0 : index
    %98 = vector.load %arg1[%c0_121, %c0_122, %c6_123, %c0_124] : memref<1x4x30x16xbf16, #tpu.memory_space<vmem>>, vector<1x1x20x16xbf16>
    %99 = vector.shape_cast %98 : vector<1x1x20x16xbf16> to vector<20x16xbf16>
    %c8 = arith.constant 8 : index
    %c0_125 = arith.constant 0 : index
    %c0_126 = arith.constant 0 : index
    %100 = vector.load %arg2[%c8, %c0_125, %c0_126] : memref<9x16x384xbf16, #tpu.memory_space<vmem>>, vector<1x16x384xbf16>
    %101 = vector.shape_cast %100 : vector<1x16x384xbf16> to vector<16x384xbf16>
    %cst_127 = arith.constant dense<0.000000e+00> : vector<20x384xf32>
    %102 = tpu.matmul %99, %101, %cst_127 {dimension_numbers = #tpu.dot_dimension_numbers<[1], [0], [0], [1], [0, 0, 1, 1], [], []>} : vector<20x16xbf16>, vector<16x384xbf16>, vector<20x384xf32> -> vector<20x384xf32>
    %103 = arith.addf %91, %102 : vector<20x384xf32>
    %c0_128 = arith.constant 0 : index
    %c0_129 = arith.constant 0 : index
    %c6_130 = arith.constant 6 : index
    %c0_131 = arith.constant 0 : index
    %104 = vector.load %arg4[%c0_128, %c0_129, %c6_130, %c0_131] : memref<1x4x30x224xbf16, #tpu.memory_space<vmem>>, vector<1x1x20x224xbf16>
    %105 = vector.shape_cast %104 : vector<1x1x20x224xbf16> to vector<20x224xbf16>
    %c8_132 = arith.constant 8 : index
    %c0_133 = arith.constant 0 : index
    %c0_134 = arith.constant 0 : index
    %106 = vector.load %arg5[%c8_132, %c0_133, %c0_134] : memref<9x224x256xbf16, #tpu.memory_space<vmem>>, vector<1x224x256xbf16>
    %107 = vector.shape_cast %106 : vector<1x224x256xbf16> to vector<224x256xbf16>
    %cst_135 = arith.constant dense<0.000000e+00> : vector<20x256xf32>
    %108 = tpu.matmul %105, %107, %cst_135 {dimension_numbers = #tpu.dot_dimension_numbers<[1], [0], [0], [1], [0, 0, 1, 1], [], []>} : vector<20x224xbf16>, vector<224x256xbf16>, vector<20x256xf32> -> vector<20x256xf32>
    %109 = arith.addf %97, %108 : vector<20x256xf32>
    %c0_136 = arith.constant 0 : index
    %c0_137 = arith.constant 0 : index
    %110 = vector.load %arg3[%c0_136, %c0_137] : memref<1x384xf32, #tpu.memory_space<vmem>>, vector<1x384xf32>
    %111 = vector.broadcast %110 : vector<1x384xf32> to vector<20x384xf32>
    %112 = arith.addf %103, %111 : vector<20x384xf32>
    %cst_138 = arith.constant 0.000000e+00 : f32
    %113 = vector.broadcast %cst_138 : f32 to vector<20x384xf32>
    %114 = arith.maximumf %112, %113 : vector<20x384xf32>
    %c0_139 = arith.constant 0 : index
    %c0_140 = arith.constant 0 : index
    %c0_141 = arith.constant 0 : index
    %115 = vector.load %arg8[%c0_139, %c0_140, %c0_141] : memref<1x20x656xf32, #tpu.memory_space<vmem>>, vector<1x20x384xf32>
    %116 = vector.shape_cast %115 : vector<1x20x384xf32> to vector<20x384xf32>
    %117 = vector.shape_cast %114 : vector<20x384xf32> to vector<1x20x384xf32>
    tpu.vector_store %arg8[%c0_139, %c0_140, %c0_141], %117 {strides = array<i32>} : memref<1x20x656xf32, #tpu.memory_space<vmem>>, vector<1x20x384xf32>,
    %c0_142 = arith.constant 0 : index
    %c0_143 = arith.constant 0 : index
    %118 = vector.load %arg6[%c0_142, %c0_143] : memref<1x256xf32, #tpu.memory_space<vmem>>, vector<1x256xf32>
    %119 = vector.broadcast %118 : vector<1x256xf32> to vector<20x256xf32>
    %120 = arith.addf %109, %119 : vector<20x256xf32>
    %cst_144 = arith.constant 0.000000e+00 : f32
    %121 = vector.broadcast %cst_144 : f32 to vector<20x256xf32>
    %122 = arith.maximumf %120, %121 : vector<20x256xf32>
    %c0_145 = arith.constant 0 : index
    %c0_146 = arith.constant 0 : index
    %c384 = arith.constant 384 : index
    %123 = vector.load %arg8[%c0_145, %c0_146, %c384] : memref<1x20x656xf32, #tpu.memory_space<vmem>>, vector<1x20x256xf32>
    %124 = vector.shape_cast %123 : vector<1x20x256xf32> to vector<20x256xf32>
    %125 = vector.shape_cast %122 : vector<20x256xf32> to vector<1x20x256xf32>
    tpu.vector_store %arg8[%c0_145, %c0_146, %c384], %125 {strides = array<i32>} : memref<1x20x656xf32, #tpu.memory_space<vmem>>, vector<1x20x256xf32>,
    %c0_147 = arith.constant 0 : index
    %c0_148 = arith.constant 0 : index
    %c0_149 = arith.constant 0 : index
    %126 = vector.load %arg7[%c0_147, %c0_148, %c0_149] : memref<1x20x16xf32, #tpu.memory_space<vmem>>, vector<1x20x16xf32>
    %127 = vector.shape_cast %126 : vector<1x20x16xf32> to vector<20x16xf32>
    %c0_150 = arith.constant 0 : index
    %c0_151 = arith.constant 0 : index
    %c640 = arith.constant 640 : index
    %128 = vector.load %arg8[%c0_150, %c0_151, %c640] : memref<1x20x656xf32, #tpu.memory_space<vmem>>, vector<1x20x16xf32>
    %129 = vector.shape_cast %128 : vector<1x20x16xf32> to vector<20x16xf32>
    %130 = vector.shape_cast %127 : vector<20x16xf32> to vector<1x20x16xf32>
    tpu.vector_store %arg8[%c0_150, %c0_151, %c640], %130 {strides = array<i32>} : memref<1x20x656xf32, #tpu.memory_space<vmem>>, vector<1x20x16xf32>,
    return
  }
  func.func @transform_0(%arg0: i32) -> (i32, i32, i32, i32) {
    %c0_i32 = arith.constant 0 : i32
    %c0_i32_0 = arith.constant 0 : i32
    %c0_i32_1 = arith.constant 0 : i32
    %c0_i32_2 = arith.constant 0 : i32
    return %arg0, %c0_i32, %c0_i32_0, %c0_i32_1 : i32, i32, i32, i32
  }
  func.func @transform_1(%arg0: i32) -> (i32, i32, i32) {
    %c0_i32 = arith.constant 0 : i32
    %c0_i32_0 = arith.constant 0 : i32
    %c0_i32_1 = arith.constant 0 : i32
    %c0_i32_2 = arith.constant 0 : i32
    return %c0_i32, %c0_i32_0, %c0_i32_1 : i32, i32, i32
  }
  func.func @transform_2(%arg0: i32) -> (i32, i32) {
    %c0_i32 = arith.constant 0 : i32
    %c0_i32_0 = arith.constant 0 : i32
    %c0_i32_1 = arith.constant 0 : i32
    return %c0_i32, %c0_i32_0 : i32, i32
  }
  func.func @transform_3(%arg0: i32) -> (i32, i32, i32, i32) {
    %c0_i32 = arith.constant 0 : i32
    %c0_i32_0 = arith.constant 0 : i32
    %c0_i32_1 = arith.constant 0 : i32
    %c0_i32_2 = arith.constant 0 : i32
    return %arg0, %c0_i32, %c0_i32_0, %c0_i32_1 : i32, i32, i32, i32
  }
  func.func @transform_4(%arg0: i32) -> (i32, i32, i32) {
    %c0_i32 = arith.constant 0 : i32
    %c0_i32_0 = arith.constant 0 : i32
    %c0_i32_1 = arith.constant 0 : i32
    %c0_i32_2 = arith.constant 0 : i32
    return %c0_i32, %c0_i32_0, %c0_i32_1 : i32, i32, i32
  }
  func.func @transform_5(%arg0: i32) -> (i32, i32) {
    %c0_i32 = arith.constant 0 : i32
    %c0_i32_0 = arith.constant 0 : i32
    %c0_i32_1 = arith.constant 0 : i32
    return %c0_i32, %c0_i32_0 : i32, i32
  }
  func.func @transform_6(%arg0: i32) -> (i32, i32, i32) {
    %c0_i32 = arith.constant 0 : i32
    %c0_i32_0 = arith.constant 0 : i32
    %c0_i32_1 = arith.constant 0 : i32
    return %arg0, %c0_i32, %c0_i32_0 : i32, i32, i32
  }
  func.func @transform_7(%arg0: i32) -> (i32, i32, i32) {
    %c0_i32 = arith.constant 0 : i32
    %c0_i32_0 = arith.constant 0 : i32
    %c0_i32_1 = arith.constant 0 : i32
    return %arg0, %c0_i32, %c0_i32_0 : i32, i32, i32
  }
}

</mosaic_0001>

<bundles_post_ra>
// kernel: reduction_a_forward.2
= control target key start
LH: loop header
LB: loop body
LE: loop exit
PB: predicated region body
PF: predicated region fallthrough
CT: control target
= control target key end

     0   :  { %s8713_s21 = smov 0   ;;  %s11171_s0 = inlined_call_operand.vmem [shape: bf16[2,154,16], index: 0, kind: input, shape index: {}]   ;;  %s11172_s1 = inlined_call_operand.vmem [shape: bf16[121,1], index: 1, kind: input, shape index: {}]   ;;  %s11173_s2 = inlined_call_operand.vmem [shape: bf16[9,16,192], index: 2, kind: input, shape index: {}]   ;;  %s11174_s3 = inlined_call_operand.vmem [shape: f32[1,192], index: 3, kind: input, shape index: {}]   ;;  %s11175_s4 = inlined_call_operand.vmem [shape: bf16[9,192,224], index: 4, kind: input, shape index: {}]   ;;  %s11176_s5 = inlined_call_operand.vmem [shape: f32[1,224], index: 5, kind: input, shape index: {}]   ;;  %s11177_s6 = inlined_call_operand.vmem [shape: bf16[2,121,224], index: 6, kind: output, shape index: {}]  }
   0x1 LB: > { %s6908_s22 = sadd.s32 4294967295, %s8674_s21   ;;  %p6912_p0 = scmp.ge.s32.totalorder %s8674_s21, 1  ;;  %s8674_s21 = sphi %s8713_s21, %s16_s21  }
   0x2   : > { %p212_p1 = scmp.lt.s32.totalorder %s8674_s21, 3 }
   0x4   : > { %p213_p2 = pnand %p6912_p0, %p212_p1 }
   0x6   : > { %216 = sbr.rel (%p213_p2) target bundleno = 1584 (0x630), region = 44 }
   0xd   : > { %v8218_v0 = vld [vmem:[%s11173_s2 + $0x14] ss:$8 sps:$4 sm:$0xff]   ;;  %p242_p3 = scmp.lt.s32.totalorder %s6908_s22, 1  ;;  %v8220_v1 = vld [vmem:[%s11173_s2 + $0x10] ss:$8 sps:$4 sm:$0xff]   ;;  %v8676_v2 = vmov 0  }
   0xe   : > { %445 = vmatprep.mubr.bf16.mxu0 %v8676_v2  ;;  %8217 = vset.pattern.permute.xlu1 %v8676_v2  ;;  %v8223_v3 = vld [vmem:[%s11173_s2 + $0x4] ss:$8 sps:$4 sm:$0xff]   ;;  %vm314_vm0 = vsmask.f32 7424  ;;  %v8221_v14 = vld [vmem:[%s11173_s2] ss:$8 sps:$4 sm:$0xff]  }
   0xf   : > { %413 = vmatprep.subr.bf16.mxu0 %v8218_v0  ;;  %s11300_s22 = smov (!%p242_p3, %s6908_s22), 1  ;;  %8216 = vset.pattern.permute.xlu0 %v8676_v2  ;;  %vm388_vm1 = vcmask 130048   ;;  %v8234_v18 = vld [vmem:[%s11173_s2 + $0x24] ss:$8 sps:$4 sm:$0xff]   ;;  %v8232_v57 = vld [vmem:[%s11173_s2 + $0x20] ss:$8 sps:$4 sm:$0xff]  }
  0x10   : > { %414 = vmatpush1.bf16.msra.mxu0 %v8220_v1  ;;  %s8205_s29 = smul.u32 80, %s11300_s22  ;;  %v8237_v58 = vld [vmem:[%s11173_s2 + $0x34] ss:$8 sps:$4 sm:$0xff]   ;;  %vm676_vm2 = vcmask 1046528   ;;  %v8235_v63 = vld [vmem:[%s11173_s2 + $0x30] ss:$8 sps:$4 sm:$0xff]  }
  0x11   : > { %552 = vmatprep.subr.bf16.mxu0 %v8223_v3  ;;  %v8242_v1 = vld [vmem:[%s11173_s2 + $0x44] ss:$8 sps:$4 sm:$0xff]   ;;  %vm1192_vm3 = vcmask 1045504   ;;  %vm930_vm4 = vsmask.f32 6400  ;;  %vm1670_vm6 = vcmask 1044480  }
  0x12   : > { %s8739_s8 = scalar_lea.vmem %s11171_s0, %s8205_s29  ;;  %vm1390_vm5 = vsmask.f32 5376  ;;  %vm1868_vm7 = vsmask.f32 4352  ;;  %vm2721_vm8 = vcmask 1043456   ;;  %vm2722_vm9 = vcmask 523268  }
  0x13   : > { %v253_v4 = vld [vmem:[%s8739_s8] sm:$0xf]  ;;  %v8743_v5 = vld [vmem:[%s8739_s8 + $0x4] sm:$0xf]  ;;  %v8749_v7 = vld [vmem:[%s8739_s8 + $0x8] sm:$0xff]   ;;  %vm2876_vm11 = vcmask 1043458  }
  0x14   : > { %v8746_v6 = vcombine.low %v253_v4, %v8743_v5  ;;  %v323_v10 = vshll.u32 %v8749_v7, 16  ;;  %v8755_v11 = vld [vmem:[%s8739_s8 + $0x10] sm:$0xff]   ;;  %v327_v16 = vshrl.u32 %v8749_v7, 16  ;;  %v8767_v20 = vld [vmem:[%s8739_s8 + $0x18] sm:$0xff]   ;;  %v8772_v23 = vld [vmem:[%s8739_s8 + $0x20] sm:$0xff]   ;;  %v678_v62 = vrot.slane %v8749_v7, 1 }
  0x15   : > { %v331_v17 = vshll.u32 %v8755_v11, 16  ;;  %v335_v24 = vshrl.u32 %v8755_v11, 16  ;;  %v339_v25 = vshll.u32 %v8767_v20, 16  ;;  %v343_v26 = vshrl.u32 %v8767_v20, 16  ;;  %v8783_v32 = vld [vmem:[%s8739_s8 + $0x28] sm:$0xff]   ;;  %v8791_v38 = vld [vmem:[%s8739_s8 + $0x30] sm:$0xff]   ;;  %vm9276_vm10 = vmor %vm2722_vm9, %vm2721_vm8 }
  0x16   : > { %v316_v8 = vshrl.u32 %v8746_v6, 16  ;;  %v318_v9 = vshll.u32 %v8746_v6, 16  ;;  %v325_v13 = vrot.slane %v323_v10, 1  ;;  %v347_v28 = vshll.u32 %v8772_v23, 16  ;;  %v8796_v41 = vld [vmem:[%s8739_s8 + $0x38] sm:$0xf] }
  0x17   : > { %v333_v22 = vrot.slane %v331_v17, 1  ;;  %v341_v30 = vrot.slane %v339_v25, 1  ;;  %v351_v36 = vshrl.u32 %v8772_v23, 16  ;;  %v355_v37 = vshll.u32 %v8783_v32, 16  ;;  %v268_v42 = vld [vmem:[%s8739_s8 + $0x3c] sm:$0x1] }
  0x18   : > { %v320_v12 = vrot.slane %v318_v9, 1  ;;  %v329_v21 = vor.u32 %v327_v16, %v325_v13  ;;  %v349_v34 = vrot.slane %v347_v28, 1  ;;  %v359_v44 = vshrl.u32 %v8783_v32, 16  ;;  %v665_v59 = vld [vmem:[%s8739_s8] sm:$0xe]  ;;  %v8854_v3 = vld [vmem:[%s8739_s8 + $0xc] sm:$0xff]  }
  0x19   : > { %v337_v29 = vor.u32 %v335_v24, %v333_v22  ;;  %v345_v33 = vor.u32 %v343_v26, %v341_v30  ;;  %v357_v40 = vrot.slane %v355_v37, 1  ;;  %v363_v45 = vshll.u32 %v8791_v38, 16  ;;  %v8857_v4 = vld [vmem:[%s8739_s8 + $0x14] sm:$0xff]   ;;  %v8871_v10 = vld [vmem:[%s8739_s8 + $0x1c] sm:$0xff]   ;;  %2725 = vst.msk [vmem:[#allocation2 + $0x8] sm:$0xff] %vm9276_vm10, %v8676_v2  ;;  %2726 = vst.msk [vmem:[#allocation2 + $0x10] sm:$0xff] %vm9276_vm10, %v8676_v2 }
  0x1a   : > { %v321_v15 = vor.u32 %v320_v12, %v316_v8  ;;  %v334_v27 = vsel %vm314_vm0, %v329_v21, %v333_v22  ;;  %v353_v39 = vor.u32 %v351_v36, %v349_v34  ;;  %v6925_v48 = vcombine.low %v8796_v41, %v268_v42  ;;  %v8904_v25 = vld [vmem:[%s8739_s8 + $0x34] sm:$0xff]   ;;  %v666_v28 = vld [vmem:[%s8739_s8 + $0x3c] sm:$0x3]  ;;  %2724 = vst.msk [vmem:[#allocation2] sm:$0xff] %vm9276_vm10, %v8676_v2  ;;  %s7652_s27 = sshll.u32 %s11300_s22, 7 }
  0x1b   : > { %v342_v31 = vsel %vm314_vm0, %v337_v29, %v341_v30  ;;  %v350_v35 = vsel %vm314_vm0, %v345_v33, %v349_v34  ;;  %v361_v46 = vor.u32 %v359_v44, %v357_v40  ;;  %v365_v47 = vrot.slane %v363_v45, 1  ;;  %v871_v33 = vld [vmem:[%s8739_s8 + $0x4] sm:$0xe]  ;;  %v8922_v34 = vld [vmem:[%s8739_s8 + $0x8] sm:$0xf]  ;;  %2727 = vst.msk [vmem:[#allocation2 + $0x18] sm:$0xff] %vm9276_vm10, %v8676_v2  ;;  %s11080_s30 = scalar_lea.vmem %s11177_s6, %s7652_s27 }
  0x1c   : > { %v326_v19 = vsel %vm314_vm0, %v321_v15, %v325_v13  ;;  %v358_v43 = vsel %vm314_vm0, %v353_v39, %v357_v40  ;;  %v367_v50 = vshrl.u32 %v8791_v38, 16  ;;  %v371_v51 = vshll.u32 %v6925_v48, 16  ;;  %v8882_v15 = vld [vmem:[%s8739_s8 + $0x24] sm:$0xff]   ;;  %2728 = vst.msk [vmem:[#allocation2 + $0x20] sm:$0xff] %vm9276_vm10, %v8676_v2  ;;  %2729 = vst.msk [vmem:[#allocation2 + $0x28] sm:$0xff] %vm9276_vm10, %v8676_v2 }
  0x1d   : > { %6928 = vmatmul.mubr.msk.bf16.vlgmr.msra.gmra.mrb[0].mxu0 %vm388_vm1, %v326_v19  ;;  %v366_v49 = vsel %vm314_vm0, %v361_v46, %v365_v47  ;;  %v375_v55 = vshrl.u32 %v6925_v48, 16  ;;  %v6948_v60 = vcombine.low %v665_v59, %v8743_v5  ;;  %v680_v5 = vrot.slane %v8755_v11, 1  ;;  %2730 = vst.msk [vmem:[#allocation2 + $0x30] sm:$0xff] %vm9276_vm10, %v8676_v2  ;;  %2731 = vst.msk [vmem:[#allocation2 + $0x38] sm:$0xff] %vm9276_vm10, %v8676_v2 }
  0x1e   : > { %553 = vmatpush1.bf16.msra.mxu0 %v8221_v14  ;;  %455 = vmatprep.mubr.bf16.mxu0 %v8676_v2  ;;  %v369_v52 = vor.u32 %v367_v50, %v365_v47  ;;  %v373_v53 = vrot.slane %v371_v51, 1  ;;  %v1198_v12 = vrot.slane %v8871_v10, 2  ;;  %v684_v16 = vrot.slane %v8772_v23, 1  ;;  %2732 = vst.msk [vmem:[#allocation2 + $0x40] sm:$0xff] %vm9276_vm10, %v8676_v2  ;;  %2733 = vst.msk [vmem:[#allocation2 + $0x48] sm:$0xff] %vm9276_vm10, %v8676_v2 }
  0x1f   : > { %726 = vmatprep.subr.bf16.mxu0 %v8234_v18  ;;  %v677_v61 = vrot.slane %v6948_v60, 1  ;;  %v681_v9 = vsel %vm676_vm2, %v678_v62, %v680_v5  ;;  %v1200_v17 = vrot.slane %v8882_v15, 2  ;;  %v686_v21 = vrot.slane %v8783_v32, 1  ;;  %2734 = vst.msk [vmem:[#allocation2 + $0x50] sm:$0xff] %vm9276_vm10, %v8676_v2  ;;  %2735 = vst.msk [vmem:[#allocation2 + $0x58] sm:$0xff] %vm9276_vm10, %v8676_v2 }
  0x20   : > { %v374_v54 = vsel %vm314_vm0, %v369_v52, %v373_v53  ;;  %v377_v56 = vor.u32 %v375_v55, %v373_v53  ;;  %v688_v26 = vrot.slane %v8791_v38, 1  ;;  %v6962_v36 = vcombine.low %v871_v33, %v8922_v34  ;;  %v8253_v53 = vld [vmem:[%s11173_s2 + $0x54] ss:$8 sps:$4 sm:$0xff]   ;;  %2736 = vst.msk [vmem:[#allocation2 + $0x60] sm:$0xff] %vm9276_vm10, %v8676_v2  ;;  %2737 = vst.msk [vmem:[#allocation2 + $0x68] sm:$0xff] %vm9276_vm10, %v8676_v2 }
  0x21   : > { %v679_v0 = vsel %vm676_vm2, %v677_v61, %v678_v62  ;;  %v8889_v18 = vsel %vm1192_vm3, %v1198_v12, %v1200_v17  ;;  %v687_v24 = vsel %vm676_vm2, %v684_v16, %v686_v21  ;;  %v940_v39 = vshrl.u32 %v8854_v3, 16  ;;  %2738 = vst.msk [vmem:[#allocation2 + $0x70] sm:$0xff] %vm9276_vm10, %v8676_v2  ;;  %2739 = vst.msk [vmem:[#allocation2 + $0x78] sm:$0xff] %vm9276_vm10, %v8676_v2 }
  0x22   : > { %v689_v30 = vsel %vm676_vm2, %v686_v21, %v688_v26  ;;  %v932_v37 = vshrl.u32 %v6962_v36, 16  ;;  %v943_v40 = vshll.u32 %v8854_v3, 16  ;;  %v949_v47 = vshrl.u32 %v8857_v4, 16  ;;  %v885_v21 = vld [vmem:[%s8739_s8 + $0x3c] sm:$0xf]  ;;  %2740 = vst.msk [vmem:[#allocation2 + $0x80] sm:$0xff] %vm9276_vm10, %v8676_v2 }
  0x23   : > { %v958_v55 = vshrl.u32 %v8871_v10, 16  ;;  %v967_v61 = vshrl.u32 %v8882_v15, 16  ;;  %v970_v62 = vshll.u32 %v8882_v15, 16  ;;  %2741 = vst.msk [vmem:[#allocation2 + $0x88] sm:$0xff] %vm9276_vm10, %v8676_v2  ;;  %2742 = vst.msk [vmem:[#allocation2 + $0x90] sm:$0xff] %vm9276_vm10, %v8676_v2  ;;  %vm2877_vm12 = vcmask 523270  }
  0x24   : > { %v945_v44 = vrot.slane %v943_v40, 2  ;;  %v951_v51 = vrot.slane %v949_v47, 1  ;;  %vm2811_vm13 = vcmask 1041408   ;;  %vm2812_vm14 = vcmask 1045508   ;;  %vm2878_vm15 = vmor %vm2877_vm12, %vm2876_vm11 }
  0x25   : > { %6929 = vmatmul.mubr.msk.bf16.gmra.mrb[4].mxu0 %vm388_vm1, %v334_v27  ;;  %v1204_v27 = vrot.slane %v8904_v25, 2  ;;  %vm3286_vm9 = vcmask 523264   ;;  %vm2894_vm11 = vcmask 1042432   ;;  %vm2895_vm12 = vsmask.f32 2304 }
  0x26   : > { %465 = vmatprep.mubr.bf16.mxu0 %v8676_v2 }
  0x2d   : > { %6930 = vmatmul.mubr.msk.bf16.gmra.mrb[8].mxu0 %vm388_vm1, %v342_v31  ;;  %v6949_v31 = vcombine.low %v8796_v41, %v666_v28  ;;  %v934_v41 = vrot.slane %v932_v37, 1 }
  0x2e   : > { %475 = vmatprep.mubr.bf16.mxu0 %v8676_v2 }
  0x35   : > { %6931 = vmatmul.mubr.msk.bf16.gmra.mrb[12].mxu0 %vm388_vm1, %v350_v35 }
  0x36   : > { %485 = vmatprep.mubr.bf16.mxu0 %v8676_v2 }
  0x3d   : > { %6932 = vmatmul.mubr.msk.bf16.gmra.mrb[16].mxu0 %vm388_vm1, %v358_v43  ;;  %v942_v43 = vrot.slane %v940_v39, 1 }
  0x3e   : > { %495 = vmatprep.mubr.bf16.mxu0 %v8676_v2 }
  0x3f   : > { %v946_v46 = vor.u32 %v945_v44, %v942_v43 }
  0x45   : > { %6933 = vmatmul.mubr.msk.bf16.gmra.mrb[20].mxu0 %vm388_vm1, %v366_v49  ;;  %v8240_v49 = vld [vmem:[%s11173_s2 + $0x40] ss:$8 sps:$4 sm:$0xff]  }
  0x46   : > { %505 = vmatprep.mubr.bf16.mxu0 %v8676_v2 }
  0x4d   : > { %6934 = vmatmul.mubr.msk.bf16.gmra.mrb[24].mxu0 %vm388_vm1, %v374_v54 }
  0x4e   : > { %515 = vmatprep.mubr.bf16.mxu0 %v8676_v2 }
  0x55   : > { %6935 = vmatmul.mubr.msk.bf16.gmra.mrb[28].mxu0 %vm388_vm1, %v377_v56  ;;  %v961_v56 = vshll.u32 %v8871_v10, 16 }
  0x56   : > { %584 = vmatprep.mubr.bf16.mxu0 %v8676_v2 }
  0x57   : > { %v963_v59 = vrot.slane %v961_v56, 2 }
  0x5d   : > { %6938 = vmatmul.mubr.msk.bf16.vlgmr.msra.gmra.mrb[0].mxu0 %vm388_vm1, %v8746_v6  ;;  %v1194_v6 = vrot.slane %v8854_v3, 2 }
  0x5e   : > { %727 = vmatpush1.bf16.msra.mxu0 %v8232_v57  ;;  %594 = vmatprep.mubr.bf16.mxu0 %v8676_v2 }
  0x5f   : > { %1036 = vmatprep.subr.bf16.mxu0 %v8237_v58  ;;  %v960_v58 = vrot.slane %v958_v55, 1 }
  0x61   : > { %v964_v60 = vor.u32 %v963_v59, %v960_v58  ;;  %v1403_v58 = vrot.slane %v949_v47, 2 }
  0x65   : > { %6939 = vmatmul.mubr.msk.bf16.gmra.mrb[4].mxu0 %vm388_vm1, %v8749_v7  ;;  %v1196_v7 = vrot.slane %v8857_v4, 2 }
  0x66   : > { %604 = vmatprep.mubr.bf16.mxu0 %v8676_v2 }
  0x67   : > { %v8867_v8 = vsel %vm1192_vm3, %v1194_v6, %v1196_v7  ;;  %v8878_v13 = vsel %vm1192_vm3, %v1196_v7, %v1198_v12 }
  0x6d   : > { %6940 = vmatmul.mubr.msk.bf16.gmra.mrb[8].mxu0 %vm388_vm1, %v8755_v11  ;;  %v682_v11 = vrot.slane %v8767_v20, 1 }
  0x6e   : > { %614 = vmatprep.mubr.bf16.mxu0 %v8676_v2 }
  0x6f   : > { %v683_v14 = vsel %vm676_vm2, %v680_v5, %v682_v11  ;;  %v685_v19 = vsel %vm676_vm2, %v682_v11, %v684_v16 }
  0x75   : > { %6941 = vmatmul.mubr.msk.bf16.gmra.mrb[12].mxu0 %vm388_vm1, %v8767_v20  ;;  %v8893_v20 = vld [vmem:[%s8739_s8 + $0x2c] sm:$0xff]  }
  0x76   : > { %624 = vmatprep.mubr.bf16.mxu0 %v8676_v2  ;;  %v1202_v22 = vrot.slane %v8893_v20, 2  ;;  %v976_v7 = vshrl.u32 %v8893_v20, 16 }
  0x78   : > { %v8914_v29 = vsel %vm1192_vm3, %v1202_v22, %v1204_v27  ;;  %v978_v12 = vrot.slane %v976_v7, 1 }
  0x7d   : > { %6942 = vmatmul.mubr.msk.bf16.gmra.mrb[16].mxu0 %vm388_vm1, %v8772_v23  ;;  %v8900_v23 = vsel %vm1192_vm3, %v1200_v17, %v1202_v22  ;;  %v985_v17 = vshrl.u32 %v8904_v25, 16  ;;  %v886_v22 = vld [vmem:[%s8739_s8 + $0x40] sm:$0x3] }
  0x7e   : > { %634 = vmatprep.mubr.bf16.mxu0 %v8676_v2 }
  0x85   : > { %6943 = vmatmul.mubr.msk.bf16.gmra.mrb[20].mxu0 %vm388_vm1, %v8783_v32  ;;  %v690_v32 = vrot.slane %v6949_v31, 1 }
  0x86   : > { %644 = vmatprep.mubr.bf16.mxu0 %v8676_v2 }
  0x87   : > { %v691_v35 = vsel %vm676_vm2, %v688_v26, %v690_v32  ;;  %v987_v26 = vrot.slane %v985_v17, 1 }
  0x8d   : > { %6944 = vmatmul.mubr.msk.bf16.gmra.mrb[24].mxu0 %vm388_vm1, %v8791_v38  ;;  %v935_v38 = vshll.u32 %v6962_v36, 16 }
  0x8e   : > { %654 = vmatprep.mubr.bf16.mxu0 %v8676_v2 }
  0x8f   : > { %v937_v42 = vrot.slane %v935_v38, 2 }
  0x91   : > { %v938_v45 = vor.u32 %v937_v42, %v934_v41  ;;  %v1181_v42 = vld [vmem:[%s8739_s8 + $0x4] sm:$0xc] }
  0x92   : > { %v6982_v43 = vcombine.low %v1181_v42, %v8922_v34  ;;  %v9114_v42 = vld [vmem:[%s8739_s8 + $0x30] sm:$0xff]  }
  0x93   : > { %v947_v50 = vsel %vm930_vm4, %v938_v45, %v946_v46  ;;  %v8251_v45 = vld [vmem:[%s11173_s2 + $0x50] ss:$8 sps:$4 sm:$0xff]  }
  0x94   : > { %v1193_v44 = vrot.slane %v6982_v43, 2 }
  0x95   : > { %6945 = vmatmul.mubr.msk.bf16.gmra.mrb[28].mxu0 %vm388_vm1, %v6925_v48  ;;  %v952_v48 = vshll.u32 %v8857_v4, 16  ;;  %v1408_v4 = vrot.slane %v961_v56, 3  ;;  %v1415_v56 = vrot.slane %v976_v7, 2 }
  0x96   : > { %758 = vmatprep.mubr.bf16.mxu0 %v8676_v2 }
  0x97   : > { %v954_v52 = vrot.slane %v952_v48, 2  ;;  %v1404_v3 = vrot.slane %v952_v48, 3 }
  0x99   : > { %v955_v54 = vor.u32 %v954_v52, %v951_v51  ;;  %v1399_v52 = vrot.slane %v940_v39, 2  ;;  %v8261_v39 = vld [vmem:[%s11173_s2 + $0x74] ss:$8 sps:$4 sm:$0xff]  }
  0x9b   : > { %v956_v57 = vsel %vm930_vm4, %v946_v46, %v955_v54  ;;  %v1195_v46 = vsel %vm1192_vm3, %v1193_v44, %v1194_v6  ;;  %v1182_v6 = vld [vmem:[%s8739_s8 + $0x40] sm:$0x7] }
  0x9c   : > { %v6983_v34 = vcombine.low %v885_v21, %v1182_v6  ;;  %v9128_v6 = vld [vmem:[%s8739_s8 + $0x40] sm:$0xff]  }
  0x9d   : > { %6952 = vmatmul.mubr.msk.bf16.vlgmr.msra.gmra.mrb[0].mxu0 %vm388_vm1, %v679_v0  ;;  %v969_v0 = vrot.slane %v967_v61, 1 }
  0x9e   : > { %1037 = vmatpush1.bf16.msra.mxu0 %v8235_v63  ;;  %768 = vmatprep.mubr.bf16.mxu0 %v8676_v2  ;;  %v965_v63 = vsel %vm930_vm4, %v955_v54, %v964_v60  ;;  %v8256_v54 = vld [vmem:[%s11173_s2 + $0x60] ss:$8 sps:$4 sm:$0xff]   ;;  %v1424_v7 = vshrl.u32 %v6983_v34, 16 }
  0x9f   : > { %1242 = vmatprep.subr.bf16.mxu0 %v8242_v1  ;;  %v972_v1 = vrot.slane %v970_v62, 2 }
  0xa1   : > { %v973_v5 = vor.u32 %v972_v1, %v969_v0  ;;  %v1412_v0 = vrot.slane %v970_v62, 3  ;;  %v1419_v62 = vrot.slane %v985_v17, 2  ;;  %v8262_v17 = vld [vmem:[%s8739_s8 + $0x8] sm:$0xf8]  }
  0xa3   : > { %v974_v11 = vsel %vm930_vm4, %v964_v60, %v973_v5  ;;  %v1407_v60 = vrot.slane %v958_v55, 2 }
  0xa5   : > { %6953 = vmatmul.mubr.msk.bf16.gmra.mrb[4].mxu0 %vm388_vm1, %v681_v9  ;;  %v979_v9 = vshll.u32 %v8893_v20, 16  ;;  %v1409_v47 = vor.u32 %v1408_v4, %v1407_v60  ;;  %v8270_v60 = vld [vmem:[%s11173_s2 + $0x80] ss:$8 sps:$4 sm:$0xff]  }
  0xa6   : > { %778 = vmatprep.mubr.bf16.mxu0 %v8676_v2 }
  0xa7   : > { %v1416_v1 = vrot.slane %v979_v9, 3 }
  0xad   : > { %6954 = vmatmul.mubr.msk.bf16.gmra.mrb[8].mxu0 %vm388_vm1, %v683_v14  ;;  %v981_v14 = vrot.slane %v979_v9, 2  ;;  %v1427_v9 = vshll.u32 %v6983_v34, 16 }
  0xae   : > { %788 = vmatprep.mubr.bf16.mxu0 %v8676_v2 }
  0xaf   : > { %v982_v16 = vor.u32 %v981_v14, %v978_v12  ;;  %v1426_v12 = vrot.slane %v1424_v7, 2  ;;  %v1429_v14 = vrot.slane %v1427_v9, 3  ;;  %v2459_v7 = vld [vmem:[%s11172_s1 + $0x28] sm:$0xf] }
  0xb5   : > { %6955 = vmatmul.mubr.msk.bf16.gmra.mrb[12].mxu0 %vm388_vm1, %v685_v19  ;;  %v988_v19 = vshll.u32 %v8904_v25, 16  ;;  %v1430_v25 = vor.u32 %v1429_v14, %v1426_v12  ;;  %v2462_v14 = vld [vmem:[%s11172_s1 + $0x34] sm:$0xf] }
  0xb6   : > { %798 = vmatprep.mubr.bf16.mxu0 %v8676_v2 }
  0xb7   : > { %v990_v28 = vrot.slane %v988_v19, 2 }
  0xb9   : > { %v991_v31 = vor.u32 %v990_v28, %v987_v26  ;;  %v8264_v28 = vld [vmem:[%s8739_s8 + $0x18] sm:$0xff]  }
  0xbd   : > { %6956 = vmatmul.mubr.msk.bf16.gmra.mrb[16].mxu0 %vm388_vm1, %v687_v24  ;;  %v983_v24 = vsel %vm930_vm4, %v973_v5, %v982_v16  ;;  %v1420_v5 = vrot.slane %v988_v19, 3  ;;  %v8263_v19 = vld [vmem:[%s8739_s8 + $0x10] sm:$0xff]  }
  0xbe   : > { %808 = vmatprep.mubr.bf16.mxu0 %v8676_v2 }
  0xbf   : > { %v1421_v20 = vor.u32 %v1420_v5, %v1419_v62 }
  0xc5   : > { %6957 = vmatmul.mubr.msk.bf16.gmra.mrb[20].mxu0 %vm388_vm1, %v689_v30  ;;  %v6969_v30 = vcombine.low %v885_v21, %v886_v22  ;;  %v1671_v21 = vrot.slane %v8262_v17, 3  ;;  %v1672_v22 = vrot.slane %v8263_v19, 3 }
  0xc6   : > { %818 = vmatprep.mubr.bf16.mxu0 %v8676_v2 }
  0xc7   : > { %v997_v33 = vshll.u32 %v6969_v30, 16  ;;  %v1673_v26 = vsel %vm1670_vm6, %v1671_v21, %v1672_v22 }
  0xc9   : > { %v999_v37 = vrot.slane %v997_v33, 2  ;;  %v9100_v33 = vld [vmem:[%s8739_s8 + $0x20] sm:$0xff]  }
  0xcd   : > { %6958 = vmatmul.mubr.msk.bf16.gmra.mrb[24].mxu0 %vm388_vm1, %v691_v35  ;;  %v992_v35 = vsel %vm930_vm4, %v982_v16, %v991_v31  ;;  %v1431_v16 = vsel %vm1390_vm5, %v1421_v20, %v1430_v25 }
  0xce   : > { %828 = vmatprep.mubr.bf16.mxu0 %v8676_v2 }
  0xd5   : > { %6959 = vmatmul.mubr.msk.bf16.gmra.mrb[28].mxu0 %vm388_vm1, %v690_v32  ;;  %v994_v32 = vshrl.u32 %v6969_v30, 16  ;;  %v8272_v30 = vld [vmem:[%s11173_s2 + $0x84] ss:$8 sps:$4 sm:$0xff]  }
  0xd6   : > { %1068 = vmatprep.mubr.bf16.mxu0 %v8676_v2 }
  0xd7   : > { %v996_v36 = vrot.slane %v994_v32, 1 }
  0xd9   : > { %v1000_v38 = vor.u32 %v999_v37, %v996_v36  ;;  %v9107_v37 = vld [vmem:[%s8739_s8 + $0x28] sm:$0xff]  }
  0xda   : > { %v1908_v12 = vshll.u32 %v9107_v37, 16 }
  0xdb   : > { %v1001_v41 = vsel %vm930_vm4, %v991_v31, %v1000_v38  ;;  %v1674_v31 = vrot.slane %v8264_v28, 3 }
  0xdc   : > { %v1910_v21 = vrot.slane %v1908_v12, 4 }
  0xdd   : > { %6972 = vmatmul.mubr.msk.bf16.vlgmr.msra.gmra.mrb[0].mxu0 %vm388_vm1, %v947_v50  ;;  %v1675_v32 = vsel %vm1670_vm6, %v1672_v22, %v1674_v31  ;;  %v8281_v22 = vld [vmem:[%s11175_s4 + $0xc0] ss:$8 sps:$4 sm:$0xff]  }
  0xde   : > { %1243 = vmatpush1.bf16.msra.mxu0 %v8240_v49  ;;  %1078 = vmatprep.mubr.bf16.mxu0 %v8676_v2  ;;  %v8258_v49 = vld [vmem:[%s11173_s2 + $0x64] ss:$8 sps:$4 sm:$0xff]  }
  0xdf   : > { %1466 = vmatprep.subr.bf16.mxu0 %v8253_v53 }
  0xe5   : > { %6973 = vmatmul.mubr.msk.bf16.gmra.mrb[4].mxu0 %vm388_vm1, %v956_v57 }
  0xe6   : > { %1088 = vmatprep.mubr.bf16.mxu0 %v8676_v2 }
  0xed   : > { %6974 = vmatmul.mubr.msk.bf16.gmra.mrb[8].mxu0 %vm388_vm1, %v965_v63  ;;  %v1411_v63 = vrot.slane %v967_v61, 2  ;;  %v1417_v61 = vor.u32 %v1416_v1, %v1415_v56  ;;  %v1899_v56 = vshll.u32 %v9100_v33, 16  ;;  %v2458_v1 = vld [vmem:[%s11172_s1 + $0x24] sm:$0xf] }
  0xee   : > { %1098 = vmatprep.mubr.bf16.mxu0 %v8676_v2 }
  0xef   : > { %v1413_v55 = vor.u32 %v1412_v0, %v1411_v63  ;;  %v2456_v63 = vld [vmem:[%s11172_s1 + $0x1c] sm:$0xf]  ;;  %v2455_v0 = vld [vmem:[%s11172_s1 + $0x18] sm:$0xf]  ;;  %v1901_v5 = vrot.slane %v1899_v56, 4 }
  0xf0   : > { %v8302_v56 = vld [vmem:[%s11175_s4 + $0x130] ss:$8 sps:$4 sm:$0xff]  }
  0xf1   : > { %v1414_v10 = vsel %vm1390_vm5, %v1409_v47, %v1413_v55  ;;  %v1418_v15 = vsel %vm1390_vm5, %v1413_v55, %v1417_v61 }
  0xf5   : > { %6975 = vmatmul.mubr.msk.bf16.gmra.mrb[12].mxu0 %vm388_vm1, %v974_v11  ;;  %v1422_v11 = vsel %vm1390_vm5, %v1417_v61, %v1421_v20  ;;  %v2457_v61 = vld [vmem:[%s11172_s1 + $0x20] sm:$0xf]  ;;  %v2460_v20 = vld [vmem:[%s11172_s1 + $0x2c] sm:$0xf] }
  0xf6   : > { %1108 = vmatprep.mubr.bf16.mxu0 %v8676_v2 }
  0xfd   : > { %6976 = vmatmul.mubr.msk.bf16.gmra.mrb[16].mxu0 %vm388_vm1, %v983_v24  ;;  %v8259_v24 = vld [vmem:[%s11173_s2 + $0x70] ss:$8 sps:$4 sm:$0xff]  }
  0xfe   : > { %1118 = vmatprep.mubr.bf16.mxu0 %v8676_v2 }
 0x105   : > { %6977 = vmatmul.mubr.msk.bf16.gmra.mrb[20].mxu0 %vm388_vm1, %v992_v35  ;;  %v1676_v35 = vrot.slane %v9100_v33, 3 }
 0x106   : > { %1128 = vmatprep.mubr.bf16.mxu0 %v8676_v2 }
 0x107   : > { %v1677_v36 = vsel %vm1670_vm6, %v1674_v31, %v1676_v35  ;;  %v1917_v31 = vshll.u32 %v9114_v42, 16 }
 0x10d   : > { %6978 = vmatmul.mubr.msk.bf16.gmra.mrb[24].mxu0 %vm388_vm1, %v1001_v41 }
 0x10e   : > { %1138 = vmatprep.mubr.bf16.mxu0 %v8676_v2 }
 0x115   : > { %6979 = vmatmul.mubr.msk.bf16.gmra.mrb[28].mxu0 %vm388_vm1, %v1000_v38  ;;  %v1678_v38 = vrot.slane %v9107_v37, 3 }
 0x116   : > { %1274 = vmatprep.mubr.bf16.mxu0 %v8676_v2 }
 0x117   : > { %v1679_v41 = vsel %vm1670_vm6, %v1676_v35, %v1678_v38  ;;  %v2450_v35 = vld [vmem:[%s11172_s1 + $0x4] sm:$0xf] }
 0x11d   : > { %6986 = vmatmul.mubr.msk.bf16.vlgmr.msra.gmra.mrb[0].mxu0 %vm388_vm1, %v1195_v46 }
 0x11e   : > { %1467 = vmatpush1.bf16.msra.mxu0 %v8251_v45  ;;  %1284 = vmatprep.mubr.bf16.mxu0 %v8676_v2  ;;  %v9121_v45 = vld [vmem:[%s8739_s8 + $0x38] sm:$0xff]  }
 0x11f   : > { %1720 = vmatprep.subr.bf16.mxu0 %v8258_v49  ;;  %v1682_v46 = vrot.slane %v9121_v45, 3 }
 0x125   : > { %6987 = vmatmul.mubr.msk.bf16.gmra.mrb[4].mxu0 %vm388_vm1, %v8867_v8  ;;  %v1206_v8 = vrot.slane %v6983_v34, 2  ;;  %v1684_v34 = vrot.slane %v9128_v6, 3 }
 0x126   : > { %1294 = vmatprep.mubr.bf16.mxu0 %v8676_v2 }
 0x12d   : > { %6988 = vmatmul.mubr.msk.bf16.gmra.mrb[8].mxu0 %vm388_vm1, %v8878_v13  ;;  %v1207_v13 = vsel %vm1192_vm3, %v1204_v27, %v1206_v8 }
 0x12e   : > { %1304 = vmatprep.mubr.bf16.mxu0 %v8676_v2 }
 0x135   : > { %6989 = vmatmul.mubr.msk.bf16.gmra.mrb[12].mxu0 %vm388_vm1, %v8889_v18  ;;  %v1392_v18 = vshrl.u32 %v6982_v43, 16 }
 0x136   : > { %1314 = vmatprep.mubr.bf16.mxu0 %v8676_v2 }
 0x137   : > { %v1394_v50 = vrot.slane %v1392_v18, 2  ;;  %v1873_v18 = vshll.u32 %v8262_v17, 16 }
 0x13d   : > { %6990 = vmatmul.mubr.msk.bf16.gmra.mrb[16].mxu0 %vm388_vm1, %v8900_v23  ;;  %v1395_v23 = vshll.u32 %v6982_v43, 16  ;;  %v1680_v43 = vrot.slane %v9114_v42, 3 }
 0x13e   : > { %1324 = vmatprep.mubr.bf16.mxu0 %v8676_v2 }
 0x13f   : > { %v1397_v51 = vrot.slane %v1395_v23, 3  ;;  %v1681_v44 = vsel %vm1670_vm6, %v1678_v38, %v1680_v43  ;;  %v1683_v49 = vsel %vm1670_vm6, %v1680_v43, %v1682_v46  ;;  %v1878_v23 = vshrl.u32 %v8263_v19, 16 }
 0x140   : > { %v1923_v43 = vshrl.u32 %v9121_v45, 16 }
 0x141   : > { %v1398_v53 = vor.u32 %v1397_v51, %v1394_v50  ;;  %v1881_v50 = vshll.u32 %v8263_v19, 16 }
 0x145   : > { %6991 = vmatmul.mubr.msk.bf16.gmra.mrb[20].mxu0 %vm388_vm1, %v8914_v29  ;;  %v1400_v29 = vrot.slane %v943_v40, 3  ;;  %v1405_v40 = vor.u32 %v1404_v3, %v1403_v58  ;;  %v1887_v3 = vshrl.u32 %v8264_v28, 16 }
 0x146   : > { %1334 = vmatprep.mubr.bf16.mxu0 %v8676_v2 }
 0x147   : > { %v1401_v27 = vor.u32 %v1400_v29, %v1399_v52  ;;  %v1410_v48 = vsel %vm1390_vm5, %v1405_v40, %v1409_v47  ;;  %v1875_v52 = vrot.slane %v1873_v18, 4  ;;  %v1880_v29 = vrot.slane %v1878_v23, 3 }
 0x148   : > { %v1889_v47 = vrot.slane %v1887_v3, 3  ;;  %v1935_v18 = vshll.u32 %v9128_v6, 16  ;;  %v8280_v3 = vld [vmem:[%s8739_s8 + $0x44] sm:$0x1f]  }
 0x149   : > { %v1402_v57 = vsel %vm1390_vm5, %v1398_v53, %v1401_v27  ;;  %v1406_v59 = vsel %vm1390_vm5, %v1401_v27, %v1405_v40  ;;  %v1883_v53 = vrot.slane %v1881_v50, 4  ;;  %v2453_v27 = vld [vmem:[%s11172_s1 + $0x10] sm:$0xf]  ;;  %v2454_v40 = vld [vmem:[%s11172_s1 + $0x14] sm:$0xf] }
 0x14a   : > { %2515 = vperm.xlu1 %8217, %v2453_v27   ;;  %v8276_v27 = vld [vmem:[%s8739_s8 + $0x24] sm:$0xff]  }
 0x14b   : > { %v1884_v58 = vor.u32 %v1883_v53, %v1880_v29  ;;  %v8274_v29 = vld [vmem:[%s8739_s8 + $0x14] sm:$0xff]   ;;  %v8275_v53 = vld [vmem:[%s8739_s8 + $0x1c] sm:$0xff]  }
 0x14d   : > { %6992 = vmatmul.mubr.msk.bf16.gmra.mrb[24].mxu0 %vm388_vm1, %v1207_v13  ;;  %v1870_v13 = vshrl.u32 %v8262_v17, 16 }
 0x14e   : > { %1344 = vmatprep.mubr.bf16.mxu0 %v8676_v2  ;;  %2527 = vperm.xlu1 %8217, %v2454_v40   ;;  %v8287_v40 = vld [vmem:[%s11175_s4 + $0xe0] ss:$8 sps:$4 sm:$0xff]  }
 0x14f   : > { %v1872_v51 = vrot.slane %v1870_v13, 3  ;;  %v1932_v13 = vshrl.u32 %v9128_v6, 16  ;;  %v8273_v6 = vld [vmem:[%s8739_s8 + $0xc] sm:$0xff]  }
 0x151   : > { %v1934_v50 = vrot.slane %v1932_v13, 3 }
 0x152   : > { %2551 = vperm.xlu1 %8217, %v2456_v63   ;;  %v8298_v63 = vld [vmem:[%s11175_s4 + $0x114] ss:$8 sps:$4 sm:$0xff]  }
 0x155   : > { %6993 = vmatmul.mubr.msk.bf16.gmra.mrb[28].mxu0 %vm388_vm1, %v1206_v8  ;;  %v1685_v8 = vsel %vm1670_vm6, %v1682_v46, %v1684_v34 }
 0x156   : > { %1498 = vmatprep.mubr.bf16.mxu0 %v8676_v2  ;;  %2575 = vperm.xlu1 %8217, %v2458_v1   ;;  %v8307_v1 = vld [vmem:[%s11175_s4 + $0x144] ss:$8 sps:$4 sm:$0xff]  }
 0x15a   : > { %2599 = vperm.xlu1 %8217, %v2460_v20   ;;  %v8311_v20 = vld [vmem:[%s11175_s4 + $0x160] ss:$8 sps:$4 sm:$0xff]  }
 0x15d   : > { %6998 = vmatmul.mubr.msk.bf16.vlgmr.msra.gmra.mrb[0].mxu0 %vm388_vm1, %v1402_v57  ;;  %v1876_v57 = vor.u32 %v1875_v52, %v1872_v51  ;;  %v1937_v51 = vrot.slane %v1935_v18, 4 }
 0x15e   : > { %1721 = vmatpush1.bf16.msra.mxu0 %v8256_v54  ;;  %1508 = vmatprep.mubr.bf16.mxu0 %v8676_v2  ;;  %v2451_v54 = vld [vmem:[%s11172_s1 + $0x8] sm:$0xf] }
 0x15f   : > { %1974 = vmatprep.subr.bf16.mxu0 %v8261_v39  ;;  %v1890_v39 = vshll.u32 %v8264_v28, 16  ;;  %2491 = vperm.xlu0 %8216, %v2451_v54   ;;  %v1885_v4 = vsel %vm1868_vm7, %v1876_v57, %v1884_v58  ;;  %v8277_v54 = vld [vmem:[%s8739_s8 + $0x2c] sm:$0xff]   ;;  %v8278_v57 = vld [vmem:[%s8739_s8 + $0x34] sm:$0xff]  }
 0x160   : > { %2623 = vperm.xlu1 %8217, %v2462_v14  }
 0x165   : > { %6999 = vmatmul.mubr.msk.bf16.gmra.mrb[4].mxu0 %vm388_vm1, %v1406_v59  ;;  %v2452_v59 = vld [vmem:[%s11172_s1 + $0xc] sm:$0xf] }
 0x166   : > { %1518 = vmatprep.mubr.bf16.mxu0 %v8676_v2  ;;  %2503 = vperm.xlu0 %8216, %v2452_v59   ;;  %v8292_v59 = vld [vmem:[%s11175_s4 + $0xf4] ss:$8 sps:$4 sm:$0xff]  }
 0x16a   : > { %2539 = vperm.xlu0 %8216, %v2455_v0   ;;  %v8296_v0 = vld [vmem:[%s11175_s4 + $0x110] ss:$8 sps:$4 sm:$0xff]  }
 0x16d   : > { %7000 = vmatmul.mubr.msk.bf16.gmra.mrb[8].mxu0 %vm388_vm1, %v1410_v48  ;;  %v1892_v48 = vrot.slane %v1890_v39, 4  ;;  %v8289_v39 = vld [vmem:[%s11175_s4 + $0xe4] ss:$8 sps:$4 sm:$0xff]  }
 0x16e   : > { %1528 = vmatprep.mubr.bf16.mxu0 %v8676_v2  ;;  %2563 = vperm.xlu0 %8216, %v2457_v61   ;;  %v8305_v61 = vld [vmem:[%s11175_s4 + $0x140] ss:$8 sps:$4 sm:$0xff]  }
 0x16f   : > { %v1893_v55 = vor.u32 %v1892_v48, %v1889_v47  ;;  %v8293_v47 = vld [vmem:[%s11175_s4 + $0x100] ss:$8 sps:$4 sm:$0xff]  }
 0x172   : > { %2587 = vperm.xlu0 %8216, %v2459_v7   ;;  %v8316_v7 = vld [vmem:[%s11175_s4 + $0x174] ss:$8 sps:$4 sm:$0xff]  }
 0x175   : > { %7001 = vmatmul.mubr.msk.bf16.gmra.mrb[12].mxu0 %vm388_vm1, %v1414_v10  ;;  %v1896_v10 = vshrl.u32 %v9100_v33, 16  ;;  %v8284_v33 = vld [vmem:[%s11175_s4 + $0xd0] ss:$8 sps:$4 sm:$0xff]  }
 0x176   : > { %1538 = vmatprep.mubr.bf16.mxu0 %v8676_v2 }
 0x177   : > { %v1898_v62 = vrot.slane %v1896_v10, 3  ;;  %v8304_v10 = vld [vmem:[%s11175_s4 + $0x134] ss:$8 sps:$4 sm:$0xff]  }
 0x179   : > { %v1902_v9 = vor.u32 %v1901_v5, %v1898_v62  ;;  %v8308_v62 = vld [vmem:[%s11175_s4 + $0x150] ss:$8 sps:$4 sm:$0xff]   ;;  %v8313_v5 = vld [vmem:[%s11175_s4 + $0x164] ss:$8 sps:$4 sm:$0xff]  }
 0x17b   : > { %v1903_v17 = vsel %vm1868_vm7, %v1893_v55, %v1902_v9 }
 0x17d   : > { %7002 = vmatmul.mubr.msk.bf16.gmra.mrb[16].mxu0 %vm388_vm1, %v1418_v15  ;;  %v1894_v15 = vsel %vm1868_vm7, %v1884_v58, %v1893_v55  ;;  %v8279_v58 = vld [vmem:[%s8739_s8 + $0x3c] sm:$0xff]   ;;  %v8301_v55 = vld [vmem:[%s11175_s4 + $0x124] ss:$8 sps:$4 sm:$0xff]  }
 0x17e   : > { %1548 = vmatprep.mubr.bf16.mxu0 %v8676_v2 }
 0x185   : > { %7003 = vmatmul.mubr.msk.bf16.gmra.mrb[20].mxu0 %vm388_vm1, %v1422_v11  ;;  %v1905_v11 = vshrl.u32 %v9107_v37, 16 }
 0x186   : > { %1558 = vmatprep.mubr.bf16.mxu0 %v8676_v2 }
 0x187   : > { %v1907_v19 = vrot.slane %v1905_v11, 3  ;;  %v8326_v11 = vld [vmem:[%s11175_s4 + $0x4] ss:$8 sps:$4 sm:$0xff]  }
 0x189   : > { %v1911_v28 = vor.u32 %v1910_v21, %v1907_v19 }
 0x18b   : > { %v1912_v37 = vsel %vm1868_vm7, %v1902_v9, %v1911_v28  ;;  %v8314_v9 = vld [vmem:[%s11175_s4 + $0x170] ss:$8 sps:$4 sm:$0xff]  }
 0x18d   : > { %7004 = vmatmul.mubr.msk.bf16.gmra.mrb[24].mxu0 %vm388_vm1, %v1431_v16  ;;  %v8283_v16 = vld [vmem:[%s11175_s4 + $0xc4] ss:$8 sps:$4 sm:$0xff]  }
 0x18e   : > { %1568 = vmatprep.mubr.bf16.mxu0 %v8676_v2  ;;  %7669 = vmatprep.subr.bf16.mxu1 %v8283_v16 }
 0x18f   : > { %7681 = vmatpush1.bf16.msra.mxu1 %v8281_v22 }
 0x195   : > { %7005 = vmatmul.mubr.msk.bf16.gmra.mrb[28].mxu0 %vm388_vm1, %v1430_v25  ;;  %v2461_v25 = vld [vmem:[%s11172_s1 + $0x30] sm:$0xf] }
 0x196   : > { %1752 = vmatprep.mubr.bf16.mxu0 %v8676_v2  ;;  %2611 = vperm.xlu0 %8216, %v2461_v25  }
 0x19d   : > { %7018 = vmatmul.mubr.msk.bf16.vlgmr.msra.gmra.mrb[0].mxu0 %vm388_vm1, %v1673_v26  ;;  %v2463_v26 = vld [vmem:[%s11172_s1 + $0x38] sm:$0xf] }
 0x19e   : > { %1975 = vmatpush1.bf16.msra.mxu0 %v8259_v24  ;;  %1762 = vmatprep.mubr.bf16.mxu0 %v8676_v2  ;;  %v2464_v24 = vld [vmem:[%s11172_s1 + $0x3c] sm:$0x1] }
 0x19f   : > { %2212 = vmatprep.subr.bf16.mxu0 %v8272_v30  ;;  %v1914_v30 = vshrl.u32 %v9114_v42, 16  ;;  %2647 = vperm.xlu1 %8217, %v2464_v24  }
 0x1a0   : > { %2635 = vperm.xlu0 %8216, %v2463_v26  }
 0x1a1   : > { %v1916_v38 = vrot.slane %v1914_v30, 3 }
 0x1a3   : > { %2479 = vperm.xlu1 %8217, %v2450_v35  }
 0x1a5   : > { %7019 = vmatmul.mubr.msk.bf16.gmra.mrb[4].mxu0 %vm388_vm1, %v1675_v32  ;;  %v8286_v32 = vld [vmem:[%s11175_s4 + $0xd4] ss:$8 sps:$4 sm:$0xff]  }
 0x1a6   : > { %1772 = vmatprep.mubr.bf16.mxu0 %v8676_v2  ;;  %7670 = vmatprep.subr.bf16.mxu1 %v8286_v32 }
 0x1a7   : > { %7682 = vmatpush1.bf16.msra.mxu1 %v8284_v33 }
 0x1a8   : > { %7671 = vmatprep.subr.bf16.mxu1 %v8289_v39 }
 0x1ab   : > { %7683 = vmatpush1.bf16.msra.mxu1 %v8287_v40 }
 0x1ac   : > { %7672 = vmatprep.subr.bf16.mxu1 %v8292_v59 }
 0x1ad   : > { %7020 = vmatmul.mubr.msk.bf16.gmra.mrb[8].mxu0 %vm388_vm1, %v1677_v36  ;;  %v2449_v36 = vld [vmem:[%s11172_s1] sm:$0xf] }
 0x1ae   : > { %1782 = vmatprep.mubr.bf16.mxu0 %v8676_v2  ;;  %2467 = vperm.xlu0 %8216, %v2449_v36  }
 0x1b5   : > { %7021 = vmatmul.mubr.msk.bf16.gmra.mrb[12].mxu0 %vm388_vm1, %v1679_v41  ;;  %v1919_v41 = vrot.slane %v1917_v31, 4 }
 0x1b6   : > { %1792 = vmatprep.mubr.bf16.mxu0 %v8676_v2 }
 0x1b7   : > { %v1920_v42 = vor.u32 %v1919_v41, %v1916_v38 }
 0x1b9   : > { %v1921_v46 = vsel %vm1868_vm7, %v1911_v28, %v1920_v42  ;;  %v2359_v28 = vlaneseq }
 0x1bd   : > { %7022 = vmatmul.mubr.msk.bf16.gmra.mrb[16].mxu0 %vm388_vm1, %v1681_v44  ;;  %v1926_v44 = vshll.u32 %v9121_v45, 16  ;;  %v1938_v45 = vor.u32 %v1937_v51, %v1934_v50 }
 0x1be   : > { %1802 = vmatprep.mubr.bf16.mxu0 %v8676_v2 }
 0x1c5   : > { %7023 = vmatmul.mubr.msk.bf16.gmra.mrb[20].mxu0 %vm388_vm1, %v1683_v49  ;;  %v1925_v49 = vrot.slane %v1923_v43, 3 }
 0x1c6   : > { %1812 = vmatprep.mubr.bf16.mxu0 %v8676_v2 }
 0x1c9   : > { %v9382_v12 = vpop.permute.xlu1 %2515 }
 0x1cd   : > { %7024 = vmatmul.mubr.msk.bf16.gmra.mrb[24].mxu0 %vm388_vm1, %v1685_v8  ;;  %v9384_v25 = vpop.permute.xlu1 %2527 }
 0x1ce   : > { %1822 = vmatprep.mubr.bf16.mxu0 %v8676_v2 }
 0x1d5   : > { %7025 = vmatmul.mubr.msk.bf16.gmra.mrb[28].mxu0 %vm388_vm1, %v1684_v34  ;;  %v1928_v34 = vrot.slane %v1926_v44, 4 }
 0x1d6   : > { %2006 = vmatprep.mubr.bf16.mxu0 %v8676_v2 }
 0x1d7   : > { %v1929_v8 = vor.u32 %v1928_v34, %v1925_v49 }
 0x1d9   : > { %v1930_v23 = vsel %vm1868_vm7, %v1920_v42, %v1929_v8  ;;  %v1939_v52 = vsel %vm1868_vm7, %v1929_v8, %v1938_v45  ;;  %v2357_v42 = vld [vmem:[%s11174_s3] sm:$0x3] }
 0x1dd   : > { %7030 = vmatmul.mubr.msk.bf16.vlgmr.msra.gmra.mrb[0].mxu0 %vm388_vm1, %v1885_v4  ;;  %v8295_v4 = vld [vmem:[%s11175_s4 + $0x104] ss:$8 sps:$4 sm:$0xff]  }
 0x1de   : > { %2213 = vmatpush1.bf16.msra.mxu0 %v8270_v60  ;;  %2016 = vmatprep.mubr.bf16.mxu0 %v8676_v2  ;;  %v8290_v60 = vld [vmem:[%s11175_s4 + $0xf0] ss:$8 sps:$4 sm:$0xff]   ;;  %v2492_v14 = vpop.permute.xlu0 %2491 }
 0x1df   : > { %3311 = vmatprep.subr.bf16.mxu0 %v8283_v16  ;;  %7684 = vmatpush1.bf16.msra.mxu1 %v8290_v60 }
 0x1e0   : > { %7673 = vmatprep.subr.bf16.mxu1 %v8295_v4 }
 0x1e3   : > { %7685 = vmatpush1.bf16.msra.mxu1 %v8293_v47 }
 0x1e4   : > { %7674 = vmatprep.subr.bf16.mxu1 %v8298_v63 }
 0x1e5   : > { %7031 = vmatmul.mubr.msk.bf16.gmra.mrb[4].mxu0 %vm388_vm1, %v1894_v15  ;;  %v8310_v15 = vld [vmem:[%s11175_s4 + $0x154] ss:$8 sps:$4 sm:$0xff]   ;;  %v2504_v16 = vpop.permute.xlu0 %2503 }
 0x1e6   : > { %2026 = vmatprep.mubr.bf16.mxu0 %v8676_v2 }
 0x1e7   : > { %7686 = vmatpush1.bf16.msra.mxu1 %v8296_v0 }
 0x1e8   : > { %7675 = vmatprep.subr.bf16.mxu1 %v8301_v55 }
 0x1e9   : > { %v9388_v19 = vpop.permute.xlu0 %2539 }
 0x1ed   : > { %7032 = vmatmul.mubr.msk.bf16.gmra.mrb[8].mxu0 %vm388_vm1, %v1903_v17  ;;  %v9386_v17 = vpop.permute.xlu1 %2551 }
 0x1ee   : > { %2036 = vmatprep.mubr.bf16.mxu0 %v8676_v2 }
 0x1f1   : > { %v9390_v21 = vpop.permute.xlu1 %2575 }
 0x1f5   : > { %7033 = vmatmul.mubr.msk.bf16.gmra.mrb[12].mxu0 %vm388_vm1, %v1912_v37  ;;  %v9394_v24 = vpop.permute.xlu1 %2599 }
 0x1f6   : > { %2046 = vmatprep.mubr.bf16.mxu0 %v8676_v2 }
 0x1f9   : > { %v9398_v30 = vpop.permute.xlu1 %2623 }
 0x1fd   : > { %7034 = vmatmul.mubr.msk.bf16.gmra.mrb[16].mxu0 %vm388_vm1, %v1921_v46 }
 0x1fe   : > { %2056 = vmatprep.mubr.bf16.mxu0 %v8676_v2 }
 0x205   : > { %7035 = vmatmul.mubr.msk.bf16.gmra.mrb[20].mxu0 %vm388_vm1, %v1930_v23 }
 0x206   : > { %2066 = vmatprep.mubr.bf16.mxu0 %v8676_v2 }
 0x20d   : > { %7036 = vmatmul.mubr.msk.bf16.gmra.mrb[24].mxu0 %vm388_vm1, %v1939_v52 }
 0x20e   : > { %2076 = vmatprep.mubr.bf16.mxu0 %v8676_v2 }
 0x215   : > { %7037 = vmatmul.mubr.msk.bf16.gmra.mrb[28].mxu0 %vm388_vm1, %v1938_v45 }
 0x216   : > { %2244 = vmatprep.mubr.bf16.mxu0 %v8676_v2 }
 0x21d   : > { %7050 = vmatmul.mubr.msk.bf16.vlgmr.msra.gmra.mrb[0].mxu0 %vm388_vm1, %v8273_v6 }
 0x21e   : > { %2254 = vmatprep.mubr.bf16.mxu0 %v8676_v2  ;;  %3312 = vmatpush1.bf16.msra.mxu0 %v8281_v22  ;;  %v9392_v22 = vpop.permute.xlu0 %2563  ;;  %v9404_v36 = vpop.permute.xlu1 %2647 }
 0x21f   : > { %3313 = vmatprep.subr.bf16.mxu0 %v8286_v32  ;;  %v9402_v32 = vshrl.u32 %v2359_v28, 7 }
 0x221   : > { %11216 = vst [vmem:[#allocation3_spill] sm:$0xff] %v9402_v32  ;;  %v11179_v41 = vsub.s32 0, %v9402_v32  ;;  %v11178_v43 = vsub.s32 1, %v9402_v32 }
 0x222   : > { %3314 = vmatpush1.bf16.msra.mxu0 %v8284_v33  ;;  %v9396_v26 = vpop.permute.xlu0 %2587  ;;  %v8677_v33 = vmov 839922192   ;;  %v2480_v34 = vpop.permute.xlu1 %2479 }
 0x223   : > { %3315 = vmatprep.subr.bf16.mxu0 %v8289_v39  ;;  %v2471_v35 = vunpack.c.l.s4 %v8677_v33  ;;  %v9418_v46 = vrot.slane %v2357_v42, %v11179_v41  ;;  %v9422_v49 = vrot.slane %v2357_v42, %v11178_v43 }
 0x225   : > { %7051 = vmatmul.mubr.msk.bf16.gmra.mrb[4].mxu0 %vm388_vm1, %v8274_v29  ;;  %v2472_v38 = vunpack.c.0.s8 %v2471_v35 }
 0x226   : > { %2264 = vmatprep.mubr.bf16.mxu0 %v8676_v2  ;;  %3316 = vmatpush1.bf16.msra.mxu0 %v8287_v40  ;;  %v9400_v31 = vpop.permute.xlu0 %2611 }
 0x227   : > { %3317 = vmatprep.subr.bf16.mxu0 %v8292_v59  ;;  %v9414_v44 = vsub.s32 %v2472_v38, %v9402_v32 }
 0x229   : > { %v2488_v50 = vrot.slane %v2480_v34, %v9414_v44  ;;  %v2536_v28 = vrot.slane %v9384_v25, %v9414_v44  ;;  %v2560_v33 = vrot.slane %v9386_v17, %v9414_v44  ;;  %v2548_v42 = vrot.slane %v9388_v19, %v9414_v44 }
 0x22a   : > { %3318 = vmatpush1.bf16.msra.mxu0 %v8290_v60  ;;  %v9406_v37 = vpop.permute.xlu0 %2635  ;;  %v2500_v60 = vrot.slane %v2492_v14, %v9414_v44  ;;  %v2584_v19 = vrot.slane %v9390_v21, %v9414_v44  ;;  %v2596_v21 = vrot.slane %v9396_v26, %v9414_v44 }
 0x22b   : > { %3319 = vmatprep.subr.bf16.mxu0 %v8295_v4  ;;  %v2512_v4 = vrot.slane %v2504_v16, %v9414_v44  ;;  %v2524_v16 = vrot.slane %v9382_v12, %v9414_v44 }
 0x22d   : > { %7052 = vmatmul.mubr.msk.bf16.gmra.mrb[8].mxu0 %vm388_vm1, %v8275_v53 }
 0x22e   : > { %2274 = vmatprep.mubr.bf16.mxu0 %v8676_v2  ;;  %3320 = vmatpush1.bf16.msra.mxu0 %v8293_v47  ;;  %v2468_v8 = vpop.permute.xlu0 %2467 }
 0x22f   : > { %3321 = vmatprep.subr.bf16.mxu0 %v8298_v63  ;;  %v2476_v51 = vrot.slane %v2468_v8, %v9414_v44 }
 0x232   : > { %3322 = vmatpush1.bf16.msra.mxu0 %v8296_v0 }
 0x233   : > { %3323 = vmatprep.subr.bf16.mxu0 %v8301_v55 }
 0x235   : > { %7053 = vmatmul.mubr.msk.bf16.gmra.mrb[12].mxu0 %vm388_vm1, %v8276_v27 }
 0x236   : > { %2284 = vmatprep.mubr.bf16.mxu0 %v8676_v2 }
 0x23d   : > { %7054 = vmatmul.mubr.msk.bf16.gmra.mrb[16].mxu0 %vm388_vm1, %v8277_v54 }
 0x23e   : > { %2294 = vmatprep.mubr.bf16.mxu0 %v8676_v2 }
 0x245   : > { %7055 = vmatmul.mubr.msk.bf16.gmra.mrb[20].mxu0 %vm388_vm1, %v8278_v57  ;;  %v7058_v57 = vcombine.low %v2476_v51, %v2488_v50 }
 0x246   : > { %2304 = vmatprep.mubr.bf16.mxu0 %v8676_v2 }
 0x24d   : > { %7056 = vmatmul.mubr.msk.bf16.gmra.mrb[24].mxu0 %vm388_vm1, %v8279_v58 }
 0x24e   : > { %2314 = vmatprep.mubr.bf16.mxu0 %v8676_v2  ;;  %v8299_v2 = vld [vmem:[%s11175_s4 + $0x120] ss:$8 sps:$4 sm:$0xff]  }
 0x24f   : > { %3324 = vmatpush1.bf16.msra.mxu0 %v8299_v2  ;;  %7687 = vmatpush1.bf16.msra.mxu1 %v8299_v2 }
 0x250   : > { %3325 = vmatprep.subr.bf16.mxu0 %v8304_v10  ;;  %7676 = vmatprep.subr.bf16.mxu1 %v8304_v10 }
 0x253   : > { %3326 = vmatpush1.bf16.msra.mxu0 %v8302_v56  ;;  %7688 = vmatpush1.bf16.msra.mxu1 %v8302_v56 }
 0x254   : > { %3327 = vmatprep.subr.bf16.mxu0 %v8307_v1  ;;  %7677 = vmatprep.subr.bf16.mxu1 %v8307_v1 }
 0x255   : > { %7057 = vmatmul.mubr.msk.bf16.gmra.mrb[28].mxu0 %vm388_vm1, %v8280_v3  ;;  %vm9443_vm1 = vmor %vm2811_vm13, %vm2812_vm14  ;;  %vm2897_vm13 = vcmask 522244  }
 0x256   : > { %vm9677_vm14 = vmand %vm2894_vm11, %vm2895_vm12 }
 0x257   : > { %3328 = vmatpush1.bf16.msra.mxu0 %v8305_v61  ;;  %7689 = vmatpush1.bf16.msra.mxu1 %v8305_v61 }
 0x258   : > { %3329 = vmatprep.subr.bf16.mxu0 %v8310_v15  ;;  %7678 = vmatprep.subr.bf16.mxu1 %v8310_v15 }
 0x25b   : > { %3330 = vmatpush1.bf16.msra.mxu0 %v8308_v62  ;;  %7690 = vmatpush1.bf16.msra.mxu1 %v8308_v62 }
 0x25c   : > { %3331 = vmatprep.subr.bf16.mxu0 %v8313_v5  ;;  %7679 = vmatprep.subr.bf16.mxu1 %v8313_v5  ;;  %v7059_v5 = vcombine.low %v2500_v60, %v2512_v4 }
 0x25f   : > { %3332 = vmatpush1.bf16.msra.mxu0 %v8311_v20  ;;  %7691 = vmatpush1.bf16.msra.mxu1 %v8311_v20 }
 0x260   : > { %3333 = vmatprep.subr.bf16.mxu0 %v8316_v7  ;;  %7680 = vmatprep.subr.bf16.mxu1 %v8316_v7 }
 0x263   : > { %3334 = vmatpush1.bf16.msra.mxu0 %v8314_v9  ;;  %7692 = vmatpush1.bf16.msra.mxu1 %v8314_v9 }
 0x264   : > { %3568 = vmatprep.subr.bf16.mxu1 %v8326_v11 }
 0x2f0   : > { %v2246_v13 = vpop.f32.mrb[0].mxu0 }
 0x2f1   : > { %v2369_v18 = vadd.f32 %v9418_v46, %v2246_v13  ;;  %v2248_v23 = vpop.f32.mrb[1].mxu0 }
 0x2f2   : > { %v2370_v45 = vadd.f32 %v9422_v49, %v2248_v23  ;;  %v2250_v52 = vpop.f32.mrb[2].mxu0 }
 0x2f3   : > { %v2371_v6 = vadd.f32 %v9418_v46, %v2250_v52  ;;  %v2252_v29 = vpop.f32.mrb[3].mxu0  ;;  %v2401_v27 = vmax.f32 %v2369_v18, 0.0  ;;  %v7060_v52 = vcombine.low %v2524_v16, %v2536_v28  ;;  %v2656_v28 = vrot.slane %v9404_v36, %v9414_v44 }
 0x2f4   : > { %v2372_v53 = vadd.f32 %v9422_v49, %v2252_v29  ;;  %v2402_v58 = vmax.f32 %v2370_v45, 0.0 }
 0x2f5   : > { %v2403_v54 = vmax.f32 %v2371_v6, 0.0  ;;  %v2572_v6 = vrot.slane %v9392_v22, %v9414_v44 }
 0x2f6   : > { %v2404_v3 = vmax.f32 %v2372_v53, 0.0 }
 0x2f7   : > { %v2433_v39 = vpack.c.bf16 %v2403_v54, %v2401_v27  ;;  %v9460_v27 = vcombine.low %v2548_v42, %v2560_v33 }
 0x2f8   : > { %v2434_v40 = vpack.c.bf16 %v2404_v3, %v2402_v58  ;;  %v2256_v59 = vpop.f32.mrb[4].mxu0  ;;  %v2608_v3 = vrot.slane %v9394_v24, %v9414_v44 }
 0x2f9   : > { %v2705_v47 = vmul.bf16 %v7058_v57, %v2433_v39  ;;  %v2373_v63 = vadd.f32 %v9418_v46, %v2256_v59  ;;  %v2258_v0 = vpop.f32.mrb[5].mxu0 }
 0x2fa   : > { %v2706_v55 = vmul.bf16 %v7058_v57, %v2434_v40  ;;  %v2374_v2 = vadd.f32 %v9422_v49, %v2258_v0  ;;  %v2260_v10 = vpop.f32.mrb[6].mxu0  ;;  %v2632_v0 = vrot.slane %v9398_v30, %v9414_v44 }
 0x2fb   : > { %v2375_v56 = vadd.f32 %v9418_v46, %v2260_v10  ;;  %v2262_v1 = vpop.f32.mrb[7].mxu0  ;;  %v2405_v20 = vmax.f32 %v2373_v63, 0.0  ;;  %v9467_v63 = vcombine.low %v2572_v6, %v2584_v19 }
 0x2fc   : > { %v7066_v61 = vcombine.low %v2705_v47, %v2706_v55  ;;  %v7067_v15 = vcombine.high %v2705_v47, %v2706_v55  ;;  %v2376_v62 = vadd.f32 %v9422_v49, %v2262_v1  ;;  %v2406_v11 = vmax.f32 %v2374_v2, 0.0  ;;  %v2903_v47 = vld [vmem:[#allocation2] sm:$0xff] }
 0x2fd   : > { %v2407_v7 = vmax.f32 %v2375_v56, 0.0  ;;  %v2620_v55 = vrot.slane %v9400_v31, %v9414_v44  ;;  %v9482_v31 = vcombine.low %v2596_v21, %v2608_v3 }
 0x2fe   : > { %v2814_v9 = vrot.slane %v7066_v61, 6  ;;  %v2408_v14 = vmax.f32 %v2376_v62, 0.0  ;;  %v2816_v8 = vrot.slane %v7067_v15, 6 }
 0x2ff   : > { %v2435_v38 = vpack.c.bf16 %v2407_v7, %v2405_v20  ;;  %v9487_v16 = vcombine.low %v2620_v55, %v2632_v0 }
 0x300   : > { %v2815_v34 = vrot.slane %v2814_v9, 4  ;;  %2879 = vst.msk [vmem:[#allocation2 + $0x8] sm:$0xcc] %vm2878_vm15, %v2814_v9  ;;  %v2436_v13 = vpack.c.bf16 %v2408_v14, %v2406_v11  ;;  %v2266_v12 = vpop.f32.mrb[8].mxu0  ;;  %v2818_v40 = vrot.slane %v2816_v8, 4  ;;  %vm9690_vm15 = vmand %vm2897_vm13, %vm930_vm4 }
 0x301   : > { %v2707_v18 = vmul.bf16 %v7059_v5, %v2435_v38  ;;  %v2377_v25 = vadd.f32 %v9418_v46, %v2266_v12  ;;  %v2268_v23 = vpop.f32.mrb[9].mxu0  ;;  %vm2899_vm11 = vmor %vm9690_vm15, %vm9677_vm14 }
 0x302   : > { %v2817_v17 = vsel %vm9443_vm1, %v2815_v34, %v2816_v8  ;;  %v2708_v50 = vmul.bf16 %v7059_v5, %v2436_v13  ;;  %v2378_v51 = vadd.f32 %v9422_v49, %v2268_v23  ;;  %v2270_v45 = vpop.f32.mrb[10].mxu0  ;;  %v2644_v34 = vrot.slane %v9406_v37, %v9414_v44 }
 0x303   : > { %2880 = vst.msk [vmem:[#allocation2 + $0x10] sm:$0xff] %vm9276_vm10, %v2817_v17  ;;  %v2379_v29 = vadd.f32 %v9418_v46, %v2270_v45  ;;  %v2272_v53 = vpop.f32.mrb[11].mxu0  ;;  %v2409_v39 = vmax.f32 %v2377_v25, 0.0 }
 0x304   : > { %v7068_v54 = vcombine.low %v2707_v18, %v2708_v50  ;;  %v7069_v57 = vcombine.high %v2707_v18, %v2708_v50  ;;  %v2380_v58 = vadd.f32 %v9422_v49, %v2272_v53  ;;  %v2410_v60 = vmax.f32 %v2378_v51, 0.0 }
 0x305   : > { %v2411_v22 = vmax.f32 %v2379_v29, 0.0 }
 0x306   : > { %v2819_v59 = vrot.slane %v7068_v54, 6  ;;  %v2412_v4 = vmax.f32 %v2380_v58, 0.0  ;;  %v2822_v56 = vrot.slane %v7069_v57, 6 }
 0x307   : > { %v2437_v2 = vpack.c.bf16 %v2411_v22, %v2409_v39  ;;  %v2904_v24 = vld [vmem:[#allocation2 + $0x8] sm:$0xff] }
 0x308   : > { %v2820_v26 = vsel %vm9443_vm1, %v2818_v40, %v2819_v59  ;;  %v2821_v10 = vrot.slane %v2819_v59, 4  ;;  %v2438_v1 = vpack.c.bf16 %v2412_v4, %v2410_v60  ;;  %v2276_v61 = vpop.f32.mrb[12].mxu0  ;;  %v9478_v30 = vcombine.low %v2903_v47, %v2904_v24 }
 0x309   : > { %2881 = vst.msk [vmem:[#allocation2 + $0x18] sm:$0xff] %vm9276_vm10, %v2820_v26  ;;  %v2709_v15 = vmul.bf16 %v7060_v52, %v2437_v2  ;;  %v2381_v62 = vadd.f32 %v9418_v46, %v2276_v61  ;;  %v2278_v5 = vpop.f32.mrb[13].mxu0  ;;  %v9480_v20 = vcombine.high %v2903_v47, %v2904_v24  ;;  %v2824_v17 = vrot.slane %v2822_v56, 4 }
 0x30a   : > { %v2823_v7 = vsel %vm9443_vm1, %v2821_v10, %v2822_v56  ;;  %v2710_v9 = vmul.bf16 %v7060_v52, %v2438_v1  ;;  %v2382_v11 = vadd.f32 %v9422_v49, %v2278_v5  ;;  %v2280_v14 = vpop.f32.mrb[14].mxu0  ;;  %v3035_v23 = vshll.u32 %v9478_v30, 16  ;;  %v2905_v3 = vld [vmem:[#allocation2 + $0x10] sm:$0xff] }
 0x30b   : > { %2882 = vst.msk [vmem:[#allocation2 + $0x20] sm:$0xff] %vm9276_vm10, %v2823_v7  ;;  %v2383_v33 = vadd.f32 %v9418_v46, %v2280_v14  ;;  %v2282_v38 = vpop.f32.mrb[15].mxu0  ;;  %v3047_v42 = vshll.u32 %v9480_v20, 16  ;;  %v2413_v18 = vmax.f32 %v2381_v62, 0.0  ;;  %v3045_v6 = vshrl.u32 %v9480_v20, 16 }
 0x30c   : > { %v7070_v8 = vcombine.low %v2709_v15, %v2710_v9  ;;  %v7071_v13 = vcombine.high %v2709_v15, %v2710_v9  ;;  %v2384_v12 = vadd.f32 %v9422_v49, %v2282_v38  ;;  %v2414_v51 = vmax.f32 %v2382_v11, 0.0 }
 0x30d   : > { %v2415_v25 = vmax.f32 %v2383_v33, 0.0  ;;  %v3049_v29 = vrot.slane %v3047_v42, 1  ;;  %v3037_v39 = vrot.slane %v3035_v23, 1  ;;  %v3033_v24 = vshrl.u32 %v9478_v30, 16 }
 0x30e   : > { %v2825_v50 = vrot.slane %v7070_v8, 6  ;;  %v2416_v45 = vmax.f32 %v2384_v12, 0.0  ;;  %v2828_v52 = vrot.slane %v7071_v13, 6 }
 0x30f   : > { %v2439_v19 = vpack.c.bf16 %v2415_v25, %v2413_v18  ;;  %v3050_v56 = vor.u32 %v3049_v29, %v3045_v6  ;;  %v3038_v5 = vor.u32 %v3037_v39, %v3033_v24 }
 0x310   : > { %v2826_v53 = vsel %vm9443_vm1, %v2824_v17, %v2825_v50  ;;  %v2827_v54 = vrot.slane %v2825_v50, 4  ;;  %v2440_v57 = vpack.c.bf16 %v2416_v45, %v2414_v51  ;;  %v2286_v58 = vpop.f32.mrb[16].mxu0  ;;  %v9502_v21 = vld [vmem:[#allocation2 + $0x18] sm:$0xff]  ;;  %v2830_v33 = vrot.slane %v2828_v52, 4 }
 0x311   : > { %2883 = vst.msk [vmem:[#allocation2 + $0x28] sm:$0xff] %vm9276_vm10, %v2826_v53  ;;  %v2711_v22 = vmul.bf16 %v9460_v27, %v2439_v19  ;;  %v2385_v40 = vadd.f32 %v9418_v46, %v2286_v58  ;;  %v2288_v59 = vpop.f32.mrb[17].mxu0  ;;  %v9509_v60 = vcombine.low %v2905_v3, %v9502_v21  ;;  %v9512_v4 = vcombine.high %v2905_v3, %v9502_v21 }
 0x312   : > { %v2829_v47 = vsel %vm9443_vm1, %v2827_v54, %v2828_v52  ;;  %v2712_v0 = vmul.bf16 %v9460_v27, %v2440_v57  ;;  %v2386_v55 = vadd.f32 %v9422_v49, %v2288_v59  ;;  %v2290_v2 = vpop.f32.mrb[18].mxu0  ;;  %v9531_v52 = vld [vmem:[#allocation2 + $0x20] sm:$0xff] }
 0x313   : > { %2884 = vst.msk [vmem:[#allocation2 + $0x30] sm:$0xff] %vm9276_vm10, %v2829_v47  ;;  %v2387_v26 = vadd.f32 %v9418_v46, %v2290_v2  ;;  %v2292_v10 = vpop.f32.mrb[19].mxu0  ;;  %v3052_v1 = vshll.u32 %v9512_v4, 16  ;;  %v3040_v61 = vshll.u32 %v9509_v60, 16  ;;  %v2417_v7 = vmax.f32 %v2385_v40, 0.0 }
 0x314   : > { %v7072_v15 = vcombine.low %v2711_v22, %v2712_v0  ;;  %v7073_v62 = vcombine.high %v2711_v22, %v2712_v0  ;;  %v2388_v27 = vadd.f32 %v9422_v49, %v2292_v10  ;;  %v2418_v42 = vmax.f32 %v2386_v55, 0.0 }
 0x315   : > { %v2419_v9 = vmax.f32 %v2387_v26, 0.0  ;;  %v3054_v11 = vrot.slane %v3052_v1, 1  ;;  %v3042_v14 = vrot.slane %v3040_v61, 1  ;;  %v3064_v25 = vshrl.u32 %v9512_v4, 16 }
 0x316   : > { %v2831_v38 = vrot.slane %v7072_v15, 6  ;;  %v2420_v8 = vmax.f32 %v2388_v27, 0.0  ;;  %v2834_v50 = vrot.slane %v7073_v62, 6  ;;  %v3056_v40 = vshrl.u32 %v9509_v60, 16 }
 0x317   : > { %v2441_v13 = vpack.c.bf16 %v2419_v9, %v2417_v7  ;;  %v3055_v12 = vsel %vm314_vm0, %v3050_v56, %v3054_v11  ;;  %v3043_v18 = vsel %vm314_vm0, %v3038_v5, %v3042_v14  ;;  %v3066_v0 = vor.u32 %v3064_v25, %v3054_v11 }
 0x318   : > { %v2832_v23 = vsel %vm9443_vm1, %v2830_v33, %v2831_v38  ;;  %v2833_v17 = vrot.slane %v2831_v38, 4  ;;  %v2442_v51 = vpack.c.bf16 %v2420_v8, %v2418_v42  ;;  %v2296_v45 = vpop.f32.mrb[20].mxu0  ;;  %7146 = vmatprep.mubr.msk.bf16.mxu0 %vm3286_vm9, %v3055_v12  ;;  %v9533_v19 = vld [vmem:[#allocation2 + $0x28] sm:$0xff]  ;;  %v3058_v10 = vor.u32 %v3056_v40, %v3042_v14 }
 0x319   : > { %2885 = vst.msk [vmem:[#allocation2 + $0x38] sm:$0xff] %vm9276_vm10, %v2832_v23  ;;  %v2713_v6 = vmul.bf16 %v9467_v63, %v2441_v13  ;;  %v2389_v29 = vadd.f32 %v9418_v46, %v2296_v45  ;;  %v2298_v53 = vpop.f32.mrb[21].mxu0  ;;  %3344 = vmatmul.mubr.bf16.vlgmr.msra.gmra.mrb[32].mxu0 %v3043_v18  ;;  %v9541_v54 = vcombine.high %v9531_v52, %v9533_v19  ;;  %v2836_v62 = vrot.slane %v2834_v50, 4 }
 0x31a   : > { %v9545_v57 = vcombine.low %v9531_v52, %v9533_v19  ;;  %v2835_v58 = vsel %vm9443_vm1, %v2833_v17, %v2834_v50  ;;  %v2714_v3 = vmul.bf16 %v9467_v63, %v2442_v51  ;;  %v2390_v39 = vadd.f32 %v9422_v49, %v2298_v53  ;;  %v2300_v22 = vpop.f32.mrb[22].mxu0  ;;  %v9564_v18 = vld [vmem:[#allocation2 + $0x30] sm:$0xff] }
 0x31b   : > { %2886 = vst.msk [vmem:[#allocation2 + $0x40] sm:$0xff] %vm9276_vm10, %v2835_v58  ;;  %v2391_v59 = vadd.f32 %v9418_v46, %v2300_v22  ;;  %v2302_v47 = vpop.f32.mrb[23].mxu0  ;;  %v3068_v55 = vshll.u32 %v9541_v54, 16  ;;  %v2421_v56 = vmax.f32 %v2389_v29, 0.0  ;;  %v3080_v38 = vshrl.u32 %v9541_v54, 16 }
 0x31c   : > { %v3060_v2 = vshll.u32 %v9545_v57, 16  ;;  %v7074_v24 = vcombine.low %v2713_v6, %v2714_v3  ;;  %v7075_v26 = vcombine.high %v2713_v6, %v2714_v3  ;;  %v2392_v63 = vadd.f32 %v9422_v49, %v2302_v47 }
 0x31d   : > { %v2423_v1 = vmax.f32 %v2391_v59, 0.0  ;;  %v3070_v61 = vrot.slane %v3068_v55, 1  ;;  %v2422_v5 = vmax.f32 %v2390_v39, 0.0  ;;  %v9586_v6 = vcombine.low %v2644_v34, %v2656_v28 }
 0x31e   : > { %v3062_v15 = vrot.slane %v3060_v2, 1  ;;  %v2837_v27 = vrot.slane %v7074_v24, 6  ;;  %v2424_v7 = vmax.f32 %v2392_v63, 0.0  ;;  %v2840_v14 = vrot.slane %v7075_v26, 6 }
 0x31f   : > { %v2443_v9 = vpack.c.bf16 %v2423_v1, %v2421_v56  ;;  %v3071_v11 = vsel %vm314_vm0, %v3066_v0, %v3070_v61  ;;  %v3082_v36 = vor.u32 %v3080_v38, %v3070_v61  ;;  %v3072_v37 = vshrl.u32 %v9545_v57, 16  ;;  %v8324_v61 = vld [vmem:[%s11175_s4] ss:$8 sps:$4 sm:$0xff]  }
 0x320   : > { %v3063_v33 = vsel %vm314_vm0, %v3058_v10, %v3062_v15  ;;  %v2838_v42 = vsel %vm9443_vm1, %v2836_v62, %v2837_v27  ;;  %v2839_v8 = vrot.slane %v2837_v27, 4  ;;  %v2444_v13 = vpack.c.bf16 %v2424_v7, %v2422_v5  ;;  %v2306_v12 = vpop.f32.mrb[24].mxu0  ;;  %7147 = vmatprep.mubr.msk.bf16.mxu0 %vm3286_vm9, %v3071_v11  ;;  %v9566_v25 = vld [vmem:[#allocation2 + $0x38] sm:$0xff] }
 0x321   : > { %2887 = vst.msk [vmem:[#allocation2 + $0x48] sm:$0xff] %vm9276_vm10, %v2838_v42  ;;  %v2715_v23 = vmul.bf16 %v9482_v31, %v2443_v9  ;;  %v2393_v17 = vadd.f32 %v9418_v46, %v2306_v12  ;;  %v2308_v50 = vpop.f32.mrb[25].mxu0  ;;  %3354 = vmatmul.mubr.bf16.gmra.mrb[36].mxu0 %v3063_v33  ;;  %v9574_v51 = vcombine.high %v9564_v18, %v9566_v25  ;;  %v2842_v44 = vrot.slane %v2840_v14, 4  ;;  %v8330_v27 = vld [vmem:[%s11175_s4 + $0x14] ss:$8 sps:$4 sm:$0xff]  }
 0x322   : > { %v9578_v45 = vcombine.low %v9564_v18, %v9566_v25  ;;  %v2841_v29 = vsel %vm9443_vm1, %v2839_v8, %v2840_v14  ;;  %v2716_v53 = vmul.bf16 %v9482_v31, %v2444_v13  ;;  %v2394_v58 = vadd.f32 %v9422_v49, %v2308_v50  ;;  %v2310_v3 = vpop.f32.mrb[26].mxu0  ;;  %v9610_v33 = vld [vmem:[#allocation2 + $0x40] sm:$0xff] }
 0x323   : > { %2888 = vst.msk [vmem:[#allocation2 + $0x50] sm:$0xff] %vm9276_vm10, %v2841_v29  ;;  %v2395_v39 = vadd.f32 %v9418_v46, %v2310_v3  ;;  %v2312_v22 = vpop.f32.mrb[27].mxu0  ;;  %v3084_v40 = vshll.u32 %v9574_v51, 16  ;;  %v2425_v31 = vmax.f32 %v2393_v17, 0.0  ;;  %v3074_v63 = vor.u32 %v3072_v37, %v3062_v15 }
 0x324   : > { %v7076_v28 = vcombine.low %v2715_v23, %v2716_v53  ;;  %v7077_v34 = vcombine.high %v2715_v23, %v2716_v53  ;;  %v2396_v59 = vadd.f32 %v9422_v49, %v2312_v22  ;;  %v3076_v55 = vshll.u32 %v9578_v45, 16 }
 0x325   : > { %v2427_v47 = vmax.f32 %v2395_v39, 0.0  ;;  %v3086_v0 = vrot.slane %v3084_v40, 1  ;;  %v2426_v24 = vmax.f32 %v2394_v58, 0.0  ;;  %v3096_v1 = vshrl.u32 %v9574_v51, 16 }
 0x326   : > { %v2843_v2 = vrot.slane %v7076_v28, 6  ;;  %v2428_v26 = vmax.f32 %v2396_v59, 0.0  ;;  %v3078_v62 = vrot.slane %v3076_v55, 1  ;;  %v2846_v9 = vrot.slane %v7077_v34, 6 }
 0x327   : > { %v2445_v10 = vpack.c.bf16 %v2427_v47, %v2425_v31  ;;  %v3087_v56 = vsel %vm314_vm0, %v3082_v36, %v3086_v0  ;;  %v3088_v22 = vshrl.u32 %v9578_v45, 16  ;;  %v3098_v37 = vor.u32 %v3096_v1, %v3086_v0 }
 0x328   : > { %v2844_v5 = vsel %vm9443_vm1, %v2842_v44, %v2843_v2  ;;  %v2845_v7 = vrot.slane %v2843_v2, 4  ;;  %v2446_v15 = vpack.c.bf16 %v2428_v26, %v2426_v24  ;;  %v2316_v11 = vpop.f32.mrb[28].mxu0  ;;  %7148 = vmatprep.mubr.msk.bf16.mxu1 %vm3286_vm9, %v3087_v56  ;;  %v9612_v38 = vld [vmem:[#allocation2 + $0x48] sm:$0xff]  ;;  %v3079_v13 = vsel %vm314_vm0, %v3074_v63, %v3078_v62 }
 0x329   : > { %2889 = vst.msk [vmem:[#allocation2 + $0x58] sm:$0xff] %vm9276_vm10, %v2844_v5  ;;  %v2717_v42 = vmul.bf16 %v9487_v16, %v2445_v10  ;;  %v2397_v8 = vadd.f32 %v9418_v46, %v2316_v11  ;;  %v2318_v14 = vpop.f32.mrb[29].mxu0  ;;  %v9621_v12 = vcombine.high %v9610_v33, %v9612_v38  ;;  %3364 = vmatmul.mubr.bf16.vlgmr.msra.gmra.mrb[0].mxu1 %v3079_v13  ;;  %v2848_v47 = vrot.slane %v2846_v9, 4  ;;  %v8338_v5 = vld [vmem:[%s11175_s4 + $0x34] ss:$8 sps:$4 sm:$0xff]  }
 0x32a   : > { %v2847_v23 = vsel %vm9443_vm1, %v2845_v7, %v2846_v9  ;;  %v2718_v17 = vmul.bf16 %v9487_v16, %v2446_v15  ;;  %v2398_v50 = vadd.f32 %v9422_v49, %v2318_v14  ;;  %v2320_v29 = vpop.f32.mrb[30].mxu0  ;;  %v9629_v53 = vcombine.low %v9610_v33, %v9612_v38  ;;  %3569 = vmatpush1.bf16.msra.mxu1 %v8324_v61  ;;  %v8328_v16 = vld [vmem:[%s11175_s4 + $0x10] ss:$8 sps:$4 sm:$0xff]  }
 0x32b   : > { %2890 = vst.msk [vmem:[#allocation2 + $0x60] sm:$0xff] %vm9276_vm10, %v2847_v23  ;;  %v2399_v58 = vadd.f32 %v9418_v46, %v2320_v29  ;;  %v2322_v3 = vpop.f32.mrb[31].mxu0  ;;  %v3100_v39 = vshll.u32 %v9621_v12, 16  ;;  %3570 = vmatprep.subr.bf16.mxu1 %v8330_v27  ;;  %v8334_v46 = vld [vmem:[%s11175_s4 + $0x24] ss:$8 sps:$4 sm:$0xff]   ;;  %v2429_v28 = vmax.f32 %v2397_v8, 0.0  ;;  %v3090_v63 = vor.u32 %v3088_v22, %v3078_v62 }
 0x32c   : > { %v7078_v36 = vcombine.low %v2717_v42, %v2718_v17  ;;  %v7079_v40 = vcombine.high %v2717_v42, %v2718_v17  ;;  %v2400_v44 = vadd.f32 %v9422_v49, %v2322_v3  ;;  %v3092_v31 = vshll.u32 %v9629_v53, 16  ;;  %v8332_v49 = vld [vmem:[%s11175_s4 + $0x20] ss:$8 sps:$4 sm:$0xff]   ;;  %v9654_v7 = vld [vmem:[#allocation2 + $0x50] sm:$0xff] }
 0x32d   : > { %v2431_v34 = vmax.f32 %v2399_v58, 0.0  ;;  %v3102_v59 = vrot.slane %v3100_v39, 1  ;;  %v2430_v2 = vmax.f32 %v2398_v50, 0.0  ;;  %v8336_v23 = vld [vmem:[%s11175_s4 + $0x30] ss:$8 sps:$4 sm:$0xff]   ;;  %v3112_v17 = vshrl.u32 %v9621_v12, 16 }
 0x32e   : > { %v2849_v55 = vrot.slane %v7078_v36, 6  ;;  %v2432_v24 = vmax.f32 %v2400_v44, 0.0  ;;  %3571 = vmatpush1.bf16.msra.mxu1 %v8328_v16  ;;  %v3094_v10 = vrot.slane %v3092_v31, 1  ;;  %v2852_v61 = vrot.slane %v7079_v40, 6  ;;  %v8342_v39 = vld [vmem:[%s11175_s4 + $0x44] ss:$8 sps:$4 sm:$0xff]  }
 0x32f   : > { %v2447_v26 = vpack.c.bf16 %v2431_v34, %v2429_v28  ;;  %v3103_v0 = vsel %vm314_vm0, %v3098_v37, %v3102_v59  ;;  %3572 = vmatprep.subr.bf16.mxu1 %v8334_v46  ;;  %v3114_v22 = vor.u32 %v3112_v17, %v3102_v59  ;;  %v2900_v28 = vld [vmem:[#allocation2 + $0x80] sm:$0x77] }
 0x330   : > { %v2850_v56 = vsel %vm9443_vm1, %v2848_v47, %v2849_v55  ;;  %v2851_v1 = vrot.slane %v2849_v55, 4  ;;  %v2448_v27 = vpack.c.bf16 %v2432_v24, %v2430_v2  ;;  %7149 = vmatprep.mubr.msk.bf16.mxu1 %vm3286_vm9, %v3103_v0  ;;  %v9656_v9 = vld [vmem:[#allocation2 + $0x58] sm:$0xff]  ;;  %v3095_v15 = vsel %vm314_vm0, %v3090_v63, %v3094_v10  ;;  %v8340_v31 = vld [vmem:[%s11175_s4 + $0x40] ss:$8 sps:$4 sm:$0xff]  }
 0x331   : > { %2891 = vst.msk [vmem:[#allocation2 + $0x68] sm:$0xff] %vm9276_vm10, %v2850_v56  ;;  %v2719_v62 = vmul.bf16 %v9586_v6, %v2447_v26  ;;  %v9664_v11 = vcombine.high %v9654_v7, %v9656_v9  ;;  %v9668_v42 = vcombine.low %v9654_v7, %v9656_v9  ;;  %3374 = vmatmul.mubr.bf16.gmra.mrb[4].mxu1 %v3095_v15  ;;  %v2854_v44 = vrot.slane %v2852_v61, 4  ;;  %v8346_v24 = vld [vmem:[%s11175_s4 + $0x54] ss:$8 sps:$4 sm:$0xff]  }
 0x332   : > { %v2853_v8 = vsel %vm9443_vm1, %v2851_v1, %v2852_v61  ;;  %v2720_v14 = vmul.bf16 %v9586_v6, %v2448_v27  ;;  %3573 = vmatpush1.bf16.msra.mxu1 %v8332_v49  ;;  %v3104_v6 = vshrl.u32 %v9629_v53, 16  ;;  %v9712_v26 = vld [vmem:[#allocation2 + $0x60] sm:$0xff]  ;;  %v8344_v1 = vld [vmem:[%s11175_s4 + $0x50] ss:$8 sps:$4 sm:$0xff]  }
 0x333   : > { %2892 = vst.msk [vmem:[#allocation2 + $0x70] sm:$0xff] %vm9276_vm10, %v2853_v8  ;;  %v3116_v50 = vshll.u32 %v9664_v11, 16  ;;  %v3108_v29 = vshll.u32 %v9668_v42, 16  ;;  %3574 = vmatprep.subr.bf16.mxu1 %v8338_v5  ;;  %v3128_v56 = vshrl.u32 %v9664_v11, 16  ;;  %v3120_v27 = vshrl.u32 %v9668_v42, 16 }
 0x334   : > { %v7080_v58 = vcombine.low %v2719_v62, %v2720_v14  ;;  %v7081_v3 = vcombine.high %v2719_v62, %v2720_v14  ;;  %v3106_v40 = vor.u32 %v3104_v6, %v3094_v10  ;;  %v8350_v5 = vld [vmem:[%s11175_s4 + $0x64] ss:$8 sps:$4 sm:$0xff]  }
 0x335   : > { %v3118_v36 = vrot.slane %v3116_v50, 1  ;;  %v3110_v37 = vrot.slane %v3108_v29, 1  ;;  %v8354_v50 = vld [vmem:[%s11175_s4 + $0x74] ss:$8 sps:$4 sm:$0xff]  }
 0x336   : > { %v2855_v46 = vrot.slane %v7080_v58, 6  ;;  %3575 = vmatpush1.bf16.msra.mxu1 %v8336_v23  ;;  %v2858_v2 = vrot.slane %v7081_v3, 6  ;;  %v8348_v23 = vld [vmem:[%s11175_s4 + $0x60] ss:$8 sps:$4 sm:$0xff]  }
 0x337   : > { %v3119_v34 = vsel %vm314_vm0, %v3114_v22, %v3118_v36  ;;  %v3111_v59 = vsel %vm314_vm0, %v3106_v40, %v3110_v37  ;;  %3576 = vmatprep.subr.bf16.mxu1 %v8342_v39  ;;  %v3130_v62 = vor.u32 %v3128_v56, %v3118_v36  ;;  %v3122_v8 = vor.u32 %v3120_v27, %v3110_v37  ;;  %v8352_v40 = vld [vmem:[%s11175_s4 + $0x70] ss:$8 sps:$4 sm:$0xff]  }
 0x338   : > { %v2856_v47 = vsel %vm9443_vm1, %v2854_v44, %v2855_v46  ;;  %v2857_v55 = vrot.slane %v2855_v46, 4  ;;  %7150 = vmatprep.mubr.msk.bf16.mxu1 %vm3286_vm9, %v3119_v34  ;;  %v9714_v0 = vld [vmem:[#allocation2 + $0x68] sm:$0xff]  ;;  %v9764_v22 = vcombine.low %v9502_v21, %v9531_v52  ;;  %v9768_v36 = vcombine.high %v9502_v21, %v9531_v52 }
 0x339   : > { %2893 = vst.msk [vmem:[#allocation2 + $0x78] sm:$0xff] %vm9276_vm10, %v2856_v47  ;;  %v9720_v49 = vcombine.high %v9712_v26, %v9714_v0  ;;  %v9724_v63 = vcombine.low %v9712_v26, %v9714_v0  ;;  %3384 = vmatmul.mubr.bf16.gmra.mrb[8].mxu1 %v3111_v59  ;;  %v9780_v21 = vcombine.high %v9533_v19, %v9564_v18 }
 0x33a   : > { %v2859_v10 = vsel %vm9443_vm1, %v2857_v55, %v2858_v2  ;;  %3577 = vmatpush1.bf16.msra.mxu1 %v8340_v31  ;;  %v9752_v6 = vld [vmem:[#allocation2 + $0x70] sm:$0xff]  ;;  %v9784_v52 = vcombine.low %v9533_v19, %v9564_v18  ;;  %v11205_v55 = vshrl.u32 %v9768_v36, 16  ;;  %v11204_v2 = vshll.u32 %v9768_v36, 16 }
 0x33b   : > { %v2901_v48 = vsel %vm2899_vm11, %v2859_v10, %v2900_v28  ;;  %v3132_v61 = vshll.u32 %v9720_v49, 16  ;;  %v3124_v35 = vshll.u32 %v9724_v63, 16  ;;  %3578 = vmatprep.subr.bf16.mxu1 %v8346_v24  ;;  %v3144_v16 = vshrl.u32 %v9720_v49, 16  ;;  %v8358_v28 = vld [vmem:[%s11175_s4 + $0x84] ss:$8 sps:$4 sm:$0xff]  }
 0x33c   : > { %2902 = vst [vmem:[#allocation2 + $0x80] sm:$0x77] %v2901_v48  ;;  %v3136_v39 = vshrl.u32 %v9724_v63, 16  ;;  %v8356_v10 = vld [vmem:[%s11175_s4 + $0x80] ss:$8 sps:$4 sm:$0xff]   ;;  %v4178_v18 = vrot.slane %v11205_v55, 1 }
 0x33d   : > { %v3134_v15 = vrot.slane %v3132_v61, 1  ;;  %v3126_v14 = vrot.slane %v3124_v35, 1  ;;  %v8362_v19 = vld [vmem:[%s11175_s4 + $0x94] ss:$8 sps:$4 sm:$0xff]   ;;  %v11203_v61 = vshrl.u32 %v9764_v22, 16  ;;  %v11202_v27 = vshll.u32 %v9764_v22, 16 }
 0x33e   : > { %3579 = vmatpush1.bf16.msra.mxu1 %v8344_v1  ;;  %v4181_v1 = vrot.slane %v11204_v2, 2  ;;  %v11200_v35 = vshrl.u32 %v9780_v21, 16 }
 0x33f   : > { %v3135_v13 = vsel %vm314_vm0, %v3130_v62, %v3134_v15  ;;  %v3127_v17 = vsel %vm314_vm0, %v3122_v8, %v3126_v14  ;;  %3580 = vmatprep.subr.bf16.mxu1 %v8350_v5  ;;  %v3146_v46 = vor.u32 %v3144_v16, %v3134_v15  ;;  %v3138_v34 = vor.u32 %v3136_v39, %v3126_v14  ;;  %v8360_v8 = vld [vmem:[%s11175_s4 + $0x90] ss:$8 sps:$4 sm:$0xff]  }
 0x340   : > { %7151 = vmatprep.mubr.msk.bf16.mxu1 %vm3286_vm9, %v3135_v13  ;;  %v2918_v29 = vld [vmem:[#allocation2 + $0x78] sm:$0x11]  ;;  %v11199_v5 = vshll.u32 %v9780_v21, 16  ;;  %v11198_v62 = vshrl.u32 %v9784_v52, 16  ;;  %v11197_v15 = vshll.u32 %v9784_v52, 16  ;;  %v4161_v14 = vrot.slane %v11203_v61, 1 }
 0x341   : > { %v9755_v58 = vcombine.high %v9752_v6, %v2918_v29  ;;  %v9758_v3 = vcombine.low %v9752_v6, %v2918_v29  ;;  %3394 = vmatmul.mubr.bf16.gmra.mrb[12].mxu1 %v3127_v17  ;;  %v9816_v13 = vcombine.high %v9566_v25, %v9610_v33  ;;  %v8365_v17 = vld [vmem:[%s11175_s4 + $0xa4] ss:$8 sps:$4 sm:$0xff]   ;;  %v4164_v29 = vrot.slane %v11202_v27, 2  ;;  %v8381_v61 = vld [vmem:[%s11175_s4 + $0x1c0] ss:$8 sps:$4 sm:$0xff]  }
 0x342   : > { %3581 = vmatpush1.bf16.msra.mxu1 %v8348_v23  ;;  %v9820_v23 = vcombine.low %v9566_v25, %v9610_v33  ;;  %v4196_v16 = vrot.slane %v11200_v35, 1  ;;  %v4199_v39 = vrot.slane %v11199_v5, 2  ;;  %v4187_v25 = vrot.slane %v11198_v62, 1 }
 0x343   : > { %v3148_v37 = vshll.u32 %v9755_v58, 16  ;;  %v3140_v44 = vshll.u32 %v9758_v3, 16  ;;  %3582 = vmatprep.subr.bf16.mxu1 %v8354_v50  ;;  %v3155_v47 = vshrl.u32 %v9755_v58, 16  ;;  %v3152_v50 = vshrl.u32 %v9758_v3, 16 }
 0x344   : > { %v4190_v33 = vrot.slane %v11197_v15, 2  ;;  %v10017_v15 = vld [vmem:[#allocation2 + $0x78] sm:$0xff] }
 0x345   : > { %v3150_v31 = vrot.slane %v3148_v37, 1  ;;  %v3142_v59 = vrot.slane %v3140_v44, 1  ;;  %v11189_v37 = vshrl.u32 %v9816_v13, 16  ;;  %v9839_v44 = vor.u32 %v4164_v29, %v4161_v14 }
 0x346   : > { %3583 = vmatpush1.bf16.msra.mxu1 %v8352_v40  ;;  %v9832_v40 = vor.u32 %v4181_v1, %v4178_v18 }
 0x347   : > { %v3151_v24 = vsel %vm314_vm0, %v3146_v46, %v3150_v31  ;;  %v3143_v56 = vsel %vm314_vm0, %v3138_v34, %v3142_v59  ;;  %v3157_v48 = vor.u32 %v3155_v47, %v3150_v31  ;;  %3584 = vmatprep.subr.bf16.mxu1 %v8358_v28  ;;  %v4200_v46 = vor.u32 %v4199_v39, %v4196_v16  ;;  %v8363_v31 = vld [vmem:[%s11175_s4 + $0xa0] ss:$8 sps:$4 sm:$0xff]  }
 0x348   : > { %7152 = vmatprep.mubr.msk.bf16.mxu1 %vm3286_vm9, %v3151_v24  ;;  %v11188_v28 = vshll.u32 %v9816_v13, 16  ;;  %v11186_v34 = vshrl.u32 %v9820_v23, 16  ;;  %v4191_v47 = vor.u32 %v4190_v33, %v4187_v25  ;;  %v4214_v24 = vrot.slane %v11189_v37, 1  ;;  %v8366_v33 = vld [vmem:[%s11175_s4 + $0xb0] ss:$8 sps:$4 sm:$0xff]  }
 0x349   : > { %3404 = vmatmul.mubr.bf16.gmra.mrb[16].mxu1 %v3143_v56  ;;  %v9851_v56 = vcombine.high %v9612_v38, %v9654_v7  ;;  %v9858_v18 = vsel %vm930_vm4, %v9832_v40, %v4200_v46  ;;  %v9874_v16 = vcombine.low %v9612_v38, %v9654_v7  ;;  %v9878_v39 = vcombine.high %v9656_v9, %v9712_v26 }
 0x34a   : > { %3585 = vmatpush1.bf16.msra.mxu1 %v8356_v10  ;;  %7153 = vmatprep.mubr.msk.bf16.mxu1 %vm3286_vm9, %v3157_v48  ;;  %v11183_v10 = vshll.u32 %v9820_v23, 16  ;;  %v3154_v48 = vor.u32 %v3152_v50, %v3142_v59  ;;  %v4217_v1 = vrot.slane %v11188_v28, 2  ;;  %v9866_v14 = vsel %vm930_vm4, %v9839_v44, %v4191_v47 }
 0x34b   : > { %3586 = vmatprep.subr.bf16.mxu1 %v8362_v19  ;;  %v8368_v19 = vld [vmem:[%s11175_s4 + $0xb4] ss:$8 sps:$4 sm:$0xff]   ;;  %v11180_v50 = vshll.u32 %v9851_v56, 16  ;;  %v9882_v25 = vcombine.low %v9656_v9, %v9712_v26  ;;  %v9891_v38 = vcombine.high %v9714_v0, %v9752_v6  ;;  %v9895_v7 = vcombine.low %v9714_v0, %v9752_v6  ;;  %v8371_v9 = vld [vmem:[%s11175_s4 + $0x184] ss:$8 sps:$4 sm:$0xff]  }
 0x34c   : > { %v4208_v59 = vrot.slane %v11183_v10, 2  ;;  %v4218_v29 = vor.u32 %v4217_v1, %v4214_v24  ;;  %v11184_v0 = vshll.u32 %v9874_v16, 16  ;;  %v4646_v62 = vrot.slane %v9878_v39, 2 }
 0x34d   : > { %v11190_v43 = vshrl.u32 %v9882_v25, 16  ;;  %v11195_v41 = vshll.u32 %v9882_v25, 16  ;;  %v11192_v28 = vshrl.u32 %v9895_v7, 16  ;;  %v4644_v5 = vrot.slane %v9882_v25, 2 }
 0x34e   : > { %3587 = vmatpush1.bf16.msra.mxu1 %v8360_v8  ;;  %v4205_v8 = vrot.slane %v11186_v34, 1  ;;  %v4650_v35 = vrot.slane %v9891_v38, 2  ;;  %vm2743_vm0 = vcmask 1040384  }
 0x34f   : > { %3588 = vmatprep.subr.bf16.mxu1 %v8365_v17  ;;  %v11181_v17 = vshrl.u32 %v9851_v56, 16  ;;  %v4241_v10 = vrot.slane %v11190_v43, 1  ;;  %v11191_v43 = vshll.u32 %v9895_v7, 16 }
 0x350   : > { %v4209_v24 = vor.u32 %v4208_v59, %v4205_v8  ;;  %v11187_v8 = vshll.u32 %v9878_v39, 16  ;;  %v10046_v32 = vsel %vm1192_vm3, %v4646_v62, %v4650_v35 }
 0x351   : > { %3414 = vmatmul.mubr.bf16.gmra.mrb[20].mxu1 %v3154_v48  ;;  %v4232_v26 = vrot.slane %v11181_v17, 1  ;;  %v11182_v48 = vshrl.u32 %v9874_v16, 16  ;;  %11230 = vst [vmem:[#allocation11_spill] sm:$0xff] %v10046_v32  ;;  %v11241_v32 = vshll.u32 %v9784_v52, 16 }
 0x352   : > { %3589 = vmatpush1.bf16.msra.mxu1 %v8363_v31  ;;  %7178 = vmatprep.mubr.msk.bf16.mxu1 %vm3286_vm9, %v9480_v20  ;;  %v9901_v20 = vsel %vm930_vm4, %v4200_v46, %v4218_v29  ;;  %v4235_v31 = vrot.slane %v11180_v50, 2  ;;  %v9909_v1 = vsel %vm930_vm4, %v4191_v47, %v4209_v24  ;;  %v8369_v47 = vld [vmem:[%s11175_s4 + $0x180] ss:$8 sps:$4 sm:$0xff]   ;;  %v4226_v50 = vrot.slane %v11184_v0, 2 }
 0x353   : > { %3590 = vmatprep.subr.bf16.mxu1 %v8368_v19  ;;  %v11185_v19 = vshrl.u32 %v9878_v39, 16  ;;  %v4223_v46 = vrot.slane %v11182_v48, 1  ;;  %v4244_v0 = vrot.slane %v11195_v41, 2 }
 0x354   : > { %v4236_v59 = vor.u32 %v4235_v31, %v4232_v26  ;;  %v4253_v26 = vrot.slane %v11187_v8, 2  ;;  %v11194_v31 = vshrl.u32 %v9891_v38, 16 }
 0x355   : > { %v4250_v17 = vrot.slane %v11185_v19, 1  ;;  %v11193_v19 = vshll.u32 %v9891_v38, 16  ;;  %v4227_v34 = vor.u32 %v4226_v50, %v4223_v46  ;;  %v4245_v37 = vor.u32 %v4244_v0, %v4241_v10  ;;  %v8377_v10 = vld [vmem:[%s11175_s4 + $0x1a4] ss:$8 sps:$4 sm:$0xff]  }
 0x356   : > { %3591 = vmatpush1.bf16.msra.mxu1 %v8366_v33  ;;  %v8374_v33 = vld [vmem:[%s11175_s4 + $0x194] ss:$8 sps:$4 sm:$0xff]   ;;  %v9932_v48 = vsel %vm930_vm4, %v4218_v29, %v4236_v59 }
 0x357   : > { %3900 = vmatprep.subr.bf16.mxu1 %v8371_v9  ;;  %v4254_v8 = vor.u32 %v4253_v26, %v4250_v17  ;;  %v4268_v9 = vrot.slane %v11194_v31, 1  ;;  %v4271_v29 = vrot.slane %v11193_v19, 2  ;;  %v8372_v17 = vld [vmem:[%s11175_s4 + $0x190] ss:$8 sps:$4 sm:$0xff]   ;;  %v9952_v50 = vsel %vm930_vm4, %v4209_v24, %v4227_v34  ;;  %v8383_v19 = vld [vmem:[%s11175_s4 + $0x1c4] ss:$8 sps:$4 sm:$0xff]  }
 0x358   : > { %v9963_v0 = vsel %vm930_vm4, %v4227_v34, %v4245_v37  ;;  %v4262_v24 = vrot.slane %v11191_v43, 2  ;;  %v8380_v34 = vld [vmem:[%s11175_s4 + $0x1b4] ss:$8 sps:$4 sm:$0xff]  }
 0x359   : > { %3601 = vmatmul.mubr.bf16.vlgmr.msra.gmra.mrb[24].mxu1 %v9478_v30  ;;  %v9955_v46 = vsel %vm930_vm4, %v4236_v59, %v4254_v8  ;;  %v4259_v30 = vrot.slane %v11192_v28, 1  ;;  %v4590_v28 = vld [vmem:[#allocation2 + $0x80] sm:$0x77] }
 0x35a   : > { %3901 = vmatpush1.bf16.msra.mxu1 %v8369_v47  ;;  %7179 = vmatprep.mubr.msk.bf16.mxu1 %vm3286_vm9, %v9512_v4  ;;  %v9965_v47 = vor.u32 %v4271_v29, %v4268_v9  ;;  %v11196_v29 = vrot.slane %v9768_v36, 2  ;;  %v10031_v27 = vcombine.low %v10017_v15, %v4590_v28 }
 0x35b   : > { %3902 = vmatprep.subr.bf16.mxu1 %v8374_v33  ;;  %v9973_v26 = vor.u32 %v4262_v24, %v4259_v30  ;;  %v8375_v33 = vld [vmem:[%s11175_s4 + $0x1a0] ss:$8 sps:$4 sm:$0xff]   ;;  %v4632_v30 = vrot.slane %v9784_v52, 2  ;;  %v4636_v24 = vrot.slane %v9820_v23, 2 }
 0x35c   : > { %v9971_v59 = vsel %vm930_vm4, %v4254_v8, %v9965_v47  ;;  %v4634_v8 = vrot.slane %v9780_v21, 2 }
 0x35d   : > { %v9983_v9 = vsel %vm930_vm4, %v4245_v37, %v9973_v26  ;;  %v8378_v37 = vld [vmem:[%s11175_s4 + $0x1b0] ss:$8 sps:$4 sm:$0xff]   ;;  %v10014_v41 = vsel %vm1192_vm3, %v4632_v30, %v4636_v24 }
 0x35e   : > { %3903 = vmatpush1.bf16.msra.mxu1 %v8372_v17  ;;  %v11201_v17 = vrot.slane %v9764_v22, 2  ;;  %v10000_v43 = vsel %vm1192_vm3, %v11196_v29, %v4634_v8  ;;  %11225 = vst [vmem:[#allocation6_spill] sm:$0xff] %v10014_v41  ;;  %v4642_v29 = vrot.slane %v9851_v56, 2 }
 0x35f   : > { %3904 = vmatprep.subr.bf16.mxu1 %v8377_v10  ;;  %v4638_v10 = vrot.slane %v9816_v13, 2 }
 0x360   : > { %v10008_v31 = vsel %vm1192_vm3, %v11201_v17, %v4632_v30  ;;  %v10028_v30 = vcombine.high %v10017_v15, %v4590_v28  ;;  %v10040_v55 = vsel %vm1192_vm3, %v4642_v29, %v4646_v62  ;;  %v8386_v28 = vld [vmem:[%s11175_s4 + $0x1d4] ss:$8 sps:$4 sm:$0xff]  }
 0x361   : > { %3611 = vmatmul.mubr.bf16.gmra.mrb[28].mxu1 %v9509_v60  ;;  %11223 = vst [vmem:[#allocation4_spill] sm:$0xff] %v10008_v31  ;;  %v10024_v17 = vsel %vm1192_vm3, %v4638_v10, %v4642_v29  ;;  %11228 = vst [vmem:[#allocation9_spill] sm:$0xff] %v10040_v55  ;;  %v11232_v29 = vshrl.u32 %v9768_v36, 16 }
 0x362   : > { %7180 = vmatprep.mubr.msk.bf16.mxu1 %vm3286_vm9, %v9541_v54  ;;  %3905 = vmatpush1.bf16.msra.mxu1 %v8375_v33  ;;  %v10011_v33 = vsel %vm1192_vm3, %v4634_v8, %v4638_v10  ;;  %11226 = vst [vmem:[#allocation7_spill] sm:$0xff] %v10024_v17  ;;  %v4648_v8 = vrot.slane %v9895_v7, 2 }
 0x363   : > { %3906 = vmatprep.subr.bf16.mxu1 %v8380_v34  ;;  %11224 = vst [vmem:[#allocation5_spill] sm:$0xff] %v10011_v33  ;;  %v4640_v34 = vrot.slane %v9874_v16, 2  ;;  %v4998_v55 = vrot.slane %v11232_v29, 2 }
 0x365   : > { %v10037_v2 = vsel %vm1192_vm3, %v4636_v24, %v4640_v34  ;;  %v10043_v10 = vsel %vm1192_vm3, %v4640_v34, %v4644_v5  ;;  %v11209_v24 = vrot.slane %v10028_v30, 2  ;;  %v11233_v34 = vshll.u32 %v9768_v36, 16 }
 0x366   : > { %3907 = vmatpush1.bf16.msra.mxu1 %v8378_v37  ;;  %11227 = vst [vmem:[#allocation8_spill] sm:$0xff] %v10037_v2  ;;  %11229 = vst [vmem:[#allocation10_spill] sm:$0xff] %v10043_v10  ;;  %v10052_v37 = vsel %vm1192_vm3, %v4644_v5, %v4648_v8  ;;  %v11208_v2 = vrot.slane %v10031_v27, 2 }
 0x367   : > { %3908 = vmatprep.subr.bf16.mxu1 %v8383_v19  ;;  %11231 = vst [vmem:[#allocation12_spill] sm:$0xff] %v10052_v37  ;;  %v4999_v10 = vrot.slane %v11233_v34, 3  ;;  %v10064_v62 = vsel %vm1192_vm3, %v4650_v35, %v11209_v24  ;;  %v8384_v19 = vld [vmem:[%s11175_s4 + $0x1d0] ss:$8 sps:$4 sm:$0xff]   ;;  %v11236_v34 = vshrl.u32 %v9764_v22, 16  ;;  %v11238_v24 = vshrl.u32 %v9780_v21, 16 }
 0x368   : > { %11234 = vst [vmem:[#allocation13_spill] sm:$0xff] %v10064_v62  ;;  %v10069_v5 = vsel %vm1192_vm3, %v4648_v8, %v11208_v2  ;;  %v8389_v35 = vld [vmem:[%s11175_s4 + $0x1e4] ss:$8 sps:$4 sm:$0xff]   ;;  %v11237_v8 = vshll.u32 %v9764_v22, 16 }
 0x369   : > { %3621 = vmatmul.mubr.bf16.gmra.mrb[0].mxu1 %v9545_v57  ;;  %11235 = vst [vmem:[#allocation14_spill] sm:$0xff] %v10069_v5  ;;  %v10076_v29 = vor.u32 %v4999_v10, %v4998_v55  ;;  %v4986_v37 = vrot.slane %v11236_v34, 2  ;;  %v11239_v5 = vshll.u32 %v9780_v21, 16  ;;  %v11240_v55 = vshrl.u32 %v9784_v52, 16  ;;  %v8387_v21 = vld [vmem:[%s11175_s4 + $0x1e0] ss:$8 sps:$4 sm:$0xff]  }
 0x36a   : > { %7181 = vmatprep.mubr.msk.bf16.mxu1 %vm3286_vm9, %v9574_v51  ;;  %3909 = vmatpush1.bf16.msra.mxu1 %v8381_v61  ;;  %v4987_v2 = vrot.slane %v11237_v8, 3  ;;  %v5006_v61 = vrot.slane %v11238_v24, 2  ;;  %v5003_v34 = vrot.slane %v11241_v32, 3  ;;  %v11243_v8 = vshll.u32 %v9816_v13, 16 }
 0x36b   : > { %3910 = vmatprep.subr.bf16.mxu1 %v8386_v28  ;;  %v5007_v62 = vrot.slane %v11239_v5, 3  ;;  %v5002_v10 = vrot.slane %v11240_v55, 2  ;;  %v11242_v28 = vshrl.u32 %v9816_v13, 16  ;;  %v11244_v5 = vshrl.u32 %v9820_v23, 16 }
 0x36c   : > { %v10095_v41 = vor.u32 %v4987_v2, %v4986_v37  ;;  %v5015_v31 = vrot.slane %v11243_v8, 3  ;;  %v11245_v32 = vshll.u32 %v9820_v23, 16  ;;  %v8392_v2 = vld [vmem:[%s11175_s4 + $0x1f4] ss:$8 sps:$4 sm:$0xff]   ;;  %v11248_v23 = vshll.u32 %v9851_v56, 16 }
 0x36d   : > { %v5014_v17 = vrot.slane %v11242_v28, 2  ;;  %v5008_v33 = vor.u32 %v5007_v62, %v5006_v61  ;;  %v5004_v24 = vor.u32 %v5003_v34, %v5002_v10  ;;  %v5010_v55 = vrot.slane %v11244_v5, 2 }
 0x36e   : > { %3911 = vmatpush1.bf16.msra.mxu1 %v8384_v19  ;;  %v5011_v52 = vrot.slane %v11245_v32, 3  ;;  %v11246_v62 = vshrl.u32 %v9851_v56, 16  ;;  %v11249_v34 = vshrl.u32 %v9874_v16, 16  ;;  %v11252_v5 = vshrl.u32 %v9878_v39, 16  ;;  %v8390_v56 = vld [vmem:[%s11175_s4 + $0x1f0] ss:$8 sps:$4 sm:$0xff]  }
 0x36f   : > { %3912 = vmatprep.subr.bf16.mxu1 %v8389_v35  ;;  %v10111_v13 = vsel %vm1390_vm5, %v10076_v29, %v5008_v33  ;;  %v5016_v37 = vor.u32 %v5015_v31, %v5014_v17  ;;  %v10117_v61 = vsel %vm1390_vm5, %v10095_v41, %v5004_v24  ;;  %v5023_v35 = vrot.slane %v11248_v23, 3 }
 0x370   : > { %v5022_v19 = vrot.slane %v11246_v62, 2  ;;  %11247 = vst [vmem:[#allocation15_spill] sm:$0xff] %v10117_v61  ;;  %v5012_v10 = vor.u32 %v5011_v52, %v5010_v55  ;;  %v5018_v28 = vrot.slane %v11249_v34, 2  ;;  %v11251_v31 = vshll.u32 %v9874_v16, 16 }
 0x371   : > { %3631 = vmatmul.mubr.bf16.gmra.mrb[4].mxu1 %v9578_v45  ;;  %v10125_v8 = vsel %vm1390_vm5, %v5008_v33, %v5016_v37  ;;  %v5030_v32 = vrot.slane %v11252_v5, 2  ;;  %v11253_v62 = vshll.u32 %v9878_v39, 16  ;;  %v11255_v16 = vshrl.u32 %v9882_v25, 16  ;;  %v8395_v39 = vld [vmem:[%s11175_s4 + $0x204] ss:$8 sps:$4 sm:$0xff]  }
 0x372   : > { %11250 = vst [vmem:[#allocation16_spill] sm:$0xff] %v10125_v8  ;;  %v5019_v17 = vrot.slane %v11251_v31, 3  ;;  %7182 = vmatprep.mubr.msk.bf16.mxu1 %vm3286_vm9, %v9621_v12  ;;  %3913 = vmatpush1.bf16.msra.mxu1 %v8387_v21  ;;  %v10139_v33 = vsel %vm1390_vm5, %v5004_v24, %v5012_v10  ;;  %v5024_v52 = vor.u32 %v5023_v35, %v5022_v19  ;;  %v11256_v34 = vshll.u32 %v9882_v25, 16 }
 0x373   : > { %v5031_v55 = vrot.slane %v11253_v62, 3  ;;  %11254 = vst [vmem:[#allocation17_spill] sm:$0xff] %v10139_v33  ;;  %v5026_v23 = vrot.slane %v11255_v16, 2  ;;  %3914 = vmatprep.subr.bf16.mxu1 %v8392_v2  ;;  %v11257_v62 = vshrl.u32 %v9891_v38, 16  ;;  %v11258_v24 = vshll.u32 %v9891_v38, 16 }
 0x374   : > { %v5027_v31 = vrot.slane %v11256_v34, 3  ;;  %v5020_v21 = vor.u32 %v5019_v17, %v5018_v28  ;;  %v10153_v19 = vsel %vm1390_vm5, %v5016_v37, %v5024_v52  ;;  %v11259_v25 = vshrl.u32 %v9895_v7, 16  ;;  %v8393_v37 = vld [vmem:[%s11175_s4 + $0x200] ss:$8 sps:$4 sm:$0xff]  }
 0x375   : > { %v5032_v5 = vor.u32 %v5031_v55, %v5030_v32  ;;  %v5038_v8 = vrot.slane %v11257_v62, 2  ;;  %v5039_v33 = vrot.slane %v11258_v24, 3  ;;  %v11260_v2 = vshll.u32 %v9895_v7, 16  ;;  %v8401_v24 = vld [vmem:[%s11175_s4 + $0x224] ss:$8 sps:$4 sm:$0xff]  }
 0x376   : > { %v5028_v35 = vor.u32 %v5027_v31, %v5026_v23  ;;  %v5034_v16 = vrot.slane %v11259_v25, 2  ;;  %v10160_v61 = vsel %vm1390_vm5, %v5012_v10, %v5020_v21  ;;  %v5052_v38 = vshrl.u32 %v10028_v30, 16  ;;  %3915 = vmatpush1.bf16.msra.mxu1 %v8390_v56 }
 0x377   : > { %v5035_v34 = vrot.slane %v11260_v2, 3  ;;  %v10163_v28 = vsel %vm1390_vm5, %v5024_v52, %v5032_v5  ;;  %v5040_v17 = vor.u32 %v5039_v33, %v5038_v8  ;;  %v5055_v7 = vshll.u32 %v10028_v30, 16  ;;  %3916 = vmatprep.subr.bf16.mxu1 %v8395_v39  ;;  %v8398_v8 = vld [vmem:[%s11175_s4 + $0x214] ss:$8 sps:$4 sm:$0xff]   ;;  %v8396_v39 = vld [vmem:[%s11175_s4 + $0x210] ss:$8 sps:$4 sm:$0xff]  }
 0x378   : > { %v10170_v32 = vsel %vm1390_vm5, %v5020_v21, %v5028_v35  ;;  %v5043_v10 = vshrl.u32 %v10031_v27, 16  ;;  %v5054_v56 = vrot.slane %v5052_v38, 2  ;;  %v5046_v52 = vshll.u32 %v10031_v27, 16  ;;  %v8399_v2 = vld [vmem:[%s11175_s4 + $0x220] ss:$8 sps:$4 sm:$0xff]  }
 0x379   : > { %v5036_v55 = vor.u32 %v5035_v34, %v5034_v16  ;;  %v10178_v33 = vsel %vm1390_vm5, %v5032_v5, %v5040_v17  ;;  %v5057_v31 = vrot.slane %v5055_v7, 3  ;;  %3641 = vmatmul.mubr.bf16.gmra.mrb[8].mxu1 %v9629_v53  ;;  %v8404_v34 = vld [vmem:[%s11175_s4 + $0x234] ss:$8 sps:$4 sm:$0xff]   ;;  %v10211_v38 = vld [vmem:[#allocation2 + $0x20] sm:$0xff] }
 0x37a   : > { %v5045_v21 = vrot.slane %v5043_v10, 2  ;;  %v5048_v62 = vrot.slane %v5046_v52, 3  ;;  %7183 = vmatprep.mubr.msk.bf16.mxu1 %vm3286_vm9, %v9664_v11  ;;  %3917 = vmatpush1.bf16.msra.mxu1 %v8393_v37  ;;  %v8402_v37 = vld [vmem:[%s11175_s4 + $0x230] ss:$8 sps:$4 sm:$0xff]   ;;  %v8407_v7 = vld [vmem:[%s11175_s4 + $0x244] ss:$8 sps:$4 sm:$0xff]  }
 0x37b   : > { %v10182_v23 = vsel %vm1390_vm5, %v5028_v35, %v5036_v55  ;;  %v10190_v5 = vor.u32 %v5057_v31, %v5054_v56  ;;  %3918 = vmatprep.subr.bf16.mxu1 %v8398_v8  ;;  %v10226_v10 = vld [vmem:[#allocation2 + $0x30] sm:$0xff]  ;;  %v3681_v8 = vld [vmem:[#allocation2] sm:$0xee]  ;;  %v10229_v56 = vld [vmem:[#allocation2 + $0x28] sm:$0xff] }
 0x37c   : > { %v10195_v35 = vor.u32 %v5048_v62, %v5045_v21  ;;  %v8665_v21 = vld [vmem:[#allocation2 + $0x8] sm:$0xff]  ;;  %v10268_v31 = vld [vmem:[#allocation2 + $0x60] sm:$0xff] }
 0x37d   : > { %v10199_v25 = vsel %vm1390_vm5, %v5040_v17, %v10190_v5  ;;  %v10214_v17 = vld [vmem:[#allocation2 + $0x18] sm:$0xff]  ;;  %v7211_v62 = vcombine.high %v3681_v8, %v8665_v21 }
 0x37e   : > { %v10203_v16 = vsel %vm1390_vm5, %v5036_v55, %v10195_v35  ;;  %3919 = vmatpush1.bf16.msra.mxu1 %v8396_v39  ;;  %v3722_v39 = vrot.slane %v9512_v4, 1  ;;  %v3719_v4 = vrot.slane %v9509_v60, 1  ;;  %v8408_v60 = vld [vmem:[%s11175_s4 + $0x250] ss:$8 sps:$4 sm:$0xff]   ;;  %v8416_v55 = vld [vmem:[%s11175_s4 + $0x274] ss:$8 sps:$4 sm:$0xff]  }
 0x37f   : > { %3920 = vmatprep.subr.bf16.mxu1 %v8401_v24  ;;  %v3721_v24 = vrot.slane %v7211_v62, 1  ;;  %v3726_v62 = vrot.slane %v9541_v54, 1  ;;  %v10263_v54 = vld [vmem:[#allocation2 + $0x50] sm:$0xff] }
 0x380   : > { %11262 = vst [vmem:[#allocation19_spill] sm:$0xff] %v10263_v54 }
 0x381   : > { %3651 = vmatmul.mubr.bf16.gmra.mrb[12].mxu1 %v9668_v42 }
 0x382   : > { %7184 = vmatprep.mubr.msk.bf16.mxu1 %vm3286_vm9, %v9720_v49  ;;  %3921 = vmatpush1.bf16.msra.mxu1 %v8399_v2  ;;  %v10238_v2 = vld [vmem:[#allocation2 + $0x40] sm:$0xff] }
 0x383   : > { %3922 = vmatprep.subr.bf16.mxu1 %v8404_v34  ;;  %11261 = vst [vmem:[#allocation18_spill] sm:$0xff] %v10238_v2  ;;  %v3723_v34 = vsel %vm676_vm2, %v3721_v24, %v3722_v39  ;;  %v8414_v2 = vld [vmem:[%s11175_s4 + $0x270] ss:$8 sps:$4 sm:$0xff]  }
 0x386   : > { %3923 = vmatpush1.bf16.msra.mxu1 %v8402_v37  ;;  %v10242_v37 = vld [vmem:[#allocation2 + $0x38] sm:$0xff] }
 0x387   : > { %4444 = vmatprep.subr.bf16.mxu1 %v8407_v7  ;;  %v10278_v7 = vld [vmem:[#allocation2 + $0x58] sm:$0xff] }
 0x389   : > { %3661 = vmatmul.mubr.bf16.gmra.mrb[16].mxu1 %v9724_v63 }
 0x38a   : > { %7185 = vmatprep.mubr.msk.bf16.mxu1 %vm3286_vm9, %v9755_v58  ;;  %v7210_v58 = vcombine.low %v3681_v8, %v8665_v21  ;;  %v8410_v8 = vld [vmem:[%s11175_s4 + $0x254] ss:$8 sps:$4 sm:$0xff]  }
 0x38c   : > { %v3718_v24 = vrot.slane %v7210_v58, 1  ;;  %v8413_v58 = vld [vmem:[%s11175_s4 + $0x264] ss:$8 sps:$4 sm:$0xff]  }
 0x38e   : > { %v3720_v21 = vsel %vm676_vm2, %v3718_v24, %v3719_v4  ;;  %v10270_v24 = vld [vmem:[#allocation2 + $0x70] sm:$0xff] }
 0x391   : > { %3671 = vmatmul.mubr.bf16.gmra.mrb[20].mxu1 %v9758_v3  ;;  %v8405_v3 = vld [vmem:[%s11175_s4 + $0x240] ss:$8 sps:$4 sm:$0xff]  }
 0x392   : > { %7238 = vmatprep.mubr.msk.bf16.mxu1 %vm3286_vm9, %v3723_v34  ;;  %v3727_v34 = vsel %vm676_vm2, %v3722_v39, %v3726_v62  ;;  %v3724_v39 = vrot.slane %v9545_v57, 1  ;;  %v8411_v57 = vld [vmem:[%s11175_s4 + $0x260] ss:$8 sps:$4 sm:$0xff]  }
 0x394   : > { %v3725_v52 = vsel %vm676_vm2, %v3719_v4, %v3724_v39  ;;  %v8422_v4 = vld [vmem:[%s11175_s4 + $0x294] ss:$8 sps:$4 sm:$0xff]  }
 0x399   : > { %3933 = vmatmul.mubr.bf16.vlgmr.msra.gmra.mrb[24].mxu1 %v3720_v21  ;;  %v7595_v21 = vcombine.high %v10278_v7, %v10268_v31 }
 0x39a   : > { %4445 = vmatpush1.bf16.msra.mxu1 %v8405_v3  ;;  %7239 = vmatprep.mubr.msk.bf16.mxu1 %vm3286_vm9, %v3727_v34  ;;  %v10273_v3 = vld [vmem:[#allocation2 + $0x48] sm:$0xff]  ;;  %v3730_v34 = vrot.slane %v9574_v51, 1  ;;  %v3728_v51 = vrot.slane %v9578_v45, 1  ;;  %v8420_v45 = vld [vmem:[%s11175_s4 + $0x290] ss:$8 sps:$4 sm:$0xff]  }
 0x39b   : > { %4446 = vmatprep.subr.bf16.mxu1 %v8410_v8  ;;  %v10280_v8 = vld [vmem:[#allocation2 + $0x68] sm:$0xff] }
 0x39c   : > { %v3731_v54 = vsel %vm676_vm2, %v3726_v62, %v3730_v34 }
 0x39e   : > { %4447 = vmatpush1.bf16.msra.mxu1 %v8408_v60  ;;  %v3734_v60 = vrot.slane %v9621_v12, 1  ;;  %v8425_v12 = vld [vmem:[%s11175_s4 + $0x2a4] ss:$8 sps:$4 sm:$0xff]  }
 0x39f   : > { %4448 = vmatprep.subr.bf16.mxu1 %v8413_v58  ;;  %v8419_v58 = vld [vmem:[%s11175_s4 + $0x284] ss:$8 sps:$4 sm:$0xff]  }
 0x3a0   : > { %v3735_v62 = vsel %vm676_vm2, %v3730_v34, %v3734_v60  ;;  %v8428_v34 = vld [vmem:[%s11175_s4 + $0x2b4] ss:$8 sps:$4 sm:$0xff]  }
 0x3a1   : > { %3943 = vmatmul.mubr.bf16.gmra.mrb[28].mxu1 %v3725_v52  ;;  %v8417_v52 = vld [vmem:[%s11175_s4 + $0x280] ss:$8 sps:$4 sm:$0xff]  }
 0x3a2   : > { %7240 = vmatprep.mubr.msk.bf16.mxu1 %vm3286_vm9, %v3731_v54  ;;  %4449 = vmatpush1.bf16.msra.mxu1 %v8411_v57  ;;  %v3738_v54 = vrot.slane %v9664_v11, 1  ;;  %v8432_v11 = vld [vmem:[%s11175_s4 + $0x2c4] ss:$8 sps:$4 sm:$0xff]  }
 0x3a3   : > { %4450 = vmatprep.subr.bf16.mxu1 %v8416_v55  ;;  %v3729_v55 = vsel %vm676_vm2, %v3724_v39, %v3728_v51  ;;  %v8423_v39 = vld [vmem:[%s11175_s4 + $0x2a0] ss:$8 sps:$4 sm:$0xff]  }
 0x3a6   : > { %4451 = vmatpush1.bf16.msra.mxu1 %v8414_v2  ;;  %v3732_v2 = vrot.slane %v9629_v53, 1  ;;  %v8426_v53 = vld [vmem:[%s11175_s4 + $0x2b0] ss:$8 sps:$4 sm:$0xff]  }
 0x3a7   : > { %4452 = vmatprep.subr.bf16.mxu1 %v8419_v58  ;;  %v3739_v58 = vsel %vm676_vm2, %v3734_v60, %v3738_v54  ;;  %v8430_v60 = vld [vmem:[%s11175_s4 + $0x2c0] ss:$8 sps:$4 sm:$0xff]  }
 0x3a8   : > { %v3733_v57 = vsel %vm676_vm2, %v3728_v51, %v3732_v2  ;;  %v3682_v51 = vld [vmem:[#allocation2 + $0x78] sm:$0x33] }
 0x3a9   : > { %3953 = vmatmul.mubr.bf16.gmra.mrb[0].mxu1 %v3729_v55  ;;  %v8435_v55 = vld [vmem:[%s11175_s4 + $0x2d4] ss:$8 sps:$4 sm:$0xff]  }
 0x3aa   : > { %7241 = vmatprep.mubr.msk.bf16.mxu1 %vm3286_vm9, %v3735_v62  ;;  %4453 = vmatpush1.bf16.msra.mxu1 %v8417_v52  ;;  %v3736_v52 = vrot.slane %v9668_v42, 1  ;;  %v7213_v42 = vcombine.high %v9752_v6, %v3682_v51 }
 0x3ab   : > { %4454 = vmatprep.subr.bf16.mxu1 %v8422_v4  ;;  %v3742_v4 = vrot.slane %v9720_v49, 1  ;;  %v8433_v49 = vld [vmem:[%s11175_s4 + $0x2d0] ss:$8 sps:$4 sm:$0xff]  }
 0x3ac   : > { %v3737_v62 = vsel %vm676_vm2, %v3732_v2, %v3736_v52  ;;  %v3746_v2 = vrot.slane %v7213_v42, 1 }
 0x3ae   : > { %4455 = vmatpush1.bf16.msra.mxu1 %v8420_v45  ;;  %v3743_v45 = vsel %vm676_vm2, %v3738_v54, %v3742_v4  ;;  %v8437_v54 = vld [vmem:[%s11175_s4 + $0x2e0] ss:$8 sps:$4 sm:$0xff]  }
 0x3af   : > { %4456 = vmatprep.subr.bf16.mxu1 %v8425_v12  ;;  %v8439_v12 = vld [vmem:[%s11175_s4 + $0x2e4] ss:$8 sps:$4 sm:$0xff]  }
 0x3b1   : > { %3963 = vmatmul.mubr.bf16.gmra.mrb[4].mxu1 %v3733_v57 }
 0x3b2   : > { %7242 = vmatprep.mubr.msk.bf16.mxu1 %vm3286_vm9, %v3739_v58  ;;  %4457 = vmatpush1.bf16.msra.mxu1 %v8423_v39  ;;  %v3740_v39 = vrot.slane %v9724_v63, 1  ;;  %v7212_v58 = vcombine.low %v9752_v6, %v3682_v51  ;;  %v4045_v63 = vld [vmem:[#allocation2 + $0x8] sm:$0xee] }
 0x3b3   : > { %4458 = vmatprep.subr.bf16.mxu1 %v8428_v34  ;;  %v8442_v34 = vld [vmem:[%s11175_s4 + $0x2f4] ss:$8 sps:$4 sm:$0xff]   ;;  %v8445_v6 = vld [vmem:[%s11175_s4 + $0x304] ss:$8 sps:$4 sm:$0xff]  }
 0x3b4   : > { %v3741_v57 = vsel %vm676_vm2, %v3736_v52, %v3740_v39  ;;  %v3744_v52 = vrot.slane %v7212_v58, 1 }
 0x3b6   : > { %4459 = vmatpush1.bf16.msra.mxu1 %v8426_v53  ;;  %v3747_v53 = vsel %vm676_vm2, %v3742_v4, %v3746_v2 }
 0x3b7   : > { %4460 = vmatprep.subr.bf16.mxu1 %v8432_v11  ;;  %v8440_v11 = vld [vmem:[%s11175_s4 + $0x2f0] ss:$8 sps:$4 sm:$0xff]  }
 0x3b9   : > { %3973 = vmatmul.mubr.bf16.gmra.mrb[8].mxu1 %v3737_v62  ;;  %v3745_v62 = vsel %vm676_vm2, %v3740_v39, %v3744_v52  ;;  %v8443_v39 = vld [vmem:[%s11175_s4 + $0x300] ss:$8 sps:$4 sm:$0xff]   ;;  %vm6827_vm2 = vcmask 785412  }
 0x3ba   : > { %7243 = vmatprep.mubr.msk.bf16.mxu1 %vm3286_vm9, %v3743_v45  ;;  %4461 = vmatpush1.bf16.msra.mxu1 %v8430_v60  ;;  %v10375_v60 = vld [vmem:[#allocation2 + $0x10] sm:$0xff] }
 0x3bb   : > { %4462 = vmatprep.subr.bf16.mxu1 %v8435_v55  ;;  %v7271_v55 = vcombine.high %v4045_v63, %v10375_v60  ;;  %v7270_v45 = vcombine.low %v4045_v63, %v10375_v60  ;;  %v8448_v63 = vld [vmem:[%s11175_s4 + $0x314] ss:$8 sps:$4 sm:$0xff]  }
 0x3bd   : > { %v4168_v4 = vshrl.u32 %v7271_v55, 16  ;;  %v4171_v51 = vshll.u32 %v7271_v55, 16  ;;  %v8451_v55 = vld [vmem:[%s11175_s4 + $0x324] ss:$8 sps:$4 sm:$0xff]  }
 0x3be   : > { %4463 = vmatpush1.bf16.msra.mxu1 %v8433_v49 }
 0x3bf   : > { %4464 = vmatprep.subr.bf16.mxu1 %v8439_v12  ;;  %v4170_v42 = vrot.slane %v4168_v4, 1  ;;  %v4173_v49 = vrot.slane %v4171_v51, 2  ;;  %v4151_v12 = vshrl.u32 %v7270_v45, 16  ;;  %v8456_v4 = vld [vmem:[%s11175_s4 + $0x340] ss:$8 sps:$4 sm:$0xff]  }
 0x3c1   : > { %3983 = vmatmul.mubr.bf16.gmra.mrb[12].mxu1 %v3741_v57  ;;  %v4153_v58 = vrot.slane %v4151_v12, 1  ;;  %v8471_v12 = vld [vmem:[%s11175_s4 + $0x374] ss:$8 sps:$4 sm:$0xff]  }
 0x3c2   : > { %7244 = vmatprep.mubr.msk.bf16.mxu1 %vm3286_vm9, %v3747_v53  ;;  %4465 = vmatpush1.bf16.msra.mxu1 %v8437_v54  ;;  %v4154_v54 = vshll.u32 %v7270_v45, 16 }
 0x3c3   : > { %4466 = vmatprep.subr.bf16.mxu1 %v8442_v34  ;;  %v4174_v34 = vor.u32 %v4173_v49, %v4170_v42  ;;  %v4060_v49 = vld [vmem:[#allocation2 + $0x80] sm:$0x33] }
 0x3c4   : > { %v4156_v53 = vrot.slane %v4154_v54, 2  ;;  %v7285_v54 = vcombine.high %v10017_v15, %v4060_v49 }
 0x3c5   : > { %v4183_v57 = vsel %vm930_vm4, %v4174_v34, %v9832_v40  ;;  %v8446_v40 = vld [vmem:[%s11175_s4 + $0x310] ss:$8 sps:$4 sm:$0xff]  }
 0x3c6   : > { %4467 = vmatpush1.bf16.msra.mxu1 %v8440_v11  ;;  %v8469_v34 = vld [vmem:[%s11175_s4 + $0x370] ss:$8 sps:$4 sm:$0xff]  }
 0x3c7   : > { %4808 = vmatprep.subr.bf16.mxu1 %v8445_v6  ;;  %v8449_v6 = vld [vmem:[%s11175_s4 + $0x320] ss:$8 sps:$4 sm:$0xff]  }
 0x3c9   : > { %3993 = vmatmul.mubr.bf16.gmra.mrb[16].mxu1 %v3745_v62  ;;  %v8466_v62 = vld [vmem:[%s11175_s4 + $0x364] ss:$8 sps:$4 sm:$0xff]  }
 0x3ca   : > { %7245 = vmatprep.mubr.msk.bf16.mxu1 %vm3286_vm9, %v3746_v2  ;;  %v4157_v2 = vor.u32 %v4156_v53, %v4153_v58  ;;  %v8476_v58 = vld [vmem:[%s11175_s4 + $0x384] ss:$8 sps:$4 sm:$0xff]  }
 0x3cc   : > { %v4166_v11 = vsel %vm930_vm4, %v4157_v2, %v9839_v44  ;;  %v8454_v44 = vld [vmem:[%s11175_s4 + $0x334] ss:$8 sps:$4 sm:$0xff]   ;;  %v4287_v2 = vshll.u32 %v7285_v54, 16 }
 0x3d1   : > { %4003 = vmatmul.mubr.bf16.gmra.mrb[20].mxu1 %v3744_v52  ;;  %v8458_v52 = vld [vmem:[%s11175_s4 + $0x344] ss:$8 sps:$4 sm:$0xff]  }
 0x3d2   : > { %7310 = vmatprep.mubr.msk.bf16.mxu1 %vm3286_vm9, %v4183_v57 }
 0x3d9   : > { %4477 = vmatmul.mubr.bf16.vlgmr.msra.gmra.mrb[24].mxu1 %v4166_v11  ;;  %v8479_v11 = vld [vmem:[%s11175_s4 + $0x394] ss:$8 sps:$4 sm:$0xff]  }
 0x3da   : > { %4809 = vmatpush1.bf16.msra.mxu1 %v8443_v39  ;;  %7311 = vmatprep.mubr.msk.bf16.mxu1 %vm3286_vm9, %v9858_v18  ;;  %v8452_v18 = vld [vmem:[%s11175_s4 + $0x330] ss:$8 sps:$4 sm:$0xff]   ;;  %v4284_v39 = vshrl.u32 %v7285_v54, 16 }
 0x3db   : > { %4810 = vmatprep.subr.bf16.mxu1 %v8448_v63 }
 0x3de   : > { %4811 = vmatpush1.bf16.msra.mxu1 %v8446_v40  ;;  %v7284_v40 = vcombine.low %v10017_v15, %v4060_v49  ;;  %v8489_v49 = vld [vmem:[%s11175_s4 + $0x3c4] ss:$8 sps:$4 sm:$0xff]  }
 0x3df   : > { %4812 = vmatprep.subr.bf16.mxu1 %v8451_v55  ;;  %v4286_v55 = vrot.slane %v4284_v39, 1 }
 0x3e1   : > { %4487 = vmatmul.mubr.bf16.gmra.mrb[28].mxu1 %v9866_v14  ;;  %v8463_v14 = vld [vmem:[%s11175_s4 + $0x354] ss:$8 sps:$4 sm:$0xff]  }
 0x3e2   : > { %7312 = vmatprep.mubr.msk.bf16.mxu1 %vm3286_vm9, %v9901_v20  ;;  %4813 = vmatpush1.bf16.msra.mxu1 %v8449_v6  ;;  %v8461_v20 = vld [vmem:[%s11175_s4 + $0x350] ss:$8 sps:$4 sm:$0xff]   ;;  %v4289_v6 = vrot.slane %v4287_v2, 2 }
 0x3e3   : > { %4814 = vmatprep.subr.bf16.mxu1 %v8454_v44  ;;  %v8477_v44 = vld [vmem:[%s11175_s4 + $0x390] ss:$8 sps:$4 sm:$0xff]  }
 0x3e4   : > { %v4290_v15 = vor.u32 %v4289_v6, %v4286_v55  ;;  %v8495_v55 = vld [vmem:[%s11175_s4 + $0x3e4] ss:$8 sps:$4 sm:$0xff]   ;;  %v8498_v6 = vld [vmem:[%s11175_s4 + $0x3f4] ss:$8 sps:$4 sm:$0xff]  }
 0x3e6   : > { %4815 = vmatpush1.bf16.msra.mxu1 %v8452_v18  ;;  %v8483_v18 = vld [vmem:[%s11175_s4 + $0x3a4] ss:$8 sps:$4 sm:$0xff]  }
 0x3e7   : > { %4816 = vmatprep.subr.bf16.mxu1 %v8458_v52  ;;  %v4275_v52 = vshrl.u32 %v7284_v40, 16 }
 0x3e9   : > { %4497 = vmatmul.mubr.bf16.gmra.mrb[0].mxu1 %v9909_v1 }
 0x3ea   : > { %7313 = vmatprep.mubr.msk.bf16.mxu1 %vm3286_vm9, %v9932_v48  ;;  %4817 = vmatpush1.bf16.msra.mxu1 %v8456_v4  ;;  %v8464_v48 = vld [vmem:[%s11175_s4 + $0x360] ss:$8 sps:$4 sm:$0xff]   ;;  %v4278_v4 = vshll.u32 %v7284_v40, 16  ;;  %v11264_v40 = vrot.slane %v9764_v22, 2 }
 0x3eb   : > { %4818 = vmatprep.subr.bf16.mxu1 %v8463_v14  ;;  %v4277_v14 = vrot.slane %v4275_v52, 1  ;;  %v8493_v22 = vld [vmem:[%s11175_s4 + $0x3e0] ss:$8 sps:$4 sm:$0xff]   ;;  %v8501_v52 = vld [vmem:[%s11175_s4 + $0x404] ss:$8 sps:$4 sm:$0xff]  }
 0x3ec   : > { %v10430_v51 = vpop.f32.mrb[32].mxu0 }
 0x3ed   : > { %v10435_v45 = vpop.f32.mrb[33].mxu0 }
 0x3ee   : > { %v10437_v42 = vpop.f32.mrb[34].mxu0  ;;  %4819 = vmatpush1.bf16.msra.mxu1 %v8461_v20  ;;  %v4280_v20 = vrot.slane %v4278_v4, 2  ;;  %v8499_v4 = vld [vmem:[%s11175_s4 + $0x400] ss:$8 sps:$4 sm:$0xff]  }
 0x3ef   : > { %v10439_v1 = vpop.f32.mrb[35].mxu0  ;;  %4820 = vmatprep.subr.bf16.mxu1 %v8466_v62  ;;  %v4291_v62 = vsel %vm930_vm4, %v9965_v47, %v4290_v15  ;;  %v4589_v47 = vld [vmem:[#allocation2 + $0x8] sm:$0xcc] }
 0x3f0   : > { %v10501_v54 = vcombine.high %v4589_v47, %v10375_v60  ;;  %v10508_v2 = vcombine.low %v4589_v47, %v10375_v60  ;;  %v8490_v60 = vld [vmem:[%s11175_s4 + $0x3d0] ss:$8 sps:$4 sm:$0xff]   ;;  %v8514_v47 = vld [vmem:[%s11175_s4 + $0x444] ss:$8 sps:$4 sm:$0xff]  }
 0x3f1   : > { %4507 = vmatmul.mubr.bf16.gmra.mrb[4].mxu1 %v9952_v50 }
 0x3f2   : > { %7314 = vmatprep.mubr.msk.bf16.mxu1 %vm3286_vm9, %v9955_v46  ;;  %4821 = vmatpush1.bf16.msra.mxu1 %v8464_v48  ;;  %v8474_v46 = vld [vmem:[%s11175_s4 + $0x380] ss:$8 sps:$4 sm:$0xff]   ;;  %v8484_v48 = vld [vmem:[%s11175_s4 + $0x3b0] ss:$8 sps:$4 sm:$0xff]  }
 0x3f3   : > { %4822 = vmatprep.subr.bf16.mxu1 %v8471_v12  ;;  %v4281_v12 = vor.u32 %v4280_v20, %v4277_v14  ;;  %v8502_v14 = vld [vmem:[%s11175_s4 + $0x410] ss:$8 sps:$4 sm:$0xff]   ;;  %v8507_v20 = vld [vmem:[%s11175_s4 + $0x424] ss:$8 sps:$4 sm:$0xff]  }
 0x3f4   : > { %v10454_v57 = vpop.f32.mrb[36].mxu0 }
 0x3f5   : > { %v10459_v53 = vpop.f32.mrb[37].mxu0 }
 0x3f6   : > { %v10461_v50 = vpop.f32.mrb[38].mxu0  ;;  %4823 = vmatpush1.bf16.msra.mxu1 %v8469_v34  ;;  %v4629_v34 = vrot.slane %v10501_v54, 2 }
 0x3f7   : > { %v10463_v63 = vpop.f32.mrb[39].mxu0  ;;  %4824 = vmatprep.subr.bf16.mxu1 %v8476_v58  ;;  %v11263_v58 = vrot.slane %v9768_v36, 2 }
 0x3f9   : > { %4517 = vmatmul.mubr.bf16.gmra.mrb[8].mxu1 %v9963_v0  ;;  %v8481_v0 = vld [vmem:[%s11175_s4 + $0x3a0] ss:$8 sps:$4 sm:$0xff]   ;;  %v4631_v39 = vsel %vm1192_vm3, %v4629_v34, %v11263_v58  ;;  %v8517_v58 = vld [vmem:[%s11175_s4 + $0x454] ss:$8 sps:$4 sm:$0xff]  }
 0x3fa   : > { %7315 = vmatprep.mubr.msk.bf16.mxu1 %vm3286_vm9, %v9971_v59  ;;  %4825 = vmatpush1.bf16.msra.mxu1 %v8474_v46  ;;  %v8486_v59 = vld [vmem:[%s11175_s4 + $0x3b4] ss:$8 sps:$4 sm:$0xff]   ;;  %v4626_v46 = vrot.slane %v10508_v2, 2  ;;  %v8512_v34 = vld [vmem:[%s11175_s4 + $0x440] ss:$8 sps:$4 sm:$0xff]  }
 0x3fb   : > { %4826 = vmatprep.subr.bf16.mxu1 %v8479_v11  ;;  %v8492_v11 = vld [vmem:[%s11175_s4 + $0x3d4] ss:$8 sps:$4 sm:$0xff]  }
 0x3fc   : > { %v4628_v36 = vsel %vm1192_vm3, %v4626_v46, %v11264_v40  ;;  %v8515_v46 = vld [vmem:[%s11175_s4 + $0x450] ss:$8 sps:$4 sm:$0xff]   ;;  %v8519_v40 = vld [vmem:[%s11175_s4 + $0x460] ss:$8 sps:$4 sm:$0xff]   ;;  %vm11083_vm3 = vmor %vm6827_vm2, %vm2721_vm8 }
 0x3fe   : > { %4827 = vmatpush1.bf16.msra.mxu1 %v8477_v44  ;;  %v11266_v44 = vld [vmem:[#allocation5_spill] sm:$0xff] }
 0x3ff   : > { %4828 = vmatprep.subr.bf16.mxu1 %v8483_v18  ;;  %v8496_v18 = vld [vmem:[%s11175_s4 + $0x3f0] ss:$8 sps:$4 sm:$0xff]  }
 0x401   : > { %4527 = vmatmul.mubr.bf16.gmra.mrb[12].mxu1 %v9983_v9  ;;  %v4282_v9 = vsel %vm930_vm4, %v9973_v26, %v4281_v12  ;;  %v8487_v26 = vld [vmem:[%s11175_s4 + $0x3c0] ss:$8 sps:$4 sm:$0xff]   ;;  %vm6845_vm4 = vsmask.f32 256 }
 0x402   : > { %7316 = vmatprep.mubr.msk.bf16.mxu1 %vm3286_vm9, %v4291_v62  ;;  %4829 = vmatpush1.bf16.msra.mxu1 %v8481_v0  ;;  %v11267_v0 = vld [vmem:[#allocation6_spill] sm:$0xff]  ;;  %v8505_v62 = vld [vmem:[%s11175_s4 + $0x420] ss:$8 sps:$4 sm:$0xff]  }
 0x403   : > { %4830 = vmatprep.subr.bf16.mxu1 %v8486_v59  ;;  %v11268_v59 = vld [vmem:[#allocation7_spill] sm:$0xff] }
 0x406   : > { %4831 = vmatpush1.bf16.msra.mxu1 %v8484_v48  ;;  %v8510_v48 = vld [vmem:[%s11175_s4 + $0x434] ss:$8 sps:$4 sm:$0xff]  }
 0x407   : > { %5212 = vmatprep.subr.bf16.mxu1 %v8489_v49  ;;  %v11269_v49 = vld [vmem:[#allocation8_spill] sm:$0xff] }
 0x409   : > { %4537 = vmatmul.mubr.bf16.gmra.mrb[16].mxu1 %v4282_v9  ;;  %v8508_v9 = vld [vmem:[%s11175_s4 + $0x430] ss:$8 sps:$4 sm:$0xff]  }
 0x40a   : > { %7317 = vmatprep.mubr.msk.bf16.mxu1 %vm3286_vm9, %v4290_v15  ;;  %v8504_v15 = vld [vmem:[%s11175_s4 + $0x414] ss:$8 sps:$4 sm:$0xff]  }
 0x411   : > { %4547 = vmatmul.mubr.bf16.gmra.mrb[20].mxu1 %v4281_v12  ;;  %v11270_v12 = vld [vmem:[#allocation9_spill] sm:$0xff] }
 0x412   : > { %7370 = vmatprep.mubr.msk.bf16.mxu1 %vm3286_vm9, %v4631_v39  ;;  %v11271_v39 = vld [vmem:[#allocation10_spill] sm:$0xff] }
 0x419   : > { %4841 = vmatmul.mubr.bf16.vlgmr.msra.gmra.mrb[24].mxu1 %v4628_v36  ;;  %v8524_v36 = vld [vmem:[%s11175_s4 + $0x474] ss:$8 sps:$4 sm:$0xff]  }
 0x41a   : > { %5213 = vmatpush1.bf16.msra.mxu1 %v8487_v26  ;;  %7371 = vmatprep.mubr.msk.bf16.mxu1 %vm3286_vm9, %v10000_v43  ;;  %v11265_v43 = vld [vmem:[#allocation4_spill] sm:$0xff]  ;;  %v11272_v26 = vld [vmem:[#allocation11_spill] sm:$0xff] }
 0x41b   : > { %5214 = vmatprep.subr.bf16.mxu1 %v8492_v11  ;;  %v8521_v11 = vld [vmem:[%s11175_s4 + $0x464] ss:$8 sps:$4 sm:$0xff]  }
 0x41e   : > { %5215 = vmatpush1.bf16.msra.mxu1 %v8490_v60  ;;  %v11273_v60 = vld [vmem:[#allocation12_spill] sm:$0xff] }
 0x41f   : > { %5216 = vmatprep.subr.bf16.mxu1 %v8495_v55  ;;  %v11274_v55 = vld [vmem:[#allocation13_spill] sm:$0xff] }
 0x421   : > { %4851 = vmatmul.mubr.bf16.gmra.mrb[28].mxu1 %v11265_v43  ;;  %v4991_v43 = vshrl.u32 %v10501_v54, 16 }
 0x422   : > { %7372 = vmatprep.mubr.msk.bf16.mxu1 %vm3286_vm9, %v11266_v44  ;;  %5217 = vmatpush1.bf16.msra.mxu1 %v8493_v22  ;;  %v8522_v22 = vld [vmem:[%s11175_s4 + $0x470] ss:$8 sps:$4 sm:$0xff]   ;;  %v4994_v44 = vshll.u32 %v10501_v54, 16 }
 0x423   : > { %5218 = vmatprep.subr.bf16.mxu1 %v8498_v6  ;;  %v8527_v6 = vld [vmem:[%s11175_s4 + $0x484] ss:$8 sps:$4 sm:$0xff]  }
 0x426   : > { %5219 = vmatpush1.bf16.msra.mxu1 %v8496_v18  ;;  %v11275_v18 = vld [vmem:[#allocation14_spill] sm:$0xff] }
 0x427   : > { %5220 = vmatprep.subr.bf16.mxu1 %v8501_v52  ;;  %v11276_v52 = vrot.slane %v10028_v30, 2  ;;  %v8525_v30 = vld [vmem:[%s11175_s4 + $0x480] ss:$8 sps:$4 sm:$0xff]  }
 0x429   : > { %4861 = vmatmul.mubr.bf16.gmra.mrb[0].mxu1 %v11267_v0  ;;  %v4979_v0 = vshrl.u32 %v10508_v2, 16 }
 0x42a   : > { %7373 = vmatprep.mubr.msk.bf16.mxu1 %vm3286_vm9, %v11268_v59  ;;  %5221 = vmatpush1.bf16.msra.mxu1 %v8499_v4  ;;  %v4993_v4 = vrot.slane %v4991_v43, 2  ;;  %v4982_v59 = vshll.u32 %v10508_v2, 16  ;;  %v8530_v2 = vld [vmem:[%s11175_s4 + $0x494] ss:$8 sps:$4 sm:$0xff]   ;;  %v8555_v43 = vld [vmem:[%s11175_s4 + $0x520] ss:$8 sps:$4 sm:$0xff]  }
 0x42b   : > { %5222 = vmatprep.subr.bf16.mxu1 %v8504_v15  ;;  %v4996_v15 = vrot.slane %v4994_v44, 3  ;;  %v8567_v44 = vld [vmem:[%s11175_s4 + $0x544] ss:$8 sps:$4 sm:$0xff]  }
 0x42e   : > { %5223 = vmatpush1.bf16.msra.mxu1 %v8502_v14  ;;  %v4997_v14 = vor.u32 %v4996_v15, %v4993_v4  ;;  %v10722_v15 = vcombine.low %v10211_v38, %v10229_v56 }
 0x42f   : > { %5224 = vmatprep.subr.bf16.mxu1 %v8507_v20  ;;  %v11277_v20 = vrot.slane %v10031_v27, 2 }
 0x430   : > { %v5001_v54 = vsel %vm1390_vm5, %v4997_v14, %v10076_v29  ;;  %v8528_v29 = vld [vmem:[%s11175_s4 + $0x490] ss:$8 sps:$4 sm:$0xff]  }
 0x431   : > { %4871 = vmatmul.mubr.bf16.gmra.mrb[4].mxu1 %v11269_v49 }
 0x432   : > { %7374 = vmatprep.mubr.msk.bf16.mxu1 %vm3286_vm9, %v11270_v12  ;;  %5225 = vmatpush1.bf16.msra.mxu1 %v8505_v62  ;;  %v4981_v62 = vrot.slane %v4979_v0, 2  ;;  %v8533_v12 = vld [vmem:[%s11175_s4 + $0x4a4] ss:$8 sps:$4 sm:$0xff]   ;;  %v10728_v0 = vcombine.high %v10226_v10, %v10242_v37 }
 0x433   : > { %5226 = vmatprep.subr.bf16.mxu1 %v8510_v48  ;;  %v4984_v48 = vrot.slane %v4982_v59, 3  ;;  %v5463_v59 = vrot.slane %v10722_v15, 3 }
 0x434   : > { %v5470_v14 = vrot.slane %v10728_v0, 3 }
 0x435   : > { %v4985_v49 = vor.u32 %v4984_v48, %v4981_v62  ;;  %v10746_v48 = vcombine.low %v10226_v10, %v10242_v37 }
 0x436   : > { %5227 = vmatpush1.bf16.msra.mxu1 %v8508_v9  ;;  %v8531_v9 = vld [vmem:[%s11175_s4 + $0x4a0] ss:$8 sps:$4 sm:$0xff]  }
 0x437   : > { %5228 = vmatprep.subr.bf16.mxu1 %v8514_v47  ;;  %v4989_v27 = vsel %vm1390_vm5, %v4985_v49, %v10095_v41  ;;  %v8536_v41 = vld [vmem:[%s11175_s4 + $0x4b4] ss:$8 sps:$4 sm:$0xff]   ;;  %v11279_v47 = vld [vmem:[#allocation16_spill] sm:$0xff]  ;;  %vm6847_vm5 = vcmask 782340  }
 0x438   : > { %v11281_v49 = vld [vmem:[#allocation18_spill] sm:$0xff]  ;;  %vm6848_vm8 = vmand %vm6847_vm5, %vm1868_vm7 }
 0x439   : > { %4881 = vmatmul.mubr.bf16.gmra.mrb[8].mxu1 %v11271_v39  ;;  %v8537_v39 = vld [vmem:[%s11175_s4 + $0x4c0] ss:$8 sps:$4 sm:$0xff]  }
 0x43a   : > { %7375 = vmatprep.mubr.msk.bf16.mxu1 %vm3286_vm9, %v11272_v26  ;;  %5229 = vmatpush1.bf16.msra.mxu1 %v8512_v34  ;;  %v8534_v34 = vld [vmem:[%s11175_s4 + $0x4b0] ss:$8 sps:$4 sm:$0xff]   ;;  %v8542_v26 = vld [vmem:[%s11175_s4 + $0x4d4] ss:$8 sps:$4 sm:$0xff]  }
 0x43b   : > { %5230 = vmatprep.subr.bf16.mxu1 %v8517_v58  ;;  %v8539_v58 = vld [vmem:[%s11175_s4 + $0x4c4] ss:$8 sps:$4 sm:$0xff]  }
 0x43e   : > { %5231 = vmatpush1.bf16.msra.mxu1 %v8515_v46  ;;  %v11280_v46 = vld [vmem:[#allocation17_spill] sm:$0xff] }
 0x43f   : > { %5232 = vmatprep.subr.bf16.mxu1 %v8521_v11  ;;  %v8540_v11 = vld [vmem:[%s11175_s4 + $0x4d0] ss:$8 sps:$4 sm:$0xff]  }
 0x441   : > { %4891 = vmatmul.mubr.bf16.gmra.mrb[12].mxu1 %v11273_v60  ;;  %v8546_v60 = vld [vmem:[%s11175_s4 + $0x4f0] ss:$8 sps:$4 sm:$0xff]  }
 0x442   : > { %7376 = vmatprep.mubr.msk.bf16.mxu1 %vm3286_vm9, %v11274_v55  ;;  %5233 = vmatpush1.bf16.msra.mxu1 %v8519_v40  ;;  %v8545_v40 = vld [vmem:[%s11175_s4 + $0x4e4] ss:$8 sps:$4 sm:$0xff]  }
 0x443   : > { %5234 = vmatprep.subr.bf16.mxu1 %v8524_v36  ;;  %v8543_v36 = vld [vmem:[%s11175_s4 + $0x4e0] ss:$8 sps:$4 sm:$0xff]   ;;  %v8551_v55 = vld [vmem:[%s11175_s4 + $0x504] ss:$8 sps:$4 sm:$0xff]  }
 0x446   : > { %5235 = vmatpush1.bf16.msra.mxu1 %v8522_v22  ;;  %v8549_v22 = vld [vmem:[%s11175_s4 + $0x500] ss:$8 sps:$4 sm:$0xff]  }
 0x447   : > { %5644 = vmatprep.subr.bf16.mxu1 %v8527_v6  ;;  %v8557_v6 = vld [vmem:[%s11175_s4 + $0x524] ss:$8 sps:$4 sm:$0xff]  }
 0x449   : > { %4901 = vmatmul.mubr.bf16.gmra.mrb[16].mxu1 %v11275_v18 }
 0x44a   : > { %7377 = vmatprep.mubr.msk.bf16.mxu1 %vm3286_vm9, %v11276_v52 }
 0x451   : > { %4911 = vmatmul.mubr.bf16.gmra.mrb[20].mxu1 %v11277_v20  ;;  %v8565_v20 = vld [vmem:[%s11175_s4 + $0x540] ss:$8 sps:$4 sm:$0xff]  }
 0x452   : > { %7426 = vmatprep.mubr.msk.bf16.mxu1 %vm3286_vm9, %v5001_v54  ;;  %v8571_v54 = vld [vmem:[%s11175_s4 + $0x554] ss:$8 sps:$4 sm:$0xff]  }
 0x459   : > { %5245 = vmatmul.mubr.bf16.vlgmr.msra.gmra.mrb[24].mxu1 %v4989_v27  ;;  %v8569_v27 = vld [vmem:[%s11175_s4 + $0x550] ss:$8 sps:$4 sm:$0xff]  }
 0x45a   : > { %5645 = vmatpush1.bf16.msra.mxu1 %v8525_v30  ;;  %7427 = vmatprep.mubr.msk.bf16.mxu1 %vm3286_vm9, %v10111_v13  ;;  %v11278_v13 = vld [vmem:[#allocation15_spill] sm:$0xff] }
 0x45b   : > { %5646 = vmatprep.subr.bf16.mxu1 %v8530_v2  ;;  %v10751_v2 = vcombine.high %v11281_v49, %v10273_v3 }
 0x45e   : > { %5647 = vmatpush1.bf16.msra.mxu1 %v8528_v29  ;;  %v8576_v29 = vld [vmem:[%s11175_s4 + $0x564] ss:$8 sps:$4 sm:$0xff]  }
 0x45f   : > { %5648 = vmatprep.subr.bf16.mxu1 %v8533_v12  ;;  %v5468_v12 = vrot.slane %v10746_v48, 3 }
 0x461   : > { %5255 = vmatmul.mubr.bf16.gmra.mrb[28].mxu1 %v11278_v13  ;;  %v8579_v13 = vld [vmem:[%s11175_s4 + $0x574] ss:$8 sps:$4 sm:$0xff]  }
 0x462   : > { %7428 = vmatprep.mubr.msk.bf16.mxu1 %vm3286_vm9, %v11279_v47  ;;  %5649 = vmatpush1.bf16.msra.mxu1 %v8531_v9  ;;  %v5474_v9 = vrot.slane %v10751_v2, 3  ;;  %v5469_v47 = vsel %vm1670_vm6, %v5463_v59, %v5468_v12 }
 0x463   : > { %5650 = vmatprep.subr.bf16.mxu1 %v8536_v41  ;;  %v8574_v41 = vld [vmem:[%s11175_s4 + $0x560] ss:$8 sps:$4 sm:$0xff]  }
 0x466   : > { %5651 = vmatpush1.bf16.msra.mxu1 %v8534_v34  ;;  %v10771_v34 = vcombine.low %v11281_v49, %v10273_v3 }
 0x467   : > { %5652 = vmatprep.subr.bf16.mxu1 %v8539_v58  ;;  %v5475_v58 = vsel %vm1670_vm6, %v5470_v14, %v5474_v9 }
 0x469   : > { %5265 = vmatmul.mubr.bf16.gmra.mrb[0].mxu1 %v11280_v46  ;;  %v8577_v46 = vld [vmem:[%s11175_s4 + $0x570] ss:$8 sps:$4 sm:$0xff]  }
 0x46a   : > { %7429 = vmatprep.mubr.msk.bf16.mxu1 %vm3286_vm9, %v10153_v19  ;;  %5653 = vmatpush1.bf16.msra.mxu1 %v8537_v39  ;;  %v8548_v19 = vld [vmem:[%s11175_s4 + $0x4f4] ss:$8 sps:$4 sm:$0xff]   ;;  %v11282_v39 = vld [vmem:[#allocation19_spill] sm:$0xff] }
 0x46b   : > { %5654 = vmatprep.subr.bf16.mxu1 %v8542_v26  ;;  %v10776_v26 = vcombine.high %v11282_v39, %v10278_v7 }
 0x46e   : > { %5655 = vmatpush1.bf16.msra.mxu1 %v8540_v11  ;;  %v8584_v11 = vld [vmem:[%s11175_s4 + $0x584] ss:$8 sps:$4 sm:$0xff]  }
 0x46f   : > { %5656 = vmatprep.subr.bf16.mxu1 %v8545_v40  ;;  %v5472_v40 = vrot.slane %v10771_v34, 3 }
 0x471   : > { %5275 = vmatmul.mubr.bf16.gmra.mrb[4].mxu1 %v10160_v61  ;;  %v8554_v61 = vld [vmem:[%s11175_s4 + $0x514] ss:$8 sps:$4 sm:$0xff]  }
 0x472   : > { %7430 = vmatprep.mubr.msk.bf16.mxu1 %vm3286_vm9, %v10163_v28  ;;  %5657 = vmatpush1.bf16.msra.mxu1 %v8543_v36  ;;  %v8552_v28 = vld [vmem:[%s11175_s4 + $0x510] ss:$8 sps:$4 sm:$0xff]   ;;  %v5478_v36 = vrot.slane %v10776_v26, 3 }
 0x473   : > { %5658 = vmatprep.subr.bf16.mxu1 %v8548_v19  ;;  %v8582_v19 = vld [vmem:[%s11175_s4 + $0x580] ss:$8 sps:$4 sm:$0xff]  }
 0x476   : > { %5659 = vmatpush1.bf16.msra.mxu1 %v8546_v60  ;;  %v8589_v60 = vld [vmem:[%s11175_s4 + $0x594] ss:$8 sps:$4 sm:$0xff]  }
 0x477   : > { %5660 = vmatprep.subr.bf16.mxu1 %v8551_v55  ;;  %v5473_v55 = vsel %vm1670_vm6, %v5468_v12, %v5472_v40  ;;  %v8605_v12 = vld [vmem:[%s11175_s4 + $0x5d4] ss:$8 sps:$4 sm:$0xff]  }
 0x479   : > { %5285 = vmatmul.mubr.bf16.gmra.mrb[8].mxu1 %v10170_v32  ;;  %v8564_v32 = vld [vmem:[%s11175_s4 + $0x534] ss:$8 sps:$4 sm:$0xff]  }
 0x47a   : > { %7431 = vmatprep.mubr.msk.bf16.mxu1 %vm3286_vm9, %v10178_v33  ;;  %5661 = vmatpush1.bf16.msra.mxu1 %v8549_v22  ;;  %v8562_v33 = vld [vmem:[%s11175_s4 + $0x530] ss:$8 sps:$4 sm:$0xff]   ;;  %v10796_v22 = vcombine.low %v11282_v39, %v10278_v7 }
 0x47b   : > { %5662 = vmatprep.subr.bf16.mxu1 %v8554_v61  ;;  %v5479_v61 = vsel %vm1670_vm6, %v5474_v9, %v5478_v36 }
 0x47e   : > { %5663 = vmatpush1.bf16.msra.mxu1 %v8552_v28  ;;  %v10801_v28 = vcombine.high %v10268_v31, %v10280_v8 }
 0x47f   : > { %5664 = vmatprep.subr.bf16.mxu1 %v8557_v6  ;;  %v8587_v6 = vld [vmem:[%s11175_s4 + $0x590] ss:$8 sps:$4 sm:$0xff]  }
 0x481   : > { %5295 = vmatmul.mubr.bf16.gmra.mrb[12].mxu1 %v10182_v23  ;;  %v10711_v23 = vcombine.high %v10211_v38, %v10229_v56 }
 0x482   : > { %7432 = vmatprep.mubr.msk.bf16.mxu1 %vm3286_vm9, %v10199_v25  ;;  %5665 = vmatpush1.bf16.msra.mxu1 %v8555_v43  ;;  %v5357_v25 = vld [vmem:[#allocation2 + $0x10] sm:$0x88]  ;;  %v8592_v43 = vld [vmem:[%s11175_s4 + $0x5a4] ss:$8 sps:$4 sm:$0xff]  }
 0x483   : > { %5666 = vmatprep.subr.bf16.mxu1 %v8564_v32  ;;  %v10716_v18 = vcombine.high %v5357_v25, %v10214_v17  ;;  %v5466_v52 = vrot.slane %v10711_v23, 3  ;;  %v5476_v32 = vrot.slane %v10796_v22, 3 }
 0x485   : > { %v5465_v4 = vrot.slane %v10716_v18, 3  ;;  %v5471_v30 = vsel %vm1670_vm6, %v5466_v52, %v5470_v14 }
 0x486   : > { %5667 = vmatpush1.bf16.msra.mxu1 %v8562_v33  ;;  %v5482_v33 = vrot.slane %v10801_v28, 3 }
 0x487   : > { %6108 = vmatprep.subr.bf16.mxu1 %v8567_v44  ;;  %v8590_v44 = vld [vmem:[%s11175_s4 + $0x5a0] ss:$8 sps:$4 sm:$0xff]  }
 0x489   : > { %5305 = vmatmul.mubr.bf16.gmra.mrb[16].mxu1 %v10203_v16  ;;  %v5467_v16 = vsel %vm1670_vm6, %v5465_v4, %v5466_v52  ;;  %v5477_v52 = vsel %vm1670_vm6, %v5472_v40, %v5476_v32  ;;  %v10821_v4 = vcombine.low %v10268_v31, %v10280_v8 }
 0x48a   : > { %7433 = vmatprep.mubr.msk.bf16.mxu1 %vm3286_vm9, %v10190_v5  ;;  %v10731_v5 = vcombine.low %v5357_v25, %v10214_v17  ;;  %v8597_v25 = vld [vmem:[%s11175_s4 + $0x5b4] ss:$8 sps:$4 sm:$0xff]  }
 0x491   : > { %5315 = vmatmul.mubr.bf16.gmra.mrb[20].mxu1 %v10195_v35  ;;  %v5462_v35 = vrot.slane %v10731_v5, 3 }
 0x492   : > { %7498 = vmatprep.mubr.msk.bf16.mxu1 %vm3286_vm9, %v5467_v16  ;;  %v5483_v16 = vsel %vm1670_vm6, %v5478_v36, %v5482_v33  ;;  %v8607_v36 = vld [vmem:[%s11175_s4 + $0x5e0] ss:$8 sps:$4 sm:$0xff]  }
 0x493   : > { %v5464_v62 = vsel %vm1670_vm6, %v5462_v35, %v5463_v59  ;;  %v8667_v59 = vld [vmem:[#allocation2 + $0x78] sm:$0xff]  ;;  %v8602_v35 = vld [vmem:[%s11175_s4 + $0x5c4] ss:$8 sps:$4 sm:$0xff]  }
 0x494   : > { %v10825_v14 = vcombine.high %v10270_v24, %v8667_v59 }
 0x499   : > { %5677 = vmatmul.mubr.bf16.vlgmr.msra.gmra.mrb[24].mxu1 %v5464_v62  ;;  %v5486_v62 = vrot.slane %v10825_v14, 3 }
 0x49a   : > { %6109 = vmatpush1.bf16.msra.mxu1 %v8565_v20  ;;  %7499 = vmatprep.mubr.msk.bf16.mxu1 %vm3286_vm9, %v5471_v30  ;;  %v8595_v20 = vld [vmem:[%s11175_s4 + $0x5b0] ss:$8 sps:$4 sm:$0xff]   ;;  %v10836_v30 = vld [vmem:[#allocation2 + $0x80] sm:$0xff] }
 0x49b   : > { %6110 = vmatprep.subr.bf16.mxu1 %v8571_v54  ;;  %v5480_v54 = vrot.slane %v10821_v4, 3 }
 0x49d   : > { %v5481_v9 = vsel %vm1670_vm6, %v5476_v32, %v5480_v54 }
 0x49e   : > { %6111 = vmatpush1.bf16.msra.mxu1 %v8569_v27  ;;  %v10838_v27 = vld [vmem:[#allocation2 + $0x88] sm:$0xff] }
 0x49f   : > { %6112 = vmatprep.subr.bf16.mxu1 %v8576_v29  ;;  %v8600_v29 = vld [vmem:[%s11175_s4 + $0x5c0] ss:$8 sps:$4 sm:$0xff]  }
 0x4a1   : > { %5687 = vmatmul.mubr.bf16.gmra.mrb[28].mxu1 %v5469_v47  ;;  %v10853_v47 = vcombine.high %v10836_v30, %v10838_v27 }
 0x4a2   : > { %7500 = vmatprep.mubr.msk.bf16.mxu1 %vm3286_vm9, %v5475_v58  ;;  %6113 = vmatpush1.bf16.msra.mxu1 %v8574_v41  ;;  %v10848_v41 = vcombine.low %v10270_v24, %v8667_v59  ;;  %v8603_v58 = vld [vmem:[%s11175_s4 + $0x5d0] ss:$8 sps:$4 sm:$0xff]  }
 0x4a3   : > { %6114 = vmatprep.subr.bf16.mxu1 %v8579_v13  ;;  %v5487_v13 = vsel %vm1670_vm6, %v5482_v33, %v5486_v62  ;;  %v5490_v40 = vrot.slane %v10853_v47, 3  ;;  %v5840_v33 = vshrl.u32 %v10711_v23, 16 }
 0x4a5   : > { %v5842_v59 = vrot.slane %v5840_v33, 3  ;;  %v5879_v33 = vshll.u32 %v10751_v2, 16 }
 0x4a6   : > { %6115 = vmatpush1.bf16.msra.mxu1 %v8577_v46  ;;  %v8609_v46 = vld [vmem:[%s11175_s4 + $0x5e4] ss:$8 sps:$4 sm:$0xff]  }
 0x4a7   : > { %6116 = vmatprep.subr.bf16.mxu1 %v8584_v11  ;;  %v5484_v11 = vrot.slane %v10848_v41, 3 }
 0x4a9   : > { %5697 = vmatmul.mubr.bf16.gmra.mrb[0].mxu1 %v5473_v55  ;;  %v10873_v55 = vcombine.low %v10836_v30, %v10838_v27 }
 0x4aa   : > { %7501 = vmatprep.mubr.msk.bf16.mxu1 %vm3286_vm9, %v5479_v61  ;;  %6117 = vmatpush1.bf16.msra.mxu1 %v8582_v19  ;;  %v8612_v19 = vld [vmem:[%s11175_s4 + $0x5f4] ss:$8 sps:$4 sm:$0xff]   ;;  %v5491_v61 = vsel %vm1670_vm6, %v5486_v62, %v5490_v40  ;;  %v5823_v62 = vshrl.u32 %v10722_v15, 16 }
 0x4ab   : > { %6118 = vmatprep.subr.bf16.mxu1 %v8589_v60  ;;  %v5485_v60 = vsel %vm1670_vm6, %v5480_v54, %v5484_v11  ;;  %v5488_v32 = vrot.slane %v10873_v55, 3 }
 0x4ae   : > { %6119 = vmatpush1.bf16.msra.mxu1 %v8587_v6  ;;  %v8610_v6 = vld [vmem:[%s11175_s4 + $0x5f0] ss:$8 sps:$4 sm:$0xff]  }
 0x4af   : > { %6120 = vmatprep.subr.bf16.mxu1 %v8592_v43  ;;  %v8615_v43 = vld [vmem:[%s11175_s4 + $0x604] ss:$8 sps:$4 sm:$0xff]  }
 0x4b1   : > { %5707 = vmatmul.mubr.bf16.gmra.mrb[4].mxu1 %v5477_v52  ;;  %v5835_v52 = vshll.u32 %v10716_v18, 16 }
 0x4b2   : > { %7502 = vmatprep.mubr.msk.bf16.mxu1 %vm3286_vm9, %v5483_v16  ;;  %6121 = vmatpush1.bf16.msra.mxu1 %v8590_v44  ;;  %v5843_v44 = vshll.u32 %v10711_v23, 16  ;;  %v5489_v16 = vsel %vm1670_vm6, %v5484_v11, %v5488_v32  ;;  %vm6846_vm6 = vmand %vm2743_vm0, %vm6845_vm4 }
 0x4b3   : > { %6122 = vmatprep.subr.bf16.mxu1 %v8597_v25  ;;  %v5832_v25 = vshrl.u32 %v10716_v18, 16  ;;  %v5837_v54 = vrot.slane %v5835_v52, 4  ;;  %v5815_v18 = vshrl.u32 %v10731_v5, 16  ;;  %vm6849_vm10 = vmor %vm6848_vm8, %vm6846_vm6 }
 0x4b6   : > { %6123 = vmatpush1.bf16.msra.mxu1 %v8595_v20  ;;  %v5845_v20 = vrot.slane %v5843_v44, 4 }
 0x4b7   : > { %6124 = vmatprep.subr.bf16.mxu1 %v8602_v35  ;;  %v5834_v35 = vrot.slane %v5832_v25, 3  ;;  %v8618_v25 = vld [vmem:[%s11175_s4 + $0x614] ss:$8 sps:$4 sm:$0xff]  }
 0x4b8   : > { %v5846_v23 = vor.u32 %v5845_v20, %v5842_v59 }
 0x4b9   : > { %5717 = vmatmul.mubr.bf16.gmra.mrb[8].mxu1 %v5481_v9  ;;  %v5861_v9 = vshll.u32 %v10728_v0, 16 }
 0x4ba   : > { %7503 = vmatprep.mubr.msk.bf16.mxu1 %vm3286_vm9, %v5487_v13  ;;  %6125 = vmatpush1.bf16.msra.mxu1 %v8600_v29  ;;  %v5826_v29 = vshll.u32 %v10722_v15, 16  ;;  %v5818_v13 = vshll.u32 %v10731_v5, 16  ;;  %v5817_v15 = vrot.slane %v5815_v18, 3  ;;  %v5876_v5 = vshrl.u32 %v10751_v2, 16  ;;  %v8616_v2 = vld [vmem:[%s11175_s4 + $0x610] ss:$8 sps:$4 sm:$0xff]  }
 0x4bb   : > { %6126 = vmatprep.subr.bf16.mxu1 %v8605_v12  ;;  %v5858_v12 = vshrl.u32 %v10728_v0, 16  ;;  %v5852_v0 = vshll.u32 %v10746_v48, 16  ;;  %v5897_v18 = vshll.u32 %v10776_v26, 16 }
 0x4bc   : > { %v5828_v11 = vrot.slane %v5826_v29, 4  ;;  %v5878_v20 = vrot.slane %v5876_v5, 3  ;;  %v5867_v29 = vshrl.u32 %v10771_v34, 16  ;;  %v5915_v5 = vshll.u32 %v10801_v28, 16 }
 0x4bd   : > { %v5854_v59 = vrot.slane %v5852_v0, 4 }
 0x4be   : > { %6127 = vmatpush1.bf16.msra.mxu1 %v8603_v58  ;;  %v5838_v58 = vor.u32 %v5837_v54, %v5834_v35  ;;  %v5881_v35 = vrot.slane %v5879_v33, 4  ;;  %v8621_v54 = vld [vmem:[%s11175_s4 + $0x624] ss:$8 sps:$4 sm:$0xff]   ;;  %v8625_v33 = vld [vmem:[%s11175_s4 + $0x640] ss:$8 sps:$4 sm:$0xff]  }
 0x4bf   : > { %6128 = vmatprep.subr.bf16.mxu1 %v8609_v46  ;;  %v5825_v46 = vrot.slane %v5823_v62, 3 }
 0x4c1   : > { %5727 = vmatmul.mubr.bf16.gmra.mrb[12].mxu1 %v5485_v60  ;;  %v5820_v60 = vrot.slane %v5818_v13, 4  ;;  %v8619_v13 = vld [vmem:[%s11175_s4 + $0x620] ss:$8 sps:$4 sm:$0xff]  }
 0x4c2   : > { %7504 = vmatprep.mubr.msk.bf16.mxu1 %vm3286_vm9, %v5491_v61  ;;  %6129 = vmatpush1.bf16.msra.mxu1 %v8607_v36  ;;  %v5860_v36 = vrot.slane %v5858_v12, 3  ;;  %v5829_v61 = vor.u32 %v5828_v11, %v5825_v46  ;;  %v5870_v12 = vshll.u32 %v10771_v34, 16  ;;  %v5869_v11 = vrot.slane %v5867_v29, 3 }
 0x4c3   : > { %6130 = vmatprep.subr.bf16.mxu1 %v8612_v19  ;;  %v5863_v19 = vrot.slane %v5861_v9, 4  ;;  %v5821_v44 = vor.u32 %v5820_v60, %v5817_v15  ;;  %v5894_v9 = vshrl.u32 %v10776_v26, 16  ;;  %v8622_v26 = vld [vmem:[%s11175_s4 + $0x630] ss:$8 sps:$4 sm:$0xff]   ;;  %v8627_v15 = vld [vmem:[%s11175_s4 + $0x644] ss:$8 sps:$4 sm:$0xff]  }
 0x4c4   : > { %v5933_v29 = vshll.u32 %v10825_v14, 16 }
 0x4c5   : > { %v5830_v52 = vsel %vm1868_vm7, %v5821_v44, %v5829_v61 }
 0x4c6   : > { %6131 = vmatpush1.bf16.msra.mxu1 %v8610_v6  ;;  %v5849_v6 = vshrl.u32 %v10746_v48, 16 }
 0x4c7   : > { %6510 = vmatprep.subr.bf16.mxu1 %v8615_v43  ;;  %v5864_v43 = vor.u32 %v5863_v19, %v5860_v36  ;;  %v5896_v36 = vrot.slane %v5894_v9, 3  ;;  %v5899_v19 = vrot.slane %v5897_v18, 4 }
 0x4c9   : > { %5737 = vmatmul.mubr.bf16.gmra.mrb[16].mxu1 %v5489_v16  ;;  %v5851_v16 = vrot.slane %v5849_v6, 3  ;;  %v5865_v48 = vsel %vm1868_vm7, %v5846_v23, %v5864_v43  ;;  %v5888_v6 = vshll.u32 %v10796_v22, 16  ;;  %v5900_v0 = vor.u32 %v5899_v19, %v5896_v36 }
 0x4ca   : > { %7505 = vmatprep.mubr.msk.bf16.mxu1 %vm3286_vm9, %v5490_v40  ;;  %v5847_v40 = vsel %vm1868_vm7, %v5838_v58, %v5846_v23  ;;  %v5882_v23 = vor.u32 %v5881_v35, %v5878_v20  ;;  %v8624_v58 = vld [vmem:[%s11175_s4 + $0x634] ss:$8 sps:$4 sm:$0xff]   ;;  %v5903_v35 = vshrl.u32 %v10821_v4, 16  ;;  %v5924_v36 = vshll.u32 %v10848_v41, 16 }
 0x4cb   : > { %v5855_v62 = vor.u32 %v5854_v59, %v5851_v16  ;;  %v5917_v59 = vrot.slane %v5915_v5, 4 }
 0x4cc   : > { %v5883_v34 = vsel %vm1868_vm7, %v5864_v43, %v5882_v23  ;;  %v5912_v43 = vshrl.u32 %v10801_v28, 16  ;;  %v8628_v28 = vld [vmem:[%s11175_s4 + $0x650] ss:$8 sps:$4 sm:$0xff]   ;;  %v5905_v18 = vrot.slane %v5903_v35, 3 }
 0x4cd   : > { %v5856_v46 = vsel %vm1868_vm7, %v5829_v61, %v5855_v62  ;;  %v5885_v61 = vshrl.u32 %v10796_v22, 16  ;;  %v5901_v22 = vsel %vm1868_vm7, %v5882_v23, %v5900_v0  ;;  %v8636_v23 = vld [vmem:[%s11175_s4 + $0x674] ss:$8 sps:$4 sm:$0xff]  }
 0x4ce   : > { %v5914_v16 = vrot.slane %v5912_v43, 3  ;;  %v5926_v43 = vrot.slane %v5924_v36, 4 }
 0x4d1   : > { %5747 = vmatmul.mubr.bf16.gmra.mrb[20].mxu1 %v5488_v32  ;;  %v8613_v32 = vld [vmem:[%s11175_s4 + $0x600] ss:$8 sps:$4 sm:$0xff]  }
 0x4d2   : > { %7554 = vmatprep.mubr.msk.bf16.mxu1 %vm3286_vm9, %v5847_v40  ;;  %v5872_v40 = vrot.slane %v5870_v12, 4  ;;  %v8631_v12 = vld [vmem:[%s11175_s4 + $0x660] ss:$8 sps:$4 sm:$0xff]  }
 0x4d4   : > { %v5873_v60 = vor.u32 %v5872_v40, %v5869_v11  ;;  %v8639_v11 = vld [vmem:[%s11175_s4 + $0x684] ss:$8 sps:$4 sm:$0xff]  }
 0x4d6   : > { %v5874_v44 = vsel %vm1868_vm7, %v5855_v62, %v5873_v60  ;;  %v5930_v62 = vshrl.u32 %v10825_v14, 16  ;;  %v8634_v14 = vld [vmem:[%s11175_s4 + $0x670] ss:$8 sps:$4 sm:$0xff]  }
 0x4d9   : > { %6141 = vmatmul.mubr.bf16.vlgmr.msra.gmra.mrb[24].mxu1 %v5830_v52  ;;  %v5890_v52 = vrot.slane %v5888_v6, 4 }
 0x4da   : > { %6511 = vmatpush1.bf16.msra.mxu1 %v8613_v32  ;;  %7555 = vmatprep.mubr.msk.bf16.mxu1 %vm3286_vm9, %v5865_v48  ;;  %v8630_v32 = vld [vmem:[%s11175_s4 + $0x654] ss:$8 sps:$4 sm:$0xff]   ;;  %v8633_v48 = vld [vmem:[%s11175_s4 + $0x664] ss:$8 sps:$4 sm:$0xff]  }
 0x4db   : > { %6512 = vmatprep.subr.bf16.mxu1 %v8618_v25  ;;  %v5887_v25 = vrot.slane %v5885_v61, 3  ;;  %v8642_v61 = vld [vmem:[%s11175_s4 + $0x694] ss:$8 sps:$4 sm:$0xff]  }
 0x4dd   : > { %v5891_v20 = vor.u32 %v5890_v52, %v5887_v25  ;;  %v5939_v25 = vshrl.u32 %v10873_v55, 16  ;;  %v5942_v52 = vshll.u32 %v10873_v55, 16  ;;  %v8648_v55 = vld [vmem:[%s11175_s4 + $0x6b0] ss:$8 sps:$4 sm:$0xff]  }
 0x4de   : > { %6513 = vmatpush1.bf16.msra.mxu1 %v8616_v2  ;;  %v5906_v2 = vshll.u32 %v10821_v4, 16 }
 0x4df   : > { %6514 = vmatprep.subr.bf16.mxu1 %v8621_v54  ;;  %v5918_v54 = vor.u32 %v5917_v59, %v5914_v16  ;;  %v5892_v9 = vsel %vm1868_vm7, %v5873_v60, %v5891_v20  ;;  %v8637_v60 = vld [vmem:[%s11175_s4 + $0x680] ss:$8 sps:$4 sm:$0xff]   ;;  %v8650_v59 = vld [vmem:[%s11175_s4 + $0x6b4] ss:$8 sps:$4 sm:$0xff]  }
 0x4e0   : > { %v8643_v16 = vld [vmem:[%s11175_s4 + $0x6a0] ss:$8 sps:$4 sm:$0xff]  }
 0x4e1   : > { %6151 = vmatmul.mubr.bf16.gmra.mrb[28].mxu1 %v5856_v46  ;;  %v5919_v4 = vsel %vm1868_vm7, %v5900_v0, %v5918_v54  ;;  %v5935_v46 = vrot.slane %v5933_v29, 4  ;;  %v11284_v29 = vcombine.low %v10214_v17, %v10211_v38 }
 0x4e2   : > { %7556 = vmatprep.mubr.msk.bf16.mxu1 %vm3286_vm9, %v5883_v34  ;;  %6515 = vmatpush1.bf16.msra.mxu1 %v8619_v13  ;;  %v5908_v13 = vrot.slane %v5906_v2, 4  ;;  %v5921_v34 = vshrl.u32 %v10848_v41, 16 }
 0x4e3   : > { %6516 = vmatprep.subr.bf16.mxu1 %v8624_v58  ;;  %v5932_v58 = vrot.slane %v5930_v62, 3  ;;  %v11283_v62 = vcombine.high %v10214_v17, %v10211_v38  ;;  %v11289_v38 = vcombine.high %v10273_v3, %v11282_v39  ;;  %v11290_v17 = vcombine.low %v10273_v3, %v11282_v39  ;;  %v6268_v39 = vld [vmem:[#allocation2 + $0x90] sm:$0x11] }
 0x4e4   : > { %v5909_v40 = vor.u32 %v5908_v13, %v5905_v18  ;;  %v5923_v0 = vrot.slane %v5921_v34, 3  ;;  %v11288_v18 = vcombine.low %v10242_v37, %v11281_v49  ;;  %v11293_v3 = vcombine.low %v10280_v8, %v10270_v24 }
 0x4e5   : > { %v5936_v19 = vor.u32 %v5935_v46, %v5932_v58 }
 0x4e6   : > { %6517 = vmatpush1.bf16.msra.mxu1 %v8622_v26  ;;  %v5948_v26 = vshrl.u32 %v10853_v47, 16  ;;  %v5910_v6 = vsel %vm1868_vm7, %v5891_v20, %v5909_v40  ;;  %v5944_v20 = vrot.slane %v5942_v52, 4 }
 0x4e7   : > { %6518 = vmatprep.subr.bf16.mxu1 %v8627_v15  ;;  %v5951_v15 = vshll.u32 %v10853_v47, 16  ;;  %v5937_v41 = vsel %vm1868_vm7, %v5918_v54, %v5936_v19  ;;  %v8640_v47 = vld [vmem:[%s11175_s4 + $0x690] ss:$8 sps:$4 sm:$0xff]  }
 0x4e8   : > { %v5950_v5 = vrot.slane %v5948_v26, 3 }
 0x4e9   : > { %6161 = vmatmul.mubr.bf16.gmra.mrb[0].mxu1 %v5874_v44  ;;  %v5927_v44 = vor.u32 %v5926_v43, %v5923_v0 }
 0x4ea   : > { %7557 = vmatprep.mubr.msk.bf16.mxu1 %vm3286_vm9, %v5901_v22  ;;  %6519 = vmatpush1.bf16.msra.mxu1 %v8625_v33  ;;  %v5953_v33 = vrot.slane %v5951_v15, 4 }
 0x4eb   : > { %6520 = vmatprep.subr.bf16.mxu1 %v8630_v32  ;;  %v8645_v32 = vld [vmem:[%s11175_s4 + $0x6a4] ss:$8 sps:$4 sm:$0xff]  }
 0x4ec   : > { %v5954_v22 = vor.u32 %v5953_v33, %v5950_v5 }
 0x4ee   : > { %6521 = vmatpush1.bf16.msra.mxu1 %v8628_v28  ;;  %v5928_v28 = vsel %vm1868_vm7, %v5909_v40, %v5927_v44  ;;  %v5955_v35 = vsel %vm1868_vm7, %v5936_v19, %v5954_v22 }
 0x4ef   : > { %6522 = vmatprep.subr.bf16.mxu1 %v8633_v48  ;;  %v5941_v48 = vrot.slane %v5939_v25, 3 }
 0x4f1   : > { %6171 = vmatmul.mubr.bf16.gmra.mrb[4].mxu1 %v5892_v9  ;;  %v5945_v2 = vor.u32 %v5944_v20, %v5941_v48  ;;  %v11287_v9 = vcombine.high %v10242_v37, %v11281_v49  ;;  %v6265_v37 = vld [vmem:[#allocation2 + $0x78] sm:$0xff] }
 0x4f2   : > { %7558 = vmatprep.mubr.msk.bf16.mxu1 %vm3286_vm9, %v5919_v4  ;;  %6523 = vmatpush1.bf16.msra.mxu1 %v8631_v12  ;;  %v11285_v12 = vcombine.high %v10229_v56, %v10226_v10  ;;  %v7599_v49 = vcombine.high %v6265_v37, %v10836_v30 }
 0x4f3   : > { %6524 = vmatprep.subr.bf16.mxu1 %v8636_v23  ;;  %v5946_v54 = vsel %vm1868_vm7, %v5927_v44, %v5945_v2  ;;  %v11286_v23 = vcombine.low %v10229_v56, %v10226_v10  ;;  %v11291_v10 = vcombine.low %v10278_v7, %v10268_v31  ;;  %v11292_v56 = vcombine.high %v10280_v8, %v10270_v24  ;;  %v6655_v24 = vld [vmem:[%s11176_s5] sm:$0x3] }
 0x4f4   : > { %v7598_v31 = vcombine.low %v6265_v37, %v10836_v30  ;;  %v7600_v7 = vcombine.low %v10838_v27, %v6268_v39  ;;  %v11294_v8 = vld [vmem:[#allocation3_spill] sm:$0xff] }
 0x4f5   : > { %v11295_v13 = vsub.s32 0, %v11294_v8  ;;  %v11296_v46 = vsub.s32 1, %v11294_v8 }
 0x4f6   : > { %6525 = vmatpush1.bf16.msra.mxu1 %v8634_v14 }
 0x4f7   : > { %6526 = vmatprep.subr.bf16.mxu1 %v8639_v11  ;;  %v11062_v4 = vrot.slane %v6655_v24, %v11295_v13  ;;  %v11066_v30 = vrot.slane %v6655_v24, %v11296_v46 }
 0x4f9   : > { %6181 = vmatmul.mubr.bf16.gmra.mrb[8].mxu1 %v5910_v6 }
 0x4fa   : > { %7559 = vmatprep.mubr.msk.bf16.mxu1 %vm3286_vm9, %v5937_v41  ;;  %6527 = vmatpush1.bf16.msra.mxu1 %v8637_v60 }
 0x4fb   : > { %6528 = vmatprep.subr.bf16.mxu1 %v8642_v61 }
 0x4fe   : > { %6529 = vmatpush1.bf16.msra.mxu1 %v8640_v47 }
 0x4ff   : > { %6530 = vmatprep.subr.bf16.mxu1 %v8645_v32 }
 0x501   : > { %6191 = vmatmul.mubr.bf16.gmra.mrb[12].mxu1 %v5928_v28 }
 0x502   : > { %7560 = vmatprep.mubr.msk.bf16.mxu1 %vm3286_vm9, %v5955_v35  ;;  %6531 = vmatpush1.bf16.msra.mxu1 %v8643_v16 }
 0x503   : > { %6532 = vmatprep.subr.bf16.mxu1 %v8650_v59 }
 0x506   : > { %6533 = vmatpush1.bf16.msra.mxu1 %v8648_v55 }
 0x509   : > { %6201 = vmatmul.mubr.bf16.gmra.mrb[16].mxu1 %v5946_v54 }
 0x50a   : > { %7561 = vmatprep.mubr.msk.bf16.mxu1 %vm3286_vm9, %v5954_v22 }
 0x511   : > { %6211 = vmatmul.mubr.bf16.gmra.mrb[20].mxu1 %v5945_v2 }
 0x512   : > { %7626 = vmatprep.mubr.msk.bf16.mxu1 %vm3286_vm9, %v11283_v62 }
 0x519   : > { %6543 = vmatmul.mubr.bf16.vlgmr.msra.gmra.mrb[24].mxu1 %v11284_v29 }
 0x51a   : > { %7627 = vmatprep.mubr.msk.bf16.mxu1 %vm3286_vm9, %v11285_v12 }
 0x521   : > { %6553 = vmatmul.mubr.bf16.gmra.mrb[28].mxu1 %v11286_v23 }
 0x522   : > { %7628 = vmatprep.mubr.msk.bf16.mxu1 %vm3286_vm9, %v11287_v9 }
 0x529   : > { %6563 = vmatmul.mubr.bf16.gmra.mrb[0].mxu1 %v11288_v18 }
 0x52a   : > { %7629 = vmatprep.mubr.msk.bf16.mxu1 %vm3286_vm9, %v11289_v38 }
 0x531   : > { %6573 = vmatmul.mubr.bf16.gmra.mrb[4].mxu1 %v11290_v17 }
 0x532   : > { %7630 = vmatprep.mubr.msk.bf16.mxu1 %vm3286_vm9, %v7595_v21  ;;  %v7601_v21 = vcombine.high %v10838_v27, %v6268_v39 }
 0x539   : > { %6583 = vmatmul.mubr.bf16.gmra.mrb[8].mxu1 %v11291_v10 }
 0x53a   : > { %7631 = vmatprep.mubr.msk.bf16.mxu1 %vm3286_vm9, %v11292_v56 }
 0x541   : > { %6593 = vmatmul.mubr.bf16.gmra.mrb[12].mxu1 %v11293_v3 }
 0x542   : > { %7632 = vmatprep.mubr.msk.bf16.mxu1 %vm3286_vm9, %v7599_v49 }
 0x549   : > { %6603 = vmatmul.mubr.bf16.gmra.mrb[16].mxu1 %v7598_v31 }
 0x54a   : > { %7633 = vmatprep.mubr.msk.bf16.mxu1 %vm3286_vm9, %v7601_v21 }
 0x551   : > { %6613 = vmatmul.mubr.bf16.gmra.mrb[20].mxu1 %v7600_v7 }
 0x5ec   : > { %v6544_v58 = vpop.f32.mrb[24].mxu1 }
 0x5ed   : > { %v7693_v14 = vadd.f32 %v6544_v58, %v10430_v51  ;;  %v6546_v11 = vpop.f32.mrb[25].mxu1 }
 0x5ee   : > { %v7694_v27 = vadd.f32 %v6546_v11, %v10435_v45  ;;  %v6548_v40 = vpop.f32.mrb[26].mxu1 }
 0x5ef   : > { %v6667_v34 = vadd.f32 %v7693_v14, %v11062_v4  ;;  %v7695_v36 = vadd.f32 %v6548_v40, %v10437_v42  ;;  %v6550_v19 = vpop.f32.mrb[27].mxu1 }
 0x5f0   : > { %v6668_v26 = vadd.f32 %v7694_v27, %v11066_v30  ;;  %v7696_v15 = vadd.f32 %v6550_v19, %v10439_v1 }
 0x5f1   : > { %v6699_v60 = vmax.f32 %v6667_v34, 0.0  ;;  %v6669_v61 = vadd.f32 %v7695_v36, %v11062_v4 }
 0x5f2   : > { %v6700_v6 = vmax.f32 %v6668_v26, 0.0  ;;  %v6670_v51 = vadd.f32 %v7696_v15, %v11066_v30 }
 0x5f3   : > { %v6701_v42 = vmax.f32 %v6669_v61, 0.0 }
 0x5f4   : > { %v7653_v1 = vpack.c.bf16 %v6700_v6, %v6699_v60  ;;  %v6702_v0 = vmax.f32 %v6670_v51, 0.0  ;;  %v6554_v43 = vpop.f32.mrb[28].mxu1 }
 0x5f5   : > { %v7697_v41 = vadd.f32 %v6554_v43, %v10454_v57  ;;  %v6556_v5 = vpop.f32.mrb[29].mxu1 }
 0x5f6   : > { %6829 = vst.msk [vmem:[%s11080_s30] sm:$0xff] %vm11083_vm3, %v7653_v1  ;;  %v7654_v33 = vpack.c.bf16 %v6702_v0, %v6701_v42  ;;  %v7698_v47 = vadd.f32 %v6556_v5, %v10459_v53  ;;  %v6558_v32 = vpop.f32.mrb[30].mxu1 }
 0x5f7   : > { %v6671_v44 = vadd.f32 %v7697_v41, %v11062_v4  ;;  %v7699_v25 = vadd.f32 %v6558_v32, %v10461_v50  ;;  %v6560_v52 = vpop.f32.mrb[31].mxu1 }
 0x5f8   : > { %6830 = vst.msk [vmem:[%s11080_s30 + $0x8] sm:$0xff] %vm11083_vm3, %v7654_v33  ;;  %v6672_v22 = vadd.f32 %v7698_v47, %v11066_v30  ;;  %v7700_v57 = vadd.f32 %v6560_v52, %v10463_v63 }
 0x5f9   : > { %v6703_v16 = vmax.f32 %v6671_v44, 0.0  ;;  %v6673_v59 = vadd.f32 %v7699_v25, %v11062_v4 }
 0x5fa   : > { %v6704_v28 = vmax.f32 %v6672_v22, 0.0  ;;  %v6674_v53 = vadd.f32 %v7700_v57, %v11066_v30 }
 0x5fb   : > { %v6705_v48 = vmax.f32 %v6673_v59, 0.0 }
 0x5fc   : > { %v7655_v20 = vpack.c.bf16 %v6704_v28, %v6703_v16  ;;  %v6706_v35 = vmax.f32 %v6674_v53, 0.0  ;;  %v6564_v55 = vpop.f32.mrb[0].mxu1 }
 0x5fd   : > { %v6675_v50 = vadd.f32 %v11062_v4, %v6564_v55  ;;  %v6566_v2 = vpop.f32.mrb[1].mxu1 }
 0x5fe   : > { %6831 = vst.msk [vmem:[%s11080_s30 + $0x10] sm:$0xff] %vm11083_vm3, %v7655_v20  ;;  %v7656_v54 = vpack.c.bf16 %v6706_v35, %v6705_v48  ;;  %v6676_v63 = vadd.f32 %v11066_v30, %v6566_v2  ;;  %v6568_v62 = vpop.f32.mrb[2].mxu1 }
 0x5ff   : > { %v6707_v29 = vmax.f32 %v6675_v50, 0.0  ;;  %v6677_v12 = vadd.f32 %v11062_v4, %v6568_v62  ;;  %v6570_v23 = vpop.f32.mrb[3].mxu1 }
 0x600   : > { %6832 = vst.msk [vmem:[%s11080_s30 + $0x18] sm:$0xff] %vm11083_vm3, %v7656_v54  ;;  %v6708_v9 = vmax.f32 %v6676_v63, 0.0  ;;  %v6678_v18 = vadd.f32 %v11066_v30, %v6570_v23 }
 0x601   : > { %v6709_v38 = vmax.f32 %v6677_v12, 0.0 }
 0x602   : > { %v7657_v17 = vpack.c.bf16 %v6708_v9, %v6707_v29  ;;  %v6710_v10 = vmax.f32 %v6678_v18, 0.0 }
 0x604   : > { %6833 = vst.msk [vmem:[%s11080_s30 + $0x20] sm:$0xff] %vm11083_vm3, %v7657_v17  ;;  %v7658_v56 = vpack.c.bf16 %v6710_v10, %v6709_v38  ;;  %v6574_v37 = vpop.f32.mrb[4].mxu1 }
 0x605   : > { %v6679_v49 = vadd.f32 %v11062_v4, %v6574_v37  ;;  %v6576_v3 = vpop.f32.mrb[5].mxu1 }
 0x606   : > { %6834 = vst.msk [vmem:[%s11080_s30 + $0x28] sm:$0xff] %vm11083_vm3, %v7658_v56  ;;  %v6680_v39 = vadd.f32 %v11066_v30, %v6576_v3  ;;  %v6578_v21 = vpop.f32.mrb[6].mxu1 }
 0x607   : > { %v6711_v31 = vmax.f32 %v6679_v49, 0.0  ;;  %v6681_v7 = vadd.f32 %v11062_v4, %v6578_v21  ;;  %v6580_v24 = vpop.f32.mrb[7].mxu1 }
 0x608   : > { %v6712_v8 = vmax.f32 %v6680_v39, 0.0  ;;  %v6682_v13 = vadd.f32 %v11066_v30, %v6580_v24 }
 0x609   : > { %v6713_v58 = vmax.f32 %v6681_v7, 0.0 }
 0x60a   : > { %v7659_v46 = vpack.c.bf16 %v6712_v8, %v6711_v31  ;;  %v6714_v14 = vmax.f32 %v6682_v13, 0.0  ;;  %v6850_v8 = vld [vmem:[%s11080_s30 + $0x78] sm:$0x11] }
 0x60c   : > { %6835 = vst.msk [vmem:[%s11080_s30 + $0x30] sm:$0xff] %vm11083_vm3, %v7659_v46  ;;  %v7660_v11 = vpack.c.bf16 %v6714_v14, %v6713_v58  ;;  %v6584_v27 = vpop.f32.mrb[8].mxu1 }
 0x60d   : > { %v6683_v40 = vadd.f32 %v11062_v4, %v6584_v27  ;;  %v6586_v34 = vpop.f32.mrb[9].mxu1 }
 0x60e   : > { %6836 = vst.msk [vmem:[%s11080_s30 + $0x38] sm:$0xff] %vm11083_vm3, %v7660_v11  ;;  %v6684_v36 = vadd.f32 %v11066_v30, %v6586_v34  ;;  %v6588_v19 = vpop.f32.mrb[10].mxu1 }
 0x60f   : > { %v6715_v26 = vmax.f32 %v6683_v40, 0.0  ;;  %v6685_v15 = vadd.f32 %v11062_v4, %v6588_v19  ;;  %v6590_v60 = vpop.f32.mrb[11].mxu1 }
 0x610   : > { %v6716_v61 = vmax.f32 %v6684_v36, 0.0  ;;  %v6686_v6 = vadd.f32 %v11066_v30, %v6590_v60 }
 0x611   : > { %v6717_v51 = vmax.f32 %v6685_v15, 0.0 }
 0x612   : > { %v7661_v42 = vpack.c.bf16 %v6716_v61, %v6715_v26  ;;  %v6718_v1 = vmax.f32 %v6686_v6, 0.0 }
 0x614   : > { %6837 = vst.msk [vmem:[%s11080_s30 + $0x40] sm:$0xff] %vm11083_vm3, %v7661_v42  ;;  %v7662_v0 = vpack.c.bf16 %v6718_v1, %v6717_v51  ;;  %v6594_v43 = vpop.f32.mrb[12].mxu1 }
 0x615   : > { %v6687_v41 = vadd.f32 %v11062_v4, %v6594_v43  ;;  %v6596_v5 = vpop.f32.mrb[13].mxu1 }
 0x616   : > { %6838 = vst.msk [vmem:[%s11080_s30 + $0x48] sm:$0xff] %vm11083_vm3, %v7662_v0  ;;  %v6688_v33 = vadd.f32 %v11066_v30, %v6596_v5  ;;  %v6598_v47 = vpop.f32.mrb[14].mxu1 }
 0x617   : > { %v6719_v32 = vmax.f32 %v6687_v41, 0.0  ;;  %v6689_v44 = vadd.f32 %v11062_v4, %v6598_v47  ;;  %v6600_v25 = vpop.f32.mrb[15].mxu1 }
 0x618   : > { %v6720_v52 = vmax.f32 %v6688_v33, 0.0  ;;  %v6690_v22 = vadd.f32 %v11066_v30, %v6600_v25 }
 0x619   : > { %v6721_v57 = vmax.f32 %v6689_v44, 0.0 }
 0x61a   : > { %v7663_v16 = vpack.c.bf16 %v6720_v52, %v6719_v32  ;;  %v6722_v59 = vmax.f32 %v6690_v22, 0.0 }
 0x61c   : > { %6839 = vst.msk [vmem:[%s11080_s30 + $0x50] sm:$0xff] %vm11083_vm3, %v7663_v16  ;;  %v7664_v28 = vpack.c.bf16 %v6722_v59, %v6721_v57  ;;  %v6604_v53 = vpop.f32.mrb[16].mxu1 }
 0x61d   : > { %v6691_v48 = vadd.f32 %v11062_v4, %v6604_v53  ;;  %v6606_v20 = vpop.f32.mrb[17].mxu1 }
 0x61e   : > { %6840 = vst.msk [vmem:[%s11080_s30 + $0x58] sm:$0xff] %vm11083_vm3, %v7664_v28  ;;  %v6692_v35 = vadd.f32 %v11066_v30, %v6606_v20  ;;  %v6608_v55 = vpop.f32.mrb[18].mxu1 }
 0x61f   : > { %v6723_v50 = vmax.f32 %v6691_v48, 0.0  ;;  %v6693_v2 = vadd.f32 %v11062_v4, %v6608_v55  ;;  %v6610_v54 = vpop.f32.mrb[19].mxu1 }
 0x620   : > { %v6724_v63 = vmax.f32 %v6692_v35, 0.0  ;;  %v6694_v62 = vadd.f32 %v11066_v30, %v6610_v54 }
 0x621   : > { %v6725_v29 = vmax.f32 %v6693_v2, 0.0 }
 0x622   : > { %v7665_v12 = vpack.c.bf16 %v6724_v63, %v6723_v50  ;;  %v6726_v23 = vmax.f32 %v6694_v62, 0.0 }
 0x624   : > { %6841 = vst.msk [vmem:[%s11080_s30 + $0x60] sm:$0xff] %vm11083_vm3, %v7665_v12  ;;  %v7666_v9 = vpack.c.bf16 %v6726_v23, %v6725_v29  ;;  %v6614_v18 = vpop.f32.mrb[20].mxu1 }
 0x625   : > { %v6695_v38 = vadd.f32 %v11062_v4, %v6614_v18  ;;  %v6616_v17 = vpop.f32.mrb[21].mxu1 }
 0x626   : > { %6842 = vst.msk [vmem:[%s11080_s30 + $0x68] sm:$0xff] %vm11083_vm3, %v7666_v9  ;;  %v6696_v10 = vadd.f32 %v11066_v30, %v6616_v17  ;;  %v6618_v56 = vpop.f32.mrb[22].mxu1 }
 0x627   : > { %v6727_v37 = vmax.f32 %v6695_v38, 0.0  ;;  %v6697_v49 = vadd.f32 %v11062_v4, %v6618_v56  ;;  %v6620_v3 = vpop.f32.mrb[23].mxu1 }
 0x628   : > { %v6728_v39 = vmax.f32 %v6696_v10, 0.0  ;;  %v6698_v21 = vadd.f32 %v11066_v30, %v6620_v3 }
 0x629   : > { %v6729_v31 = vmax.f32 %v6697_v49, 0.0 }
 0x62a   : > { %v7667_v7 = vpack.c.bf16 %v6728_v39, %v6727_v37  ;;  %v6730_v24 = vmax.f32 %v6698_v21, 0.0 }
 0x62c   : > { %6843 = vst.msk [vmem:[%s11080_s30 + $0x70] sm:$0xff] %vm11083_vm3, %v7667_v7  ;;  %v7668_v13 = vpack.c.bf16 %v6730_v24, %v6729_v31 }
 0x62e   : > { %v6851_v58 = vsel %vm6849_vm10, %v7668_v13, %v6850_v8 }
 0x62f   : > { %6852 = vst [vmem:[%s11080_s30 + $0x78] sm:$0x11] %v6851_v58 }
 0x630 PF: > { %s16_s21 = sadd.s32 1, %s8674_s21  }
 0x631   : > { %p13_p4 = scmp.ge.s32.totalorder %s16_s21, 4  }
 0x633   :  { %15 = sbr.rel (!%p13_p4) target bundleno = 1 (0x1), region = 90 }

// kernel: reduction_a_forward.3
= control target key start
LH: loop header
LB: loop body
LE: loop exit
PB: predicated region body
PF: predicated region fallthrough
CT: control target
= control target key end

     0   :  { %s5533_s24 = smov 0   ;;  %s6733_s0 = inlined_call_operand.vmem [shape: bf16[2,4,30,16], index: 0, kind: input, shape index: {}]   ;;  %s6734_s1 = inlined_call_operand.vmem [shape: bf16[9,16,384], index: 1, kind: input, shape index: {}]   ;;  %s6735_s2 = inlined_call_operand.vmem [shape: f32[1,384], index: 2, kind: input, shape index: {}]   ;;  %s6736_s3 = inlined_call_operand.vmem [shape: bf16[2,4,30,224], index: 3, kind: input, shape index: {}]   ;;  %s6737_s4 = inlined_call_operand.vmem [shape: bf16[9,224,256], index: 4, kind: input, shape index: {}]   ;;  %s6738_s5 = inlined_call_operand.vmem [shape: f32[1,256], index: 5, kind: input, shape index: {}]   ;;  %s6739_s6 = inlined_call_operand.vmem [shape: f32[2,20,16], index: 6, kind: input, shape index: {}]   ;;  %s6740_s7 = inlined_call_operand.vmem [shape: f32[2,20,656], index: 7, kind: output, shape index: {}]  }
   0x1 LB: > { %s4183_s25 = sadd.s32 4294967295, %s5490_s24   ;;  %p4187_p0 = scmp.ge.s32.totalorder %s5490_s24, 1  ;;  %s5490_s24 = sphi %s5533_s24, %s17_s24  }
   0x2   : > { %p257_p1 = scmp.lt.s32.totalorder %s5490_s24, 3 }
   0x4   : > { %p258_p2 = pnand %p4187_p0, %p257_p1 }
   0x5   : > { %v5018_v0 = vld [vmem:[%s6734_s1 + $0x1c] ss:$12 sps:$4 sm:$0xff] (!%p258_p2)   ;;  %p299_p3 = scmp.lt.s32.totalorder (!%p258_p2), %s4183_s25, 1  ;;  %v5020_v1 = vld [vmem:[%s6734_s1 + $0x18] ss:$12 sps:$4 sm:$0xff] (!%p258_p2)   ;;  %v5492_v2 = vmov (!%p258_p2), 0  }
   0x6   : > { %261 = sbr.rel (%p258_p2) target bundleno = 603 (0x25b), region = 48  ;;  %430 = vmatprep.mubr.bf16.mxu0 (!%p258_p2), %v5492_v2  ;;  %440 = vmatprep.mubr.bf16.mxu1 (!%p258_p2), %v5492_v2  ;;  %v5025_v3 = vld [vmem:[%s6734_s1 + $0x4] ss:$12 sps:$4 sm:$0xff] (!%p258_p2)   ;;  %v5026_v4 = vld [vmem:[%s6734_s1 + $0x20] ss:$12 sps:$4 sm:$0xff] (!%p258_p2)   ;;  %vm391_vm0 = vcmask (!%p258_p2), 130048  }
   0x7   : > { %398 = vmatprep.subr.bf16.mxu0 (!%p258_p2), %v5018_v0  ;;  %4941 = vmatprep.subr.bf16.mxu1 (!%p258_p2), %v5018_v0  ;;  %v5023_v5 = vld [vmem:[%s6734_s1] ss:$12 sps:$4 sm:$0xff] (!%p258_p2)   ;;  %v5027_v7 = vld [vmem:[%s6734_s1 + $0x8] ss:$12 sps:$4 sm:$0xff] (!%p258_p2)   ;;  %v5032_v14 = vld [vmem:[%s6737_s4 + $0xf0] ss:$8 sps:$4 sm:$0xff] (!%p258_p2)  }
   0x8   : > { %399 = vmatpush1.bf16.msra.mxu0 (!%p258_p2), %v5020_v1  ;;  %4942 = vmatpush1.bf16.msra.mxu1 (!%p258_p2), %v5020_v1  ;;  %v5030_v9 = vld [vmem:[%s6737_s4 + $0xe4] ss:$8 sps:$4 sm:$0xff] (!%p258_p2)   ;;  %v5028_v12 = vld [vmem:[%s6737_s4 + $0xe0] ss:$8 sps:$4 sm:$0xff] (!%p258_p2)   ;;  %v5034_v13 = vld [vmem:[%s6737_s4 + $0xf4] ss:$8 sps:$4 sm:$0xff] (!%p258_p2)  }
   0x9   : > { %527 = vmatprep.subr.bf16.mxu0 (!%p258_p2), %v5025_v3  ;;  %4887 = vmatprep.subr.bf16.mxu1 (!%p258_p2), %v5026_v4  ;;  %v5037_v11 = vld [vmem:[%s6737_s4 + $0x2a4] ss:$8 sps:$4 sm:$0xff] (!%p258_p2)   ;;  %v5035_v17 = vld [vmem:[%s6737_s4 + $0x2a0] ss:$8 sps:$4 sm:$0xff] (!%p258_p2)   ;;  %v5044_v18 = vld [vmem:[%s6737_s4 + $0x2b4] ss:$8 sps:$4 sm:$0xff] (!%p258_p2)  }
   0xa   : > { %v5041_v16 = vld [vmem:[%s6737_s4 + $0x104] ss:$8 sps:$4 sm:$0xff] (!%p258_p2)   ;;  %v5039_v19 = vld [vmem:[%s6737_s4 + $0x100] ss:$8 sps:$4 sm:$0xff] (!%p258_p2)   ;;  %v5047_v20 = vld [vmem:[%s6737_s4 + $0x114] ss:$8 sps:$4 sm:$0xff] (!%p258_p2)  }
   0xb   : > { %v5042_v21 = vld [vmem:[%s6737_s4 + $0x2b0] ss:$8 sps:$4 sm:$0xff] (!%p258_p2)   ;;  %v5050_v22 = vld [vmem:[%s6737_s4 + $0x2c4] ss:$8 sps:$4 sm:$0xff] (!%p258_p2)   ;;  %v5048_v25 = vld [vmem:[%s6737_s4 + $0x2c0] ss:$8 sps:$4 sm:$0xff] (!%p258_p2)  }
   0xc   : > { %v5045_v23 = vld [vmem:[%s6737_s4 + $0x110] ss:$8 sps:$4 sm:$0xff] (!%p258_p2)   ;;  %v5053_v24 = vld [vmem:[%s6737_s4 + $0x124] ss:$8 sps:$4 sm:$0xff] (!%p258_p2)   ;;  %v5056_v26 = vld [vmem:[%s6737_s4 + $0x2d4] ss:$8 sps:$4 sm:$0xff] (!%p258_p2)  }
   0xd   : > { %s6742_s25 = smov (!%p299_p3, %s4183_s25), 1  ;;  %v5051_v27 = vld [vmem:[%s6737_s4 + $0x120] ss:$8 sps:$4 sm:$0xff]   ;;  %v5059_v28 = vld [vmem:[%s6737_s4 + $0x134] ss:$8 sps:$4 sm:$0xff]   ;;  %vm814_vm1 = vcmask 785408  }
   0xe   : > { %s4858_s11 = sshll.u32 %s6742_s25, 6  ;;  %v5054_v29 = vld [vmem:[%s6737_s4 + $0x2d0] ss:$8 sps:$4 sm:$0xff]   ;;  %v5062_v30 = vld [vmem:[%s6737_s4 + $0x2e4] ss:$8 sps:$4 sm:$0xff]   ;;  %s4859_s29 = sshll.u32 %s6742_s25, 7 }
   0xf   : > { %s5561_s14 = scalar_lea.vmem %s6733_s0, %s4858_s11  ;;  %v5057_v31 = vld [vmem:[%s6737_s4 + $0x130] ss:$8 sps:$4 sm:$0xff]   ;;  %v5065_v32 = vld [vmem:[%s6737_s4 + $0x144] ss:$8 sps:$4 sm:$0xff]   ;;  %v5060_v33 = vld [vmem:[%s6737_s4 + $0x2e0] ss:$8 sps:$4 sm:$0xff]   ;;  %s5672_s16 = scalar_lea.vmem %s6736_s3, %s4859_s29 }
  0x10   : > { %v5021_v6 = vld [vmem:[%s5561_s14 + $0x10] sm:$0xff]   ;;  %v5022_v8 = vld [vmem:[%s5561_s14 + $0x18] ss:$0 sps:$4 sm:$0x33]   ;;  %v5579_v10 = vld [vmem:[%s5561_s14] sm:$0xff]   ;;  %vm3643_vm4 = vcmask 1044480  }
  0x11   : > { %4206 = vmatmul.mubr.msk.bf16.vlgmr.msra.gmra.mrb[0].mxu0 %vm391_vm0, %v5021_v6  ;;  %4207 = vmatmul.mubr.msk.bf16.vlgmr.msra.gmra.mrb[0].mxu1 %vm391_vm0, %v5022_v8  ;;  %v5038_v15 = vld [vmem:[%s5561_s14 + $0x8] ss:$0 sps:$4 sm:$0x33]   ;;  %v5068_v34 = vld [vmem:[%s6737_s4 + $0x2f4] ss:$8 sps:$4 sm:$0xff]   ;;  %s5007_s8 = smul.u32 24, %s6742_s25 }
  0x12   : > { %528 = vmatpush1.bf16.msra.mxu0 %v5023_v5  ;;  %559 = vmatprep.mubr.bf16.mxu0 %v5492_v2  ;;  %v5063_v35 = vld [vmem:[%s6737_s4 + $0x140] ss:$8 sps:$4 sm:$0xff]   ;;  %v5071_v36 = vld [vmem:[%s6737_s4 + $0x154] ss:$8 sps:$4 sm:$0xff]   ;;  %v5066_v37 = vld [vmem:[%s6737_s4 + $0x2f0] ss:$8 sps:$4 sm:$0xff]  }
  0x13   : > { %4888 = vmatpush3.bf16.msra.mxu1 %v5026_v4  ;;  %4889 = vmatprep.mubr.msk.bf16.mxu1 %vm391_vm0, %v5021_v6  ;;  %v5074_v38 = vld [vmem:[%s6737_s4 + $0x304] ss:$8 sps:$4 sm:$0xff]   ;;  %v5069_v39 = vld [vmem:[%s6737_s4 + $0x150] ss:$8 sps:$4 sm:$0xff]   ;;  %v5072_v42 = vld [vmem:[%s6737_s4 + $0x300] ss:$8 sps:$4 sm:$0xff]   ;;  %s313_s11 = scalar_lea.vmem %s6739_s6, %s5007_s8 }
  0x14   : > { %4893 = vmatprep.subr.bf16.mxu1 %v5027_v7  ;;  %821 = vmatprep.subr.bf16.mxu0 %v5030_v9  ;;  %v5077_v40 = vld [vmem:[%s6737_s4 + $0x164] ss:$8 sps:$4 sm:$0xff]   ;;  %v5080_v43 = vld [vmem:[%s6737_s4 + $0x314] ss:$8 sps:$4 sm:$0xff]   ;;  %v5075_v44 = vld [vmem:[%s6737_s4 + $0x160] ss:$8 sps:$4 sm:$0xff]  }
  0x15   : > { %v5113_v41 = vld [vmem:[%s5672_s16 + $0x24] ss:$8 sps:$4 sm:$0xff]   ;;  %v5078_v45 = vld [vmem:[%s6737_s4 + $0x310] ss:$8 sps:$4 sm:$0xff]   ;;  %v5083_v46 = vld [vmem:[%s6737_s4 + $0x174] ss:$8 sps:$4 sm:$0xff]  }
  0x16   : > { %v5701_v47 = vld [vmem:[%s5672_s16 + $0x44] ss:$8 sps:$4 sm:$0xff]   ;;  %v5081_v49 = vld [vmem:[%s6737_s4 + $0x170] ss:$8 sps:$4 sm:$0xff]   ;;  %v5084_v51 = vld [vmem:[%s6737_s4 + $0x320] ss:$8 sps:$4 sm:$0xff]  }
  0x17   : > { %v5086_v48 = vld [vmem:[%s6737_s4 + $0x324] ss:$8 sps:$4 sm:$0xff]   ;;  %v5092_v52 = vld [vmem:[%s6737_s4 + $0x334] ss:$8 sps:$4 sm:$0xff]   ;;  %v5087_v53 = vld [vmem:[%s6737_s4 + $0x180] ss:$8 sps:$4 sm:$0xff]  }
  0x18   : > { %v5089_v50 = vld [vmem:[%s6737_s4 + $0x184] ss:$8 sps:$4 sm:$0xff]   ;;  %v5095_v54 = vld [vmem:[%s6737_s4 + $0x194] ss:$8 sps:$4 sm:$0xff]   ;;  %v5090_v55 = vld [vmem:[%s6737_s4 + $0x330] ss:$8 sps:$4 sm:$0xff]  }
  0x19   : > { %4890 = vmatmul.mubr.msk.bf16.vlgmr.msra.gmra.mrb[4].mxu1 %vm391_vm0, %v5022_v8  ;;  %v5098_v56 = vld [vmem:[%s6737_s4 + $0x344] ss:$8 sps:$4 sm:$0xff]   ;;  %v5093_v57 = vld [vmem:[%s6737_s4 + $0x190] ss:$8 sps:$4 sm:$0xff]   ;;  %v5096_v59 = vld [vmem:[%s6737_s4 + $0x340] ss:$8 sps:$4 sm:$0xff]  }
  0x1a   : > { %4894 = vmatpush3.bf16.msra.mxu1 %v5027_v7  ;;  %4895 = vmatprep.mubr.msk.bf16.mxu1 %vm391_vm0, %v5579_v10  ;;  %v5101_v58 = vld [vmem:[%s6737_s4 + $0x1a4] ss:$8 sps:$4 sm:$0xff]   ;;  %v5104_v60 = vld [vmem:[%s6737_s4 + $0x354] ss:$8 sps:$4 sm:$0xff]   ;;  %v5099_v61 = vld [vmem:[%s6737_s4 + $0x1a0] ss:$8 sps:$4 sm:$0xff]  }
  0x1b   : > { %1848 = vmatprep.subr.bf16.mxu1 %v5037_v11  ;;  %v5107_v62 = vld [vmem:[%s6737_s4 + $0x1b4] ss:$8 sps:$4 sm:$0xff]   ;;  %v5102_v63 = vld [vmem:[%s6737_s4 + $0x350] ss:$8 sps:$4 sm:$0xff]   ;;  %v5110_v0 = vld [vmem:[%s6737_s4 + $0x364] ss:$8 sps:$4 sm:$0xff]  }
  0x1c   : > { %v5105_v1 = vld [vmem:[%s6737_s4 + $0x1b0] ss:$8 sps:$4 sm:$0xff]   ;;  %v5116_v3 = vld [vmem:[%s6737_s4 + $0x4] ss:$8 sps:$4 sm:$0xff]   ;;  %v5108_v4 = vld [vmem:[%s6737_s4 + $0x360] ss:$8 sps:$4 sm:$0xff]  }
  0x1d   : > { %4215 = vmatmul.mubr.msk.bf16.vlgmr.msra.gmra.mrb[0].mxu0 %vm391_vm0, %v5579_v10  ;;  %v5111_v5 = vld [vmem:[%s5672_s16 + $0x20] ss:$8 sps:$4 sm:$0xff]   ;;  %v5119_v6 = vld [vmem:[%s6737_s4 + $0x374] ss:$8 sps:$4 sm:$0xff]   ;;  %v5117_v9 = vld [vmem:[%s6737_s4 + $0x370] ss:$8 sps:$4 sm:$0xff]  }
  0x1e   : > { %822 = vmatpush1.bf16.msra.mxu0 %v5028_v12  ;;  %569 = vmatprep.mubr.bf16.mxu0 %v5492_v2  ;;  %v5114_v7 = vld [vmem:[%s6737_s4] ss:$8 sps:$4 sm:$0xff]   ;;  %v5122_v8 = vld [vmem:[%s6737_s4 + $0x14] ss:$8 sps:$4 sm:$0xff]   ;;  %v5127_v11 = vld [vmem:[%s6737_s4 + $0x384] ss:$8 sps:$4 sm:$0xff]  }
  0x1f   : > { %823 = vmatprep.subr.bf16.mxu0 %v5034_v13  ;;  %v5120_v12 = vld [vmem:[%s6737_s4 + $0x10] ss:$8 sps:$4 sm:$0xff]   ;;  %vm1093_vm2 = vsmask.f32 7424  ;;  %vm2744_vm3 = vsmask.f32 5376 }
  0x20   : > { %v4221_v13 = vld [vmem:[%s5672_s16 + $0x30] sm:$0x33]  ;;  %s5008_s12 = smul.u32 144, %s6742_s25  ;;  %vm4102_vm5 = vcmask 125952  }
  0x21   : > { %4896 = vmatmul.mubr.msk.bf16.vlgmr.msra.gmra.mrb[8].mxu1 %vm391_vm0, %v5038_v15 }
  0x22   : > { %824 = vmatpush1.bf16.msra.mxu0 %v5032_v14  ;;  %1849 = vmatpush1.bf16.msra.mxu1 %v5035_v17  ;;  %v5786_v14 = vld [vmem:[%s5672_s16 + $0x40] ss:$8 sps:$4 sm:$0xff]   ;;  %s6676_s17 = scalar_lea.vmem %s6740_s7, %s5008_s12 }
  0x23   : > { %825 = vmatprep.subr.bf16.mxu0 %v5041_v16  ;;  %1850 = vmatprep.subr.bf16.mxu1 %v5044_v18  ;;  %v4253_v16 = vcombine.high %v4221_v13, %v4221_v13  ;;  %v5125_v17 = vld [vmem:[%s6737_s4 + $0x380] ss:$8 sps:$4 sm:$0xff]   ;;  %v5134_v18 = vld [vmem:[%s6737_s4 + $0x394] ss:$8 sps:$4 sm:$0xff]  }
  0x24   : > { %4469 = vmatprep.mubr.msk.bf16.mxu1 %vm814_vm1, %v5701_v47 }
  0x25   : > { %4216 = vmatmul.mubr.msk.bf16.gmra.mrb[4].mxu0 %vm391_vm0, %v5038_v15  ;;  %v5131_v15 = vld [vmem:[%s6737_s4 + $0x24] ss:$8 sps:$4 sm:$0xff]  }
  0x26   : > { %826 = vmatpush1.bf16.msra.mxu0 %v5039_v19  ;;  %1851 = vmatpush1.bf16.msra.mxu1 %v5042_v21  ;;  %v4252_v19 = vcombine.low %v4221_v13, %v4221_v13  ;;  %v5137_v21 = vld [vmem:[%s6737_s4 + $0x34] ss:$8 sps:$4 sm:$0xff]   ;;  %v5201_v13 = vld [vmem:[%s6737_s4 + $0x440] ss:$8 sps:$4 sm:$0xff]  }
  0x27   : > { %827 = vmatprep.subr.bf16.mxu0 %v5047_v20  ;;  %1852 = vmatprep.subr.bf16.mxu1 %v5050_v22  ;;  %v5129_v20 = vld [vmem:[%s6737_s4 + $0x20] ss:$8 sps:$4 sm:$0xff]   ;;  %v5132_v22 = vld [vmem:[%s6737_s4 + $0x390] ss:$8 sps:$4 sm:$0xff]  }
  0x28   : > { %4282 = vmatprep.mubr.msk.bf16.mxu0 %vm814_vm1, %v5113_v41  ;;  %v5150_v41 = vld [vmem:[%s6737_s4 + $0x3c0] ss:$8 sps:$4 sm:$0xff]  }
  0x2a   : > { %828 = vmatpush1.bf16.msra.mxu0 %v5045_v23  ;;  %1853 = vmatpush1.bf16.msra.mxu1 %v5048_v25  ;;  %v5140_v23 = vld [vmem:[%s6737_s4 + $0x3a4] ss:$8 sps:$4 sm:$0xff]   ;;  %v5135_v25 = vld [vmem:[%s6737_s4 + $0x30] ss:$8 sps:$4 sm:$0xff]  }
  0x2b   : > { %829 = vmatprep.subr.bf16.mxu0 %v5053_v24  ;;  %1854 = vmatprep.subr.bf16.mxu1 %v5056_v26  ;;  %v4408_v24 = vld [vmem:[%s5672_s16 + $0x50] sm:$0x33]  ;;  %v5143_v26 = vld [vmem:[%s6737_s4 + $0x44] ss:$8 sps:$4 sm:$0xff]  }
  0x2e   : > { %830 = vmatpush1.bf16.msra.mxu0 %v5051_v27  ;;  %1855 = vmatpush1.bf16.msra.mxu1 %v5054_v29  ;;  %v4440_v27 = vcombine.high %v4408_v24, %v4408_v24  ;;  %v5819_v29 = vld [vmem:[%s5672_s16] sm:$0xff] }
  0x2f   : > { %831 = vmatprep.subr.bf16.mxu0 %v5059_v28  ;;  %1856 = vmatprep.subr.bf16.mxu1 %v5062_v30  ;;  %v4439_v28 = vcombine.low %v4408_v24, %v4408_v24  ;;  %v5822_v30 = vld [vmem:[%s5672_s16 + $0x8] sm:$0xff] }
  0x32   : > { %832 = vmatpush1.bf16.msra.mxu0 %v5057_v31  ;;  %1857 = vmatpush1.bf16.msra.mxu1 %v5060_v33  ;;  %v5138_v31 = vld [vmem:[%s6737_s4 + $0x3a0] ss:$8 sps:$4 sm:$0xff]   ;;  %v5146_v33 = vld [vmem:[%s6737_s4 + $0x3b4] ss:$8 sps:$4 sm:$0xff]  }
  0x33   : > { %833 = vmatprep.subr.bf16.mxu0 %v5065_v32  ;;  %1858 = vmatprep.subr.bf16.mxu1 %v5068_v34  ;;  %v5830_v32 = vcombine.high %v5819_v29, %v5822_v30  ;;  %v5141_v34 = vld [vmem:[%s6737_s4 + $0x40] ss:$8 sps:$4 sm:$0xff]  }
  0x36   : > { %834 = vmatpush1.bf16.msra.mxu0 %v5063_v35  ;;  %1859 = vmatpush1.bf16.msra.mxu1 %v5066_v37  ;;  %v5149_v35 = vld [vmem:[%s6737_s4 + $0x54] ss:$8 sps:$4 sm:$0xff]   ;;  %v5144_v37 = vld [vmem:[%s6737_s4 + $0x3b0] ss:$8 sps:$4 sm:$0xff]  }
  0x37   : > { %835 = vmatprep.subr.bf16.mxu0 %v5071_v36  ;;  %1860 = vmatprep.subr.bf16.mxu1 %v5074_v38  ;;  %v5215_v36 = vld [vmem:[%s5672_s16 + $0x64] ss:$8 sps:$4 sm:$0xff]  }
  0x38   : > { %v5152_v38 = vld [vmem:[%s6737_s4 + $0x3c4] ss:$8 sps:$4 sm:$0xff]  }
  0x3a   : > { %836 = vmatpush1.bf16.msra.mxu0 %v5069_v39  ;;  %1861 = vmatpush1.bf16.msra.mxu1 %v5072_v42  ;;  %v5147_v39 = vld [vmem:[%s6737_s4 + $0x50] ss:$8 sps:$4 sm:$0xff]   ;;  %v5158_v42 = vld [vmem:[%s6737_s4 + $0x3d4] ss:$8 sps:$4 sm:$0xff]  }
  0x3b   : > { %837 = vmatprep.subr.bf16.mxu0 %v5077_v40  ;;  %1862 = vmatprep.subr.bf16.mxu1 %v5080_v43  ;;  %v5155_v40 = vld [vmem:[%s6737_s4 + $0x64] ss:$8 sps:$4 sm:$0xff]   ;;  %v5153_v43 = vld [vmem:[%s6737_s4 + $0x60] ss:$8 sps:$4 sm:$0xff]  }
  0x3e   : > { %838 = vmatpush1.bf16.msra.mxu0 %v5075_v44  ;;  %1863 = vmatpush1.bf16.msra.mxu1 %v5078_v45  ;;  %v5161_v44 = vld [vmem:[%s6737_s4 + $0x74] ss:$8 sps:$4 sm:$0xff]   ;;  %v5156_v45 = vld [vmem:[%s6737_s4 + $0x3d0] ss:$8 sps:$4 sm:$0xff]  }
  0x3f   : > { %839 = vmatprep.subr.bf16.mxu0 %v5083_v46  ;;  %1864 = vmatprep.subr.bf16.mxu1 %v5086_v48  ;;  %v5164_v46 = vld [vmem:[%s6737_s4 + $0x3e4] ss:$8 sps:$4 sm:$0xff]   ;;  %v5159_v48 = vld [vmem:[%s6737_s4 + $0x70] ss:$8 sps:$4 sm:$0xff]  }
  0x42   : > { %840 = vmatpush1.bf16.msra.mxu0 %v5081_v49  ;;  %1865 = vmatpush1.bf16.msra.mxu1 %v5084_v51  ;;  %v5167_v49 = vld [vmem:[%s6737_s4 + $0x84] ss:$8 sps:$4 sm:$0xff]   ;;  %v5170_v51 = vld [vmem:[%s6737_s4 + $0x3f4] ss:$8 sps:$4 sm:$0xff]  }
  0x43   : > { %841 = vmatprep.subr.bf16.mxu0 %v5089_v50  ;;  %1866 = vmatprep.subr.bf16.mxu1 %v5092_v52  ;;  %v5162_v50 = vld [vmem:[%s6737_s4 + $0x3e0] ss:$8 sps:$4 sm:$0xff]  }
  0x44   : > { %v5165_v52 = vld [vmem:[%s6737_s4 + $0x80] ss:$8 sps:$4 sm:$0xff]  }
  0x46   : > { %842 = vmatpush1.bf16.msra.mxu0 %v5087_v53  ;;  %1867 = vmatpush1.bf16.msra.mxu1 %v5090_v55  ;;  %v5173_v53 = vld [vmem:[%s6737_s4 + $0x94] ss:$8 sps:$4 sm:$0xff]   ;;  %v5176_v55 = vld [vmem:[%s6737_s4 + $0x404] ss:$8 sps:$4 sm:$0xff]  }
  0x47   : > { %843 = vmatprep.subr.bf16.mxu0 %v5095_v54  ;;  %1868 = vmatprep.subr.bf16.mxu1 %v5098_v56  ;;  %v5168_v54 = vld [vmem:[%s6737_s4 + $0x3f0] ss:$8 sps:$4 sm:$0xff]  }
  0x48   : > { %v5171_v56 = vld [vmem:[%s6737_s4 + $0x90] ss:$8 sps:$4 sm:$0xff]  }
  0x4a   : > { %844 = vmatpush1.bf16.msra.mxu0 %v5093_v57  ;;  %1869 = vmatpush1.bf16.msra.mxu1 %v5096_v59  ;;  %v5179_v57 = vld [vmem:[%s6737_s4 + $0xa4] ss:$8 sps:$4 sm:$0xff]   ;;  %v5182_v59 = vld [vmem:[%s6737_s4 + $0x414] ss:$8 sps:$4 sm:$0xff]  }
  0x4b   : > { %845 = vmatprep.subr.bf16.mxu0 %v5101_v58  ;;  %1870 = vmatprep.subr.bf16.mxu1 %v5104_v60  ;;  %v5174_v58 = vld [vmem:[%s6737_s4 + $0x400] ss:$8 sps:$4 sm:$0xff]  }
  0x4c   : > { %v5177_v60 = vld [vmem:[%s6737_s4 + $0xa0] ss:$8 sps:$4 sm:$0xff]  }
  0x4e   : > { %846 = vmatpush1.bf16.msra.mxu0 %v5099_v61  ;;  %1871 = vmatpush1.bf16.msra.mxu1 %v5102_v63  ;;  %v5186_v61 = vld [vmem:[%s6737_s4 + $0xb4] ss:$8 sps:$4 sm:$0xff]   ;;  %v5189_v63 = vld [vmem:[%s6737_s4 + $0x424] ss:$8 sps:$4 sm:$0xff]  }
  0x4f   : > { %847 = vmatprep.subr.bf16.mxu0 %v5107_v62  ;;  %1872 = vmatprep.subr.bf16.mxu1 %v5110_v0  ;;  %v5180_v62 = vld [vmem:[%s6737_s4 + $0x410] ss:$8 sps:$4 sm:$0xff]  }
  0x50   : > { %v5184_v0 = vld [vmem:[%s6737_s4 + $0xb0] ss:$8 sps:$4 sm:$0xff]  }
  0x52   : > { %848 = vmatpush1.bf16.msra.mxu0 %v5105_v1  ;;  %1873 = vmatpush1.bf16.msra.mxu1 %v5108_v4  ;;  %v5193_v1 = vld [vmem:[%s6737_s4 + $0xc4] ss:$8 sps:$4 sm:$0xff]   ;;  %v5196_v4 = vld [vmem:[%s6737_s4 + $0x434] ss:$8 sps:$4 sm:$0xff]  }
  0x53   : > { %1033 = vmatprep.subr.bf16.mxu0 %v5116_v3  ;;  %1874 = vmatprep.subr.bf16.mxu1 %v5119_v6  ;;  %v5187_v3 = vld [vmem:[%s6737_s4 + $0x420] ss:$8 sps:$4 sm:$0xff]   ;;  %v5199_v6 = vld [vmem:[%s6737_s4 + $0xd4] ss:$8 sps:$4 sm:$0xff]  }
  0x55   : > { %854 = vmatmul.mubr.bf16.vlgmr.msra.gmra.mrb[8].mxu0 %v5111_v5  ;;  %v5191_v5 = vld [vmem:[%s6737_s4 + $0xc0] ss:$8 sps:$4 sm:$0xff]  }
  0x56   : > { %1034 = vmatpush1.bf16.msra.mxu0 %v5114_v7  ;;  %1875 = vmatpush1.bf16.msra.mxu1 %v5117_v9  ;;  %v5194_v7 = vld [vmem:[%s6737_s4 + $0x430] ss:$8 sps:$4 sm:$0xff]  }
  0x57   : > { %1035 = vmatprep.subr.bf16.mxu0 %v5122_v8  ;;  %2246 = vmatprep.subr.bf16.mxu1 %v5127_v11  ;;  %v5203_v8 = vld [vmem:[%s6737_s4 + $0x444] ss:$8 sps:$4 sm:$0xff]   ;;  %v5197_v9 = vld [vmem:[%s6737_s4 + $0xd0] ss:$8 sps:$4 sm:$0xff]   ;;  %v5209_v11 = vld [vmem:[%s6734_s1 + $0x34] ss:$12 sps:$4 sm:$0xff]  }
  0x58   : > { %4283 = vmatprep.mubr.msk.bf16.mxu0 %vm814_vm1, %v4253_v16  ;;  %v5207_v16 = vld [vmem:[%s6734_s1 + $0x30] ss:$12 sps:$4 sm:$0xff]  }
  0x59   : > { %1881 = vmatmul.mubr.bf16.vlgmr.msra.gmra.mrb[12].mxu1 %v5786_v14 }
  0x5a   : > { %1036 = vmatpush1.bf16.msra.mxu0 %v5120_v12  ;;  %2247 = vmatpush1.bf16.msra.mxu1 %v5125_v17  ;;  %v329_v12 = vld [vmem:[%s5672_s16 + $0x10] sm:$0x33] }
  0x5b   : > { %1037 = vmatprep.subr.bf16.mxu0 %v5131_v15  ;;  %2248 = vmatprep.subr.bf16.mxu1 %v5134_v18  ;;  %v5959_v15 = vcombine.low %v5819_v29, %v5822_v30  ;;  %v5212_v17 = vld [vmem:[%s6737_s4 + $0x454] ss:$8 sps:$4 sm:$0xff]   ;;  %v4287_v18 = vcombine.high %v329_v12, %v329_v12  ;;  %v5216_v29 = vld [vmem:[%s6737_s4 + $0x460] ss:$8 sps:$4 sm:$0xff]  }
  0x5c   : > { %4470 = vmatprep.mubr.msk.bf16.mxu1 %vm814_vm1, %v4440_v27  ;;  %v1096_v27 = vshll.u32 %v5579_v10, 16 }
  0x5d   : > { %864 = vmatmul.mubr.bf16.gmra.mrb[12].mxu0 %v4252_v19  ;;  %v5968_v19 = vld [vmem:[%s5672_s16 + $0x50] sm:$0x77] }
  0x5e   : > { %1038 = vmatpush1.bf16.msra.mxu0 %v5129_v20  ;;  %2249 = vmatpush1.bf16.msra.mxu1 %v5132_v22  ;;  %v5228_v20 = vld [vmem:[%s6734_s1 + $0x38] ss:$12 sps:$4 sm:$0xff]   ;;  %v5983_v24 = vcombine.high %v5968_v19, %v5968_v19 }
  0x5f   : > { %1039 = vmatprep.subr.bf16.mxu0 %v5137_v21  ;;  %2250 = vmatprep.subr.bf16.mxu1 %v5140_v23  ;;  %v5210_v21 = vld [vmem:[%s6737_s4 + $0x450] ss:$8 sps:$4 sm:$0xff]   ;;  %v5218_v22 = vld [vmem:[%s6737_s4 + $0x464] ss:$8 sps:$4 sm:$0xff]  }
  0x60   : > { %4316 = vmatprep.mubr.msk.bf16.mxu0 %vm814_vm1, %v5830_v32  ;;  %v4489_v23 = vld [vmem:[%s5672_s16 + $0x70] sm:$0x33] }
  0x61   : > { %1891 = vmatmul.mubr.bf16.gmra.mrb[16].mxu1 %v4439_v28  ;;  %v5213_v28 = vld [vmem:[%s5672_s16 + $0x60] ss:$8 sps:$4 sm:$0xff]  }
  0x62   : > { %1040 = vmatpush1.bf16.msra.mxu0 %v5135_v25  ;;  %2251 = vmatpush1.bf16.msra.mxu1 %v5138_v31  ;;  %v2505_v25 = vshll.u32 %v5701_v47, 16  ;;  %v4521_v31 = vcombine.high %v4489_v23, %v4489_v23 }
  0x63   : > { %1041 = vmatprep.subr.bf16.mxu0 %v5143_v26  ;;  %2252 = vmatprep.subr.bf16.mxu1 %v5146_v33  ;;  %v5227_v26 = vld [vmem:[%s5561_s14 + $0x8] ss:$0 sps:$4 sm:$0x77]   ;;  %v2503_v33 = vshrl.u32 %v5701_v47, 16  ;;  %v5226_v47 = vld [vmem:[%s6737_s4 + $0x484] ss:$8 sps:$4 sm:$0xff]  }
  0x64   : > { %4550 = vmatprep.mubr.msk.bf16.mxu1 %vm814_vm1, %v5215_v36  ;;  %v2507_v36 = vrot.slane %v2505_v25, 1  ;;  %v5267_v25 = vld [vmem:[%s6737_s4 + $0x204] ss:$8 sps:$4 sm:$0xff]  }
  0x66   : > { %1042 = vmatpush1.bf16.msra.mxu0 %v5141_v34  ;;  %2253 = vmatpush1.bf16.msra.mxu1 %v5144_v37  ;;  %v4286_v34 = vcombine.low %v329_v12, %v329_v12  ;;  %v2510_v37 = vshll.u32 %v5983_v24, 16  ;;  %v5247_v12 = vld [vmem:[%s6737_s4 + $0x1d0] ss:$8 sps:$4 sm:$0xff]  }
  0x67   : > { %1043 = vmatprep.subr.bf16.mxu0 %v5149_v35  ;;  %2254 = vmatprep.subr.bf16.mxu1 %v5152_v38  ;;  %v5223_v35 = vld [vmem:[%s6737_s4 + $0x474] ss:$8 sps:$4 sm:$0xff]   ;;  %v1094_v38 = vshrl.u32 %v5579_v10, 16 }
  0x6a   : > { %1044 = vmatpush1.bf16.msra.mxu0 %v5147_v39  ;;  %2255 = vmatpush1.bf16.msra.mxu1 %v5150_v41  ;;  %v1098_v39 = vrot.slane %v1096_v27, 1  ;;  %v5221_v41 = vld [vmem:[%s6737_s4 + $0x470] ss:$8 sps:$4 sm:$0xff]   ;;  %v5270_v27 = vld [vmem:[%s6737_s4 + $0x514] ss:$8 sps:$4 sm:$0xff]  }
  0x6b   : > { %1045 = vmatprep.subr.bf16.mxu0 %v5155_v40  ;;  %2256 = vmatprep.subr.bf16.mxu1 %v5158_v42  ;;  %v1101_v40 = vshll.u32 %v5227_v26, 16  ;;  %v2508_v42 = vor.u32 %v2507_v36, %v2503_v33  ;;  %v5268_v33 = vld [vmem:[%s6737_s4 + $0x510] ss:$8 sps:$4 sm:$0xff]   ;;  %v5277_v36 = vld [vmem:[%s6737_s4 + $0x524] ss:$8 sps:$4 sm:$0xff]  }
  0x6c   : > { %v1099_v10 = vor.u32 %v1098_v39, %v1094_v38  ;;  %v2492_v38 = vshrl.u32 %v5786_v14, 16  ;;  %v5281_v39 = vld [vmem:[%s6737_s4 + $0x224] ss:$8 sps:$4 sm:$0xff]  }
  0x6e   : > { %1046 = vmatpush1.bf16.msra.mxu0 %v5153_v43  ;;  %2257 = vmatpush1.bf16.msra.mxu1 %v5156_v45  ;;  %v6006_v43 = vrot.slane %v2510_v37, 1  ;;  %v4520_v45 = vcombine.low %v4489_v23, %v4489_v23  ;;  %v5259_v23 = vld [vmem:[%s6737_s4 + $0x1f0] ss:$8 sps:$4 sm:$0xff]   ;;  %v6135_v37 = vld [vmem:[%s5672_s16] sm:$0xcc] }
  0x6f   : > { %1047 = vmatprep.subr.bf16.mxu0 %v5161_v44  ;;  %2258 = vmatprep.subr.bf16.mxu1 %v5164_v46  ;;  %v1103_v44 = vrot.slane %v1101_v40, 1  ;;  %v5224_v46 = vld [vmem:[%s6737_s4 + $0x480] ss:$8 sps:$4 sm:$0xff]  }
  0x72   : > { %1048 = vmatpush1.bf16.msra.mxu0 %v5159_v48  ;;  %2259 = vmatpush1.bf16.msra.mxu1 %v5162_v50  ;;  %v5231_v48 = vld [vmem:[%s6737_s4 + $0x494] ss:$8 sps:$4 sm:$0xff]   ;;  %v1104_v50 = vsel %vm1093_vm2, %v1099_v10, %v1103_v44  ;;  %v5279_v10 = vld [vmem:[%s6737_s4 + $0x220] ss:$8 sps:$4 sm:$0xff]  }
  0x73   : > { %1049 = vmatprep.subr.bf16.mxu0 %v5167_v49  ;;  %2260 = vmatprep.subr.bf16.mxu1 %v5170_v51  ;;  %v2513_v49 = vsel %vm1093_vm2, %v2508_v42, %v6006_v43  ;;  %v5229_v51 = vld [vmem:[%s6737_s4 + $0x490] ss:$8 sps:$4 sm:$0xff]   ;;  %v6151_v42 = vld [vmem:[%s5672_s16 + $0x14] ss:$8 sps:$4 sm:$0x1f]  }
  0x76   : > { %1050 = vmatpush1.bf16.msra.mxu0 %v5165_v52  ;;  %2261 = vmatpush1.bf16.msra.mxu1 %v5168_v54  ;;  %v1105_v52 = vshrl.u32 %v5227_v26, 16  ;;  %v6026_v54 = vld [vmem:[%s5672_s16 + $0x10] sm:$0x77]  ;;  %v5262_v26 = vld [vmem:[%s6737_s4 + $0x500] ss:$8 sps:$4 sm:$0xff]  }
  0x77   : > { %1051 = vmatprep.subr.bf16.mxu0 %v5173_v53  ;;  %2262 = vmatprep.subr.bf16.mxu1 %v5176_v55  ;;  %v5243_v53 = vld [vmem:[%s6737_s4 + $0x1c4] ss:$8 sps:$4 sm:$0xff]  }
  0x78   : > { %v5234_v55 = vld [vmem:[%s6737_s4 + $0x4a4] ss:$8 sps:$4 sm:$0xff]  }
  0x7a   : > { %1052 = vmatpush1.bf16.msra.mxu0 %v5171_v56  ;;  %2263 = vmatpush1.bf16.msra.mxu1 %v5174_v58  ;;  %v6035_v56 = vcombine.high %v6026_v54, %v6026_v54  ;;  %v5232_v58 = vld [vmem:[%s6737_s4 + $0x4a0] ss:$8 sps:$4 sm:$0xff]  }
  0x7b   : > { %1053 = vmatprep.subr.bf16.mxu0 %v5179_v57  ;;  %2264 = vmatprep.subr.bf16.mxu1 %v5182_v59  ;;  %v1287_v57 = vshll.u32 %v5830_v32, 16  ;;  %v1107_v59 = vor.u32 %v1105_v52, %v1103_v44  ;;  %v5287_v44 = vld [vmem:[%s6737_s4 + $0x234] ss:$8 sps:$4 sm:$0xff]   ;;  %v2967_v52 = vshrl.u32 %v6151_v42, 16 }
  0x7e   : > { %1054 = vmatpush1.bf16.msra.mxu0 %v5177_v60  ;;  %2265 = vmatpush1.bf16.msra.mxu1 %v5180_v62  ;;  %v5237_v60 = vld [vmem:[%s6737_s4 + $0x4b4] ss:$8 sps:$4 sm:$0xff]   ;;  %v1289_v62 = vrot.slane %v1287_v57, 1  ;;  %v5295_v57 = vld [vmem:[%s6737_s4 + $0x244] ss:$8 sps:$4 sm:$0xff]  }
  0x7f   : > { %1055 = vmatprep.subr.bf16.mxu0 %v5186_v61  ;;  %2266 = vmatprep.subr.bf16.mxu1 %v5189_v63  ;;  %v1285_v61 = vshrl.u32 %v5830_v32, 16  ;;  %v1292_v63 = vshll.u32 %v6035_v56, 16  ;;  %v5238_v32 = vld [vmem:[%s6737_s4 + $0x4c0] ss:$8 sps:$4 sm:$0xff]  }
  0x82   : > { %1056 = vmatpush1.bf16.msra.mxu0 %v5184_v0  ;;  %2267 = vmatpush1.bf16.msra.mxu1 %v5187_v3  ;;  %v5235_v0 = vld [vmem:[%s6737_s4 + $0x4b0] ss:$8 sps:$4 sm:$0xff]   ;;  %v1290_v3 = vor.u32 %v1289_v62, %v1285_v61  ;;  %v5298_v61 = vld [vmem:[%s6737_s4 + $0x554] ss:$8 sps:$4 sm:$0xff]  }
  0x83   : > { %1057 = vmatprep.subr.bf16.mxu0 %v5193_v1  ;;  %2268 = vmatprep.subr.bf16.mxu1 %v5196_v4  ;;  %v5240_v1 = vld [vmem:[%s6737_s4 + $0x4c4] ss:$8 sps:$4 sm:$0xff]   ;;  %v6054_v4 = vrot.slane %v1292_v63, 1 }
  0x86   : > { %1058 = vmatpush1.bf16.msra.mxu0 %v5191_v5  ;;  %2269 = vmatpush1.bf16.msra.mxu1 %v5194_v7  ;;  %v5246_v5 = vld [vmem:[%s6737_s4 + $0x4d4] ss:$8 sps:$4 sm:$0xff]  }
  0x87   : > { %1059 = vmatprep.subr.bf16.mxu0 %v5199_v6  ;;  %2270 = vmatprep.subr.bf16.mxu1 %v5203_v8  ;;  %v5241_v6 = vld [vmem:[%s6737_s4 + $0x1c0] ss:$8 sps:$4 sm:$0xff]   ;;  %v5249_v7 = vld [vmem:[%s6737_s4 + $0x1d4] ss:$8 sps:$4 sm:$0xff]   ;;  %v1295_v8 = vsel %vm1093_vm2, %v1290_v3, %v6054_v4 }
  0x88   : > { %v5301_v3 = vld [vmem:[%s6737_s4 + $0x254] ss:$8 sps:$4 sm:$0xff]  }
  0x8a   : > { %1060 = vmatpush1.bf16.msra.mxu0 %v5197_v9  ;;  %2271 = vmatpush1.bf16.msra.mxu1 %v5201_v13  ;;  %v5244_v9 = vld [vmem:[%s6737_s4 + $0x4d0] ss:$8 sps:$4 sm:$0xff]   ;;  %v5255_v13 = vld [vmem:[%s6737_s4 + $0x1e4] ss:$8 sps:$4 sm:$0xff]  }
  0x8b   : > { %1130 = vmatprep.subr.bf16.mxu0 %v5209_v11  ;;  %2272 = vmatprep.subr.bf16.mxu1 %v5212_v17  ;;  %v5252_v11 = vld [vmem:[%s6737_s4 + $0x4e4] ss:$8 sps:$4 sm:$0xff]   ;;  %v5258_v17 = vld [vmem:[%s6737_s4 + $0x4f4] ss:$8 sps:$4 sm:$0xff]  }
  0x8d   : > { %1066 = vmatmul.mubr.bf16.vlgmr.msra.gmra.mrb[8].mxu0 %v5959_v15 }
  0x8e   : > { %1131 = vmatpush1.bf16.msra.mxu0 %v5207_v16  ;;  %4317 = vmatprep.mubr.msk.bf16.mxu0 %vm814_vm1, %v4287_v18  ;;  %v5250_v16 = vld [vmem:[%s6737_s4 + $0x4e0] ss:$8 sps:$4 sm:$0xff]  }
  0x8f   : > { %4899 = vmatprep.subr.bf16.mxu0 %v5228_v20  ;;  %2273 = vmatpush1.bf16.msra.mxu1 %v5210_v21  ;;  %v5253_v18 = vld [vmem:[%s6737_s4 + $0x1e0] ss:$8 sps:$4 sm:$0xff]   ;;  %v5256_v21 = vld [vmem:[%s6737_s4 + $0x4f0] ss:$8 sps:$4 sm:$0xff]  }
  0x90   : > { %2668 = vmatprep.subr.bf16.mxu1 %v5218_v22  ;;  %v5264_v22 = vld [vmem:[%s6737_s4 + $0x504] ss:$8 sps:$4 sm:$0xff]  }
  0x92   : > { %2279 = vmatmul.mubr.bf16.vlgmr.msra.gmra.mrb[12].mxu1 %v5213_v28  ;;  %v5265_v28 = vld [vmem:[%s6737_s4 + $0x200] ss:$8 sps:$4 sm:$0xff]  }
  0x93   : > { %2669 = vmatpush1.bf16.msra.mxu1 %v5216_v29  ;;  %4551 = vmatprep.mubr.msk.bf16.mxu1 %vm814_vm1, %v4521_v31  ;;  %v2494_v29 = vshll.u32 %v5786_v14, 16  ;;  %v5273_v31 = vld [vmem:[%s6737_s4 + $0x214] ss:$8 sps:$4 sm:$0xff]   ;;  %v4668_v14 = vcombine.high %v6135_v37, %v5822_v30  ;;  %v5292_v30 = vld [vmem:[%s6737_s4 + $0x544] ss:$8 sps:$4 sm:$0xff]  }
  0x94   : > { %2670 = vmatprep.subr.bf16.mxu1 %v5223_v35  ;;  %v6129_v35 = vcombine.low %v5968_v19, %v5968_v19  ;;  %v5275_v19 = vld [vmem:[%s6737_s4 + $0x520] ss:$8 sps:$4 sm:$0xff]  }
  0x95   : > { %1076 = vmatmul.mubr.bf16.gmra.mrb[16].mxu0 %v4286_v34  ;;  %v5271_v34 = vld [vmem:[%s6737_s4 + $0x210] ss:$8 sps:$4 sm:$0xff]   ;;  %v2496_v40 = vrot.slane %v2494_v29, 1  ;;  %v1274_v29 = vshrl.u32 %v5959_v15, 16 }
  0x96   : > { %1162 = vmatprep.mubr.bf16.mxu0 %v5492_v2 }
  0x97   : > { %2671 = vmatpush1.bf16.msra.mxu1 %v5221_v41  ;;  %v5284_v41 = vld [vmem:[%s6737_s4 + $0x534] ss:$8 sps:$4 sm:$0xff]  }
  0x98   : > { %2672 = vmatprep.subr.bf16.mxu1 %v5226_v47  ;;  %v2499_v47 = vshll.u32 %v6129_v35, 16 }
  0x9a   : > { %2289 = vmatmul.mubr.bf16.gmra.mrb[20].mxu1 %v4520_v45  ;;  %v5282_v45 = vld [vmem:[%s6737_s4 + $0x530] ss:$8 sps:$4 sm:$0xff]  }
  0x9b   : > { %2673 = vmatpush1.bf16.msra.mxu1 %v5224_v46  ;;  %4624 = vmatprep.mubr.msk.bf16.mxu1 %vm814_vm1, %v2513_v49  ;;  %v2497_v46 = vor.u32 %v2496_v40, %v2492_v38  ;;  %v2517_v49 = vshrl.u32 %v5983_v24, 16  ;;  %v5290_v24 = vld [vmem:[%s6737_s4 + $0x540] ss:$8 sps:$4 sm:$0xff]   ;;  %v5333_v38 = vld [vmem:[%s6734_s1 + $0x4c] ss:$12 sps:$4 sm:$0xff]  }
  0x9c   : > { %2674 = vmatprep.subr.bf16.mxu1 %v5231_v48  ;;  %v2501_v48 = vrot.slane %v2499_v47, 1  ;;  %v5336_v47 = vld [vmem:[%s6737_s4 + $0x5b4] ss:$8 sps:$4 sm:$0xff]  }
  0x9d   : > { %4326 = vmatmul.mubr.msk.bf16.vlgmr.msra.gmra.mrb[0].mxu0 %vm391_vm0, %v1104_v50 }
  0x9e   : > { %4900 = vmatpush3.bf16.msra.mxu0 %v5228_v20  ;;  %1172 = vmatprep.mubr.bf16.mxu0 %v5492_v2  ;;  %v5261_v20 = vld [vmem:[%s6737_s4 + $0x1f4] ss:$8 sps:$4 sm:$0xff]  }
  0x9f   : > { %1450 = vmatprep.subr.bf16.mxu0 %v5243_v53  ;;  %2675 = vmatpush1.bf16.msra.mxu1 %v5229_v51  ;;  %v2962_v51 = vshll.u32 %v4668_v14, 16  ;;  %v2970_v53 = vshll.u32 %v6151_v42, 16 }
  0xa0   : > { %2676 = vmatprep.subr.bf16.mxu1 %v5234_v55  ;;  %v5285_v55 = vld [vmem:[%s6737_s4 + $0x230] ss:$8 sps:$4 sm:$0xff]  }
  0xa1   : > { %v2964_v63 = vrot.slane %v2962_v51, 3 }
  0xa3   : > { %2677 = vmatpush1.bf16.msra.mxu1 %v5232_v58  ;;  %v2502_v58 = vsel %vm1093_vm2, %v2497_v46, %v2501_v48 }
  0xa4   : > { %2678 = vmatprep.subr.bf16.mxu1 %v5237_v60  ;;  %v2519_v60 = vor.u32 %v2517_v49, %v6006_v43  ;;  %v5296_v43 = vld [vmem:[%s6737_s4 + $0x550] ss:$8 sps:$4 sm:$0xff]   ;;  %v5337_v49 = vld [vmem:[%s6737_s4 + $0x5c0] ss:$8 sps:$4 sm:$0xff]  }
  0xa5   : > { %4327 = vmatmul.mubr.msk.bf16.gmra.mrb[20].mxu0 %vm391_vm0, %v1107_v59 }
  0xa6   : > { %4901 = vmatprep.mubr.msk.bf16.mxu0 %vm391_vm0, %v1104_v50  ;;  %v2959_v50 = vshrl.u32 %v4668_v14, 16 }
  0xa7   : > { %2679 = vmatpush1.bf16.msra.mxu1 %v5235_v0  ;;  %v2969_v0 = vrot.slane %v2967_v52, 2 }
  0xa8   : > { %2680 = vmatprep.subr.bf16.mxu1 %v5240_v1  ;;  %v2961_v62 = vrot.slane %v2959_v50, 2  ;;  %v2972_v1 = vrot.slane %v2970_v53, 3  ;;  %v5342_v53 = vld [vmem:[%s6737_s4 + $0x5d4] ss:$8 sps:$4 sm:$0xff]  }
  0xab   : > { %2681 = vmatpush1.bf16.msra.mxu1 %v5238_v32  ;;  %v2514_v32 = vshrl.u32 %v6129_v35, 16  ;;  %v5325_v35 = vld [vmem:[%s6737_s4 + $0x294] ss:$8 sps:$4 sm:$0xff]  }
  0xac   : > { %2682 = vmatprep.subr.bf16.mxu1 %v5246_v5  ;;  %v5304_v5 = vld [vmem:[%s6737_s4 + $0x564] ss:$8 sps:$4 sm:$0xff]  }
  0xad   : > { %4902 = vmatmul.mubr.msk.bf16.vlgmr.msra.gmra.mrb[24].mxu0 %vm391_vm0, %v1107_v59  ;;  %v5293_v59 = vld [vmem:[%s6737_s4 + $0x240] ss:$8 sps:$4 sm:$0xff]  }
  0xae   : > { %1451 = vmatpush1.bf16.msra.mxu0 %v5241_v6  ;;  %4388 = vmatprep.mubr.msk.bf16.mxu0 %vm814_vm1, %v1295_v8  ;;  %v2965_v6 = vor.u32 %v2964_v63, %v2961_v62  ;;  %v5299_v8 = vld [vmem:[%s6737_s4 + $0x250] ss:$8 sps:$4 sm:$0xff]   ;;  %v5343_v62 = vld [vmem:[%s6737_s4 + $0x5e0] ss:$8 sps:$4 sm:$0xff]  }
  0xaf   : > { %1452 = vmatprep.subr.bf16.mxu0 %v5249_v7  ;;  %2683 = vmatpush1.bf16.msra.mxu1 %v5244_v9  ;;  %v6196_v7 = vor.u32 %v2972_v1, %v2969_v0  ;;  %v5307_v9 = vld [vmem:[%s6737_s4 + $0x264] ss:$8 sps:$4 sm:$0xff]  }
  0xb0   : > { %2684 = vmatprep.subr.bf16.mxu1 %v5252_v11  ;;  %v2516_v11 = vor.u32 %v2514_v32, %v2501_v48  ;;  %v6306_v1 = vld [vmem:[%s5561_s14 + $0x20] sm:$0xff]  }
  0xb2   : > { %1453 = vmatpush1.bf16.msra.mxu0 %v5247_v12  ;;  %v5302_v12 = vld [vmem:[%s6737_s4 + $0x560] ss:$8 sps:$4 sm:$0xff]  }
  0xb3   : > { %1454 = vmatprep.subr.bf16.mxu0 %v5255_v13  ;;  %2685 = vmatpush1.bf16.msra.mxu1 %v5250_v16  ;;  %v5310_v13 = vld [vmem:[%s6737_s4 + $0x574] ss:$8 sps:$4 sm:$0xff]   ;;  %v2974_v16 = vsel %vm2744_vm3, %v2965_v6, %v6196_v7  ;;  %v5348_v6 = vld [vmem:[%s6737_s4 + $0x5f0] ss:$8 sps:$4 sm:$0xff]  }
  0xb4   : > { %2686 = vmatprep.subr.bf16.mxu1 %v5258_v17  ;;  %v5305_v17 = vld [vmem:[%s6737_s4 + $0x260] ss:$8 sps:$4 sm:$0xff]  }
  0xb6   : > { %1455 = vmatpush1.bf16.msra.mxu0 %v5253_v18  ;;  %v5313_v18 = vld [vmem:[%s6737_s4 + $0x274] ss:$8 sps:$4 sm:$0xff]  }
  0xb7   : > { %1456 = vmatprep.subr.bf16.mxu0 %v5261_v20  ;;  %2687 = vmatpush1.bf16.msra.mxu1 %v5256_v21  ;;  %v5308_v20 = vld [vmem:[%s6737_s4 + $0x570] ss:$8 sps:$4 sm:$0xff]   ;;  %v1276_v21 = vshll.u32 %v5959_v15, 16  ;;  %v5328_v15 = vld [vmem:[%s6737_s4 + $0x5a4] ss:$8 sps:$4 sm:$0xff]  }
  0xb8   : > { %2688 = vmatprep.subr.bf16.mxu1 %v5264_v22  ;;  %v5311_v22 = vld [vmem:[%s6737_s4 + $0x270] ss:$8 sps:$4 sm:$0xff]  }
  0xba   : > { %1457 = vmatpush1.bf16.msra.mxu0 %v5259_v23  ;;  %v5316_v23 = vld [vmem:[%s6737_s4 + $0x584] ss:$8 sps:$4 sm:$0xff]  }
  0xbb   : > { %1458 = vmatprep.subr.bf16.mxu0 %v5267_v25  ;;  %2689 = vmatpush1.bf16.msra.mxu1 %v5262_v26  ;;  %v4358_v25 = vcombine.low %v6026_v54, %v6026_v54  ;;  %v5319_v26 = vld [vmem:[%s6737_s4 + $0x284] ss:$8 sps:$4 sm:$0xff]   ;;  %v5317_v54 = vld [vmem:[%s6737_s4 + $0x280] ss:$8 sps:$4 sm:$0xff]  }
  0xbc   : > { %2690 = vmatprep.subr.bf16.mxu1 %v5270_v27  ;;  %v5314_v27 = vld [vmem:[%s6737_s4 + $0x580] ss:$8 sps:$4 sm:$0xff]  }
  0xbd   : > { %v1296_v46 = vshrl.u32 %v4358_v25, 16 }
  0xbe   : > { %1459 = vmatpush1.bf16.msra.mxu0 %v5265_v28  ;;  %v5322_v28 = vld [vmem:[%s6737_s4 + $0x594] ss:$8 sps:$4 sm:$0xff]  }
  0xbf   : > { %1460 = vmatprep.subr.bf16.mxu0 %v5273_v31  ;;  %2691 = vmatpush1.bf16.msra.mxu1 %v5268_v33  ;;  %v1278_v31 = vrot.slane %v1276_v21, 1  ;;  %v1281_v33 = vshll.u32 %v4358_v25, 16 }
  0xc0   : > { %2692 = vmatprep.subr.bf16.mxu1 %v5277_v36  ;;  %v5323_v36 = vld [vmem:[%s6737_s4 + $0x290] ss:$8 sps:$4 sm:$0xff]  }
  0xc1   : > { %v1283_v40 = vrot.slane %v1281_v33, 1  ;;  %v5424_v33 = vld [vmem:[%s5672_s16 + $0x34] ss:$8 sps:$4 sm:$0x1f]  }
  0xc2   : > { %1461 = vmatpush1.bf16.msra.mxu0 %v5271_v34  ;;  %v5320_v34 = vld [vmem:[%s6737_s4 + $0x590] ss:$8 sps:$4 sm:$0xff]  }
  0xc3   : > { %1462 = vmatprep.subr.bf16.mxu0 %v5281_v39  ;;  %2693 = vmatpush1.bf16.msra.mxu1 %v5275_v19  ;;  %v1279_v39 = vor.u32 %v1278_v31, %v1274_v29  ;;  %v1299_v19 = vshrl.u32 %v6035_v56, 16  ;;  %v1298_v52 = vor.u32 %v1296_v46, %v1283_v40 }
  0xc4   : > { %2694 = vmatprep.subr.bf16.mxu1 %v5284_v41  ;;  %v5326_v41 = vld [vmem:[%s6737_s4 + $0x5a0] ss:$8 sps:$4 sm:$0xff]  }
  0xc5   : > { %v1284_v14 = vsel %vm1093_vm2, %v1279_v39, %v1283_v40  ;;  %v1301_v56 = vor.u32 %v1299_v19, %v6054_v4  ;;  %v5365_v19 = vld [vmem:[%s6737_s4 + $0x624] ss:$8 sps:$4 sm:$0xff]  }
  0xc6   : > { %1463 = vmatpush1.bf16.msra.mxu0 %v5279_v10  ;;  %v5331_v10 = vld [vmem:[%s6734_s1 + $0x48] ss:$12 sps:$4 sm:$0xff]  }
  0xc7   : > { %1464 = vmatprep.subr.bf16.mxu0 %v5287_v44  ;;  %2695 = vmatpush1.bf16.msra.mxu1 %v5282_v45  ;;  %v5347_v44 = vld [vmem:[%s6734_s1 + $0x50] ss:$12 sps:$4 sm:$0xff]  }
  0xc8   : > { %3123 = vmatprep.subr.bf16.mxu1 %v5292_v30  ;;  %v5334_v45 = vld [vmem:[%s6737_s4 + $0x5b0] ss:$8 sps:$4 sm:$0xff]   ;;  %v5339_v30 = vld [vmem:[%s6737_s4 + $0x5c4] ss:$8 sps:$4 sm:$0xff]  }
  0xca   : > { %1465 = vmatpush1.bf16.msra.mxu0 %v5285_v55  ;;  %2701 = vmatmul.mubr.bf16.vlgmr.msra.gmra.mrb[12].mxu1 %v2502_v58  ;;  %v5340_v55 = vld [vmem:[%s6737_s4 + $0x5d0] ss:$8 sps:$4 sm:$0xff]  }
  0xcb   : > { %1466 = vmatprep.subr.bf16.mxu0 %v5295_v57  ;;  %3124 = vmatpush1.bf16.msra.mxu1 %v5290_v24  ;;  %v5345_v57 = vld [vmem:[%s6737_s4 + $0x5e4] ss:$8 sps:$4 sm:$0xff]  }
  0xcc   : > { %4625 = vmatprep.mubr.msk.bf16.mxu1 %vm814_vm1, %v2519_v60  ;;  %3125 = vmatprep.subr.bf16.mxu1 %v5298_v61  ;;  %v6300_v61 = vld [vmem:[%s5672_s16 + $0x10] ss:$8 sps:$4 sm:$0x1f]  }
  0xce   : > { %1467 = vmatpush1.bf16.msra.mxu0 %v5293_v59  ;;  %v6295_v59 = vld [vmem:[%s5672_s16 + $0x8] sm:$0xff] }
  0xcf   : > { %1468 = vmatprep.subr.bf16.mxu0 %v5301_v3  ;;  %3126 = vmatpush1.bf16.msra.mxu1 %v5296_v43  ;;  %v4667_v60 = vcombine.low %v6135_v37, %v6295_v59  ;;  %v5350_v3 = vld [vmem:[%s6737_s4 + $0x5f4] ss:$8 sps:$4 sm:$0xff]   ;;  %v2950_v37 = vshrl.u32 %v6300_v61, 16 }
  0xd0   : > { %3127 = vmatprep.subr.bf16.mxu1 %v5304_v5  ;;  %v5368_v5 = vld [vmem:[%s6734_s1 + $0x64] ss:$12 sps:$4 sm:$0xff]  }
  0xd1   : > { %v2942_v32 = vshrl.u32 %v4667_v60, 16  ;;  %v2945_v43 = vshll.u32 %v4667_v60, 16  ;;  %v5392_v60 = vld [vmem:[%s6734_s1 + $0x7c] ss:$12 sps:$4 sm:$0xff]  }
  0xd2   : > { %1469 = vmatpush1.bf16.msra.mxu0 %v5299_v8  ;;  %2711 = vmatmul.mubr.bf16.gmra.mrb[24].mxu1 %v2516_v11  ;;  %v2953_v8 = vshll.u32 %v6300_v61, 16 }
  0xd3   : > { %1470 = vmatprep.subr.bf16.mxu0 %v5307_v9  ;;  %3128 = vmatpush1.bf16.msra.mxu1 %v5302_v12  ;;  %v5353_v9 = vld [vmem:[%s6737_s4 + $0x604] ss:$8 sps:$4 sm:$0xff]   ;;  %v5351_v12 = vld [vmem:[%s6737_s4 + $0x600] ss:$8 sps:$4 sm:$0xff]   ;;  %v2947_v21 = vrot.slane %v2945_v43, 3 }
  0xd4   : > { %4699 = vmatprep.mubr.msk.bf16.mxu1 %vm814_vm1, %v2974_v16  ;;  %3129 = vmatprep.subr.bf16.mxu1 %v5310_v13  ;;  %v5384_v43 = vld [vmem:[%s6737_s4 + $0x670] ss:$8 sps:$4 sm:$0xff]  }
  0xd6   : > { %1471 = vmatpush1.bf16.msra.mxu0 %v5305_v17  ;;  %v5354_v17 = vld [vmem:[%s5561_s14 + $0x28] ss:$0 sps:$4 sm:$0x33]  }
  0xd7   : > { %1472 = vmatprep.subr.bf16.mxu0 %v5313_v18  ;;  %3130 = vmatpush1.bf16.msra.mxu1 %v5308_v20  ;;  %v5357_v18 = vld [vmem:[%s6737_s4 + $0x614] ss:$8 sps:$4 sm:$0xff]   ;;  %v2944_v20 = vrot.slane %v2942_v32, 2 }
  0xd8   : > { %3131 = vmatprep.subr.bf16.mxu1 %v5316_v23  ;;  %v5386_v32 = vld [vmem:[%s6737_s4 + $0x674] ss:$8 sps:$4 sm:$0xff]  }
  0xd9   : > { %v2948_v39 = vor.u32 %v2947_v21, %v2944_v20  ;;  %v5393_v20 = vld [vmem:[%s6737_s4 + $0x690] ss:$8 sps:$4 sm:$0xff]   ;;  %v5398_v21 = vld [vmem:[%s6737_s4 + $0x6a4] ss:$8 sps:$4 sm:$0xff]  }
  0xda   : > { %1473 = vmatpush1.bf16.msra.mxu0 %v5311_v22  ;;  %v2952_v22 = vrot.slane %v2950_v37, 2  ;;  %v5389_v37 = vld [vmem:[%s6737_s4 + $0x684] ss:$8 sps:$4 sm:$0xff]  }
  0xdb   : > { %1474 = vmatprep.subr.bf16.mxu0 %v5319_v26  ;;  %3132 = vmatpush1.bf16.msra.mxu1 %v5314_v27  ;;  %v2955_v27 = vrot.slane %v2953_v8, 3  ;;  %v5387_v8 = vld [vmem:[%s6737_s4 + $0x680] ss:$8 sps:$4 sm:$0xff]  }
  0xdc   : > { %3133 = vmatprep.subr.bf16.mxu1 %v5322_v28  ;;  %v5421_v28 = vld [vmem:[%s5672_s16 + $0x24] ss:$8 sps:$4 sm:$0xfc]  }
  0xdd   : > { %v2956_v40 = vor.u32 %v2955_v27, %v2952_v22 }
  0xde   : > { %1475 = vmatpush1.bf16.msra.mxu0 %v5317_v54 }
  0xdf   : > { %1476 = vmatprep.subr.bf16.mxu0 %v5325_v35  ;;  %3134 = vmatpush1.bf16.msra.mxu1 %v5320_v34 }
  0xe0   : > { %3135 = vmatprep.subr.bf16.mxu1 %v5328_v15 }
  0xe2   : > { %1477 = vmatpush1.bf16.msra.mxu0 %v5323_v36 }
  0xe3   : > { %1546 = vmatprep.subr.bf16.mxu0 %v5333_v38  ;;  %3136 = vmatpush1.bf16.msra.mxu1 %v5326_v41  ;;  %v5355_v38 = vld [vmem:[%s6737_s4 + $0x610] ss:$8 sps:$4 sm:$0xff]   ;;  %v3413_v41 = vshrl.u32 %v5421_v28, 16 }
  0xe4   : > { %3137 = vmatprep.subr.bf16.mxu1 %v5336_v47  ;;  %v442_v48 = vpop.f32.mrb[0].mxu1  ;;  %v3416_v47 = vshll.u32 %v5421_v28, 16  ;;  %v5415_v28 = vld [vmem:[%s6734_s1 + $0x94] ss:$12 sps:$4 sm:$0xff]  }
  0xe5   : > { %1483 = vmatmul.mubr.bf16.vlgmr.msra.gmra.mrb[8].mxu0 %v1284_v14  ;;  %v444_v4 = vpop.f32.mrb[1].mxu1  ;;  %v3421_v14 = vshrl.u32 %v5424_v33, 16 }
  0xe6   : > { %1547 = vmatpush1.bf16.msra.mxu0 %v5331_v10  ;;  %4389 = vmatprep.mubr.msk.bf16.mxu0 %vm814_vm1, %v1301_v56  ;;  %v446_v50 = vpop.f32.mrb[2].mxu1  ;;  %v3424_v10 = vshll.u32 %v5424_v33, 16  ;;  %v2957_v56 = vsel %vm2744_vm3, %v2948_v39, %v2956_v40  ;;  %v3418_v46 = vrot.slane %v3416_v47, 3  ;;  %v5419_v39 = vld [vmem:[%s5672_s16 + $0x20] ss:$8 sps:$4 sm:$0xfc]  }
  0xe7   : > { %4905 = vmatprep.subr.bf16.mxu0 %v5347_v44  ;;  %3138 = vmatpush1.bf16.msra.mxu1 %v5334_v45  ;;  %v447_v51 = vpop.f32.mrb[3].mxu1  ;;  %v5371_v45 = vld [vmem:[%s6737_s4 + $0x634] ss:$8 sps:$4 sm:$0xff]  }
  0xe8   : > { %3139 = vmatprep.subr.bf16.mxu1 %v5339_v30  ;;  %v3415_v30 = vrot.slane %v3413_v41, 2  ;;  %v5376_v50 = vld [vmem:[%s6734_s1 + $0x68] ss:$12 sps:$4 sm:$0xff]   ;;  %v5369_v51 = vld [vmem:[%s6737_s4 + $0x630] ss:$8 sps:$4 sm:$0xff]  }
  0xe9   : > { %v5409_v41 = vld [vmem:[%s6737_s4 + $0x6d4] ss:$8 sps:$4 sm:$0xff]  }
  0xeb   : > { %3140 = vmatpush1.bf16.msra.mxu1 %v5337_v49  ;;  %v5366_v49 = vld [vmem:[%s6734_s1 + $0x60] ss:$12 sps:$4 sm:$0xff]  }
  0xec   : > { %3141 = vmatprep.subr.bf16.mxu1 %v5342_v53  ;;  %v4891_v24 = vpop.f32.mrb[4].mxu1  ;;  %v3419_v53 = vor.u32 %v3418_v46, %v3415_v30  ;;  %v5412_v46 = vld [vmem:[%s6737_s4 + $0x6e4] ss:$8 sps:$4 sm:$0xff]  }
  0xed   : > { %1493 = vmatmul.mubr.bf16.gmra.mrb[28].mxu0 %v1298_v52  ;;  %v483_v58 = vpop.f32.mrb[5].mxu1  ;;  %v5374_v52 = vld [vmem:[%s6737_s4 + $0x644] ss:$8 sps:$4 sm:$0xff]  }
  0xee   : > { %1578 = vmatprep.mubr.bf16.mxu0 %v5492_v2  ;;  %v4892_v63 = vpop.f32.mrb[6].mxu1 }
  0xef   : > { %3142 = vmatpush1.bf16.msra.mxu1 %v5340_v55  ;;  %v486_v0 = vpop.f32.mrb[7].mxu1  ;;  %v5382_v63 = vld [vmem:[%s6737_s4 + $0x664] ss:$8 sps:$4 sm:$0xff]  }
  0xf0   : > { %3143 = vmatprep.subr.bf16.mxu1 %v5345_v57  ;;  %v5372_v57 = vld [vmem:[%s6737_s4 + $0x640] ss:$8 sps:$4 sm:$0xff]  }
  0xf3   : > { %3144 = vmatpush1.bf16.msra.mxu1 %v5343_v62  ;;  %v5377_v62 = vld [vmem:[%s6737_s4 + $0x650] ss:$8 sps:$4 sm:$0xff]  }
  0xf4   : > { %3145 = vmatprep.subr.bf16.mxu1 %v5350_v3  ;;  %v4897_v11 = vpop.f32.mrb[8].mxu1  ;;  %v5383_v3 = vld [vmem:[%s5561_s14 + $0x38] ss:$0 sps:$4 sm:$0x33]  }
  0xf5   : > { %4402 = vmatmul.mubr.msk.bf16.vlgmr.msra.gmra.mrb[0].mxu0 %vm391_vm0, %v6306_v1  ;;  %v6328_v13 = vadd.f32 %v4897_v11, %v4891_v24  ;;  %v612_v16 = vpop.f32.mrb[9].mxu1  ;;  %v5379_v24 = vld [vmem:[%s6737_s4 + $0x654] ss:$8 sps:$4 sm:$0xff]   ;;  %v5390_v11 = vld [vmem:[%s6734_s1 + $0x78] ss:$12 sps:$4 sm:$0xff]  }
  0xf6   : > { %4906 = vmatpush3.bf16.msra.mxu0 %v5347_v44  ;;  %1588 = vmatprep.mubr.bf16.mxu0 %v5492_v2  ;;  %v6334_v23 = vadd.f32 %v612_v16, %v483_v58  ;;  %v4898_v25 = vpop.f32.mrb[10].mxu1  ;;  %v5363_v44 = vld [vmem:[%s6737_s4 + $0x620] ss:$8 sps:$4 sm:$0xff]  }
  0xf7   : > { %1944 = vmatprep.subr.bf16.mxu0 %v5368_v5  ;;  %3146 = vmatpush1.bf16.msra.mxu1 %v5348_v6  ;;  %v615_v54 = vpop.f32.mrb[11].mxu1  ;;  %v5399_v5 = vld [vmem:[%s5561_s14 + $0x28] ss:$0 sps:$4 sm:$0x77]   ;;  %v2314_v6 = vshll.u32 %v6306_v1, 16 }
  0xf8   : > { %v571_v26 = vpop.f32.mrb[4].mxu0  ;;  %3147 = vmatprep.subr.bf16.mxu1 %v5353_v9  ;;  %v6340_v34 = vadd.f32 %v615_v54, %v486_v0  ;;  %v5380_v0 = vld [vmem:[%s6737_s4 + $0x660] ss:$8 sps:$4 sm:$0xff]   ;;  %v5395_v9 = vld [vmem:[%s6737_s4 + $0x694] ss:$8 sps:$4 sm:$0xff]   ;;  %v2323_v33 = vshrl.u32 %v5399_v5, 16 }
  0xf9   : > { %v6337_v29 = vadd.f32 %v571_v26, %v442_v48  ;;  %v573_v31 = vpop.f32.mrb[5].mxu0  ;;  %v3423_v48 = vrot.slane %v3421_v14, 2  ;;  %v2316_v16 = vrot.slane %v2314_v6, 1  ;;  %v5396_v25 = vld [vmem:[%s6737_s4 + $0x6a0] ss:$8 sps:$4 sm:$0xff]  }
  0xfa   : > { %v6342_v35 = vadd.f32 %v573_v31, %v444_v4  ;;  %v575_v36 = vpop.f32.mrb[6].mxu0  ;;  %v3426_v4 = vrot.slane %v3424_v10, 3  ;;  %v5403_v26 = vld [vmem:[%s6737_s4 + $0x6b4] ss:$8 sps:$4 sm:$0xff]   ;;  %v5401_v54 = vld [vmem:[%s6737_s4 + $0x6b0] ss:$8 sps:$4 sm:$0xff]  }
  0xfb   : > { %v576_v15 = vpop.f32.mrb[7].mxu0  ;;  %3148 = vmatpush1.bf16.msra.mxu1 %v5351_v12  ;;  %v2312_v12 = vshrl.u32 %v6306_v1, 16  ;;  %v5406_v31 = vld [vmem:[%s6737_s4 + $0x6c4] ss:$8 sps:$4 sm:$0xff]   ;;  %v5404_v36 = vld [vmem:[%s6737_s4 + $0x6c0] ss:$8 sps:$4 sm:$0xff]  }
  0xfc   : > { %3149 = vmatprep.subr.bf16.mxu1 %v5357_v18  ;;  %v6375_v55 = vor.u32 %v3426_v4, %v3423_v48  ;;  %v5400_v18 = vld [vmem:[%s6734_s1 + $0x80] ss:$12 sps:$4 sm:$0xff]   ;;  %v5407_v10 = vld [vmem:[%s6737_s4 + $0x6d0] ss:$8 sps:$4 sm:$0xff]  }
  0xfd   : > { %4403 = vmatmul.mubr.msk.bf16.gmra.mrb[32].mxu0 %vm391_vm0, %v5354_v17  ;;  %v2725_v15 = vld [vmem:[%s5561_s14] sm:$0xc]  ;;  %v6469_v14 = vld [vmem:[%s5561_s14 + $0x8] sm:$0x1f]   ;;  %v5416_v6 = vld [vmem:[%s6737_s4 + $0x6f0] ss:$8 sps:$4 sm:$0xff]  }
  0xfe   : > { %4907 = vmatprep.mubr.msk.bf16.mxu0 %vm391_vm0, %v6306_v1  ;;  %v3428_v58 = vsel %vm2744_vm3, %v3419_v53, %v6375_v55  ;;  %v2317_v1 = vor.u32 %v2316_v16, %v2312_v12 }
  0xff   : > { %3150 = vmatpush1.bf16.msra.mxu1 %v5355_v38  ;;  %v6460_v38 = vld [vmem:[%s5561_s14 + $0x4] sm:$0xf] }
 0x100   : > { %3577 = vmatprep.subr.bf16.mxu1 %v5365_v19  ;;  %v4630_v47 = vcombine.low %v2725_v15, %v6460_v38  ;;  %v3816_v15 = vrot.slane %v6151_v42, 3 }
 0x102   : > { %3156 = vmatmul.mubr.bf16.vlgmr.msra.gmra.mrb[12].mxu1 %v2957_v56  ;;  %v3396_v56 = vshrl.u32 %v5419_v39, 16  ;;  %v2746_v48 = vshrl.u32 %v4630_v47, 16  ;;  %v2749_v4 = vshll.u32 %v4630_v47, 16  ;;  %v5437_v47 = vld [vmem:[%s6737_s4 + $0x730] ss:$8 sps:$4 sm:$0xff]  }
 0x103   : > { %3578 = vmatpush1.bf16.msra.mxu1 %v5363_v44  ;;  %4700 = vmatprep.mubr.msk.bf16.mxu1 %vm814_vm1, %v6196_v7  ;;  %v5375_v7 = vld [vmem:[%s5561_s14 + $0x30] sm:$0xff]   ;;  %v3399_v44 = vshll.u32 %v5419_v39, 16 }
 0x104   : > { %3579 = vmatprep.subr.bf16.mxu1 %v5371_v45  ;;  %v5439_v39 = vld [vmem:[%s6737_s4 + $0x734] ss:$8 sps:$4 sm:$0xff]  }
 0x105   : > { %4908 = vmatmul.mubr.msk.bf16.vlgmr.msra.gmra.mrb[36].mxu0 %vm391_vm0, %v5354_v17  ;;  %v2319_v17 = vshll.u32 %v5399_v5, 16  ;;  %v3401_v53 = vrot.slane %v3399_v44, 3 }
 0x106   : > { %1945 = vmatpush1.bf16.msra.mxu0 %v5366_v49  ;;  %1976 = vmatprep.mubr.bf16.mxu0 %v5492_v2  ;;  %v2754_v49 = vshrl.u32 %v6469_v14, 16 }
 0x107   : > { %4911 = vmatprep.subr.bf16.mxu0 %v5376_v50  ;;  %3580 = vmatpush1.bf16.msra.mxu1 %v5369_v51  ;;  %v2321_v22 = vrot.slane %v2319_v17, 1  ;;  %v5410_v51 = vld [vmem:[%s6737_s4 + $0x6e0] ss:$8 sps:$4 sm:$0xff]  }
 0x108   : > { %3581 = vmatprep.subr.bf16.mxu1 %v5374_v52  ;;  %v3398_v52 = vrot.slane %v3396_v56, 2 }
 0x109   : > { %v2322_v27 = vsel %vm1093_vm2, %v2317_v1, %v2321_v22  ;;  %v2325_v19 = vor.u32 %v2323_v33, %v2321_v22  ;;  %v5425_v1 = vld [vmem:[%s6737_s4 + $0x700] ss:$8 sps:$4 sm:$0xff]   ;;  %v5436_v33 = vld [vmem:[%s6737_s4 + $0x724] ss:$8 sps:$4 sm:$0xff]  }
 0x10a   : > { %3166 = vmatmul.mubr.bf16.gmra.mrb[28].mxu1 %v2956_v40  ;;  %v5422_v40 = vld [vmem:[%s5672_s16 + $0x30] ss:$8 sps:$4 sm:$0x1f]  }
 0x10b   : > { %3582 = vmatpush1.bf16.msra.mxu1 %v5372_v57  ;;  %4782 = vmatprep.mubr.msk.bf16.mxu1 %vm814_vm1, %v3428_v58  ;;  %v3404_v45 = vshrl.u32 %v5422_v40, 16  ;;  %v3407_v30 = vshll.u32 %v5422_v40, 16  ;;  %v5413_v58 = vld [vmem:[%s6734_s1 + $0x90] ss:$12 sps:$4 sm:$0xff]  }
 0x10c   : > { %3583 = vmatprep.subr.bf16.mxu1 %v5379_v24 }
 0x10d   : > { %4483 = vmatmul.mubr.msk.bf16.vlgmr.msra.gmra.mrb[0].mxu0 %vm391_vm0, %v5375_v7  ;;  %v3406_v57 = vrot.slane %v3404_v45, 2 }
 0x10e   : > { %4912 = vmatpush3.bf16.msra.mxu0 %v5376_v50  ;;  %1986 = vmatprep.mubr.bf16.mxu0 %v5492_v2  ;;  %v2757_v50 = vshll.u32 %v6469_v14, 16 }
 0x10f   : > { %2348 = vmatprep.subr.bf16.mxu0 %v5392_v60  ;;  %3584 = vmatpush1.bf16.msra.mxu1 %v5377_v62  ;;  %v5418_v60 = vld [vmem:[%s6737_s4 + $0x6f4] ss:$8 sps:$4 sm:$0xff]  }
 0x110   : > { %3585 = vmatprep.subr.bf16.mxu1 %v5382_v63  ;;  %v2748_v63 = vrot.slane %v2746_v48, 2  ;;  %v5448_v48 = vld [vmem:[%s6737_s4 + $0x754] ss:$8 sps:$4 sm:$0xff]  }
 0x113   : > { %3586 = vmatpush1.bf16.msra.mxu1 %v5380_v0  ;;  %v2751_v0 = vrot.slane %v2749_v4, 3  ;;  %v5443_v4 = vld [vmem:[%s6734_s1 + $0xa8] ss:$12 sps:$4 sm:$0xff]  }
 0x114   : > { %3587 = vmatprep.subr.bf16.mxu1 %v5386_v32  ;;  %v2759_v32 = vrot.slane %v2757_v50, 3 }
 0x115   : > { %4484 = vmatmul.mubr.msk.bf16.gmra.mrb[40].mxu0 %vm391_vm0, %v5383_v3  ;;  %v2752_v12 = vor.u32 %v2751_v0, %v2748_v63  ;;  %v5449_v63 = vld [vmem:[%s6737_s4 + $0x760] ss:$8 sps:$4 sm:$0xff]   ;;  %v5457_v0 = vld [vmem:[%s6737_s4 + $0x774] ss:$8 sps:$4 sm:$0xff]  }
 0x116   : > { %4913 = vmatprep.mubr.msk.bf16.mxu0 %vm391_vm0, %v5375_v7  ;;  %v3409_v7 = vrot.slane %v3407_v30, 3 }
 0x117   : > { %3588 = vmatpush1.bf16.msra.mxu1 %v5384_v43 }
 0x118   : > { %3589 = vmatprep.subr.bf16.mxu1 %v5389_v37  ;;  %v5430_v37 = vld [vmem:[%s6734_s1 + $0x98] ss:$12 sps:$4 sm:$0xff]  }
 0x11b   : > { %3590 = vmatpush1.bf16.msra.mxu1 %v5387_v8  ;;  %v3402_v8 = vor.u32 %v3401_v53, %v3398_v52  ;;  %v5454_v53 = vld [vmem:[%s6734_s1 + $0xb0] ss:$12 sps:$4 sm:$0xff]  }
 0x11c   : > { %3591 = vmatprep.subr.bf16.mxu1 %v5395_v9  ;;  %v3410_v9 = vor.u32 %v3409_v7, %v3406_v57  ;;  %v5446_v57 = vld [vmem:[%s6737_s4 + $0x750] ss:$8 sps:$4 sm:$0xff]   ;;  %v5451_v7 = vld [vmem:[%s6737_s4 + $0x764] ss:$8 sps:$4 sm:$0xff]  }
 0x11d   : > { %4914 = vmatmul.mubr.msk.bf16.vlgmr.msra.gmra.mrb[44].mxu0 %vm391_vm0, %v5383_v3  ;;  %v2756_v3 = vrot.slane %v2754_v49, 2 }
 0x11e   : > { %2349 = vmatpush1.bf16.msra.mxu0 %v5390_v11  ;;  %2380 = vmatprep.mubr.bf16.mxu0 %v5492_v2  ;;  %v5427_v11 = vld [vmem:[%s6737_s4 + $0x704] ss:$8 sps:$4 sm:$0xff]  }
 0x11f   : > { %4917 = vmatprep.subr.bf16.mxu0 %v5400_v18  ;;  %3592 = vmatpush1.bf16.msra.mxu1 %v5393_v20  ;;  %v2760_v16 = vor.u32 %v2759_v32, %v2756_v3  ;;  %v5469_v32 = vld [vmem:[%s6734_s1 + $0xc4] ss:$12 sps:$4 sm:$0xff]  }
 0x120   : > { %3593 = vmatprep.subr.bf16.mxu1 %v5398_v21  ;;  %v3411_v21 = vsel %vm2744_vm3, %v3402_v8, %v3410_v9  ;;  %v5461_v8 = vld [vmem:[%s6737_s4 + $0x790] ss:$8 sps:$4 sm:$0xff]  }
 0x123   : > { %3594 = vmatpush1.bf16.msra.mxu1 %v5396_v25  ;;  %v5433_v25 = vld [vmem:[%s6737_s4 + $0x714] ss:$8 sps:$4 sm:$0xff]  }
 0x124   : > { %3595 = vmatprep.subr.bf16.mxu1 %v5403_v26 }
 0x125   : > { %4561 = vmatmul.mubr.msk.bf16.vlgmr.msra.gmra.mrb[0].mxu0 %vm391_vm0, %v2322_v27 }
 0x126   : > { %4918 = vmatpush3.bf16.msra.mxu0 %v5400_v18  ;;  %2390 = vmatprep.mubr.bf16.mxu0 %v5492_v2  ;;  %v6508_v18 = vld [vmem:[%s5672_s16] sm:$0x88] }
 0x127   : > { %2784 = vmatprep.subr.bf16.mxu0 %v5415_v28  ;;  %3596 = vmatpush1.bf16.msra.mxu1 %v5401_v54  ;;  %v2761_v28 = vsel %vm2744_vm3, %v2752_v12, %v2760_v16  ;;  %v5445_v54 = vld [vmem:[%s6734_s1 + $0xac] ss:$12 sps:$4 sm:$0xff]   ;;  %v5464_v12 = vld [vmem:[%s6737_s4 + $0x7a0] ss:$8 sps:$4 sm:$0xff]  }
 0x128   : > { %3597 = vmatprep.subr.bf16.mxu1 %v5406_v31  ;;  %v5431_v31 = vld [vmem:[%s6737_s4 + $0x710] ss:$8 sps:$4 sm:$0xff]  }
 0x12b   : > { %3598 = vmatpush1.bf16.msra.mxu1 %v5404_v36 }
 0x12c   : > { %3599 = vmatprep.subr.bf16.mxu1 %v5409_v41  ;;  %v5453_v41 = vld [vmem:[%s5561_s14 + $0x18] sm:$0x1f]  }
 0x12d   : > { %4562 = vmatmul.mubr.msk.bf16.gmra.mrb[48].mxu0 %vm391_vm0, %v2325_v19  ;;  %v3208_v45 = vshrl.u32 %v5453_v41, 16  ;;  %v3211_v30 = vshll.u32 %v5453_v41, 16  ;;  %v5478_v41 = vld [vmem:[%s6737_s4 + $0x7d0] ss:$8 sps:$4 sm:$0xff]  }
 0x12e   : > { %4919 = vmatprep.mubr.msk.bf16.mxu0 %vm391_vm0, %v2322_v27  ;;  %v4825_v27 = vcombine.high %v6508_v18, %v6295_v59 }
 0x12f   : > { %3600 = vmatpush1.bf16.msra.mxu1 %v5407_v10  ;;  %v5442_v10 = vld [vmem:[%s6737_s4 + $0x744] ss:$8 sps:$4 sm:$0xff]   ;;  %v3213_v52 = vrot.slane %v3211_v30, 3 }
 0x130   : > { %v6484_v24 = vpop.f32.mrb[12].mxu0  ;;  %3601 = vmatprep.subr.bf16.mxu1 %v5412_v46  ;;  %v3815_v36 = vrot.slane %v4825_v27, 3  ;;  %v5440_v46 = vld [vmem:[%s6737_s4 + $0x740] ss:$8 sps:$4 sm:$0xff]   ;;  %v3645_v27 = vrot.slane %v6469_v14, 3 }
 0x131   : > { %v6492_v62 = vpop.f32.mrb[13].mxu0 }
 0x132   : > { %v869_v43 = vpop.f32.mrb[14].mxu0  ;;  %v3817_v40 = vsel %vm3643_vm4, %v3815_v36, %v3816_v15 }
 0x133   : > { %v870_v5 = vpop.f32.mrb[15].mxu0  ;;  %3602 = vmatpush1.bf16.msra.mxu1 %v5410_v51  ;;  %v3210_v51 = vrot.slane %v3208_v45, 2  ;;  %v5455_v43 = vld [vmem:[%s6737_s4 + $0x770] ss:$8 sps:$4 sm:$0xff]  }
 0x134   : > { %3603 = vmatprep.subr.bf16.mxu1 %v5418_v60  ;;  %v6505_v17 = vpop.f32.mrb[16].mxu1  ;;  %v5458_v5 = vld [vmem:[%s6737_s4 + $0x780] ss:$8 sps:$4 sm:$0xff]  }
 0x135   : > { %4920 = vmatmul.mubr.msk.bf16.vlgmr.msra.gmra.mrb[52].mxu0 %vm391_vm0, %v2325_v19  ;;  %v6510_v20 = vpop.f32.mrb[17].mxu1  ;;  %v5452_v19 = vld [vmem:[%s5561_s14 + $0x10] sm:$0xfc]   ;;  %v3214_v60 = vor.u32 %v3213_v52, %v3210_v51 }
 0x136   : > { %2785 = vmatpush1.bf16.msra.mxu0 %v5413_v58  ;;  %2816 = vmatprep.mubr.bf16.mxu0 %v5492_v2  ;;  %v1896_v22 = vpop.f32.mrb[18].mxu1  ;;  %v3200_v56 = vshrl.u32 %v5452_v19, 16  ;;  %v3203_v44 = vshll.u32 %v5452_v19, 16 }
 0x137   : > { %4923 = vmatprep.subr.bf16.mxu0 %v5430_v37  ;;  %3604 = vmatpush1.bf16.msra.mxu1 %v5416_v6  ;;  %v1897_v26 = vpop.f32.mrb[19].mxu1  ;;  %v5463_v6 = vld [vmem:[%s6737_s4 + $0x794] ss:$8 sps:$4 sm:$0xff]  }
 0x138   : > { %3966 = vmatprep.subr.bf16.mxu1 %v5427_v11  ;;  %v3202_v49 = vrot.slane %v3200_v56, 2  ;;  %v3205_v50 = vrot.slane %v3203_v44, 3  ;;  %v3634_v11 = vld [vmem:[%s5561_s14] sm:$0x8]  ;;  %v5477_v22 = vld [vmem:[%s6734_s1 + $0xc8] ss:$12 sps:$4 sm:$0xff]  }
 0x139   : > { %v5475_v26 = vld [vmem:[%s6737_s4 + $0x7c4] ss:$8 sps:$4 sm:$0xff]  }
 0x13a   : > { %3610 = vmatmul.mubr.bf16.vlgmr.msra.gmra.mrb[12].mxu1 %v3411_v21  ;;  %v3206_v58 = vor.u32 %v3205_v50, %v3202_v49  ;;  %v5467_v21 = vld [vmem:[%s6734_s1 + $0xc0] ss:$12 sps:$4 sm:$0xff]  }
 0x13b   : > { %3967 = vmatpush1.bf16.msra.mxu1 %v5425_v1  ;;  %4783 = vmatprep.mubr.msk.bf16.mxu1 %vm814_vm1, %v6375_v55  ;;  %v5434_v55 = vld [vmem:[%s6737_s4 + $0x720] ss:$8 sps:$4 sm:$0xff]   ;;  %v4788_v1 = vcombine.low %v3634_v11, %v6460_v38 }
 0x13c   : > { %3968 = vmatprep.subr.bf16.mxu1 %v5433_v25  ;;  %v3215_v3 = vsel %vm2744_vm3, %v3206_v58, %v3214_v60  ;;  %v5470_v25 = vld [vmem:[%s6737_s4 + $0x7b0] ss:$8 sps:$4 sm:$0xff]   ;;  %v4097_v58 = vld [vmem:[%s313_s11] sm:$0xff] }
 0x13d   : > { %4635 = vmatmul.mubr.msk.bf16.vlgmr.msra.gmra.mrb[0].mxu0 %vm391_vm0, %v2761_v28  ;;  %v3644_v38 = vrot.slane %v4788_v1, 3  ;;  %4100 = vst.msk [vmem:[%s6676_s17 + $0x28] sm:$0xff] %vm391_vm0, %v4097_v58 }
 0x13e   : > { %4924 = vmatpush3.bf16.msra.mxu0 %v5430_v37  ;;  %2826 = vmatprep.mubr.bf16.mxu0 %v5492_v2  ;;  %v5460_v37 = vld [vmem:[%s6737_s4 + $0x784] ss:$8 sps:$4 sm:$0xff]  }
 0x13f   : > { %3238 = vmatprep.subr.bf16.mxu0 %v5445_v54  ;;  %3969 = vmatpush1.bf16.msra.mxu1 %v5431_v31  ;;  %v5473_v54 = vld [vmem:[%s6737_s4 + $0x7c0] ss:$8 sps:$4 sm:$0xff]   ;;  %v4824_v31 = vcombine.low %v6508_v18, %v6295_v59 }
 0x140   : > { %3970 = vmatprep.subr.bf16.mxu1 %v5436_v33 }
 0x141   : > { %v3812_v59 = vrot.slane %v4824_v31, 3 }
 0x142   : > { %3620 = vmatmul.mubr.bf16.gmra.mrb[32].mxu1 %v3410_v9  ;;  %v5466_v9 = vld [vmem:[%s6737_s4 + $0x7a4] ss:$8 sps:$4 sm:$0xff]  }
 0x143   : > { %3971 = vmatpush1.bf16.msra.mxu1 %v5434_v55  ;;  %4854 = vmatprep.mubr.msk.bf16.mxu1 %vm814_vm1, %v3817_v40  ;;  %v5480_v55 = vld [vmem:[%s6737_s4 + $0x7d4] ss:$8 sps:$4 sm:$0xff]   ;;  %v3646_v40 = vsel %vm3643_vm4, %v3644_v38, %v3645_v27 }
 0x144   : > { %3972 = vmatprep.subr.bf16.mxu1 %v5439_v39 }
 0x145   : > { %4636 = vmatmul.mubr.msk.bf16.gmra.mrb[56].mxu0 %vm391_vm0, %v2760_v16 }
 0x146   : > { %4925 = vmatprep.mubr.msk.bf16.mxu0 %vm391_vm0, %v2761_v28 }
 0x147   : > { %3973 = vmatpush1.bf16.msra.mxu1 %v5437_v47 }
 0x148   : > { %3974 = vmatprep.subr.bf16.mxu1 %v5442_v10 }
 0x14b   : > { %3975 = vmatpush1.bf16.msra.mxu1 %v5440_v46 }
 0x14c   : > { %3976 = vmatprep.subr.bf16.mxu1 %v5448_v48 }
 0x14d   : > { %4926 = vmatmul.mubr.msk.bf16.vlgmr.msra.gmra.mrb[60].mxu0 %vm391_vm0, %v2760_v16  ;;  %v5472_v16 = vld [vmem:[%s6737_s4 + $0x7b4] ss:$8 sps:$4 sm:$0xff]  }
 0x14e   : > { %3239 = vmatpush1.bf16.msra.mxu0 %v5443_v4  ;;  %3270 = vmatprep.mubr.bf16.mxu0 %v5492_v2 }
 0x14f   : > { %4929 = vmatprep.subr.bf16.mxu0 %v5454_v53  ;;  %3977 = vmatpush1.bf16.msra.mxu1 %v5446_v57 }
 0x150   : > { %3978 = vmatprep.subr.bf16.mxu1 %v5451_v7 }
 0x153   : > { %3979 = vmatpush1.bf16.msra.mxu1 %v5449_v63 }
 0x154   : > { %3980 = vmatprep.subr.bf16.mxu1 %v5457_v0 }
 0x155   : > { %4714 = vmatmul.mubr.msk.bf16.vlgmr.msra.gmra.mrb[0].mxu0 %vm391_vm0, %v3215_v3 }
 0x156   : > { %4930 = vmatpush3.bf16.msra.mxu0 %v5454_v53  ;;  %3280 = vmatprep.mubr.bf16.mxu0 %v5492_v2 }
 0x157   : > { %3669 = vmatprep.subr.bf16.mxu0 %v5469_v32  ;;  %3981 = vmatpush1.bf16.msra.mxu1 %v5455_v43  ;;  %v4099_v43 = vld [vmem:[%s313_s11 + $0x10] sm:$0xf] }
 0x158   : > { %3982 = vmatprep.subr.bf16.mxu1 %v5460_v37  ;;  %4103 = vst.msk [vmem:[%s6676_s17 + $0x88] sm:$0xf] %vm4102_vm5, %v4099_v43 }
 0x15b   : > { %3983 = vmatpush1.bf16.msra.mxu1 %v5458_v5 }
 0x15c   : > { %3984 = vmatprep.subr.bf16.mxu1 %v5463_v6 }
 0x15d   : > { %4715 = vmatmul.mubr.msk.bf16.gmra.mrb[64].mxu0 %vm391_vm0, %v3214_v60 }
 0x15e   : > { %4931 = vmatprep.mubr.msk.bf16.mxu0 %vm391_vm0, %v3215_v3 }
 0x15f   : > { %3985 = vmatpush1.bf16.msra.mxu1 %v5461_v8 }
 0x160   : > { %3986 = vmatprep.subr.bf16.mxu1 %v5466_v9 }
 0x163   : > { %3987 = vmatpush1.bf16.msra.mxu1 %v5464_v12 }
 0x164   : > { %3988 = vmatprep.subr.bf16.mxu1 %v5472_v16 }
 0x165   : > { %4932 = vmatmul.mubr.msk.bf16.vlgmr.msra.gmra.mrb[68].mxu0 %vm391_vm0, %v3214_v60  ;;  %v4098_v60 = vld [vmem:[%s313_s11 + $0x8] sm:$0xff] }
 0x166   : > { %3670 = vmatpush1.bf16.msra.mxu0 %v5467_v21  ;;  %3701 = vmatprep.mubr.bf16.mxu0 %v5492_v2  ;;  %4101 = vst.msk [vmem:[%s6676_s17 + $0x58] sm:$0xff] %vm391_vm0, %v4098_v60 }
 0x167   : > { %4935 = vmatprep.subr.bf16.mxu0 %v5477_v22  ;;  %3989 = vmatpush1.bf16.msra.mxu1 %v5470_v25 }
 0x168   : > { %v1077_v28 = vpop.f32.mrb[16].mxu0  ;;  %3990 = vmatprep.subr.bf16.mxu1 %v5475_v26 }
 0x169   : > { %v1078_v33 = vadd.f32 %v1077_v28, %v6484_v24  ;;  %v1079_v36 = vpop.f32.mrb[17].mxu0  ;;  %v3813_v24 = vrot.slane %v6300_v61, 3 }
 0x16a   : > { %v1080_v14 = vadd.f32 %v1079_v36, %v6492_v62  ;;  %v1081_v39 = vpop.f32.mrb[18].mxu0 }
 0x16b   : > { %v1082_v19 = vpop.f32.mrb[19].mxu0  ;;  %3991 = vmatpush1.bf16.msra.mxu1 %v5473_v54  ;;  %v3814_v47 = vsel %vm3643_vm4, %v3812_v59, %v3813_v24 }
 0x16c   : > { %3992 = vmatprep.subr.bf16.mxu1 %v5480_v55 }
 0x16d   : > { %4792 = vmatmul.mubr.msk.bf16.vlgmr.msra.gmra.mrb[0].mxu0 %vm391_vm0, %v3646_v40  ;;  %v2290_v18 = vpop.f32.mrb[20].mxu1 }
 0x16e   : > { %4936 = vmatpush3.bf16.msra.mxu0 %v5477_v22  ;;  %3711 = vmatprep.mubr.bf16.mxu0 %v5492_v2  ;;  %v2292_v62 = vpop.f32.mrb[21].mxu1 }
 0x16f   : > { %3993 = vmatpush1.bf16.msra.mxu1 %v5478_v41  ;;  %v2294_v10 = vpop.f32.mrb[22].mxu1 }
 0x170   : > { %v2295_v56 = vpop.f32.mrb[23].mxu1 }
 0x172   : > { %3999 = vmatmul.mubr.bf16.vlgmr.msra.gmra.mrb[12].mxu1 %v3814_v47 }
 0x173   : > { %4855 = vmatprep.mubr.msk.bf16.mxu1 %vm814_vm1, %v3816_v15 }
 0x175   : > { %4793 = vmatmul.mubr.msk.bf16.gmra.mrb[72].mxu0 %vm391_vm0, %v3645_v27 }
 0x176   : > { %4937 = vmatprep.mubr.msk.bf16.mxu0 %vm391_vm0, %v3646_v40 }
 0x178   : > { %v1174_v61 = vpop.f32.mrb[20].mxu0 }
 0x179   : > { %v1235_v44 = vadd.f32 %v1174_v61, %v6337_v29  ;;  %v1176_v2 = vpop.f32.mrb[21].mxu0 }
 0x17a   : > { %v1236_v45 = vadd.f32 %v1176_v2, %v6342_v35  ;;  %v1178_v30 = vpop.f32.mrb[22].mxu0  ;;  %4009 = vmatmul.mubr.bf16.gmra.mrb[36].mxu1 %v3813_v24 }
 0x17b   : > { %v1179_v46 = vpop.f32.mrb[23].mxu0 }
 0x17d   : > { %4938 = vmatmul.mubr.msk.bf16.vlgmr.msra.gmra.mrb[76].mxu0 %vm391_vm0, %v3645_v27 }
 0x180   : > { %v4903_v48 = vpop.f32.mrb[24].mxu0 }
 0x181   : > { %v1237_v42 = vadd.f32 %v4903_v48, %v6328_v13  ;;  %v1215_v15 = vpop.f32.mrb[25].mxu0 }
 0x182   : > { %v1231_v4 = vadd.f32 %v1215_v15, %v6334_v23  ;;  %v4904_v49 = vpop.f32.mrb[26].mxu0 }
 0x183   : > { %v1218_v50 = vpop.f32.mrb[27].mxu0 }
 0x184   : > { %v1234_v29 = vadd.f32 %v1218_v50, %v6340_v34 }
 0x1a5   : > { %v2712_v51 = vpop.f32.mrb[24].mxu1 }
 0x1a6   : > { %v2714_v52 = vpop.f32.mrb[25].mxu1 }
 0x1a7   : > { %v2716_v35 = vpop.f32.mrb[26].mxu1 }
 0x1a8   : > { %v2717_v53 = vpop.f32.mrb[27].mxu1 }
 0x1b8   : > { %v6661_v57 = vpop.f32.mrb[8].mxu0 }
 0x1b9   : > { %v6666_v13 = vpop.f32.mrb[9].mxu0 }
 0x1ba   : > { %v6668_v7 = vpop.f32.mrb[10].mxu0 }
 0x1bb   : > { %v6670_v23 = vpop.f32.mrb[11].mxu0 }
 0x1c0   : > { %v1494_v34 = vpop.f32.mrb[28].mxu0 }
 0x1c1   : > { %v1505_v63 = vadd.f32 %v1494_v34, %v1078_v33  ;;  %v1496_v0 = vpop.f32.mrb[29].mxu0 }
 0x1c2   : > { %v1506_v3 = vadd.f32 %v1496_v0, %v1080_v14  ;;  %v1498_v32 = vpop.f32.mrb[30].mxu0 }
 0x1c3   : > { %v1903_v37 = vadd.f32 %v6505_v17, %v1505_v63  ;;  %v1499_v5 = vpop.f32.mrb[31].mxu0 }
 0x1c4   : > { %v1904_v6 = vadd.f32 %v6510_v20, %v1506_v3 }
 0x1c5   : > { %v2301_v8 = vadd.f32 %v2290_v18, %v1903_v37 }
 0x1c6   : > { %v2302_v9 = vadd.f32 %v2292_v62, %v1904_v6 }
 0x1c7   : > { %v2723_v11 = vadd.f32 %v2712_v51, %v2301_v8 }
 0x1c8   : > { %v2724_v12 = vadd.f32 %v2714_v52, %v2302_v9 }
 0x1d0   : > { %v1590_v16 = vpop.f32.mrb[32].mxu0 }
 0x1d1   : > { %v1651_v21 = vadd.f32 %v1590_v16, %v1235_v44  ;;  %v1592_v1 = vpop.f32.mrb[33].mxu0 }
 0x1d2   : > { %v1652_v22 = vadd.f32 %v1592_v1, %v1236_v45  ;;  %v1594_v25 = vpop.f32.mrb[34].mxu0 }
 0x1d3   : > { %v1595_v26 = vpop.f32.mrb[35].mxu0 }
 0x1d8   : > { %v4909_v38 = vpop.f32.mrb[36].mxu0 }
 0x1d9   : > { %v1653_v27 = vadd.f32 %v4909_v38, %v1237_v42  ;;  %v1631_v28 = vpop.f32.mrb[37].mxu0 }
 0x1da   : > { %v1647_v54 = vadd.f32 %v1631_v28, %v1231_v4  ;;  %v4910_v17 = vpop.f32.mrb[38].mxu0 }
 0x1db   : > { %v1634_v31 = vpop.f32.mrb[39].mxu0 }
 0x1dc   : > { %v1650_v33 = vadd.f32 %v1634_v31, %v1234_v29 }
 0x1dd   : > { %v3167_v20 = vpop.f32.mrb[28].mxu1 }
 0x1de   : > { %v3178_v36 = vadd.f32 %v3167_v20, %v2723_v11  ;;  %v3169_v55 = vpop.f32.mrb[29].mxu1 }
 0x1df   : > { %v3179_v14 = vadd.f32 %v3169_v55, %v2724_v12  ;;  %v3171_v39 = vpop.f32.mrb[30].mxu1 }
 0x1e0   : > { %v3172_v40 = vpop.f32.mrb[31].mxu1 }
 0x1e1   : > { %v4023_v40 = vld [vmem:[%s6735_s2] sm:$0x7] }
 0x1e8   : > { %v1988_v19 = vpop.f32.mrb[40].mxu0 }
 0x1e9   : > { %v2049_v41 = vadd.f32 %v1988_v19, %v1651_v21  ;;  %v1990_v59 = vpop.f32.mrb[41].mxu0 }
 0x1ea   : > { %v2050_v24 = vadd.f32 %v1990_v59, %v1652_v22  ;;  %v1992_v18 = vpop.f32.mrb[42].mxu0 }
 0x1eb   : > { %v1993_v62 = vpop.f32.mrb[43].mxu0 }
 0x1f0   : > { %v4915_v47 = vpop.f32.mrb[44].mxu0 }
 0x1f1   : > { %v2051_v10 = vadd.f32 %v4915_v47, %v1653_v27  ;;  %v2029_v56 = vpop.f32.mrb[45].mxu0  ;;  %v4025_v27 = vlaneseq }
 0x1f2   : > { %v2045_v61 = vadd.f32 %v2029_v56, %v1647_v54  ;;  %v4916_v44 = vpop.f32.mrb[46].mxu0 }
 0x1f3   : > { %v2032_v2 = vpop.f32.mrb[47].mxu0  ;;  %v6689_v31 = vshrl.u32 %v4025_v27, 7  ;;  %v4067_v44 = vld [vmem:[%s6738_s5] sm:$0x3] }
 0x1f4   : > { %v2048_v45 = vadd.f32 %v2032_v2, %v1650_v33 }
 0x1f5   : > { %v4027_v55 = vsub.s32 0, %v6689_v31  ;;  %v4031_v19 = vsub.s32 1, %v6689_v31 }
 0x1f7   : > { %v4032_v18 = vrot.slane %v4023_v40, %v4031_v19 }
 0x200   : > { %v2392_v30 = vpop.f32.mrb[48].mxu0 }
 0x201   : > { %v2453_v46 = vadd.f32 %v2392_v30, %v2049_v41  ;;  %v2394_v48 = vpop.f32.mrb[49].mxu0 }
 0x202   : > { %v2454_v42 = vadd.f32 %v2394_v48, %v2050_v24  ;;  %v2396_v15 = vpop.f32.mrb[50].mxu0  ;;  %v4028_v24 = vrot.slane %v4023_v40, %v4027_v55 }
 0x203   : > { %v2397_v4 = vpop.f32.mrb[51].mxu0  ;;  %v4072_v15 = vrot.slane %v4067_v44, %v4027_v55 }
 0x208   : > { %v4921_v49 = vpop.f32.mrb[52].mxu0 }
 0x209   : > { %v2455_v50 = vadd.f32 %v4921_v49, %v2051_v10  ;;  %v2433_v29 = vpop.f32.mrb[53].mxu0 }
 0x20a   : > { %v2449_v51 = vadd.f32 %v2433_v29, %v2045_v61  ;;  %v4922_v52 = vpop.f32.mrb[54].mxu0 }
 0x20b   : > { %v2436_v35 = vpop.f32.mrb[55].mxu0 }
 0x20c   : > { %v2452_v53 = vadd.f32 %v2436_v35, %v2048_v45 }
 0x215   : > { %v3621_v58 = vpop.f32.mrb[32].mxu1 }
 0x216   : > { %v6685_v60 = vadd.f32 %v3621_v58, %v3178_v36  ;;  %v3623_v34 = vpop.f32.mrb[33].mxu1 }
 0x217   : > { %v6687_v63 = vadd.f32 %v3623_v34, %v3179_v14  ;;  %v3625_v3 = vpop.f32.mrb[34].mxu1 }
 0x218   : > { %v2828_v0 = vpop.f32.mrb[56].mxu0  ;;  %v3626_v37 = vpop.f32.mrb[35].mxu1 }
 0x219   : > { %v2889_v32 = vadd.f32 %v2828_v0, %v2453_v46  ;;  %v2830_v43 = vpop.f32.mrb[57].mxu0 }
 0x21a   : > { %v2890_v5 = vadd.f32 %v2830_v43, %v2454_v42  ;;  %v2832_v6 = vpop.f32.mrb[58].mxu0 }
 0x21b   : > { %v2833_v8 = vpop.f32.mrb[59].mxu0 }
 0x220   : > { %v4927_v9 = vpop.f32.mrb[60].mxu0 }
 0x221   : > { %v2891_v11 = vadd.f32 %v4927_v9, %v2455_v50  ;;  %v2869_v12 = vpop.f32.mrb[61].mxu0  ;;  %v4076_v50 = vrot.slane %v4067_v44, %v4031_v19 }
 0x222   : > { %v2885_v16 = vadd.f32 %v2869_v12, %v2449_v51  ;;  %v4928_v21 = vpop.f32.mrb[62].mxu0 }
 0x223   : > { %v2872_v1 = vpop.f32.mrb[63].mxu0 }
 0x224   : > { %v2888_v22 = vadd.f32 %v2872_v1, %v2452_v53 }
 0x230   : > { %v3282_v25 = vpop.f32.mrb[64].mxu0 }
 0x231   : > { %v3343_v26 = vadd.f32 %v3282_v25, %v2889_v32  ;;  %v3284_v38 = vpop.f32.mrb[65].mxu0 }
 0x232   : > { %v3344_v28 = vadd.f32 %v3284_v38, %v2890_v5  ;;  %v3286_v54 = vpop.f32.mrb[66].mxu0 }
 0x233   : > { %v3287_v17 = vpop.f32.mrb[67].mxu0 }
 0x238   : > { %v4933_v33 = vpop.f32.mrb[68].mxu0 }
 0x239   : > { %v6691_v20 = vadd.f32 %v4933_v33, %v2891_v11  ;;  %v3323_v36 = vpop.f32.mrb[69].mxu0  ;;  %v4035_v11 = vsub.s32 2, %v6689_v31 }
 0x23a   : > { %v6694_v14 = vadd.f32 %v3323_v36, %v2885_v16  ;;  %v4934_v39 = vpop.f32.mrb[70].mxu0 }
 0x23b   : > { %v3326_v41 = vpop.f32.mrb[71].mxu0  ;;  %v4036_v27 = vrot.slane %v4023_v40, %v4035_v11 }
 0x23c   : > { %v6700_v59 = vadd.f32 %v3326_v41, %v2888_v22 }
 0x240   : > { %v3703_v62 = vpop.f32.mrb[0].mxu0 }
 0x241   : > { %v4040_v47 = vadd.f32 %v4028_v24, %v3703_v62  ;;  %v3705_v10 = vpop.f32.mrb[1].mxu0 }
 0x242   : > { %v4041_v56 = vadd.f32 %v4032_v18, %v3705_v10  ;;  %v3707_v61 = vpop.f32.mrb[2].mxu0 }
 0x243   : > { %v4049_v2 = vmax.f32 %v4040_v47, 0.0  ;;  %v4043_v45 = vadd.f32 %v4028_v24, %v3707_v61  ;;  %v3709_v30 = vpop.f32.mrb[3].mxu0 }
 0x244   : > { %v4050_v46 = vmax.f32 %v4041_v56, 0.0  ;;  %v4044_v48 = vadd.f32 %v4032_v18, %v3709_v30 }
 0x245   : > { %4058 = vst [vmem:[%s6676_s17] sm:$0xff] %v4049_v2  ;;  %v4052_v42 = vmax.f32 %v4043_v45, 0.0  ;;  %v4000_v49 = vpop.f32.mrb[12].mxu1 }
 0x246   : > { %4059 = vst [vmem:[%s6676_s17 + $0x8] sm:$0xff] %v4050_v46  ;;  %v4053_v4 = vmax.f32 %v4044_v48, 0.0  ;;  %v4943_v29 = vadd.f32 %v4000_v49, %v6661_v57  ;;  %v4002_v51 = vpop.f32.mrb[13].mxu1 }
 0x247   : > { %4061 = vst [vmem:[%s6676_s17 + $0x30] sm:$0xff] %v4052_v42  ;;  %v4944_v52 = vadd.f32 %v4002_v51, %v6666_v13  ;;  %v4004_v35 = vpop.f32.mrb[14].mxu1 }
 0x248   : > { %4062 = vst [vmem:[%s6676_s17 + $0x38] sm:$0xff] %v4053_v4  ;;  %v3713_v53 = vpop.f32.mrb[72].mxu0  ;;  %v4079_v58 = vadd.f32 %v4943_v29, %v4072_v15  ;;  %v4945_v34 = vadd.f32 %v4004_v35, %v6668_v7  ;;  %v4006_v3 = vpop.f32.mrb[15].mxu1 }
 0x249   : > { %v3774_v0 = vadd.f32 %v3713_v53, %v3343_v26  ;;  %v3715_v32 = vpop.f32.mrb[73].mxu0  ;;  %v4080_v43 = vadd.f32 %v4944_v52, %v4076_v50  ;;  %v4946_v37 = vadd.f32 %v4006_v3, %v6670_v23 }
 0x24a   : > { %v3775_v5 = vadd.f32 %v3715_v32, %v3344_v28  ;;  %v3717_v6 = vpop.f32.mrb[74].mxu0  ;;  %v4085_v57 = vmax.f32 %v4079_v58, 0.0  ;;  %v4081_v8 = vadd.f32 %v4945_v34, %v4072_v15 }
 0x24b   : > { %v4046_v13 = vadd.f32 %v4028_v24, %v3774_v0  ;;  %v3718_v9 = vpop.f32.mrb[75].mxu0  ;;  %v4086_v7 = vmax.f32 %v4080_v43, 0.0  ;;  %v4082_v12 = vadd.f32 %v4946_v37, %v4076_v50 }
 0x24c   : > { %v4047_v16 = vadd.f32 %v4032_v18, %v3775_v5  ;;  %4091 = vst [vmem:[%s6676_s17 + $0x18] sm:$0xff] %v4085_v57  ;;  %v4087_v21 = vmax.f32 %v4081_v8, 0.0 }
 0x24d   : > { %v4055_v1 = vmax.f32 %v4046_v13, 0.0  ;;  %4092 = vst [vmem:[%s6676_s17 + $0x20] sm:$0xff] %v4086_v7  ;;  %v4088_v23 = vmax.f32 %v4082_v12, 0.0  ;;  %v4010_v25 = vpop.f32.mrb[36].mxu1 }
 0x24e   : > { %v4056_v22 = vmax.f32 %v4047_v16, 0.0  ;;  %4093 = vst [vmem:[%s6676_s17 + $0x48] sm:$0xff] %v4087_v21  ;;  %v4021_v26 = vadd.f32 %v4010_v25, %v6685_v60  ;;  %v4012_v38 = vpop.f32.mrb[37].mxu1 }
 0x24f   : > { %4064 = vst [vmem:[%s6676_s17 + $0x60] sm:$0xf] %v4055_v1  ;;  %4094 = vst [vmem:[%s6676_s17 + $0x50] sm:$0xff] %v4088_v23  ;;  %v4022_v28 = vadd.f32 %v4012_v38, %v6687_v63  ;;  %v4014_v17 = vpop.f32.mrb[38].mxu1 }
 0x250   : > { %4065 = vst [vmem:[%s6676_s17 + $0x68] sm:$0xf] %v4056_v22  ;;  %v4939_v54 = vpop.f32.mrb[76].mxu0  ;;  %v4083_v31 = vadd.f32 %v4072_v15, %v4021_v26  ;;  %v4015_v55 = vpop.f32.mrb[39].mxu1 }
 0x251   : > { %v3776_v33 = vadd.f32 %v4939_v54, %v6691_v20  ;;  %v3754_v36 = vpop.f32.mrb[77].mxu0  ;;  %v4084_v39 = vadd.f32 %v4076_v50, %v4022_v28 }
 0x252   : > { %v3770_v60 = vadd.f32 %v3754_v36, %v6694_v14  ;;  %v4940_v40 = vpop.f32.mrb[78].mxu0  ;;  %v4089_v19 = vmax.f32 %v4083_v31, 0.0 }
 0x253   : > { %v4048_v41 = vadd.f32 %v4036_v27, %v3776_v33  ;;  %v3757_v24 = vpop.f32.mrb[79].mxu0  ;;  %v4090_v63 = vmax.f32 %v4084_v39, 0.0 }
 0x254   : > { %v4042_v18 = vadd.f32 %v4036_v27, %v3770_v60  ;;  %v3773_v62 = vadd.f32 %v3757_v24, %v6700_v59  ;;  %4095 = vst [vmem:[%s6676_s17 + $0x78] sm:$0xf] %v4089_v19 }
 0x255   : > { %v4057_v47 = vmax.f32 %v4048_v41, 0.0  ;;  %4096 = vst [vmem:[%s6676_s17 + $0x80] sm:$0xf] %v4090_v63 }
 0x256   : > { %v4051_v20 = vmax.f32 %v4042_v18, 0.0  ;;  %v4045_v10 = vadd.f32 %v4036_v27, %v3773_v62 }
 0x257   : > { %4066 = vst [vmem:[%s6676_s17 + $0x70] sm:$0xf] %v4057_v47 }
 0x258   : > { %4060 = vst [vmem:[%s6676_s17 + $0x10] sm:$0xff] %v4051_v20  ;;  %v4054_v56 = vmax.f32 %v4045_v10, 0.0 }
 0x25a   : > { %4063 = vst [vmem:[%s6676_s17 + $0x40] sm:$0xff] %v4054_v56 }
 0x25b PF: > { %s17_s24 = sadd.s32 1, %s5490_s24  }
 0x25c   : > { %p14_p4 = scmp.ge.s32.totalorder %s17_s24, 4  }
 0x25e   :  { %16 = sbr.rel (!%p14_p4) target bundleno = 1 (0x1), region = 106 }

</bundles_post_ra>
